<compile_context>
chip_gen: v7x
topology: tpu7x:2x2x1
jax: 0.10.0
libtpu: 0.0.40
codegen_flags: <defaults>
</compile_context>

<pallas_src>
import functools

import jax
import jax.numpy as jnp
import numpy as np
from jax import lax
from jax.experimental import pallas as pl
from jax.experimental.pallas import tpu as pltpu

KSZ = 3          # cubic conv kernel, padding 1 -> "same"
N_STAGES = 5     # conv1..conv5


def _shift_lanes(p, s):
    """q[:, i] = p[:, i + s] with zero fill outside [0, n) (static s)."""
    if s == 0:
        return p
    n = p.shape[-1]
    z = jnp.zeros(p.shape[:-1] + (abs(s),), p.dtype)
    if s > 0:
        return jnp.concatenate([p[:, s:], z], axis=-1)
    return jnp.concatenate([z, p[:, : n + s]], axis=-1)


def _dense_block_kernel(x_ref, w1, w2, w3, w4, w5, bn_ref, o_ref, feat_ref,
                        *, C, D, H, W):
    """One batch element of the fused DenseBlock.

    x_ref    : (D, C, H*W)          VMEM   depth-major, lane-dense input
    w1..w5   : (27, C, k*C)         VMEM   per-tap conv matrices, tap = kd*9+kh*3+kw
    bn_ref   : (5, 2)               SMEM   per-layer folded BN [scale, shift]
    o_ref    : (D, C, H*W)          VMEM   output (conv5 + residual x)
    feat_ref : (D+2, 5*C, H*W) f32  VMEM   persistent feature buffer, zero D-halo
    """
    HW = H * W
    w_refs = (w1, w2, w3, w4, w5)

    # Lane masks for the horizontal taps (dw = -1 / +1).  The H boundary is
    # handled by the zero fill of the lane shift, the D boundary by the zero
    # halo planes of the feature buffer.
    lane = lax.broadcasted_iota(jnp.int32, (1, HW), 1)
    wpos = lane % W
    w_masks = {
        0: (wpos != 0).astype(jnp.float32),      # reads w-1 -> invalid at w == 0
        2: (wpos != W - 1).astype(jnp.float32),  # reads w+1 -> invalid at w == W-1
    }

    # Zero the two depth-halo planes, load x into channel rows [0, C).
    zero_plane = jnp.zeros((N_STAGES * C, HW), jnp.float32)
    feat_ref[0] = zero_plane
    feat_ref[D + 1] = zero_plane
    feat_ref[1:D + 1, 0:C, :] = x_ref[...].astype(jnp.float32)

    # Stage k consumes channel rows [0, k*C) and appends rows [k*C, (k+1)*C);
    # stage 5 writes straight to the output with the residual add.
    for stage in range(1, N_STAGES + 1):
        cin = stage * C
        w_ref = w_refs[stage - 1]                    # (27, C, cin)
        scale = bn_ref[stage - 1, 0]
        shift = bn_ref[stage - 1, 1]

        def depth_body(d, carry, cin=cin, w_ref=w_ref, scale=scale,
                       shift=shift, stage=stage):
            # The three contributing depth planes (zero halo at the edges).
            planes = [feat_ref[d + kd][0:cin, :] for kd in range(KSZ)]

            acc = jnp.zeros((C, HW), jnp.float32)
            for kd in range(KSZ):
                for kh in range(KSZ):
                    for kw in range(KSZ):
                        s = (kh - 1) * W + (kw - 1)
                        xs = _shift_lanes(planes[kd], s)
                        if kw in w_masks:
                            xs = xs * w_masks[kw]
                        wt = w_ref[kd * KSZ * KSZ + kh * KSZ + kw]  # (C, cin)
                        acc = acc + jnp.dot(
                            wt, xs, preferred_element_type=jnp.float32)

            y = acc * scale + shift                   # folded eval-mode BN
            if stage < N_STAGES:
                y = jnp.maximum(y, 0.0)               # ReLU
                feat_ref[d + 1, stage * C:(stage + 1) * C, :] = y
            else:
                res = y + x_ref[d].astype(jnp.float32)   # out + x residual
                o_ref[d] = res.astype(o_ref.dtype)
            return carry

        lax.fori_loop(0, D, depth_body, 0)


def dense_block(x, weights, bn):
    """x: (N, C, D, H, W); weights[k]: (C, (k+1)*C, 3, 3, 3); bn: (5, 2)."""
    N, C, D, H, W = x.shape
    HW = H * W

    # Depth-major, lane-dense view for the kernel: (N, D, C, H*W).
    x_dm = jnp.transpose(x, (0, 2, 1, 3, 4)).reshape(N, D, C, HW)

    # Per-tap weight matrices: (27, C_out, C_in), tap index = kd*9 + kh*3 + kw.
    w_taps = []
    for k, w in enumerate(weights, start=1):
        cin = k * C
        assert w.shape == (C, cin, KSZ, KSZ, KSZ)
        w_taps.append(
            jnp.transpose(w, (2, 3, 4, 0, 1)).reshape(KSZ ** 3, C, cin))

    kern = functools.partial(_dense_block_kernel, C=C, D=D, H=H, W=W)
    w_specs = [pl.BlockSpec(wt.shape, lambda n: (0, 0, 0)) for wt in w_taps]

    out_dm = pl.pallas_call(
        kern,
        out_shape=jax.ShapeDtypeStruct((N, D, C, HW), x.dtype),
        grid_spec=pltpu.PrefetchScalarGridSpec(
            num_scalar_prefetch=0,
            grid=(N,),
            in_specs=[pl.BlockSpec((None, D, C, HW), lambda n: (n, 0, 0, 0))]
            + w_specs
            + [pl.BlockSpec(memory_space=pltpu.MemorySpace.SMEM)],
            out_specs=pl.BlockSpec((None, D, C, HW), lambda n: (n, 0, 0, 0)),
            scratch_shapes=[
                pltpu.VMEM((D + 2, N_STAGES * C, HW), jnp.float32),
            ],
        ),
        compiler_params=pltpu.CompilerParams(
            dimension_semantics=("parallel",),
            vmem_limit_bytes=32 * 1024 * 1024,
        ),
    )(x_dm, *w_taps, bn)

    return jnp.transpose(out_dm.reshape(N, D, C, H, W), (0, 2, 1, 3, 4))


# ----------------------------- pure-JAX reference ---------------------------

def dense_block_ref(x, weights, bn):
    feats = x
    out = None
    for k in range(1, N_STAGES + 1):
        w = weights[k - 1]
        y = lax.conv_general_dilated(
            feats, w, window_strides=(1, 1, 1), padding=[(1, 1)] * 3,
            dimension_numbers=("NCDHW", "OIDHW", "NCDHW"),
            precision=lax.Precision.HIGHEST)
        y = y * bn[k - 1, 0] + bn[k - 1, 1]
        if k < N_STAGES:
            y = jnp.maximum(y, 0.0)
            feats = jnp.concatenate([feats, y], axis=1)
        else:
            out = y + x
    return out


# ---------------------------------- driver ----------------------------------

if __name__ == "__main__":
    key = jax.random.PRNGKey(0)
    keys = jax.random.split(key, N_STAGES + 1)

    N, C, D, H, W = 2, 4, 8, 16, 16
    x = jax.random.normal(keys[0], (N, C, D, H, W), jnp.float32)

    # Conv3d weights (bias=False), PyTorch kaiming-uniform-style bound.
    weights = []
    for k in range(1, N_STAGES + 1):
        cin = k * C
        bound = 1.0 / float(np.sqrt(cin * KSZ ** 3))
        weights.append(jax.random.uniform(
            keys[k], (C, cin, KSZ, KSZ, KSZ), jnp.float32, -bound, bound))

    # Eval-mode BN with default stats: scale = 1/sqrt(1+eps), shift = 0.
    eps = 1e-5
    bn = jnp.tile(jnp.array([[1.0 / np.sqrt(1.0 + eps), 0.0]], jnp.float32),
                  (N_STAGES, 1))

    out = jax.block_until_ready(dense_block(x, weights, bn))
    ref = dense_block_ref(x, weights, bn)
    # Tolerance allows for MXU f32-matmul pass differences vs XLA's conv.
    np.testing.assert_allclose(np.asarray(out), np.asarray(ref),
                               rtol=1e-2, atol=1e-2)
    print("KERNEL_OK")
</pallas_src>

<mosaic_0001>
module attributes {stable_mosaic.version = 11 : i64} {
  func.func @_dense_block_kernel(%arg0: i32, %arg1: memref<1x8x4x256xf32, #tpu.memory_space<vmem>>, %arg2: memref<27x4x4xf32, #tpu.memory_space<vmem>>, %arg3: memref<27x4x8xf32, #tpu.memory_space<vmem>>, %arg4: memref<27x4x12xf32, #tpu.memory_space<vmem>>, %arg5: memref<27x4x16xf32, #tpu.memory_space<vmem>>, %arg6: memref<27x4x20xf32, #tpu.memory_space<vmem>>, %arg7: memref<5x2xf32, #tpu.memory_space<smem>>, %arg8: memref<1x8x4x256xf32, #tpu.memory_space<vmem>>, %arg9: memref<10x20x256xf32, #tpu.memory_space<vmem>>) attributes {dimension_semantics = [#tpu.dimension_semantics<parallel>], iteration_bounds = array<i64: 2>, scalar_prefetch = 0 : i64, scratch_operands = 1 : i64, tpu.core_type = #tpu.core_type<tc>, window_params = [{transform_indices = @transform_0, window_bounds = array<i64: 1, 8, 4, 256>}, {pipeline_mode = #tpu.pipeline_mode<synchronous>, transform_indices = @transform_1, window_bounds = array<i64: 27, 4, 4>}, {pipeline_mode = #tpu.pipeline_mode<synchronous>, transform_indices = @transform_2, window_bounds = array<i64: 27, 4, 8>}, {pipeline_mode = #tpu.pipeline_mode<synchronous>, transform_indices = @transform_3, window_bounds = array<i64: 27, 4, 12>}, {pipeline_mode = #tpu.pipeline_mode<synchronous>, transform_indices = @transform_4, window_bounds = array<i64: 27, 4, 16>}, {pipeline_mode = #tpu.pipeline_mode<synchronous>, transform_indices = @transform_5, window_bounds = array<i64: 27, 4, 20>}, {transform_indices = @transform_6, window_bounds = array<i64: 5, 2>}, {transform_indices = @transform_7, window_bounds = array<i64: 1, 8, 4, 256>}]} {
    %0 = tpu.iota {dimensions = array<i32: 1>} : vector<1x256xi32>
    %c16_i32 = arith.constant 16 : i32
    %c0_i32 = arith.constant 0 : i32
    %1 = arith.cmpi eq, %c16_i32, %c0_i32 : i32
    %c1_i32 = arith.constant 1 : i32
    %2 = arith.select %1, %c1_i32, %c16_i32 : i32
    %3 = vector.broadcast %2 : i32 to vector<1x256xi32>
    %4 = arith.remsi %0, %3 : vector<1x256xi32>
    %c0_i32_0 = arith.constant 0 : i32
    %5 = vector.broadcast %c0_i32_0 : i32 to vector<1x256xi32>
    %6 = arith.cmpi ne, %4, %5 : vector<1x256xi32>
    %c0_i32_1 = arith.constant 0 : i32
    %7 = vector.broadcast %c0_i32_1 : i32 to vector<1x256xi32>
    %8 = arith.cmpi slt, %4, %7 : vector<1x256xi32>
    %c0_i32_2 = arith.constant 0 : i32
    %9 = arith.cmpi slt, %2, %c0_i32_2 : i32
    %10 = vector.broadcast %9 : i1 to vector<1x256xi1>
    %11 = vector.broadcast %10 : vector<1x256xi1> to vector<1x256xi1>
    %12 = arith.xori %8, %11 : vector<1x256xi1>
    %13 = arith.andi %12, %6 : vector<1x256xi1>
    %14 = vector.broadcast %2 : i32 to vector<1x256xi32>
    %15 = arith.addi %4, %14 : vector<1x256xi32>
    %16 = arith.select %13, %15, %4 : vector<1x256xi1>, vector<1x256xi32>
    %c0_i32_3 = arith.constant 0 : i32
    %17 = vector.broadcast %c0_i32_3 : i32 to vector<1x256xi32>
    %18 = arith.cmpi ne, %16, %17 : vector<1x256xi32>
    %19 = arith.extui %18 : vector<1x256xi1> to vector<1x256xi32>
    %20 = arith.sitofp %19 : vector<1x256xi32> to vector<1x256xf32>
    %c15_i32 = arith.constant 15 : i32
    %21 = vector.broadcast %c15_i32 : i32 to vector<1x256xi32>
    %22 = arith.cmpi ne, %16, %21 : vector<1x256xi32>
    %23 = arith.extui %22 : vector<1x256xi1> to vector<1x256xi32>
    %24 = arith.sitofp %23 : vector<1x256xi32> to vector<1x256xf32>
    %cst = arith.constant 0.000000e+00 : f32
    %25 = vector.broadcast %cst : f32 to vector<20x256xf32>
    %c0 = arith.constant 0 : index
    %c0_4 = arith.constant 0 : index
    %c0_5 = arith.constant 0 : index
    %26 = vector.load %arg9[%c0, %c0_4, %c0_5] : memref<10x20x256xf32, #tpu.memory_space<vmem>>, vector<1x20x256xf32>
    %27 = vector.shape_cast %26 : vector<1x20x256xf32> to vector<20x256xf32>
    %28 = vector.shape_cast %25 : vector<20x256xf32> to vector<1x20x256xf32>
    tpu.vector_store %arg9[%c0, %c0_4, %c0_5], %28 {strides = array<i32>} : memref<10x20x256xf32, #tpu.memory_space<vmem>>, vector<1x20x256xf32>,
    %c9 = arith.constant 9 : index
    %c0_6 = arith.constant 0 : index
    %c0_7 = arith.constant 0 : index
    %29 = vector.load %arg9[%c9, %c0_6, %c0_7] : memref<10x20x256xf32, #tpu.memory_space<vmem>>, vector<1x20x256xf32>
    %30 = vector.shape_cast %29 : vector<1x20x256xf32> to vector<20x256xf32>
    %31 = vector.shape_cast %25 : vector<20x256xf32> to vector<1x20x256xf32>
    tpu.vector_store %arg9[%c9, %c0_6, %c0_7], %31 {strides = array<i32>} : memref<10x20x256xf32, #tpu.memory_space<vmem>>, vector<1x20x256xf32>,
    %c0_8 = arith.constant 0 : index
    %c0_9 = arith.constant 0 : index
    %c0_10 = arith.constant 0 : index
    %c0_11 = arith.constant 0 : index
    %32 = vector.load %arg1[%c0_8, %c0_9, %c0_10, %c0_11] : memref<1x8x4x256xf32, #tpu.memory_space<vmem>>, vector<1x8x4x256xf32>
    %33 = vector.shape_cast %32 : vector<1x8x4x256xf32> to vector<8x4x256xf32>
    %c1 = arith.constant 1 : index
    %c0_12 = arith.constant 0 : index
    %c0_13 = arith.constant 0 : index
    %34 = vector.load %arg9[%c1, %c0_12, %c0_13] : memref<10x20x256xf32, #tpu.memory_space<vmem>>, vector<8x4x256xf32>
    tpu.vector_store %arg9[%c1, %c0_12, %c0_13], %33 {strides = array<i32>} : memref<10x20x256xf32, #tpu.memory_space<vmem>>, vector<8x4x256xf32>,
    %c0_14 = arith.constant 0 : index
    %c0_15 = arith.constant 0 : index
    %35 = memref.load %arg7[%c0_14, %c0_15] : memref<5x2xf32, #tpu.memory_space<smem>>
    %c0_16 = arith.constant 0 : index
    %c1_17 = arith.constant 1 : index
    %36 = memref.load %arg7[%c0_16, %c1_17] : memref<5x2xf32, #tpu.memory_space<smem>>
    %c0_i32_18 = arith.constant 0 : i32
    %c8_i32 = arith.constant 8 : i32
    %37 = arith.addi %c0_i32_18, %c8_i32 : i32
    %c1_i32_19 = arith.constant 1 : i32
    scf.for %arg10 = %c0_i32_18 to %37 step %c1_i32_19  : i32 {
      %c0_i32_50 = arith.constant 0 : i32
      %50 = arith.addi %arg10, %c0_i32_50 : i32
      %51 = arith.index_cast %50 : i32 to index
      %c0_51 = arith.constant 0 : index
      %c0_52 = arith.constant 0 : index
      %52 = vector.load %arg9[%51, %c0_51, %c0_52] : memref<10x20x256xf32, #tpu.memory_space<vmem>>, vector<1x20x256xf32>
      %53 = vector.shape_cast %52 : vector<1x20x256xf32> to vector<20x256xf32>
      %54 = vector.extract_strided_slice %53 {offsets = [0, 0], sizes = [4, 256], strides = [1, 1]} : vector<20x256xf32> to vector<4x256xf32>
      %c1_i32_53 = arith.constant 1 : i32
      %55 = arith.addi %arg10, %c1_i32_53 : i32
      %56 = arith.index_cast %55 : i32 to index
      %c0_54 = arith.constant 0 : index
      %c0_55 = arith.constant 0 : index
      %57 = vector.load %arg9[%56, %c0_54, %c0_55] : memref<10x20x256xf32, #tpu.memory_space<vmem>>, vector<1x20x256xf32>
      %58 = vector.shape_cast %57 : vector<1x20x256xf32> to vector<20x256xf32>
      %59 = vector.extract_strided_slice %58 {offsets = [0, 0], sizes = [4, 256], strides = [1, 1]} : vector<20x256xf32> to vector<4x256xf32>
      %c2_i32 = arith.constant 2 : i32
      %60 = arith.addi %arg10, %c2_i32 : i32
      %61 = arith.index_cast %60 : i32 to index
      %c0_56 = arith.constant 0 : index
      %c0_57 = arith.constant 0 : index
      %62 = vector.load %arg9[%61, %c0_56, %c0_57] : memref<10x20x256xf32, #tpu.memory_space<vmem>>, vector<1x20x256xf32>
      %63 = vector.shape_cast %62 : vector<1x20x256xf32> to vector<20x256xf32>
      %64 = vector.extract_strided_slice %63 {offsets = [0, 0], sizes = [4, 256], strides = [1, 1]} : vector<20x256xf32> to vector<4x256xf32>
      %cst_58 = arith.constant 0.000000e+00 : f32
      %65 = vector.broadcast %cst_58 : f32 to vector<4x256xf32>
      %cst_59 = arith.constant 0.000000e+00 : f32
      %66 = vector.broadcast %cst_59 : f32 to vector<4x17xf32>
      %67 = vector.extract_strided_slice %54 {offsets = [0, 0], sizes = [4, 239], strides = [1, 1]} : vector<4x256xf32> to vector<4x239xf32>
      %68 = tpu.concatenate %66, %67 in 1 : vector<4x17xf32>, vector<4x239xf32> -> vector<4x256xf32>
      %69 = vector.broadcast %20 : vector<1x256xf32> to vector<4x256xf32>
      %70 = arith.mulf %68, %69 : vector<4x256xf32>
      %c0_60 = arith.constant 0 : index
      %c0_61 = arith.constant 0 : index
      %c0_62 = arith.constant 0 : index
      %71 = vector.load %arg2[%c0_60, %c0_61, %c0_62] : memref<27x4x4xf32, #tpu.memory_space<vmem>>, vector<1x4x4xf32>
      %72 = vector.shape_cast %71 : vector<1x4x4xf32> to vector<4x4xf32>
      %cst_63 = arith.constant dense<0.000000e+00> : vector<4x256xf32>
      %73 = tpu.matmul %72, %70, %cst_63 {dimension_numbers = #tpu.dot_dimension_numbers<[1], [0], [0], [1], [0, 0, 1, 1], [], []>} : vector<4x4xf32>, vector<4x256xf32>, vector<4x256xf32> -> vector<4x256xf32>
      %74 = arith.addf %65, %73 : vector<4x256xf32>
      %cst_64 = arith.constant 0.000000e+00 : f32
      %75 = vector.broadcast %cst_64 : f32 to vector<4x16xf32>
      %76 = vector.extract_strided_slice %54 {offsets = [0, 0], sizes = [4, 240], strides = [1, 1]} : vector<4x256xf32> to vector<4x240xf32>
      %77 = tpu.concatenate %75, %76 in 1 : vector<4x16xf32>, vector<4x240xf32> -> vector<4x256xf32>
      %c1_65 = arith.constant 1 : index
      %c0_66 = arith.constant 0 : index
      %c0_67 = arith.constant 0 : index
      %78 = vector.load %arg2[%c1_65, %c0_66, %c0_67] : memref<27x4x4xf32, #tpu.memory_space<vmem>>, vector<1x4x4xf32>
      %79 = vector.shape_cast %78 : vector<1x4x4xf32> to vector<4x4xf32>
      %cst_68 = arith.constant dense<0.000000e+00> : vector<4x256xf32>
      %80 = tpu.matmul %79, %77, %cst_68 {dimension_numbers = #tpu.dot_dimension_numbers<[1], [0], [0], [1], [0, 0, 1, 1], [], []>} : vector<4x4xf32>, vector<4x256xf32>, vector<4x256xf32> -> vector<4x256xf32>
      %81 = arith.addf %74, %80 : vector<4x256xf32>
      %cst_69 = arith.constant 0.000000e+00 : f32
      %82 = vector.broadcast %cst_69 : f32 to vector<4x15xf32>
      %83 = vector.extract_strided_slice %54 {offsets = [0, 0], sizes = [4, 241], strides = [1, 1]} : vector<4x256xf32> to vector<4x241xf32>
      %84 = tpu.concatenate %82, %83 in 1 : vector<4x15xf32>, vector<4x241xf32> -> vector<4x256xf32>
      %85 = vector.broadcast %24 : vector<1x256xf32> to vector<4x256xf32>
      %86 = arith.mulf %84, %85 : vector<4x256xf32>
      %c2_70 = arith.constant 2 : index
      %c0_71 = arith.constant 0 : index
      %c0_72 = arith.constant 0 : index
      %87 = vector.load %arg2[%c2_70, %c0_71, %c0_72] : memref<27x4x4xf32, #tpu.memory_space<vmem>>, vector<1x4x4xf32>
      %88 = vector.shape_cast %87 : vector<1x4x4xf32> to vector<4x4xf32>
      %cst_73 = arith.constant dense<0.000000e+00> : vector<4x256xf32>
      %89 = tpu.matmul %88, %86, %cst_73 {dimension_numbers = #tpu.dot_dimension_numbers<[1], [0], [0], [1], [0, 0, 1, 1], [], []>} : vector<4x4xf32>, vector<4x256xf32>, vector<4x256xf32> -> vector<4x256xf32>
      %90 = arith.addf %81, %89 : vector<4x256xf32>
      %cst_74 = arith.constant 0.000000e+00 : f32
      %91 = vector.broadcast %cst_74 : f32 to vector<4x1xf32>
      %92 = vector.extract_strided_slice %54 {offsets = [0, 0], sizes = [4, 255], strides = [1, 1]} : vector<4x256xf32> to vector<4x255xf32>
      %93 = tpu.concatenate %91, %92 in 1 : vector<4x1xf32>, vector<4x255xf32> -> vector<4x256xf32>
      %94 = vector.broadcast %20 : vector<1x256xf32> to vector<4x256xf32>
      %95 = arith.mulf %93, %94 : vector<4x256xf32>
      %c3_75 = arith.constant 3 : index
      %c0_76 = arith.constant 0 : index
      %c0_77 = arith.constant 0 : index
      %96 = vector.load %arg2[%c3_75, %c0_76, %c0_77] : memref<27x4x4xf32, #tpu.memory_space<vmem>>, vector<1x4x4xf32>
      %97 = vector.shape_cast %96 : vector<1x4x4xf32> to vector<4x4xf32>
      %cst_78 = arith.constant dense<0.000000e+00> : vector<4x256xf32>
      %98 = tpu.matmul %97, %95, %cst_78 {dimension_numbers = #tpu.dot_dimension_numbers<[1], [0], [0], [1], [0, 0, 1, 1], [], []>} : vector<4x4xf32>, vector<4x256xf32>, vector<4x256xf32> -> vector<4x256xf32>
      %99 = arith.addf %90, %98 : vector<4x256xf32>
      %c4_79 = arith.constant 4 : index
      %c0_80 = arith.constant 0 : index
      %c0_81 = arith.constant 0 : index
      %100 = vector.load %arg2[%c4_79, %c0_80, %c0_81] : memref<27x4x4xf32, #tpu.memory_space<vmem>>, vector<1x4x4xf32>
      %101 = vector.shape_cast %100 : vector<1x4x4xf32> to vector<4x4xf32>
      %cst_82 = arith.constant dense<0.000000e+00> : vector<4x256xf32>
      %102 = tpu.matmul %101, %54, %cst_82 {dimension_numbers = #tpu.dot_dimension_numbers<[1], [0], [0], [1], [0, 0, 1, 1], [], []>} : vector<4x4xf32>, vector<4x256xf32>, vector<4x256xf32> -> vector<4x256xf32>
      %103 = arith.addf %99, %102 : vector<4x256xf32>
      %cst_83 = arith.constant 0.000000e+00 : f32
      %104 = vector.broadcast %cst_83 : f32 to vector<4x1xf32>
      %105 = vector.extract_strided_slice %54 {offsets = [0, 1], sizes = [4, 255], strides = [1, 1]} : vector<4x256xf32> to vector<4x255xf32>
      %106 = tpu.concatenate %105, %104 in 1 : vector<4x255xf32>, vector<4x1xf32> -> vector<4x256xf32>
      %107 = vector.broadcast %24 : vector<1x256xf32> to vector<4x256xf32>
      %108 = arith.mulf %106, %107 : vector<4x256xf32>
      %c5 = arith.constant 5 : index
      %c0_84 = arith.constant 0 : index
      %c0_85 = arith.constant 0 : index
      %109 = vector.load %arg2[%c5, %c0_84, %c0_85] : memref<27x4x4xf32, #tpu.memory_space<vmem>>, vector<1x4x4xf32>
      %110 = vector.shape_cast %109 : vector<1x4x4xf32> to vector<4x4xf32>
      %cst_86 = arith.constant dense<0.000000e+00> : vector<4x256xf32>
      %111 = tpu.matmul %110, %108, %cst_86 {dimension_numbers = #tpu.dot_dimension_numbers<[1], [0], [0], [1], [0, 0, 1, 1], [], []>} : vector<4x4xf32>, vector<4x256xf32>, vector<4x256xf32> -> vector<4x256xf32>
      %112 = arith.addf %103, %111 : vector<4x256xf32>
      %cst_87 = arith.constant 0.000000e+00 : f32
      %113 = vector.broadcast %cst_87 : f32 to vector<4x15xf32>
      %114 = vector.extract_strided_slice %54 {offsets = [0, 15], sizes = [4, 241], strides = [1, 1]} : vector<4x256xf32> to vector<4x241xf32>
      %115 = tpu.concatenate %114, %113 in 1 : vector<4x241xf32>, vector<4x15xf32> -> vector<4x256xf32>
      %116 = vector.broadcast %20 : vector<1x256xf32> to vector<4x256xf32>
      %117 = arith.mulf %115, %116 : vector<4x256xf32>
      %c6 = arith.constant 6 : index
      %c0_88 = arith.constant 0 : index
      %c0_89 = arith.constant 0 : index
      %118 = vector.load %arg2[%c6, %c0_88, %c0_89] : memref<27x4x4xf32, #tpu.memory_space<vmem>>, vector<1x4x4xf32>
      %119 = vector.shape_cast %118 : vector<1x4x4xf32> to vector<4x4xf32>
      %cst_90 = arith.constant dense<0.000000e+00> : vector<4x256xf32>
      %120 = tpu.matmul %119, %117, %cst_90 {dimension_numbers = #tpu.dot_dimension_numbers<[1], [0], [0], [1], [0, 0, 1, 1], [], []>} : vector<4x4xf32>, vector<4x256xf32>, vector<4x256xf32> -> vector<4x256xf32>
      %121 = arith.addf %112, %120 : vector<4x256xf32>
      %cst_91 = arith.constant 0.000000e+00 : f32
      %122 = vector.broadcast %cst_91 : f32 to vector<4x16xf32>
      %123 = vector.extract_strided_slice %54 {offsets = [0, 16], sizes = [4, 240], strides = [1, 1]} : vector<4x256xf32> to vector<4x240xf32>
      %124 = tpu.concatenate %123, %122 in 1 : vector<4x240xf32>, vector<4x16xf32> -> vector<4x256xf32>
      %c7 = arith.constant 7 : index
      %c0_92 = arith.constant 0 : index
      %c0_93 = arith.constant 0 : index
      %125 = vector.load %arg2[%c7, %c0_92, %c0_93] : memref<27x4x4xf32, #tpu.memory_space<vmem>>, vector<1x4x4xf32>
      %126 = vector.shape_cast %125 : vector<1x4x4xf32> to vector<4x4xf32>
      %cst_94 = arith.constant dense<0.000000e+00> : vector<4x256xf32>
      %127 = tpu.matmul %126, %124, %cst_94 {dimension_numbers = #tpu.dot_dimension_numbers<[1], [0], [0], [1], [0, 0, 1, 1], [], []>} : vector<4x4xf32>, vector<4x256xf32>, vector<4x256xf32> -> vector<4x256xf32>
      %128 = arith.addf %121, %127 : vector<4x256xf32>
      %cst_95 = arith.constant 0.000000e+00 : f32
      %129 = vector.broadcast %cst_95 : f32 to vector<4x17xf32>
      %130 = vector.extract_strided_slice %54 {offsets = [0, 17], sizes = [4, 239], strides = [1, 1]} : vector<4x256xf32> to vector<4x239xf32>
      %131 = tpu.concatenate %130, %129 in 1 : vector<4x239xf32>, vector<4x17xf32> -> vector<4x256xf32>
      %132 = vector.broadcast %24 : vector<1x256xf32> to vector<4x256xf32>
      %133 = arith.mulf %131, %132 : vector<4x256xf32>
      %c8 = arith.constant 8 : index
      %c0_96 = arith.constant 0 : index
      %c0_97 = arith.constant 0 : index
      %134 = vector.load %arg2[%c8, %c0_96, %c0_97] : memref<27x4x4xf32, #tpu.memory_space<vmem>>, vector<1x4x4xf32>
      %135 = vector.shape_cast %134 : vector<1x4x4xf32> to vector<4x4xf32>
      %cst_98 = arith.constant dense<0.000000e+00> : vector<4x256xf32>
      %136 = tpu.matmul %135, %133, %cst_98 {dimension_numbers = #tpu.dot_dimension_numbers<[1], [0], [0], [1], [0, 0, 1, 1], [], []>} : vector<4x4xf32>, vector<4x256xf32>, vector<4x256xf32> -> vector<4x256xf32>
      %137 = arith.addf %128, %136 : vector<4x256xf32>
      %cst_99 = arith.constant 0.000000e+00 : f32
      %138 = vector.broadcast %cst_99 : f32 to vector<4x17xf32>
      %139 = vector.extract_strided_slice %59 {offsets = [0, 0], sizes = [4, 239], strides = [1, 1]} : vector<4x256xf32> to vector<4x239xf32>
      %140 = tpu.concatenate %138, %139 in 1 : vector<4x17xf32>, vector<4x239xf32> -> vector<4x256xf32>
      %141 = vector.broadcast %20 : vector<1x256xf32> to vector<4x256xf32>
      %142 = arith.mulf %140, %141 : vector<4x256xf32>
      %c9_100 = arith.constant 9 : index
      %c0_101 = arith.constant 0 : index
      %c0_102 = arith.constant 0 : index
      %143 = vector.load %arg2[%c9_100, %c0_101, %c0_102] : memref<27x4x4xf32, #tpu.memory_space<vmem>>, vector<1x4x4xf32>
      %144 = vector.shape_cast %143 : vector<1x4x4xf32> to vector<4x4xf32>
      %cst_103 = arith.constant dense<0.000000e+00> : vector<4x256xf32>
      %145 = tpu.matmul %144, %142, %cst_103 {dimension_numbers = #tpu.dot_dimension_numbers<[1], [0], [0], [1], [0, 0, 1, 1], [], []>} : vector<4x4xf32>, vector<4x256xf32>, vector<4x256xf32> -> vector<4x256xf32>
      %146 = arith.addf %137, %145 : vector<4x256xf32>
      %cst_104 = arith.constant 0.000000e+00 : f32
      %147 = vector.broadcast %cst_104 : f32 to vector<4x16xf32>
      %148 = vector.extract_strided_slice %59 {offsets = [0, 0], sizes = [4, 240], strides = [1, 1]} : vector<4x256xf32> to vector<4x240xf32>
      %149 = tpu.concatenate %147, %148 in 1 : vector<4x16xf32>, vector<4x240xf32> -> vector<4x256xf32>
      %c10 = arith.constant 10 : index
      %c0_105 = arith.constant 0 : index
      %c0_106 = arith.constant 0 : index
      %150 = vector.load %arg2[%c10, %c0_105, %c0_106] : memref<27x4x4xf32, #tpu.memory_space<vmem>>, vector<1x4x4xf32>
      %151 = vector.shape_cast %150 : vector<1x4x4xf32> to vector<4x4xf32>
      %cst_107 = arith.constant dense<0.000000e+00> : vector<4x256xf32>
      %152 = tpu.matmul %151, %149, %cst_107 {dimension_numbers = #tpu.dot_dimension_numbers<[1], [0], [0], [1], [0, 0, 1, 1], [], []>} : vector<4x4xf32>, vector<4x256xf32>, vector<4x256xf32> -> vector<4x256xf32>
      %153 = arith.addf %146, %152 : vector<4x256xf32>
      %cst_108 = arith.constant 0.000000e+00 : f32
      %154 = vector.broadcast %cst_108 : f32 to vector<4x15xf32>
      %155 = vector.extract_strided_slice %59 {offsets = [0, 0], sizes = [4, 241], strides = [1, 1]} : vector<4x256xf32> to vector<4x241xf32>
      %156 = tpu.concatenate %154, %155 in 1 : vector<4x15xf32>, vector<4x241xf32> -> vector<4x256xf32>
      %157 = vector.broadcast %24 : vector<1x256xf32> to vector<4x256xf32>
      %158 = arith.mulf %156, %157 : vector<4x256xf32>
      %c11 = arith.constant 11 : index
      %c0_109 = arith.constant 0 : index
      %c0_110 = arith.constant 0 : index
      %159 = vector.load %arg2[%c11, %c0_109, %c0_110] : memref<27x4x4xf32, #tpu.memory_space<vmem>>, vector<1x4x4xf32>
      %160 = vector.shape_cast %159 : vector<1x4x4xf32> to vector<4x4xf32>
      %cst_111 = arith.constant dense<0.000000e+00> : vector<4x256xf32>
      %161 = tpu.matmul %160, %158, %cst_111 {dimension_numbers = #tpu.dot_dimension_numbers<[1], [0], [0], [1], [0, 0, 1, 1], [], []>} : vector<4x4xf32>, vector<4x256xf32>, vector<4x256xf32> -> vector<4x256xf32>
      %162 = arith.addf %153, %161 : vector<4x256xf32>
      %cst_112 = arith.constant 0.000000e+00 : f32
      %163 = vector.broadcast %cst_112 : f32 to vector<4x1xf32>
      %164 = vector.extract_strided_slice %59 {offsets = [0, 0], sizes = [4, 255], strides = [1, 1]} : vector<4x256xf32> to vector<4x255xf32>
      %165 = tpu.concatenate %163, %164 in 1 : vector<4x1xf32>, vector<4x255xf32> -> vector<4x256xf32>
      %166 = vector.broadcast %20 : vector<1x256xf32> to vector<4x256xf32>
      %167 = arith.mulf %165, %166 : vector<4x256xf32>
      %c12 = arith.constant 12 : index
      %c0_113 = arith.constant 0 : index
      %c0_114 = arith.constant 0 : index
      %168 = vector.load %arg2[%c12, %c0_113, %c0_114] : memref<27x4x4xf32, #tpu.memory_space<vmem>>, vector<1x4x4xf32>
      %169 = vector.shape_cast %168 : vector<1x4x4xf32> to vector<4x4xf32>
      %cst_115 = arith.constant dense<0.000000e+00> : vector<4x256xf32>
      %170 = tpu.matmul %169, %167, %cst_115 {dimension_numbers = #tpu.dot_dimension_numbers<[1], [0], [0], [1], [0, 0, 1, 1], [], []>} : vector<4x4xf32>, vector<4x256xf32>, vector<4x256xf32> -> vector<4x256xf32>
      %171 = arith.addf %162, %170 : vector<4x256xf32>
      %c13 = arith.constant 13 : index
      %c0_116 = arith.constant 0 : index
      %c0_117 = arith.constant 0 : index
      %172 = vector.load %arg2[%c13, %c0_116, %c0_117] : memref<27x4x4xf32, #tpu.memory_space<vmem>>, vector<1x4x4xf32>
      %173 = vector.shape_cast %172 : vector<1x4x4xf32> to vector<4x4xf32>
      %cst_118 = arith.constant dense<0.000000e+00> : vector<4x256xf32>
      %174 = tpu.matmul %173, %59, %cst_118 {dimension_numbers = #tpu.dot_dimension_numbers<[1], [0], [0], [1], [0, 0, 1, 1], [], []>} : vector<4x4xf32>, vector<4x256xf32>, vector<4x256xf32> -> vector<4x256xf32>
      %175 = arith.addf %171, %174 : vector<4x256xf32>
      %cst_119 = arith.constant 0.000000e+00 : f32
      %176 = vector.broadcast %cst_119 : f32 to vector<4x1xf32>
      %177 = vector.extract_strided_slice %59 {offsets = [0, 1], sizes = [4, 255], strides = [1, 1]} : vector<4x256xf32> to vector<4x255xf32>
      %178 = tpu.concatenate %177, %176 in 1 : vector<4x255xf32>, vector<4x1xf32> -> vector<4x256xf32>
      %179 = vector.broadcast %24 : vector<1x256xf32> to vector<4x256xf32>
      %180 = arith.mulf %178, %179 : vector<4x256xf32>
      %c14 = arith.constant 14 : index
      %c0_120 = arith.constant 0 : index
      %c0_121 = arith.constant 0 : index
      %181 = vector.load %arg2[%c14, %c0_120, %c0_121] : memref<27x4x4xf32, #tpu.memory_space<vmem>>, vector<1x4x4xf32>
      %182 = vector.shape_cast %181 : vector<1x4x4xf32> to vector<4x4xf32>
      %cst_122 = arith.constant dense<0.000000e+00> : vector<4x256xf32>
      %183 = tpu.matmul %182, %180, %cst_122 {dimension_numbers = #tpu.dot_dimension_numbers<[1], [0], [0], [1], [0, 0, 1, 1], [], []>} : vector<4x4xf32>, vector<4x256xf32>, vector<4x256xf32> -> vector<4x256xf32>
      %184 = arith.addf %175, %183 : vector<4x256xf32>
      %cst_123 = arith.constant 0.000000e+00 : f32
      %185 = vector.broadcast %cst_123 : f32 to vector<4x15xf32>
      %186 = vector.extract_strided_slice %59 {offsets = [0, 15], sizes = [4, 241], strides = [1, 1]} : vector<4x256xf32> to vector<4x241xf32>
      %187 = tpu.concatenate %186, %185 in 1 : vector<4x241xf32>, vector<4x15xf32> -> vector<4x256xf32>
      %188 = vector.broadcast %20 : vector<1x256xf32> to vector<4x256xf32>
      %189 = arith.mulf %187, %188 : vector<4x256xf32>
      %c15 = arith.constant 15 : index
      %c0_124 = arith.constant 0 : index
      %c0_125 = arith.constant 0 : index
      %190 = vector.load %arg2[%c15, %c0_124, %c0_125] : memref<27x4x4xf32, #tpu.memory_space<vmem>>, vector<1x4x4xf32>
      %191 = vector.shape_cast %190 : vector<1x4x4xf32> to vector<4x4xf32>
      %cst_126 = arith.constant dense<0.000000e+00> : vector<4x256xf32>
      %192 = tpu.matmul %191, %189, %cst_126 {dimension_numbers = #tpu.dot_dimension_numbers<[1], [0], [0], [1], [0, 0, 1, 1], [], []>} : vector<4x4xf32>, vector<4x256xf32>, vector<4x256xf32> -> vector<4x256xf32>
      %193 = arith.addf %184, %192 : vector<4x256xf32>
      %cst_127 = arith.constant 0.000000e+00 : f32
      %194 = vector.broadcast %cst_127 : f32 to vector<4x16xf32>
      %195 = vector.extract_strided_slice %59 {offsets = [0, 16], sizes = [4, 240], strides = [1, 1]} : vector<4x256xf32> to vector<4x240xf32>
      %196 = tpu.concatenate %195, %194 in 1 : vector<4x240xf32>, vector<4x16xf32> -> vector<4x256xf32>
      %c16 = arith.constant 16 : index
      %c0_128 = arith.constant 0 : index
      %c0_129 = arith.constant 0 : index
      %197 = vector.load %arg2[%c16, %c0_128, %c0_129] : memref<27x4x4xf32, #tpu.memory_space<vmem>>, vector<1x4x4xf32>
      %198 = vector.shape_cast %197 : vector<1x4x4xf32> to vector<4x4xf32>
      %cst_130 = arith.constant dense<0.000000e+00> : vector<4x256xf32>
      %199 = tpu.matmul %198, %196, %cst_130 {dimension_numbers = #tpu.dot_dimension_numbers<[1], [0], [0], [1], [0, 0, 1, 1], [], []>} : vector<4x4xf32>, vector<4x256xf32>, vector<4x256xf32> -> vector<4x256xf32>
      %200 = arith.addf %193, %199 : vector<4x256xf32>
      %cst_131 = arith.constant 0.000000e+00 : f32
      %201 = vector.broadcast %cst_131 : f32 to vector<4x17xf32>
      %202 = vector.extract_strided_slice %59 {offsets = [0, 17], sizes = [4, 239], strides = [1, 1]} : vector<4x256xf32> to vector<4x239xf32>
      %203 = tpu.concatenate %202, %201 in 1 : vector<4x239xf32>, vector<4x17xf32> -> vector<4x256xf32>
      %204 = vector.broadcast %24 : vector<1x256xf32> to vector<4x256xf32>
      %205 = arith.mulf %203, %204 : vector<4x256xf32>
      %c17 = arith.constant 17 : index
      %c0_132 = arith.constant 0 : index
      %c0_133 = arith.constant 0 : index
      %206 = vector.load %arg2[%c17, %c0_132, %c0_133] : memref<27x4x4xf32, #tpu.memory_space<vmem>>, vector<1x4x4xf32>
      %207 = vector.shape_cast %206 : vector<1x4x4xf32> to vector<4x4xf32>
      %cst_134 = arith.constant dense<0.000000e+00> : vector<4x256xf32>
      %208 = tpu.matmul %207, %205, %cst_134 {dimension_numbers = #tpu.dot_dimension_numbers<[1], [0], [0], [1], [0, 0, 1, 1], [], []>} : vector<4x4xf32>, vector<4x256xf32>, vector<4x256xf32> -> vector<4x256xf32>
      %209 = arith.addf %200, %208 : vector<4x256xf32>
      %cst_135 = arith.constant 0.000000e+00 : f32
      %210 = vector.broadcast %cst_135 : f32 to vector<4x17xf32>
      %211 = vector.extract_strided_slice %64 {offsets = [0, 0], sizes = [4, 239], strides = [1, 1]} : vector<4x256xf32> to vector<4x239xf32>
      %212 = tpu.concatenate %210, %211 in 1 : vector<4x17xf32>, vector<4x239xf32> -> vector<4x256xf32>
      %213 = vector.broadcast %20 : vector<1x256xf32> to vector<4x256xf32>
      %214 = arith.mulf %212, %213 : vector<4x256xf32>
      %c18 = arith.constant 18 : index
      %c0_136 = arith.constant 0 : index
      %c0_137 = arith.constant 0 : index
      %215 = vector.load %arg2[%c18, %c0_136, %c0_137] : memref<27x4x4xf32, #tpu.memory_space<vmem>>, vector<1x4x4xf32>
      %216 = vector.shape_cast %215 : vector<1x4x4xf32> to vector<4x4xf32>
      %cst_138 = arith.constant dense<0.000000e+00> : vector<4x256xf32>
      %217 = tpu.matmul %216, %214, %cst_138 {dimension_numbers = #tpu.dot_dimension_numbers<[1], [0], [0], [1], [0, 0, 1, 1], [], []>} : vector<4x4xf32>, vector<4x256xf32>, vector<4x256xf32> -> vector<4x256xf32>
      %218 = arith.addf %209, %217 : vector<4x256xf32>
      %cst_139 = arith.constant 0.000000e+00 : f32
      %219 = vector.broadcast %cst_139 : f32 to vector<4x16xf32>
      %220 = vector.extract_strided_slice %64 {offsets = [0, 0], sizes = [4, 240], strides = [1, 1]} : vector<4x256xf32> to vector<4x240xf32>
      %221 = tpu.concatenate %219, %220 in 1 : vector<4x16xf32>, vector<4x240xf32> -> vector<4x256xf32>
      %c19 = arith.constant 19 : index
      %c0_140 = arith.constant 0 : index
      %c0_141 = arith.constant 0 : index
      %222 = vector.load %arg2[%c19, %c0_140, %c0_141] : memref<27x4x4xf32, #tpu.memory_space<vmem>>, vector<1x4x4xf32>
      %223 = vector.shape_cast %222 : vector<1x4x4xf32> to vector<4x4xf32>
      %cst_142 = arith.constant dense<0.000000e+00> : vector<4x256xf32>
      %224 = tpu.matmul %223, %221, %cst_142 {dimension_numbers = #tpu.dot_dimension_numbers<[1], [0], [0], [1], [0, 0, 1, 1], [], []>} : vector<4x4xf32>, vector<4x256xf32>, vector<4x256xf32> -> vector<4x256xf32>
      %225 = arith.addf %218, %224 : vector<4x256xf32>
      %cst_143 = arith.constant 0.000000e+00 : f32
      %226 = vector.broadcast %cst_143 : f32 to vector<4x15xf32>
      %227 = vector.extract_strided_slice %64 {offsets = [0, 0], sizes = [4, 241], strides = [1, 1]} : vector<4x256xf32> to vector<4x241xf32>
      %228 = tpu.concatenate %226, %227 in 1 : vector<4x15xf32>, vector<4x241xf32> -> vector<4x256xf32>
      %229 = vector.broadcast %24 : vector<1x256xf32> to vector<4x256xf32>
      %230 = arith.mulf %228, %229 : vector<4x256xf32>
      %c20 = arith.constant 20 : index
      %c0_144 = arith.constant 0 : index
      %c0_145 = arith.constant 0 : index
      %231 = vector.load %arg2[%c20, %c0_144, %c0_145] : memref<27x4x4xf32, #tpu.memory_space<vmem>>, vector<1x4x4xf32>
      %232 = vector.shape_cast %231 : vector<1x4x4xf32> to vector<4x4xf32>
      %cst_146 = arith.constant dense<0.000000e+00> : vector<4x256xf32>
      %233 = tpu.matmul %232, %230, %cst_146 {dimension_numbers = #tpu.dot_dimension_numbers<[1], [0], [0], [1], [0, 0, 1, 1], [], []>} : vector<4x4xf32>, vector<4x256xf32>, vector<4x256xf32> -> vector<4x256xf32>
      %234 = arith.addf %225, %233 : vector<4x256xf32>
      %cst_147 = arith.constant 0.000000e+00 : f32
      %235 = vector.broadcast %cst_147 : f32 to vector<4x1xf32>
      %236 = vector.extract_strided_slice %64 {offsets = [0, 0], sizes = [4, 255], strides = [1, 1]} : vector<4x256xf32> to vector<4x255xf32>
      %237 = tpu.concatenate %235, %236 in 1 : vector<4x1xf32>, vector<4x255xf32> -> vector<4x256xf32>
      %238 = vector.broadcast %20 : vector<1x256xf32> to vector<4x256xf32>
      %239 = arith.mulf %237, %238 : vector<4x256xf32>
      %c21 = arith.constant 21 : index
      %c0_148 = arith.constant 0 : index
      %c0_149 = arith.constant 0 : index
      %240 = vector.load %arg2[%c21, %c0_148, %c0_149] : memref<27x4x4xf32, #tpu.memory_space<vmem>>, vector<1x4x4xf32>
      %241 = vector.shape_cast %240 : vector<1x4x4xf32> to vector<4x4xf32>
      %cst_150 = arith.constant dense<0.000000e+00> : vector<4x256xf32>
      %242 = tpu.matmul %241, %239, %cst_150 {dimension_numbers = #tpu.dot_dimension_numbers<[1], [0], [0], [1], [0, 0, 1, 1], [], []>} : vector<4x4xf32>, vector<4x256xf32>, vector<4x256xf32> -> vector<4x256xf32>
      %243 = arith.addf %234, %242 : vector<4x256xf32>
      %c22 = arith.constant 22 : index
      %c0_151 = arith.constant 0 : index
      %c0_152 = arith.constant 0 : index
      %244 = vector.load %arg2[%c22, %c0_151, %c0_152] : memref<27x4x4xf32, #tpu.memory_space<vmem>>, vector<1x4x4xf32>
      %245 = vector.shape_cast %244 : vector<1x4x4xf32> to vector<4x4xf32>
      %cst_153 = arith.constant dense<0.000000e+00> : vector<4x256xf32>
      %246 = tpu.matmul %245, %64, %cst_153 {dimension_numbers = #tpu.dot_dimension_numbers<[1], [0], [0], [1], [0, 0, 1, 1], [], []>} : vector<4x4xf32>, vector<4x256xf32>, vector<4x256xf32> -> vector<4x256xf32>
      %247 = arith.addf %243, %246 : vector<4x256xf32>
      %cst_154 = arith.constant 0.000000e+00 : f32
      %248 = vector.broadcast %cst_154 : f32 to vector<4x1xf32>
      %249 = vector.extract_strided_slice %64 {offsets = [0, 1], sizes = [4, 255], strides = [1, 1]} : vector<4x256xf32> to vector<4x255xf32>
      %250 = tpu.concatenate %249, %248 in 1 : vector<4x255xf32>, vector<4x1xf32> -> vector<4x256xf32>
      %251 = vector.broadcast %24 : vector<1x256xf32> to vector<4x256xf32>
      %252 = arith.mulf %250, %251 : vector<4x256xf32>
      %c23 = arith.constant 23 : index
      %c0_155 = arith.constant 0 : index
      %c0_156 = arith.constant 0 : index
      %253 = vector.load %arg2[%c23, %c0_155, %c0_156] : memref<27x4x4xf32, #tpu.memory_space<vmem>>, vector<1x4x4xf32>
      %254 = vector.shape_cast %253 : vector<1x4x4xf32> to vector<4x4xf32>
      %cst_157 = arith.constant dense<0.000000e+00> : vector<4x256xf32>
      %255 = tpu.matmul %254, %252, %cst_157 {dimension_numbers = #tpu.dot_dimension_numbers<[1], [0], [0], [1], [0, 0, 1, 1], [], []>} : vector<4x4xf32>, vector<4x256xf32>, vector<4x256xf32> -> vector<4x256xf32>
      %256 = arith.addf %247, %255 : vector<4x256xf32>
      %cst_158 = arith.constant 0.000000e+00 : f32
      %257 = vector.broadcast %cst_158 : f32 to vector<4x15xf32>
      %258 = vector.extract_strided_slice %64 {offsets = [0, 15], sizes = [4, 241], strides = [1, 1]} : vector<4x256xf32> to vector<4x241xf32>
      %259 = tpu.concatenate %258, %257 in 1 : vector<4x241xf32>, vector<4x15xf32> -> vector<4x256xf32>
      %260 = vector.broadcast %20 : vector<1x256xf32> to vector<4x256xf32>
      %261 = arith.mulf %259, %260 : vector<4x256xf32>
      %c24 = arith.constant 24 : index
      %c0_159 = arith.constant 0 : index
      %c0_160 = arith.constant 0 : index
      %262 = vector.load %arg2[%c24, %c0_159, %c0_160] : memref<27x4x4xf32, #tpu.memory_space<vmem>>, vector<1x4x4xf32>
      %263 = vector.shape_cast %262 : vector<1x4x4xf32> to vector<4x4xf32>
      %cst_161 = arith.constant dense<0.000000e+00> : vector<4x256xf32>
      %264 = tpu.matmul %263, %261, %cst_161 {dimension_numbers = #tpu.dot_dimension_numbers<[1], [0], [0], [1], [0, 0, 1, 1], [], []>} : vector<4x4xf32>, vector<4x256xf32>, vector<4x256xf32> -> vector<4x256xf32>
      %265 = arith.addf %256, %264 : vector<4x256xf32>
      %cst_162 = arith.constant 0.000000e+00 : f32
      %266 = vector.broadcast %cst_162 : f32 to vector<4x16xf32>
      %267 = vector.extract_strided_slice %64 {offsets = [0, 16], sizes = [4, 240], strides = [1, 1]} : vector<4x256xf32> to vector<4x240xf32>
      %268 = tpu.concatenate %267, %266 in 1 : vector<4x240xf32>, vector<4x16xf32> -> vector<4x256xf32>
      %c25 = arith.constant 25 : index
      %c0_163 = arith.constant 0 : index
      %c0_164 = arith.constant 0 : index
      %269 = vector.load %arg2[%c25, %c0_163, %c0_164] : memref<27x4x4xf32, #tpu.memory_space<vmem>>, vector<1x4x4xf32>
      %270 = vector.shape_cast %269 : vector<1x4x4xf32> to vector<4x4xf32>
      %cst_165 = arith.constant dense<0.000000e+00> : vector<4x256xf32>
      %271 = tpu.matmul %270, %268, %cst_165 {dimension_numbers = #tpu.dot_dimension_numbers<[1], [0], [0], [1], [0, 0, 1, 1], [], []>} : vector<4x4xf32>, vector<4x256xf32>, vector<4x256xf32> -> vector<4x256xf32>
      %272 = arith.addf %265, %271 : vector<4x256xf32>
      %cst_166 = arith.constant 0.000000e+00 : f32
      %273 = vector.broadcast %cst_166 : f32 to vector<4x17xf32>
      %274 = vector.extract_strided_slice %64 {offsets = [0, 17], sizes = [4, 239], strides = [1, 1]} : vector<4x256xf32> to vector<4x239xf32>
      %275 = tpu.concatenate %274, %273 in 1 : vector<4x239xf32>, vector<4x17xf32> -> vector<4x256xf32>
      %276 = vector.broadcast %24 : vector<1x256xf32> to vector<4x256xf32>
      %277 = arith.mulf %275, %276 : vector<4x256xf32>
      %c26 = arith.constant 26 : index
      %c0_167 = arith.constant 0 : index
      %c0_168 = arith.constant 0 : index
      %278 = vector.load %arg2[%c26, %c0_167, %c0_168] : memref<27x4x4xf32, #tpu.memory_space<vmem>>, vector<1x4x4xf32>
      %279 = vector.shape_cast %278 : vector<1x4x4xf32> to vector<4x4xf32>
      %cst_169 = arith.constant dense<0.000000e+00> : vector<4x256xf32>
      %280 = tpu.matmul %279, %277, %cst_169 {dimension_numbers = #tpu.dot_dimension_numbers<[1], [0], [0], [1], [0, 0, 1, 1], [], []>} : vector<4x4xf32>, vector<4x256xf32>, vector<4x256xf32> -> vector<4x256xf32>
      %281 = arith.addf %272, %280 : vector<4x256xf32>
      %282 = vector.broadcast %35 : f32 to vector<4x256xf32>
      %283 = arith.mulf %281, %282 : vector<4x256xf32>
      %284 = vector.broadcast %36 : f32 to vector<4x256xf32>
      %285 = arith.addf %283, %284 : vector<4x256xf32>
      %cst_170 = arith.constant 0.000000e+00 : f32
      %286 = vector.broadcast %cst_170 : f32 to vector<4x256xf32>
      %287 = arith.maximumf %285, %286 : vector<4x256xf32>
      %c1_i32_171 = arith.constant 1 : i32
      %288 = arith.addi %arg10, %c1_i32_171 : i32
      %289 = arith.index_cast %288 : i32 to index
      %c4_172 = arith.constant 4 : index
      %c0_173 = arith.constant 0 : index
      %290 = vector.load %arg9[%289, %c4_172, %c0_173] : memref<10x20x256xf32, #tpu.memory_space<vmem>>, vector<1x4x256xf32>
      %291 = vector.shape_cast %290 : vector<1x4x256xf32> to vector<4x256xf32>
      %292 = vector.shape_cast %287 : vector<4x256xf32> to vector<1x4x256xf32>
      tpu.vector_store %arg9[%289, %c4_172, %c0_173], %292 {strides = array<i32>} : memref<10x20x256xf32, #tpu.memory_space<vmem>>, vector<1x4x256xf32>,
    }
    %c8_i32_20 = arith.constant 8 : i32
    %c1_21 = arith.constant 1 : index
    %c0_22 = arith.constant 0 : index
    %38 = memref.load %arg7[%c1_21, %c0_22] : memref<5x2xf32, #tpu.memory_space<smem>>
    %c1_23 = arith.constant 1 : index
    %c1_24 = arith.constant 1 : index
    %39 = memref.load %arg7[%c1_23, %c1_24] : memref<5x2xf32, #tpu.memory_space<smem>>
    %c0_i32_25 = arith.constant 0 : i32
    %c8_i32_26 = arith.constant 8 : i32
    %40 = arith.addi %c0_i32_25, %c8_i32_26 : i32
    %c1_i32_27 = arith.constant 1 : i32
    scf.for %arg10 = %c0_i32_25 to %40 step %c1_i32_27  : i32 {
      %c0_i32_50 = arith.constant 0 : i32
      %50 = arith.addi %arg10, %c0_i32_50 : i32
      %51 = arith.index_cast %50 : i32 to index
      %c0_51 = arith.constant 0 : index
      %c0_52 = arith.constant 0 : index
      %52 = vector.load %arg9[%51, %c0_51, %c0_52] : memref<10x20x256xf32, #tpu.memory_space<vmem>>, vector<1x20x256xf32>
      %53 = vector.shape_cast %52 : vector<1x20x256xf32> to vector<20x256xf32>
      %54 = vector.extract_strided_slice %53 {offsets = [0, 0], sizes = [8, 256], strides = [1, 1]} : vector<20x256xf32> to vector<8x256xf32>
      %c1_i32_53 = arith.constant 1 : i32
      %55 = arith.addi %arg10, %c1_i32_53 : i32
      %56 = arith.index_cast %55 : i32 to index
      %c0_54 = arith.constant 0 : index
      %c0_55 = arith.constant 0 : index
      %57 = vector.load %arg9[%56, %c0_54, %c0_55] : memref<10x20x256xf32, #tpu.memory_space<vmem>>, vector<1x20x256xf32>
      %58 = vector.shape_cast %57 : vector<1x20x256xf32> to vector<20x256xf32>
      %59 = vector.extract_strided_slice %58 {offsets = [0, 0], sizes = [8, 256], strides = [1, 1]} : vector<20x256xf32> to vector<8x256xf32>
      %c2_i32 = arith.constant 2 : i32
      %60 = arith.addi %arg10, %c2_i32 : i32
      %61 = arith.index_cast %60 : i32 to index
      %c0_56 = arith.constant 0 : index
      %c0_57 = arith.constant 0 : index
      %62 = vector.load %arg9[%61, %c0_56, %c0_57] : memref<10x20x256xf32, #tpu.memory_space<vmem>>, vector<1x20x256xf32>
      %63 = vector.shape_cast %62 : vector<1x20x256xf32> to vector<20x256xf32>
      %64 = vector.extract_strided_slice %63 {offsets = [0, 0], sizes = [8, 256], strides = [1, 1]} : vector<20x256xf32> to vector<8x256xf32>
      %cst_58 = arith.constant 0.000000e+00 : f32
      %65 = vector.broadcast %cst_58 : f32 to vector<4x256xf32>
      %cst_59 = arith.constant 0.000000e+00 : f32
      %66 = vector.broadcast %cst_59 : f32 to vector<8x17xf32>
      %67 = vector.extract_strided_slice %54 {offsets = [0, 0], sizes = [8, 239], strides = [1, 1]} : vector<8x256xf32> to vector<8x239xf32>
      %68 = tpu.concatenate %66, %67 in 1 : vector<8x17xf32>, vector<8x239xf32> -> vector<8x256xf32>
      %69 = vector.broadcast %20 : vector<1x256xf32> to vector<8x256xf32>
      %70 = arith.mulf %68, %69 : vector<8x256xf32>
      %c0_60 = arith.constant 0 : index
      %c0_61 = arith.constant 0 : index
      %c0_62 = arith.constant 0 : index
      %71 = vector.load %arg3[%c0_60, %c0_61, %c0_62] : memref<27x4x8xf32, #tpu.memory_space<vmem>>, vector<1x4x8xf32>
      %72 = vector.shape_cast %71 : vector<1x4x8xf32> to vector<4x8xf32>
      %cst_63 = arith.constant dense<0.000000e+00> : vector<4x256xf32>
      %73 = tpu.matmul %72, %70, %cst_63 {dimension_numbers = #tpu.dot_dimension_numbers<[1], [0], [0], [1], [0, 0, 1, 1], [], []>} : vector<4x8xf32>, vector<8x256xf32>, vector<4x256xf32> -> vector<4x256xf32>
      %74 = arith.addf %65, %73 : vector<4x256xf32>
      %cst_64 = arith.constant 0.000000e+00 : f32
      %75 = vector.broadcast %cst_64 : f32 to vector<8x16xf32>
      %76 = vector.extract_strided_slice %54 {offsets = [0, 0], sizes = [8, 240], strides = [1, 1]} : vector<8x256xf32> to vector<8x240xf32>
      %77 = tpu.concatenate %75, %76 in 1 : vector<8x16xf32>, vector<8x240xf32> -> vector<8x256xf32>
      %c1_65 = arith.constant 1 : index
      %c0_66 = arith.constant 0 : index
      %c0_67 = arith.constant 0 : index
      %78 = vector.load %arg3[%c1_65, %c0_66, %c0_67] : memref<27x4x8xf32, #tpu.memory_space<vmem>>, vector<1x4x8xf32>
      %79 = vector.shape_cast %78 : vector<1x4x8xf32> to vector<4x8xf32>
      %cst_68 = arith.constant dense<0.000000e+00> : vector<4x256xf32>
      %80 = tpu.matmul %79, %77, %cst_68 {dimension_numbers = #tpu.dot_dimension_numbers<[1], [0], [0], [1], [0, 0, 1, 1], [], []>} : vector<4x8xf32>, vector<8x256xf32>, vector<4x256xf32> -> vector<4x256xf32>
      %81 = arith.addf %74, %80 : vector<4x256xf32>
      %cst_69 = arith.constant 0.000000e+00 : f32
      %82 = vector.broadcast %cst_69 : f32 to vector<8x15xf32>
      %83 = vector.extract_strided_slice %54 {offsets = [0, 0], sizes = [8, 241], strides = [1, 1]} : vector<8x256xf32> to vector<8x241xf32>
      %84 = tpu.concatenate %82, %83 in 1 : vector<8x15xf32>, vector<8x241xf32> -> vector<8x256xf32>
      %85 = vector.broadcast %24 : vector<1x256xf32> to vector<8x256xf32>
      %86 = arith.mulf %84, %85 : vector<8x256xf32>
      %c2_70 = arith.constant 2 : index
      %c0_71 = arith.constant 0 : index
      %c0_72 = arith.constant 0 : index
      %87 = vector.load %arg3[%c2_70, %c0_71, %c0_72] : memref<27x4x8xf32, #tpu.memory_space<vmem>>, vector<1x4x8xf32>
      %88 = vector.shape_cast %87 : vector<1x4x8xf32> to vector<4x8xf32>
      %cst_73 = arith.constant dense<0.000000e+00> : vector<4x256xf32>
      %89 = tpu.matmul %88, %86, %cst_73 {dimension_numbers = #tpu.dot_dimension_numbers<[1], [0], [0], [1], [0, 0, 1, 1], [], []>} : vector<4x8xf32>, vector<8x256xf32>, vector<4x256xf32> -> vector<4x256xf32>
      %90 = arith.addf %81, %89 : vector<4x256xf32>
      %cst_74 = arith.constant 0.000000e+00 : f32
      %91 = vector.broadcast %cst_74 : f32 to vector<8x1xf32>
      %92 = vector.extract_strided_slice %54 {offsets = [0, 0], sizes = [8, 255], strides = [1, 1]} : vector<8x256xf32> to vector<8x255xf32>
      %93 = tpu.concatenate %91, %92 in 1 : vector<8x1xf32>, vector<8x255xf32> -> vector<8x256xf32>
      %94 = vector.broadcast %20 : vector<1x256xf32> to vector<8x256xf32>
      %95 = arith.mulf %93, %94 : vector<8x256xf32>
      %c3_75 = arith.constant 3 : index
      %c0_76 = arith.constant 0 : index
      %c0_77 = arith.constant 0 : index
      %96 = vector.load %arg3[%c3_75, %c0_76, %c0_77] : memref<27x4x8xf32, #tpu.memory_space<vmem>>, vector<1x4x8xf32>
      %97 = vector.shape_cast %96 : vector<1x4x8xf32> to vector<4x8xf32>
      %cst_78 = arith.constant dense<0.000000e+00> : vector<4x256xf32>
      %98 = tpu.matmul %97, %95, %cst_78 {dimension_numbers = #tpu.dot_dimension_numbers<[1], [0], [0], [1], [0, 0, 1, 1], [], []>} : vector<4x8xf32>, vector<8x256xf32>, vector<4x256xf32> -> vector<4x256xf32>
      %99 = arith.addf %90, %98 : vector<4x256xf32>
      %c4_79 = arith.constant 4 : index
      %c0_80 = arith.constant 0 : index
      %c0_81 = arith.constant 0 : index
      %100 = vector.load %arg3[%c4_79, %c0_80, %c0_81] : memref<27x4x8xf32, #tpu.memory_space<vmem>>, vector<1x4x8xf32>
      %101 = vector.shape_cast %100 : vector<1x4x8xf32> to vector<4x8xf32>
      %cst_82 = arith.constant dense<0.000000e+00> : vector<4x256xf32>
      %102 = tpu.matmul %101, %54, %cst_82 {dimension_numbers = #tpu.dot_dimension_numbers<[1], [0], [0], [1], [0, 0, 1, 1], [], []>} : vector<4x8xf32>, vector<8x256xf32>, vector<4x256xf32> -> vector<4x256xf32>
      %103 = arith.addf %99, %102 : vector<4x256xf32>
      %cst_83 = arith.constant 0.000000e+00 : f32
      %104 = vector.broadcast %cst_83 : f32 to vector<8x1xf32>
      %105 = vector.extract_strided_slice %54 {offsets = [0, 1], sizes = [8, 255], strides = [1, 1]} : vector<8x256xf32> to vector<8x255xf32>
      %106 = tpu.concatenate %105, %104 in 1 : vector<8x255xf32>, vector<8x1xf32> -> vector<8x256xf32>
      %107 = vector.broadcast %24 : vector<1x256xf32> to vector<8x256xf32>
      %108 = arith.mulf %106, %107 : vector<8x256xf32>
      %c5 = arith.constant 5 : index
      %c0_84 = arith.constant 0 : index
      %c0_85 = arith.constant 0 : index
      %109 = vector.load %arg3[%c5, %c0_84, %c0_85] : memref<27x4x8xf32, #tpu.memory_space<vmem>>, vector<1x4x8xf32>
      %110 = vector.shape_cast %109 : vector<1x4x8xf32> to vector<4x8xf32>
      %cst_86 = arith.constant dense<0.000000e+00> : vector<4x256xf32>
      %111 = tpu.matmul %110, %108, %cst_86 {dimension_numbers = #tpu.dot_dimension_numbers<[1], [0], [0], [1], [0, 0, 1, 1], [], []>} : vector<4x8xf32>, vector<8x256xf32>, vector<4x256xf32> -> vector<4x256xf32>
      %112 = arith.addf %103, %111 : vector<4x256xf32>
      %cst_87 = arith.constant 0.000000e+00 : f32
      %113 = vector.broadcast %cst_87 : f32 to vector<8x15xf32>
      %114 = vector.extract_strided_slice %54 {offsets = [0, 15], sizes = [8, 241], strides = [1, 1]} : vector<8x256xf32> to vector<8x241xf32>
      %115 = tpu.concatenate %114, %113 in 1 : vector<8x241xf32>, vector<8x15xf32> -> vector<8x256xf32>
      %116 = vector.broadcast %20 : vector<1x256xf32> to vector<8x256xf32>
      %117 = arith.mulf %115, %116 : vector<8x256xf32>
      %c6 = arith.constant 6 : index
      %c0_88 = arith.constant 0 : index
      %c0_89 = arith.constant 0 : index
      %118 = vector.load %arg3[%c6, %c0_88, %c0_89] : memref<27x4x8xf32, #tpu.memory_space<vmem>>, vector<1x4x8xf32>
      %119 = vector.shape_cast %118 : vector<1x4x8xf32> to vector<4x8xf32>
      %cst_90 = arith.constant dense<0.000000e+00> : vector<4x256xf32>
      %120 = tpu.matmul %119, %117, %cst_90 {dimension_numbers = #tpu.dot_dimension_numbers<[1], [0], [0], [1], [0, 0, 1, 1], [], []>} : vector<4x8xf32>, vector<8x256xf32>, vector<4x256xf32> -> vector<4x256xf32>
      %121 = arith.addf %112, %120 : vector<4x256xf32>
      %cst_91 = arith.constant 0.000000e+00 : f32
      %122 = vector.broadcast %cst_91 : f32 to vector<8x16xf32>
      %123 = vector.extract_strided_slice %54 {offsets = [0, 16], sizes = [8, 240], strides = [1, 1]} : vector<8x256xf32> to vector<8x240xf32>
      %124 = tpu.concatenate %123, %122 in 1 : vector<8x240xf32>, vector<8x16xf32> -> vector<8x256xf32>
      %c7 = arith.constant 7 : index
      %c0_92 = arith.constant 0 : index
      %c0_93 = arith.constant 0 : index
      %125 = vector.load %arg3[%c7, %c0_92, %c0_93] : memref<27x4x8xf32, #tpu.memory_space<vmem>>, vector<1x4x8xf32>
      %126 = vector.shape_cast %125 : vector<1x4x8xf32> to vector<4x8xf32>
      %cst_94 = arith.constant dense<0.000000e+00> : vector<4x256xf32>
      %127 = tpu.matmul %126, %124, %cst_94 {dimension_numbers = #tpu.dot_dimension_numbers<[1], [0], [0], [1], [0, 0, 1, 1], [], []>} : vector<4x8xf32>, vector<8x256xf32>, vector<4x256xf32> -> vector<4x256xf32>
      %128 = arith.addf %121, %127 : vector<4x256xf32>
      %cst_95 = arith.constant 0.000000e+00 : f32
      %129 = vector.broadcast %cst_95 : f32 to vector<8x17xf32>
      %130 = vector.extract_strided_slice %54 {offsets = [0, 17], sizes = [8, 239], strides = [1, 1]} : vector<8x256xf32> to vector<8x239xf32>
      %131 = tpu.concatenate %130, %129 in 1 : vector<8x239xf32>, vector<8x17xf32> -> vector<8x256xf32>
      %132 = vector.broadcast %24 : vector<1x256xf32> to vector<8x256xf32>
      %133 = arith.mulf %131, %132 : vector<8x256xf32>
      %c8 = arith.constant 8 : index
      %c0_96 = arith.constant 0 : index
      %c0_97 = arith.constant 0 : index
      %134 = vector.load %arg3[%c8, %c0_96, %c0_97] : memref<27x4x8xf32, #tpu.memory_space<vmem>>, vector<1x4x8xf32>
      %135 = vector.shape_cast %134 : vector<1x4x8xf32> to vector<4x8xf32>
      %cst_98 = arith.constant dense<0.000000e+00> : vector<4x256xf32>
      %136 = tpu.matmul %135, %133, %cst_98 {dimension_numbers = #tpu.dot_dimension_numbers<[1], [0], [0], [1], [0, 0, 1, 1], [], []>} : vector<4x8xf32>, vector<8x256xf32>, vector<4x256xf32> -> vector<4x256xf32>
      %137 = arith.addf %128, %136 : vector<4x256xf32>
      %cst_99 = arith.constant 0.000000e+00 : f32
      %138 = vector.broadcast %cst_99 : f32 to vector<8x17xf32>
      %139 = vector.extract_strided_slice %59 {offsets = [0, 0], sizes = [8, 239], strides = [1, 1]} : vector<8x256xf32> to vector<8x239xf32>
      %140 = tpu.concatenate %138, %139 in 1 : vector<8x17xf32>, vector<8x239xf32> -> vector<8x256xf32>
      %141 = vector.broadcast %20 : vector<1x256xf32> to vector<8x256xf32>
      %142 = arith.mulf %140, %141 : vector<8x256xf32>
      %c9_100 = arith.constant 9 : index
      %c0_101 = arith.constant 0 : index
      %c0_102 = arith.constant 0 : index
      %143 = vector.load %arg3[%c9_100, %c0_101, %c0_102] : memref<27x4x8xf32, #tpu.memory_space<vmem>>, vector<1x4x8xf32>
      %144 = vector.shape_cast %143 : vector<1x4x8xf32> to vector<4x8xf32>
      %cst_103 = arith.constant dense<0.000000e+00> : vector<4x256xf32>
      %145 = tpu.matmul %144, %142, %cst_103 {dimension_numbers = #tpu.dot_dimension_numbers<[1], [0], [0], [1], [0, 0, 1, 1], [], []>} : vector<4x8xf32>, vector<8x256xf32>, vector<4x256xf32> -> vector<4x256xf32>
      %146 = arith.addf %137, %145 : vector<4x256xf32>
      %cst_104 = arith.constant 0.000000e+00 : f32
      %147 = vector.broadcast %cst_104 : f32 to vector<8x16xf32>
      %148 = vector.extract_strided_slice %59 {offsets = [0, 0], sizes = [8, 240], strides = [1, 1]} : vector<8x256xf32> to vector<8x240xf32>
      %149 = tpu.concatenate %147, %148 in 1 : vector<8x16xf32>, vector<8x240xf32> -> vector<8x256xf32>
      %c10 = arith.constant 10 : index
      %c0_105 = arith.constant 0 : index
      %c0_106 = arith.constant 0 : index
      %150 = vector.load %arg3[%c10, %c0_105, %c0_106] : memref<27x4x8xf32, #tpu.memory_space<vmem>>, vector<1x4x8xf32>
      %151 = vector.shape_cast %150 : vector<1x4x8xf32> to vector<4x8xf32>
      %cst_107 = arith.constant dense<0.000000e+00> : vector<4x256xf32>
      %152 = tpu.matmul %151, %149, %cst_107 {dimension_numbers = #tpu.dot_dimension_numbers<[1], [0], [0], [1], [0, 0, 1, 1], [], []>} : vector<4x8xf32>, vector<8x256xf32>, vector<4x256xf32> -> vector<4x256xf32>
      %153 = arith.addf %146, %152 : vector<4x256xf32>
      %cst_108 = arith.constant 0.000000e+00 : f32
      %154 = vector.broadcast %cst_108 : f32 to vector<8x15xf32>
      %155 = vector.extract_strided_slice %59 {offsets = [0, 0], sizes = [8, 241], strides = [1, 1]} : vector<8x256xf32> to vector<8x241xf32>
      %156 = tpu.concatenate %154, %155 in 1 : vector<8x15xf32>, vector<8x241xf32> -> vector<8x256xf32>
      %157 = vector.broadcast %24 : vector<1x256xf32> to vector<8x256xf32>
      %158 = arith.mulf %156, %157 : vector<8x256xf32>
      %c11 = arith.constant 11 : index
      %c0_109 = arith.constant 0 : index
      %c0_110 = arith.constant 0 : index
      %159 = vector.load %arg3[%c11, %c0_109, %c0_110] : memref<27x4x8xf32, #tpu.memory_space<vmem>>, vector<1x4x8xf32>
      %160 = vector.shape_cast %159 : vector<1x4x8xf32> to vector<4x8xf32>
      %cst_111 = arith.constant dense<0.000000e+00> : vector<4x256xf32>
      %161 = tpu.matmul %160, %158, %cst_111 {dimension_numbers = #tpu.dot_dimension_numbers<[1], [0], [0], [1], [0, 0, 1, 1], [], []>} : vector<4x8xf32>, vector<8x256xf32>, vector<4x256xf32> -> vector<4x256xf32>
      %162 = arith.addf %153, %161 : vector<4x256xf32>
      %cst_112 = arith.constant 0.000000e+00 : f32
      %163 = vector.broadcast %cst_112 : f32 to vector<8x1xf32>
      %164 = vector.extract_strided_slice %59 {offsets = [0, 0], sizes = [8, 255], strides = [1, 1]} : vector<8x256xf32> to vector<8x255xf32>
      %165 = tpu.concatenate %163, %164 in 1 : vector<8x1xf32>, vector<8x255xf32> -> vector<8x256xf32>
      %166 = vector.broadcast %20 : vector<1x256xf32> to vector<8x256xf32>
      %167 = arith.mulf %165, %166 : vector<8x256xf32>
      %c12 = arith.constant 12 : index
      %c0_113 = arith.constant 0 : index
      %c0_114 = arith.constant 0 : index
      %168 = vector.load %arg3[%c12, %c0_113, %c0_114] : memref<27x4x8xf32, #tpu.memory_space<vmem>>, vector<1x4x8xf32>
      %169 = vector.shape_cast %168 : vector<1x4x8xf32> to vector<4x8xf32>
      %cst_115 = arith.constant dense<0.000000e+00> : vector<4x256xf32>
      %170 = tpu.matmul %169, %167, %cst_115 {dimension_numbers = #tpu.dot_dimension_numbers<[1], [0], [0], [1], [0, 0, 1, 1], [], []>} : vector<4x8xf32>, vector<8x256xf32>, vector<4x256xf32> -> vector<4x256xf32>
      %171 = arith.addf %162, %170 : vector<4x256xf32>
      %c13 = arith.constant 13 : index
      %c0_116 = arith.constant 0 : index
      %c0_117 = arith.constant 0 : index
      %172 = vector.load %arg3[%c13, %c0_116, %c0_117] : memref<27x4x8xf32, #tpu.memory_space<vmem>>, vector<1x4x8xf32>
      %173 = vector.shape_cast %172 : vector<1x4x8xf32> to vector<4x8xf32>
      %cst_118 = arith.constant dense<0.000000e+00> : vector<4x256xf32>
      %174 = tpu.matmul %173, %59, %cst_118 {dimension_numbers = #tpu.dot_dimension_numbers<[1], [0], [0], [1], [0, 0, 1, 1], [], []>} : vector<4x8xf32>, vector<8x256xf32>, vector<4x256xf32> -> vector<4x256xf32>
      %175 = arith.addf %171, %174 : vector<4x256xf32>
      %cst_119 = arith.constant 0.000000e+00 : f32
      %176 = vector.broadcast %cst_119 : f32 to vector<8x1xf32>
      %177 = vector.extract_strided_slice %59 {offsets = [0, 1], sizes = [8, 255], strides = [1, 1]} : vector<8x256xf32> to vector<8x255xf32>
      %178 = tpu.concatenate %177, %176 in 1 : vector<8x255xf32>, vector<8x1xf32> -> vector<8x256xf32>
      %179 = vector.broadcast %24 : vector<1x256xf32> to vector<8x256xf32>
      %180 = arith.mulf %178, %179 : vector<8x256xf32>
      %c14 = arith.constant 14 : index
      %c0_120 = arith.constant 0 : index
      %c0_121 = arith.constant 0 : index
      %181 = vector.load %arg3[%c14, %c0_120, %c0_121] : memref<27x4x8xf32, #tpu.memory_space<vmem>>, vector<1x4x8xf32>
      %182 = vector.shape_cast %181 : vector<1x4x8xf32> to vector<4x8xf32>
      %cst_122 = arith.constant dense<0.000000e+00> : vector<4x256xf32>
      %183 = tpu.matmul %182, %180, %cst_122 {dimension_numbers = #tpu.dot_dimension_numbers<[1], [0], [0], [1], [0, 0, 1, 1], [], []>} : vector<4x8xf32>, vector<8x256xf32>, vector<4x256xf32> -> vector<4x256xf32>
      %184 = arith.addf %175, %183 : vector<4x256xf32>
      %cst_123 = arith.constant 0.000000e+00 : f32
      %185 = vector.broadcast %cst_123 : f32 to vector<8x15xf32>
      %186 = vector.extract_strided_slice %59 {offsets = [0, 15], sizes = [8, 241], strides = [1, 1]} : vector<8x256xf32> to vector<8x241xf32>
      %187 = tpu.concatenate %186, %185 in 1 : vector<8x241xf32>, vector<8x15xf32> -> vector<8x256xf32>
      %188 = vector.broadcast %20 : vector<1x256xf32> to vector<8x256xf32>
      %189 = arith.mulf %187, %188 : vector<8x256xf32>
      %c15 = arith.constant 15 : index
      %c0_124 = arith.constant 0 : index
      %c0_125 = arith.constant 0 : index
      %190 = vector.load %arg3[%c15, %c0_124, %c0_125] : memref<27x4x8xf32, #tpu.memory_space<vmem>>, vector<1x4x8xf32>
      %191 = vector.shape_cast %190 : vector<1x4x8xf32> to vector<4x8xf32>
      %cst_126 = arith.constant dense<0.000000e+00> : vector<4x256xf32>
      %192 = tpu.matmul %191, %189, %cst_126 {dimension_numbers = #tpu.dot_dimension_numbers<[1], [0], [0], [1], [0, 0, 1, 1], [], []>} : vector<4x8xf32>, vector<8x256xf32>, vector<4x256xf32> -> vector<4x256xf32>
      %193 = arith.addf %184, %192 : vector<4x256xf32>
      %cst_127 = arith.constant 0.000000e+00 : f32
      %194 = vector.broadcast %cst_127 : f32 to vector<8x16xf32>
      %195 = vector.extract_strided_slice %59 {offsets = [0, 16], sizes = [8, 240], strides = [1, 1]} : vector<8x256xf32> to vector<8x240xf32>
      %196 = tpu.concatenate %195, %194 in 1 : vector<8x240xf32>, vector<8x16xf32> -> vector<8x256xf32>
      %c16 = arith.constant 16 : index
      %c0_128 = arith.constant 0 : index
      %c0_129 = arith.constant 0 : index
      %197 = vector.load %arg3[%c16, %c0_128, %c0_129] : memref<27x4x8xf32, #tpu.memory_space<vmem>>, vector<1x4x8xf32>
      %198 = vector.shape_cast %197 : vector<1x4x8xf32> to vector<4x8xf32>
      %cst_130 = arith.constant dense<0.000000e+00> : vector<4x256xf32>
      %199 = tpu.matmul %198, %196, %cst_130 {dimension_numbers = #tpu.dot_dimension_numbers<[1], [0], [0], [1], [0, 0, 1, 1], [], []>} : vector<4x8xf32>, vector<8x256xf32>, vector<4x256xf32> -> vector<4x256xf32>
      %200 = arith.addf %193, %199 : vector<4x256xf32>
      %cst_131 = arith.constant 0.000000e+00 : f32
      %201 = vector.broadcast %cst_131 : f32 to vector<8x17xf32>
      %202 = vector.extract_strided_slice %59 {offsets = [0, 17], sizes = [8, 239], strides = [1, 1]} : vector<8x256xf32> to vector<8x239xf32>
      %203 = tpu.concatenate %202, %201 in 1 : vector<8x239xf32>, vector<8x17xf32> -> vector<8x256xf32>
      %204 = vector.broadcast %24 : vector<1x256xf32> to vector<8x256xf32>
      %205 = arith.mulf %203, %204 : vector<8x256xf32>
      %c17 = arith.constant 17 : index
      %c0_132 = arith.constant 0 : index
      %c0_133 = arith.constant 0 : index
      %206 = vector.load %arg3[%c17, %c0_132, %c0_133] : memref<27x4x8xf32, #tpu.memory_space<vmem>>, vector<1x4x8xf32>
      %207 = vector.shape_cast %206 : vector<1x4x8xf32> to vector<4x8xf32>
      %cst_134 = arith.constant dense<0.000000e+00> : vector<4x256xf32>
      %208 = tpu.matmul %207, %205, %cst_134 {dimension_numbers = #tpu.dot_dimension_numbers<[1], [0], [0], [1], [0, 0, 1, 1], [], []>} : vector<4x8xf32>, vector<8x256xf32>, vector<4x256xf32> -> vector<4x256xf32>
      %209 = arith.addf %200, %208 : vector<4x256xf32>
      %cst_135 = arith.constant 0.000000e+00 : f32
      %210 = vector.broadcast %cst_135 : f32 to vector<8x17xf32>
      %211 = vector.extract_strided_slice %64 {offsets = [0, 0], sizes = [8, 239], strides = [1, 1]} : vector<8x256xf32> to vector<8x239xf32>
      %212 = tpu.concatenate %210, %211 in 1 : vector<8x17xf32>, vector<8x239xf32> -> vector<8x256xf32>
      %213 = vector.broadcast %20 : vector<1x256xf32> to vector<8x256xf32>
      %214 = arith.mulf %212, %213 : vector<8x256xf32>
      %c18 = arith.constant 18 : index
      %c0_136 = arith.constant 0 : index
      %c0_137 = arith.constant 0 : index
      %215 = vector.load %arg3[%c18, %c0_136, %c0_137] : memref<27x4x8xf32, #tpu.memory_space<vmem>>, vector<1x4x8xf32>
      %216 = vector.shape_cast %215 : vector<1x4x8xf32> to vector<4x8xf32>
      %cst_138 = arith.constant dense<0.000000e+00> : vector<4x256xf32>
      %217 = tpu.matmul %216, %214, %cst_138 {dimension_numbers = #tpu.dot_dimension_numbers<[1], [0], [0], [1], [0, 0, 1, 1], [], []>} : vector<4x8xf32>, vector<8x256xf32>, vector<4x256xf32> -> vector<4x256xf32>
      %218 = arith.addf %209, %217 : vector<4x256xf32>
      %cst_139 = arith.constant 0.000000e+00 : f32
      %219 = vector.broadcast %cst_139 : f32 to vector<8x16xf32>
      %220 = vector.extract_strided_slice %64 {offsets = [0, 0], sizes = [8, 240], strides = [1, 1]} : vector<8x256xf32> to vector<8x240xf32>
      %221 = tpu.concatenate %219, %220 in 1 : vector<8x16xf32>, vector<8x240xf32> -> vector<8x256xf32>
      %c19 = arith.constant 19 : index
      %c0_140 = arith.constant 0 : index
      %c0_141 = arith.constant 0 : index
      %222 = vector.load %arg3[%c19, %c0_140, %c0_141] : memref<27x4x8xf32, #tpu.memory_space<vmem>>, vector<1x4x8xf32>
      %223 = vector.shape_cast %222 : vector<1x4x8xf32> to vector<4x8xf32>
      %cst_142 = arith.constant dense<0.000000e+00> : vector<4x256xf32>
      %224 = tpu.matmul %223, %221, %cst_142 {dimension_numbers = #tpu.dot_dimension_numbers<[1], [0], [0], [1], [0, 0, 1, 1], [], []>} : vector<4x8xf32>, vector<8x256xf32>, vector<4x256xf32> -> vector<4x256xf32>
      %225 = arith.addf %218, %224 : vector<4x256xf32>
      %cst_143 = arith.constant 0.000000e+00 : f32
      %226 = vector.broadcast %cst_143 : f32 to vector<8x15xf32>
      %227 = vector.extract_strided_slice %64 {offsets = [0, 0], sizes = [8, 241], strides = [1, 1]} : vector<8x256xf32> to vector<8x241xf32>
      %228 = tpu.concatenate %226, %227 in 1 : vector<8x15xf32>, vector<8x241xf32> -> vector<8x256xf32>
      %229 = vector.broadcast %24 : vector<1x256xf32> to vector<8x256xf32>
      %230 = arith.mulf %228, %229 : vector<8x256xf32>
      %c20 = arith.constant 20 : index
      %c0_144 = arith.constant 0 : index
      %c0_145 = arith.constant 0 : index
      %231 = vector.load %arg3[%c20, %c0_144, %c0_145] : memref<27x4x8xf32, #tpu.memory_space<vmem>>, vector<1x4x8xf32>
      %232 = vector.shape_cast %231 : vector<1x4x8xf32> to vector<4x8xf32>
      %cst_146 = arith.constant dense<0.000000e+00> : vector<4x256xf32>
      %233 = tpu.matmul %232, %230, %cst_146 {dimension_numbers = #tpu.dot_dimension_numbers<[1], [0], [0], [1], [0, 0, 1, 1], [], []>} : vector<4x8xf32>, vector<8x256xf32>, vector<4x256xf32> -> vector<4x256xf32>
      %234 = arith.addf %225, %233 : vector<4x256xf32>
      %cst_147 = arith.constant 0.000000e+00 : f32
      %235 = vector.broadcast %cst_147 : f32 to vector<8x1xf32>
      %236 = vector.extract_strided_slice %64 {offsets = [0, 0], sizes = [8, 255], strides = [1, 1]} : vector<8x256xf32> to vector<8x255xf32>
      %237 = tpu.concatenate %235, %236 in 1 : vector<8x1xf32>, vector<8x255xf32> -> vector<8x256xf32>
      %238 = vector.broadcast %20 : vector<1x256xf32> to vector<8x256xf32>
      %239 = arith.mulf %237, %238 : vector<8x256xf32>
      %c21 = arith.constant 21 : index
      %c0_148 = arith.constant 0 : index
      %c0_149 = arith.constant 0 : index
      %240 = vector.load %arg3[%c21, %c0_148, %c0_149] : memref<27x4x8xf32, #tpu.memory_space<vmem>>, vector<1x4x8xf32>
      %241 = vector.shape_cast %240 : vector<1x4x8xf32> to vector<4x8xf32>
      %cst_150 = arith.constant dense<0.000000e+00> : vector<4x256xf32>
      %242 = tpu.matmul %241, %239, %cst_150 {dimension_numbers = #tpu.dot_dimension_numbers<[1], [0], [0], [1], [0, 0, 1, 1], [], []>} : vector<4x8xf32>, vector<8x256xf32>, vector<4x256xf32> -> vector<4x256xf32>
      %243 = arith.addf %234, %242 : vector<4x256xf32>
      %c22 = arith.constant 22 : index
      %c0_151 = arith.constant 0 : index
      %c0_152 = arith.constant 0 : index
      %244 = vector.load %arg3[%c22, %c0_151, %c0_152] : memref<27x4x8xf32, #tpu.memory_space<vmem>>, vector<1x4x8xf32>
      %245 = vector.shape_cast %244 : vector<1x4x8xf32> to vector<4x8xf32>
      %cst_153 = arith.constant dense<0.000000e+00> : vector<4x256xf32>
      %246 = tpu.matmul %245, %64, %cst_153 {dimension_numbers = #tpu.dot_dimension_numbers<[1], [0], [0], [1], [0, 0, 1, 1], [], []>} : vector<4x8xf32>, vector<8x256xf32>, vector<4x256xf32> -> vector<4x256xf32>
      %247 = arith.addf %243, %246 : vector<4x256xf32>
      %cst_154 = arith.constant 0.000000e+00 : f32
      %248 = vector.broadcast %cst_154 : f32 to vector<8x1xf32>
      %249 = vector.extract_strided_slice %64 {offsets = [0, 1], sizes = [8, 255], strides = [1, 1]} : vector<8x256xf32> to vector<8x255xf32>
      %250 = tpu.concatenate %249, %248 in 1 : vector<8x255xf32>, vector<8x1xf32> -> vector<8x256xf32>
      %251 = vector.broadcast %24 : vector<1x256xf32> to vector<8x256xf32>
      %252 = arith.mulf %250, %251 : vector<8x256xf32>
      %c23 = arith.constant 23 : index
      %c0_155 = arith.constant 0 : index
      %c0_156 = arith.constant 0 : index
      %253 = vector.load %arg3[%c23, %c0_155, %c0_156] : memref<27x4x8xf32, #tpu.memory_space<vmem>>, vector<1x4x8xf32>
      %254 = vector.shape_cast %253 : vector<1x4x8xf32> to vector<4x8xf32>
      %cst_157 = arith.constant dense<0.000000e+00> : vector<4x256xf32>
      %255 = tpu.matmul %254, %252, %cst_157 {dimension_numbers = #tpu.dot_dimension_numbers<[1], [0], [0], [1], [0, 0, 1, 1], [], []>} : vector<4x8xf32>, vector<8x256xf32>, vector<4x256xf32> -> vector<4x256xf32>
      %256 = arith.addf %247, %255 : vector<4x256xf32>
      %cst_158 = arith.constant 0.000000e+00 : f32
      %257 = vector.broadcast %cst_158 : f32 to vector<8x15xf32>
      %258 = vector.extract_strided_slice %64 {offsets = [0, 15], sizes = [8, 241], strides = [1, 1]} : vector<8x256xf32> to vector<8x241xf32>
      %259 = tpu.concatenate %258, %257 in 1 : vector<8x241xf32>, vector<8x15xf32> -> vector<8x256xf32>
      %260 = vector.broadcast %20 : vector<1x256xf32> to vector<8x256xf32>
      %261 = arith.mulf %259, %260 : vector<8x256xf32>
      %c24 = arith.constant 24 : index
      %c0_159 = arith.constant 0 : index
      %c0_160 = arith.constant 0 : index
      %262 = vector.load %arg3[%c24, %c0_159, %c0_160] : memref<27x4x8xf32, #tpu.memory_space<vmem>>, vector<1x4x8xf32>
      %263 = vector.shape_cast %262 : vector<1x4x8xf32> to vector<4x8xf32>
      %cst_161 = arith.constant dense<0.000000e+00> : vector<4x256xf32>
      %264 = tpu.matmul %263, %261, %cst_161 {dimension_numbers = #tpu.dot_dimension_numbers<[1], [0], [0], [1], [0, 0, 1, 1], [], []>} : vector<4x8xf32>, vector<8x256xf32>, vector<4x256xf32> -> vector<4x256xf32>
      %265 = arith.addf %256, %264 : vector<4x256xf32>
      %cst_162 = arith.constant 0.000000e+00 : f32
      %266 = vector.broadcast %cst_162 : f32 to vector<8x16xf32>
      %267 = vector.extract_strided_slice %64 {offsets = [0, 16], sizes = [8, 240], strides = [1, 1]} : vector<8x256xf32> to vector<8x240xf32>
      %268 = tpu.concatenate %267, %266 in 1 : vector<8x240xf32>, vector<8x16xf32> -> vector<8x256xf32>
      %c25 = arith.constant 25 : index
      %c0_163 = arith.constant 0 : index
      %c0_164 = arith.constant 0 : index
      %269 = vector.load %arg3[%c25, %c0_163, %c0_164] : memref<27x4x8xf32, #tpu.memory_space<vmem>>, vector<1x4x8xf32>
      %270 = vector.shape_cast %269 : vector<1x4x8xf32> to vector<4x8xf32>
      %cst_165 = arith.constant dense<0.000000e+00> : vector<4x256xf32>
      %271 = tpu.matmul %270, %268, %cst_165 {dimension_numbers = #tpu.dot_dimension_numbers<[1], [0], [0], [1], [0, 0, 1, 1], [], []>} : vector<4x8xf32>, vector<8x256xf32>, vector<4x256xf32> -> vector<4x256xf32>
      %272 = arith.addf %265, %271 : vector<4x256xf32>
      %cst_166 = arith.constant 0.000000e+00 : f32
      %273 = vector.broadcast %cst_166 : f32 to vector<8x17xf32>
      %274 = vector.extract_strided_slice %64 {offsets = [0, 17], sizes = [8, 239], strides = [1, 1]} : vector<8x256xf32> to vector<8x239xf32>
      %275 = tpu.concatenate %274, %273 in 1 : vector<8x239xf32>, vector<8x17xf32> -> vector<8x256xf32>
      %276 = vector.broadcast %24 : vector<1x256xf32> to vector<8x256xf32>
      %277 = arith.mulf %275, %276 : vector<8x256xf32>
      %c26 = arith.constant 26 : index
      %c0_167 = arith.constant 0 : index
      %c0_168 = arith.constant 0 : index
      %278 = vector.load %arg3[%c26, %c0_167, %c0_168] : memref<27x4x8xf32, #tpu.memory_space<vmem>>, vector<1x4x8xf32>
      %279 = vector.shape_cast %278 : vector<1x4x8xf32> to vector<4x8xf32>
      %cst_169 = arith.constant dense<0.000000e+00> : vector<4x256xf32>
      %280 = tpu.matmul %279, %277, %cst_169 {dimension_numbers = #tpu.dot_dimension_numbers<[1], [0], [0], [1], [0, 0, 1, 1], [], []>} : vector<4x8xf32>, vector<8x256xf32>, vector<4x256xf32> -> vector<4x256xf32>
      %281 = arith.addf %272, %280 : vector<4x256xf32>
      %282 = vector.broadcast %38 : f32 to vector<4x256xf32>
      %283 = arith.mulf %281, %282 : vector<4x256xf32>
      %284 = vector.broadcast %39 : f32 to vector<4x256xf32>
      %285 = arith.addf %283, %284 : vector<4x256xf32>
      %cst_170 = arith.constant 0.000000e+00 : f32
      %286 = vector.broadcast %cst_170 : f32 to vector<4x256xf32>
      %287 = arith.maximumf %285, %286 : vector<4x256xf32>
      %c1_i32_171 = arith.constant 1 : i32
      %288 = arith.addi %arg10, %c1_i32_171 : i32
      %289 = arith.index_cast %288 : i32 to index
      %c8_172 = arith.constant 8 : index
      %c0_173 = arith.constant 0 : index
      %290 = vector.load %arg9[%289, %c8_172, %c0_173] : memref<10x20x256xf32, #tpu.memory_space<vmem>>, vector<1x4x256xf32>
      %291 = vector.shape_cast %290 : vector<1x4x256xf32> to vector<4x256xf32>
      %292 = vector.shape_cast %287 : vector<4x256xf32> to vector<1x4x256xf32>
      tpu.vector_store %arg9[%289, %c8_172, %c0_173], %292 {strides = array<i32>} : memref<10x20x256xf32, #tpu.memory_space<vmem>>, vector<1x4x256xf32>,
    }
    %c8_i32_28 = arith.constant 8 : i32
    %c2 = arith.constant 2 : index
    %c0_29 = arith.constant 0 : index
    %41 = memref.load %arg7[%c2, %c0_29] : memref<5x2xf32, #tpu.memory_space<smem>>
    %c2_30 = arith.constant 2 : index
    %c1_31 = arith.constant 1 : index
    %42 = memref.load %arg7[%c2_30, %c1_31] : memref<5x2xf32, #tpu.memory_space<smem>>
    %c0_i32_32 = arith.constant 0 : i32
    %c8_i32_33 = arith.constant 8 : i32
    %43 = arith.addi %c0_i32_32, %c8_i32_33 : i32
    %c1_i32_34 = arith.constant 1 : i32
    scf.for %arg10 = %c0_i32_32 to %43 step %c1_i32_34  : i32 {
      %c0_i32_50 = arith.constant 0 : i32
      %50 = arith.addi %arg10, %c0_i32_50 : i32
      %51 = arith.index_cast %50 : i32 to index
      %c0_51 = arith.constant 0 : index
      %c0_52 = arith.constant 0 : index
      %52 = vector.load %arg9[%51, %c0_51, %c0_52] : memref<10x20x256xf32, #tpu.memory_space<vmem>>, vector<1x20x256xf32>
      %53 = vector.shape_cast %52 : vector<1x20x256xf32> to vector<20x256xf32>
      %54 = vector.extract_strided_slice %53 {offsets = [0, 0], sizes = [12, 256], strides = [1, 1]} : vector<20x256xf32> to vector<12x256xf32>
      %c1_i32_53 = arith.constant 1 : i32
      %55 = arith.addi %arg10, %c1_i32_53 : i32
      %56 = arith.index_cast %55 : i32 to index
      %c0_54 = arith.constant 0 : index
      %c0_55 = arith.constant 0 : index
      %57 = vector.load %arg9[%56, %c0_54, %c0_55] : memref<10x20x256xf32, #tpu.memory_space<vmem>>, vector<1x20x256xf32>
      %58 = vector.shape_cast %57 : vector<1x20x256xf32> to vector<20x256xf32>
      %59 = vector.extract_strided_slice %58 {offsets = [0, 0], sizes = [12, 256], strides = [1, 1]} : vector<20x256xf32> to vector<12x256xf32>
      %c2_i32 = arith.constant 2 : i32
      %60 = arith.addi %arg10, %c2_i32 : i32
      %61 = arith.index_cast %60 : i32 to index
      %c0_56 = arith.constant 0 : index
      %c0_57 = arith.constant 0 : index
      %62 = vector.load %arg9[%61, %c0_56, %c0_57] : memref<10x20x256xf32, #tpu.memory_space<vmem>>, vector<1x20x256xf32>
      %63 = vector.shape_cast %62 : vector<1x20x256xf32> to vector<20x256xf32>
      %64 = vector.extract_strided_slice %63 {offsets = [0, 0], sizes = [12, 256], strides = [1, 1]} : vector<20x256xf32> to vector<12x256xf32>
      %cst_58 = arith.constant 0.000000e+00 : f32
      %65 = vector.broadcast %cst_58 : f32 to vector<4x256xf32>
      %cst_59 = arith.constant 0.000000e+00 : f32
      %66 = vector.broadcast %cst_59 : f32 to vector<12x17xf32>
      %67 = vector.extract_strided_slice %54 {offsets = [0, 0], sizes = [12, 239], strides = [1, 1]} : vector<12x256xf32> to vector<12x239xf32>
      %68 = tpu.concatenate %66, %67 in 1 : vector<12x17xf32>, vector<12x239xf32> -> vector<12x256xf32>
      %69 = vector.broadcast %20 : vector<1x256xf32> to vector<12x256xf32>
      %70 = arith.mulf %68, %69 : vector<12x256xf32>
      %c0_60 = arith.constant 0 : index
      %c0_61 = arith.constant 0 : index
      %c0_62 = arith.constant 0 : index
      %71 = vector.load %arg4[%c0_60, %c0_61, %c0_62] : memref<27x4x12xf32, #tpu.memory_space<vmem>>, vector<1x4x12xf32>
      %72 = vector.shape_cast %71 : vector<1x4x12xf32> to vector<4x12xf32>
      %cst_63 = arith.constant dense<0.000000e+00> : vector<4x256xf32>
      %73 = tpu.matmul %72, %70, %cst_63 {dimension_numbers = #tpu.dot_dimension_numbers<[1], [0], [0], [1], [0, 0, 1, 1], [], []>} : vector<4x12xf32>, vector<12x256xf32>, vector<4x256xf32> -> vector<4x256xf32>
      %74 = arith.addf %65, %73 : vector<4x256xf32>
      %cst_64 = arith.constant 0.000000e+00 : f32
      %75 = vector.broadcast %cst_64 : f32 to vector<12x16xf32>
      %76 = vector.extract_strided_slice %54 {offsets = [0, 0], sizes = [12, 240], strides = [1, 1]} : vector<12x256xf32> to vector<12x240xf32>
      %77 = tpu.concatenate %75, %76 in 1 : vector<12x16xf32>, vector<12x240xf32> -> vector<12x256xf32>
      %c1_65 = arith.constant 1 : index
      %c0_66 = arith.constant 0 : index
      %c0_67 = arith.constant 0 : index
      %78 = vector.load %arg4[%c1_65, %c0_66, %c0_67] : memref<27x4x12xf32, #tpu.memory_space<vmem>>, vector<1x4x12xf32>
      %79 = vector.shape_cast %78 : vector<1x4x12xf32> to vector<4x12xf32>
      %cst_68 = arith.constant dense<0.000000e+00> : vector<4x256xf32>
      %80 = tpu.matmul %79, %77, %cst_68 {dimension_numbers = #tpu.dot_dimension_numbers<[1], [0], [0], [1], [0, 0, 1, 1], [], []>} : vector<4x12xf32>, vector<12x256xf32>, vector<4x256xf32> -> vector<4x256xf32>
      %81 = arith.addf %74, %80 : vector<4x256xf32>
      %cst_69 = arith.constant 0.000000e+00 : f32
      %82 = vector.broadcast %cst_69 : f32 to vector<12x15xf32>
      %83 = vector.extract_strided_slice %54 {offsets = [0, 0], sizes = [12, 241], strides = [1, 1]} : vector<12x256xf32> to vector<12x241xf32>
      %84 = tpu.concatenate %82, %83 in 1 : vector<12x15xf32>, vector<12x241xf32> -> vector<12x256xf32>
      %85 = vector.broadcast %24 : vector<1x256xf32> to vector<12x256xf32>
      %86 = arith.mulf %84, %85 : vector<12x256xf32>
      %c2_70 = arith.constant 2 : index
      %c0_71 = arith.constant 0 : index
      %c0_72 = arith.constant 0 : index
      %87 = vector.load %arg4[%c2_70, %c0_71, %c0_72] : memref<27x4x12xf32, #tpu.memory_space<vmem>>, vector<1x4x12xf32>
      %88 = vector.shape_cast %87 : vector<1x4x12xf32> to vector<4x12xf32>
      %cst_73 = arith.constant dense<0.000000e+00> : vector<4x256xf32>
      %89 = tpu.matmul %88, %86, %cst_73 {dimension_numbers = #tpu.dot_dimension_numbers<[1], [0], [0], [1], [0, 0, 1, 1], [], []>} : vector<4x12xf32>, vector<12x256xf32>, vector<4x256xf32> -> vector<4x256xf32>
      %90 = arith.addf %81, %89 : vector<4x256xf32>
      %cst_74 = arith.constant 0.000000e+00 : f32
      %91 = vector.broadcast %cst_74 : f32 to vector<12x1xf32>
      %92 = vector.extract_strided_slice %54 {offsets = [0, 0], sizes = [12, 255], strides = [1, 1]} : vector<12x256xf32> to vector<12x255xf32>
      %93 = tpu.concatenate %91, %92 in 1 : vector<12x1xf32>, vector<12x255xf32> -> vector<12x256xf32>
      %94 = vector.broadcast %20 : vector<1x256xf32> to vector<12x256xf32>
      %95 = arith.mulf %93, %94 : vector<12x256xf32>
      %c3_75 = arith.constant 3 : index
      %c0_76 = arith.constant 0 : index
      %c0_77 = arith.constant 0 : index
      %96 = vector.load %arg4[%c3_75, %c0_76, %c0_77] : memref<27x4x12xf32, #tpu.memory_space<vmem>>, vector<1x4x12xf32>
      %97 = vector.shape_cast %96 : vector<1x4x12xf32> to vector<4x12xf32>
      %cst_78 = arith.constant dense<0.000000e+00> : vector<4x256xf32>
      %98 = tpu.matmul %97, %95, %cst_78 {dimension_numbers = #tpu.dot_dimension_numbers<[1], [0], [0], [1], [0, 0, 1, 1], [], []>} : vector<4x12xf32>, vector<12x256xf32>, vector<4x256xf32> -> vector<4x256xf32>
      %99 = arith.addf %90, %98 : vector<4x256xf32>
      %c4_79 = arith.constant 4 : index
      %c0_80 = arith.constant 0 : index
      %c0_81 = arith.constant 0 : index
      %100 = vector.load %arg4[%c4_79, %c0_80, %c0_81] : memref<27x4x12xf32, #tpu.memory_space<vmem>>, vector<1x4x12xf32>
      %101 = vector.shape_cast %100 : vector<1x4x12xf32> to vector<4x12xf32>
      %cst_82 = arith.constant dense<0.000000e+00> : vector<4x256xf32>
      %102 = tpu.matmul %101, %54, %cst_82 {dimension_numbers = #tpu.dot_dimension_numbers<[1], [0], [0], [1], [0, 0, 1, 1], [], []>} : vector<4x12xf32>, vector<12x256xf32>, vector<4x256xf32> -> vector<4x256xf32>
      %103 = arith.addf %99, %102 : vector<4x256xf32>
      %cst_83 = arith.constant 0.000000e+00 : f32
      %104 = vector.broadcast %cst_83 : f32 to vector<12x1xf32>
      %105 = vector.extract_strided_slice %54 {offsets = [0, 1], sizes = [12, 255], strides = [1, 1]} : vector<12x256xf32> to vector<12x255xf32>
      %106 = tpu.concatenate %105, %104 in 1 : vector<12x255xf32>, vector<12x1xf32> -> vector<12x256xf32>
      %107 = vector.broadcast %24 : vector<1x256xf32> to vector<12x256xf32>
      %108 = arith.mulf %106, %107 : vector<12x256xf32>
      %c5 = arith.constant 5 : index
      %c0_84 = arith.constant 0 : index
      %c0_85 = arith.constant 0 : index
      %109 = vector.load %arg4[%c5, %c0_84, %c0_85] : memref<27x4x12xf32, #tpu.memory_space<vmem>>, vector<1x4x12xf32>
      %110 = vector.shape_cast %109 : vector<1x4x12xf32> to vector<4x12xf32>
      %cst_86 = arith.constant dense<0.000000e+00> : vector<4x256xf32>
      %111 = tpu.matmul %110, %108, %cst_86 {dimension_numbers = #tpu.dot_dimension_numbers<[1], [0], [0], [1], [0, 0, 1, 1], [], []>} : vector<4x12xf32>, vector<12x256xf32>, vector<4x256xf32> -> vector<4x256xf32>
      %112 = arith.addf %103, %111 : vector<4x256xf32>
      %cst_87 = arith.constant 0.000000e+00 : f32
      %113 = vector.broadcast %cst_87 : f32 to vector<12x15xf32>
      %114 = vector.extract_strided_slice %54 {offsets = [0, 15], sizes = [12, 241], strides = [1, 1]} : vector<12x256xf32> to vector<12x241xf32>
      %115 = tpu.concatenate %114, %113 in 1 : vector<12x241xf32>, vector<12x15xf32> -> vector<12x256xf32>
      %116 = vector.broadcast %20 : vector<1x256xf32> to vector<12x256xf32>
      %117 = arith.mulf %115, %116 : vector<12x256xf32>
      %c6 = arith.constant 6 : index
      %c0_88 = arith.constant 0 : index
      %c0_89 = arith.constant 0 : index
      %118 = vector.load %arg4[%c6, %c0_88, %c0_89] : memref<27x4x12xf32, #tpu.memory_space<vmem>>, vector<1x4x12xf32>
      %119 = vector.shape_cast %118 : vector<1x4x12xf32> to vector<4x12xf32>
      %cst_90 = arith.constant dense<0.000000e+00> : vector<4x256xf32>
      %120 = tpu.matmul %119, %117, %cst_90 {dimension_numbers = #tpu.dot_dimension_numbers<[1], [0], [0], [1], [0, 0, 1, 1], [], []>} : vector<4x12xf32>, vector<12x256xf32>, vector<4x256xf32> -> vector<4x256xf32>
      %121 = arith.addf %112, %120 : vector<4x256xf32>
      %cst_91 = arith.constant 0.000000e+00 : f32
      %122 = vector.broadcast %cst_91 : f32 to vector<12x16xf32>
      %123 = vector.extract_strided_slice %54 {offsets = [0, 16], sizes = [12, 240], strides = [1, 1]} : vector<12x256xf32> to vector<12x240xf32>
      %124 = tpu.concatenate %123, %122 in 1 : vector<12x240xf32>, vector<12x16xf32> -> vector<12x256xf32>
      %c7 = arith.constant 7 : index
      %c0_92 = arith.constant 0 : index
      %c0_93 = arith.constant 0 : index
      %125 = vector.load %arg4[%c7, %c0_92, %c0_93] : memref<27x4x12xf32, #tpu.memory_space<vmem>>, vector<1x4x12xf32>
      %126 = vector.shape_cast %125 : vector<1x4x12xf32> to vector<4x12xf32>
      %cst_94 = arith.constant dense<0.000000e+00> : vector<4x256xf32>
      %127 = tpu.matmul %126, %124, %cst_94 {dimension_numbers = #tpu.dot_dimension_numbers<[1], [0], [0], [1], [0, 0, 1, 1], [], []>} : vector<4x12xf32>, vector<12x256xf32>, vector<4x256xf32> -> vector<4x256xf32>
      %128 = arith.addf %121, %127 : vector<4x256xf32>
      %cst_95 = arith.constant 0.000000e+00 : f32
      %129 = vector.broadcast %cst_95 : f32 to vector<12x17xf32>
      %130 = vector.extract_strided_slice %54 {offsets = [0, 17], sizes = [12, 239], strides = [1, 1]} : vector<12x256xf32> to vector<12x239xf32>
      %131 = tpu.concatenate %130, %129 in 1 : vector<12x239xf32>, vector<12x17xf32> -> vector<12x256xf32>
      %132 = vector.broadcast %24 : vector<1x256xf32> to vector<12x256xf32>
      %133 = arith.mulf %131, %132 : vector<12x256xf32>
      %c8 = arith.constant 8 : index
      %c0_96 = arith.constant 0 : index
      %c0_97 = arith.constant 0 : index
      %134 = vector.load %arg4[%c8, %c0_96, %c0_97] : memref<27x4x12xf32, #tpu.memory_space<vmem>>, vector<1x4x12xf32>
      %135 = vector.shape_cast %134 : vector<1x4x12xf32> to vector<4x12xf32>
      %cst_98 = arith.constant dense<0.000000e+00> : vector<4x256xf32>
      %136 = tpu.matmul %135, %133, %cst_98 {dimension_numbers = #tpu.dot_dimension_numbers<[1], [0], [0], [1], [0, 0, 1, 1], [], []>} : vector<4x12xf32>, vector<12x256xf32>, vector<4x256xf32> -> vector<4x256xf32>
      %137 = arith.addf %128, %136 : vector<4x256xf32>
      %cst_99 = arith.constant 0.000000e+00 : f32
      %138 = vector.broadcast %cst_99 : f32 to vector<12x17xf32>
      %139 = vector.extract_strided_slice %59 {offsets = [0, 0], sizes = [12, 239], strides = [1, 1]} : vector<12x256xf32> to vector<12x239xf32>
      %140 = tpu.concatenate %138, %139 in 1 : vector<12x17xf32>, vector<12x239xf32> -> vector<12x256xf32>
      %141 = vector.broadcast %20 : vector<1x256xf32> to vector<12x256xf32>
      %142 = arith.mulf %140, %141 : vector<12x256xf32>
      %c9_100 = arith.constant 9 : index
      %c0_101 = arith.constant 0 : index
      %c0_102 = arith.constant 0 : index
      %143 = vector.load %arg4[%c9_100, %c0_101, %c0_102] : memref<27x4x12xf32, #tpu.memory_space<vmem>>, vector<1x4x12xf32>
      %144 = vector.shape_cast %143 : vector<1x4x12xf32> to vector<4x12xf32>
      %cst_103 = arith.constant dense<0.000000e+00> : vector<4x256xf32>
      %145 = tpu.matmul %144, %142, %cst_103 {dimension_numbers = #tpu.dot_dimension_numbers<[1], [0], [0], [1], [0, 0, 1, 1], [], []>} : vector<4x12xf32>, vector<12x256xf32>, vector<4x256xf32> -> vector<4x256xf32>
      %146 = arith.addf %137, %145 : vector<4x256xf32>
      %cst_104 = arith.constant 0.000000e+00 : f32
      %147 = vector.broadcast %cst_104 : f32 to vector<12x16xf32>
      %148 = vector.extract_strided_slice %59 {offsets = [0, 0], sizes = [12, 240], strides = [1, 1]} : vector<12x256xf32> to vector<12x240xf32>
      %149 = tpu.concatenate %147, %148 in 1 : vector<12x16xf32>, vector<12x240xf32> -> vector<12x256xf32>
      %c10 = arith.constant 10 : index
      %c0_105 = arith.constant 0 : index
      %c0_106 = arith.constant 0 : index
      %150 = vector.load %arg4[%c10, %c0_105, %c0_106] : memref<27x4x12xf32, #tpu.memory_space<vmem>>, vector<1x4x12xf32>
      %151 = vector.shape_cast %150 : vector<1x4x12xf32> to vector<4x12xf32>
      %cst_107 = arith.constant dense<0.000000e+00> : vector<4x256xf32>
      %152 = tpu.matmul %151, %149, %cst_107 {dimension_numbers = #tpu.dot_dimension_numbers<[1], [0], [0], [1], [0, 0, 1, 1], [], []>} : vector<4x12xf32>, vector<12x256xf32>, vector<4x256xf32> -> vector<4x256xf32>
      %153 = arith.addf %146, %152 : vector<4x256xf32>
      %cst_108 = arith.constant 0.000000e+00 : f32
      %154 = vector.broadcast %cst_108 : f32 to vector<12x15xf32>
      %155 = vector.extract_strided_slice %59 {offsets = [0, 0], sizes = [12, 241], strides = [1, 1]} : vector<12x256xf32> to vector<12x241xf32>
      %156 = tpu.concatenate %154, %155 in 1 : vector<12x15xf32>, vector<12x241xf32> -> vector<12x256xf32>
      %157 = vector.broadcast %24 : vector<1x256xf32> to vector<12x256xf32>
      %158 = arith.mulf %156, %157 : vector<12x256xf32>
      %c11 = arith.constant 11 : index
      %c0_109 = arith.constant 0 : index
      %c0_110 = arith.constant 0 : index
      %159 = vector.load %arg4[%c11, %c0_109, %c0_110] : memref<27x4x12xf32, #tpu.memory_space<vmem>>, vector<1x4x12xf32>
      %160 = vector.shape_cast %159 : vector<1x4x12xf32> to vector<4x12xf32>
      %cst_111 = arith.constant dense<0.000000e+00> : vector<4x256xf32>
      %161 = tpu.matmul %160, %158, %cst_111 {dimension_numbers = #tpu.dot_dimension_numbers<[1], [0], [0], [1], [0, 0, 1, 1], [], []>} : vector<4x12xf32>, vector<12x256xf32>, vector<4x256xf32> -> vector<4x256xf32>
      %162 = arith.addf %153, %161 : vector<4x256xf32>
      %cst_112 = arith.constant 0.000000e+00 : f32
      %163 = vector.broadcast %cst_112 : f32 to vector<12x1xf32>
      %164 = vector.extract_strided_slice %59 {offsets = [0, 0], sizes = [12, 255], strides = [1, 1]} : vector<12x256xf32> to vector<12x255xf32>
      %165 = tpu.concatenate %163, %164 in 1 : vector<12x1xf32>, vector<12x255xf32> -> vector<12x256xf32>
      %166 = vector.broadcast %20 : vector<1x256xf32> to vector<12x256xf32>
      %167 = arith.mulf %165, %166 : vector<12x256xf32>
      %c12 = arith.constant 12 : index
      %c0_113 = arith.constant 0 : index
      %c0_114 = arith.constant 0 : index
      %168 = vector.load %arg4[%c12, %c0_113, %c0_114] : memref<27x4x12xf32, #tpu.memory_space<vmem>>, vector<1x4x12xf32>
      %169 = vector.shape_cast %168 : vector<1x4x12xf32> to vector<4x12xf32>
      %cst_115 = arith.constant dense<0.000000e+00> : vector<4x256xf32>
      %170 = tpu.matmul %169, %167, %cst_115 {dimension_numbers = #tpu.dot_dimension_numbers<[1], [0], [0], [1], [0, 0, 1, 1], [], []>} : vector<4x12xf32>, vector<12x256xf32>, vector<4x256xf32> -> vector<4x256xf32>
      %171 = arith.addf %162, %170 : vector<4x256xf32>
      %c13 = arith.constant 13 : index
      %c0_116 = arith.constant 0 : index
      %c0_117 = arith.constant 0 : index
      %172 = vector.load %arg4[%c13, %c0_116, %c0_117] : memref<27x4x12xf32, #tpu.memory_space<vmem>>, vector<1x4x12xf32>
      %173 = vector.shape_cast %172 : vector<1x4x12xf32> to vector<4x12xf32>
      %cst_118 = arith.constant dense<0.000000e+00> : vector<4x256xf32>
      %174 = tpu.matmul %173, %59, %cst_118 {dimension_numbers = #tpu.dot_dimension_numbers<[1], [0], [0], [1], [0, 0, 1, 1], [], []>} : vector<4x12xf32>, vector<12x256xf32>, vector<4x256xf32> -> vector<4x256xf32>
      %175 = arith.addf %171, %174 : vector<4x256xf32>
      %cst_119 = arith.constant 0.000000e+00 : f32
      %176 = vector.broadcast %cst_119 : f32 to vector<12x1xf32>
      %177 = vector.extract_strided_slice %59 {offsets = [0, 1], sizes = [12, 255], strides = [1, 1]} : vector<12x256xf32> to vector<12x255xf32>
      %178 = tpu.concatenate %177, %176 in 1 : vector<12x255xf32>, vector<12x1xf32> -> vector<12x256xf32>
      %179 = vector.broadcast %24 : vector<1x256xf32> to vector<12x256xf32>
      %180 = arith.mulf %178, %179 : vector<12x256xf32>
      %c14 = arith.constant 14 : index
      %c0_120 = arith.constant 0 : index
      %c0_121 = arith.constant 0 : index
      %181 = vector.load %arg4[%c14, %c0_120, %c0_121] : memref<27x4x12xf32, #tpu.memory_space<vmem>>, vector<1x4x12xf32>
      %182 = vector.shape_cast %181 : vector<1x4x12xf32> to vector<4x12xf32>
      %cst_122 = arith.constant dense<0.000000e+00> : vector<4x256xf32>
      %183 = tpu.matmul %182, %180, %cst_122 {dimension_numbers = #tpu.dot_dimension_numbers<[1], [0], [0], [1], [0, 0, 1, 1], [], []>} : vector<4x12xf32>, vector<12x256xf32>, vector<4x256xf32> -> vector<4x256xf32>
      %184 = arith.addf %175, %183 : vector<4x256xf32>
      %cst_123 = arith.constant 0.000000e+00 : f32
      %185 = vector.broadcast %cst_123 : f32 to vector<12x15xf32>
      %186 = vector.extract_strided_slice %59 {offsets = [0, 15], sizes = [12, 241], strides = [1, 1]} : vector<12x256xf32> to vector<12x241xf32>
      %187 = tpu.concatenate %186, %185 in 1 : vector<12x241xf32>, vector<12x15xf32> -> vector<12x256xf32>
      %188 = vector.broadcast %20 : vector<1x256xf32> to vector<12x256xf32>
      %189 = arith.mulf %187, %188 : vector<12x256xf32>
      %c15 = arith.constant 15 : index
      %c0_124 = arith.constant 0 : index
      %c0_125 = arith.constant 0 : index
      %190 = vector.load %arg4[%c15, %c0_124, %c0_125] : memref<27x4x12xf32, #tpu.memory_space<vmem>>, vector<1x4x12xf32>
      %191 = vector.shape_cast %190 : vector<1x4x12xf32> to vector<4x12xf32>
      %cst_126 = arith.constant dense<0.000000e+00> : vector<4x256xf32>
      %192 = tpu.matmul %191, %189, %cst_126 {dimension_numbers = #tpu.dot_dimension_numbers<[1], [0], [0], [1], [0, 0, 1, 1], [], []>} : vector<4x12xf32>, vector<12x256xf32>, vector<4x256xf32> -> vector<4x256xf32>
      %193 = arith.addf %184, %192 : vector<4x256xf32>
      %cst_127 = arith.constant 0.000000e+00 : f32
      %194 = vector.broadcast %cst_127 : f32 to vector<12x16xf32>
      %195 = vector.extract_strided_slice %59 {offsets = [0, 16], sizes = [12, 240], strides = [1, 1]} : vector<12x256xf32> to vector<12x240xf32>
      %196 = tpu.concatenate %195, %194 in 1 : vector<12x240xf32>, vector<12x16xf32> -> vector<12x256xf32>
      %c16 = arith.constant 16 : index
      %c0_128 = arith.constant 0 : index
      %c0_129 = arith.constant 0 : index
      %197 = vector.load %arg4[%c16, %c0_128, %c0_129] : memref<27x4x12xf32, #tpu.memory_space<vmem>>, vector<1x4x12xf32>
      %198 = vector.shape_cast %197 : vector<1x4x12xf32> to vector<4x12xf32>
      %cst_130 = arith.constant dense<0.000000e+00> : vector<4x256xf32>
      %199 = tpu.matmul %198, %196, %cst_130 {dimension_numbers = #tpu.dot_dimension_numbers<[1], [0], [0], [1], [0, 0, 1, 1], [], []>} : vector<4x12xf32>, vector<12x256xf32>, vector<4x256xf32> -> vector<4x256xf32>
      %200 = arith.addf %193, %199 : vector<4x256xf32>
      %cst_131 = arith.constant 0.000000e+00 : f32
      %201 = vector.broadcast %cst_131 : f32 to vector<12x17xf32>
      %202 = vector.extract_strided_slice %59 {offsets = [0, 17], sizes = [12, 239], strides = [1, 1]} : vector<12x256xf32> to vector<12x239xf32>
      %203 = tpu.concatenate %202, %201 in 1 : vector<12x239xf32>, vector<12x17xf32> -> vector<12x256xf32>
      %204 = vector.broadcast %24 : vector<1x256xf32> to vector<12x256xf32>
      %205 = arith.mulf %203, %204 : vector<12x256xf32>
      %c17 = arith.constant 17 : index
      %c0_132 = arith.constant 0 : index
      %c0_133 = arith.constant 0 : index
      %206 = vector.load %arg4[%c17, %c0_132, %c0_133] : memref<27x4x12xf32, #tpu.memory_space<vmem>>, vector<1x4x12xf32>
      %207 = vector.shape_cast %206 : vector<1x4x12xf32> to vector<4x12xf32>
      %cst_134 = arith.constant dense<0.000000e+00> : vector<4x256xf32>
      %208 = tpu.matmul %207, %205, %cst_134 {dimension_numbers = #tpu.dot_dimension_numbers<[1], [0], [0], [1], [0, 0, 1, 1], [], []>} : vector<4x12xf32>, vector<12x256xf32>, vector<4x256xf32> -> vector<4x256xf32>
      %209 = arith.addf %200, %208 : vector<4x256xf32>
      %cst_135 = arith.constant 0.000000e+00 : f32
      %210 = vector.broadcast %cst_135 : f32 to vector<12x17xf32>
      %211 = vector.extract_strided_slice %64 {offsets = [0, 0], sizes = [12, 239], strides = [1, 1]} : vector<12x256xf32> to vector<12x239xf32>
      %212 = tpu.concatenate %210, %211 in 1 : vector<12x17xf32>, vector<12x239xf32> -> vector<12x256xf32>
      %213 = vector.broadcast %20 : vector<1x256xf32> to vector<12x256xf32>
      %214 = arith.mulf %212, %213 : vector<12x256xf32>
      %c18 = arith.constant 18 : index
      %c0_136 = arith.constant 0 : index
      %c0_137 = arith.constant 0 : index
      %215 = vector.load %arg4[%c18, %c0_136, %c0_137] : memref<27x4x12xf32, #tpu.memory_space<vmem>>, vector<1x4x12xf32>
      %216 = vector.shape_cast %215 : vector<1x4x12xf32> to vector<4x12xf32>
      %cst_138 = arith.constant dense<0.000000e+00> : vector<4x256xf32>
      %217 = tpu.matmul %216, %214, %cst_138 {dimension_numbers = #tpu.dot_dimension_numbers<[1], [0], [0], [1], [0, 0, 1, 1], [], []>} : vector<4x12xf32>, vector<12x256xf32>, vector<4x256xf32> -> vector<4x256xf32>
      %218 = arith.addf %209, %217 : vector<4x256xf32>
      %cst_139 = arith.constant 0.000000e+00 : f32
      %219 = vector.broadcast %cst_139 : f32 to vector<12x16xf32>
      %220 = vector.extract_strided_slice %64 {offsets = [0, 0], sizes = [12, 240], strides = [1, 1]} : vector<12x256xf32> to vector<12x240xf32>
      %221 = tpu.concatenate %219, %220 in 1 : vector<12x16xf32>, vector<12x240xf32> -> vector<12x256xf32>
      %c19 = arith.constant 19 : index
      %c0_140 = arith.constant 0 : index
      %c0_141 = arith.constant 0 : index
      %222 = vector.load %arg4[%c19, %c0_140, %c0_141] : memref<27x4x12xf32, #tpu.memory_space<vmem>>, vector<1x4x12xf32>
      %223 = vector.shape_cast %222 : vector<1x4x12xf32> to vector<4x12xf32>
      %cst_142 = arith.constant dense<0.000000e+00> : vector<4x256xf32>
      %224 = tpu.matmul %223, %221, %cst_142 {dimension_numbers = #tpu.dot_dimension_numbers<[1], [0], [0], [1], [0, 0, 1, 1], [], []>} : vector<4x12xf32>, vector<12x256xf32>, vector<4x256xf32> -> vector<4x256xf32>
      %225 = arith.addf %218, %224 : vector<4x256xf32>
      %cst_143 = arith.constant 0.000000e+00 : f32
      %226 = vector.broadcast %cst_143 : f32 to vector<12x15xf32>
      %227 = vector.extract_strided_slice %64 {offsets = [0, 0], sizes = [12, 241], strides = [1, 1]} : vector<12x256xf32> to vector<12x241xf32>
      %228 = tpu.concatenate %226, %227 in 1 : vector<12x15xf32>, vector<12x241xf32> -> vector<12x256xf32>
      %229 = vector.broadcast %24 : vector<1x256xf32> to vector<12x256xf32>
      %230 = arith.mulf %228, %229 : vector<12x256xf32>
      %c20 = arith.constant 20 : index
      %c0_144 = arith.constant 0 : index
      %c0_145 = arith.constant 0 : index
      %231 = vector.load %arg4[%c20, %c0_144, %c0_145] : memref<27x4x12xf32, #tpu.memory_space<vmem>>, vector<1x4x12xf32>
      %232 = vector.shape_cast %231 : vector<1x4x12xf32> to vector<4x12xf32>
      %cst_146 = arith.constant dense<0.000000e+00> : vector<4x256xf32>
      %233 = tpu.matmul %232, %230, %cst_146 {dimension_numbers = #tpu.dot_dimension_numbers<[1], [0], [0], [1], [0, 0, 1, 1], [], []>} : vector<4x12xf32>, vector<12x256xf32>, vector<4x256xf32> -> vector<4x256xf32>
      %234 = arith.addf %225, %233 : vector<4x256xf32>
      %cst_147 = arith.constant 0.000000e+00 : f32
      %235 = vector.broadcast %cst_147 : f32 to vector<12x1xf32>
      %236 = vector.extract_strided_slice %64 {offsets = [0, 0], sizes = [12, 255], strides = [1, 1]} : vector<12x256xf32> to vector<12x255xf32>
      %237 = tpu.concatenate %235, %236 in 1 : vector<12x1xf32>, vector<12x255xf32> -> vector<12x256xf32>
      %238 = vector.broadcast %20 : vector<1x256xf32> to vector<12x256xf32>
      %239 = arith.mulf %237, %238 : vector<12x256xf32>
      %c21 = arith.constant 21 : index
      %c0_148 = arith.constant 0 : index
      %c0_149 = arith.constant 0 : index
      %240 = vector.load %arg4[%c21, %c0_148, %c0_149] : memref<27x4x12xf32, #tpu.memory_space<vmem>>, vector<1x4x12xf32>
      %241 = vector.shape_cast %240 : vector<1x4x12xf32> to vector<4x12xf32>
      %cst_150 = arith.constant dense<0.000000e+00> : vector<4x256xf32>
      %242 = tpu.matmul %241, %239, %cst_150 {dimension_numbers = #tpu.dot_dimension_numbers<[1], [0], [0], [1], [0, 0, 1, 1], [], []>} : vector<4x12xf32>, vector<12x256xf32>, vector<4x256xf32> -> vector<4x256xf32>
      %243 = arith.addf %234, %242 : vector<4x256xf32>
      %c22 = arith.constant 22 : index
      %c0_151 = arith.constant 0 : index
      %c0_152 = arith.constant 0 : index
      %244 = vector.load %arg4[%c22, %c0_151, %c0_152] : memref<27x4x12xf32, #tpu.memory_space<vmem>>, vector<1x4x12xf32>
      %245 = vector.shape_cast %244 : vector<1x4x12xf32> to vector<4x12xf32>
      %cst_153 = arith.constant dense<0.000000e+00> : vector<4x256xf32>
      %246 = tpu.matmul %245, %64, %cst_153 {dimension_numbers = #tpu.dot_dimension_numbers<[1], [0], [0], [1], [0, 0, 1, 1], [], []>} : vector<4x12xf32>, vector<12x256xf32>, vector<4x256xf32> -> vector<4x256xf32>
      %247 = arith.addf %243, %246 : vector<4x256xf32>
      %cst_154 = arith.constant 0.000000e+00 : f32
      %248 = vector.broadcast %cst_154 : f32 to vector<12x1xf32>
      %249 = vector.extract_strided_slice %64 {offsets = [0, 1], sizes = [12, 255], strides = [1, 1]} : vector<12x256xf32> to vector<12x255xf32>
      %250 = tpu.concatenate %249, %248 in 1 : vector<12x255xf32>, vector<12x1xf32> -> vector<12x256xf32>
      %251 = vector.broadcast %24 : vector<1x256xf32> to vector<12x256xf32>
      %252 = arith.mulf %250, %251 : vector<12x256xf32>
      %c23 = arith.constant 23 : index
      %c0_155 = arith.constant 0 : index
      %c0_156 = arith.constant 0 : index
      %253 = vector.load %arg4[%c23, %c0_155, %c0_156] : memref<27x4x12xf32, #tpu.memory_space<vmem>>, vector<1x4x12xf32>
      %254 = vector.shape_cast %253 : vector<1x4x12xf32> to vector<4x12xf32>
      %cst_157 = arith.constant dense<0.000000e+00> : vector<4x256xf32>
      %255 = tpu.matmul %254, %252, %cst_157 {dimension_numbers = #tpu.dot_dimension_numbers<[1], [0], [0], [1], [0, 0, 1, 1], [], []>} : vector<4x12xf32>, vector<12x256xf32>, vector<4x256xf32> -> vector<4x256xf32>
      %256 = arith.addf %247, %255 : vector<4x256xf32>
      %cst_158 = arith.constant 0.000000e+00 : f32
      %257 = vector.broadcast %cst_158 : f32 to vector<12x15xf32>
      %258 = vector.extract_strided_slice %64 {offsets = [0, 15], sizes = [12, 241], strides = [1, 1]} : vector<12x256xf32> to vector<12x241xf32>
      %259 = tpu.concatenate %258, %257 in 1 : vector<12x241xf32>, vector<12x15xf32> -> vector<12x256xf32>
      %260 = vector.broadcast %20 : vector<1x256xf32> to vector<12x256xf32>
      %261 = arith.mulf %259, %260 : vector<12x256xf32>
      %c24 = arith.constant 24 : index
      %c0_159 = arith.constant 0 : index
      %c0_160 = arith.constant 0 : index
      %262 = vector.load %arg4[%c24, %c0_159, %c0_160] : memref<27x4x12xf32, #tpu.memory_space<vmem>>, vector<1x4x12xf32>
      %263 = vector.shape_cast %262 : vector<1x4x12xf32> to vector<4x12xf32>
      %cst_161 = arith.constant dense<0.000000e+00> : vector<4x256xf32>
      %264 = tpu.matmul %263, %261, %cst_161 {dimension_numbers = #tpu.dot_dimension_numbers<[1], [0], [0], [1], [0, 0, 1, 1], [], []>} : vector<4x12xf32>, vector<12x256xf32>, vector<4x256xf32> -> vector<4x256xf32>
      %265 = arith.addf %256, %264 : vector<4x256xf32>
      %cst_162 = arith.constant 0.000000e+00 : f32
      %266 = vector.broadcast %cst_162 : f32 to vector<12x16xf32>
      %267 = vector.extract_strided_slice %64 {offsets = [0, 16], sizes = [12, 240], strides = [1, 1]} : vector<12x256xf32> to vector<12x240xf32>
      %268 = tpu.concatenate %267, %266 in 1 : vector<12x240xf32>, vector<12x16xf32> -> vector<12x256xf32>
      %c25 = arith.constant 25 : index
      %c0_163 = arith.constant 0 : index
      %c0_164 = arith.constant 0 : index
      %269 = vector.load %arg4[%c25, %c0_163, %c0_164] : memref<27x4x12xf32, #tpu.memory_space<vmem>>, vector<1x4x12xf32>
      %270 = vector.shape_cast %269 : vector<1x4x12xf32> to vector<4x12xf32>
      %cst_165 = arith.constant dense<0.000000e+00> : vector<4x256xf32>
      %271 = tpu.matmul %270, %268, %cst_165 {dimension_numbers = #tpu.dot_dimension_numbers<[1], [0], [0], [1], [0, 0, 1, 1], [], []>} : vector<4x12xf32>, vector<12x256xf32>, vector<4x256xf32> -> vector<4x256xf32>
      %272 = arith.addf %265, %271 : vector<4x256xf32>
      %cst_166 = arith.constant 0.000000e+00 : f32
      %273 = vector.broadcast %cst_166 : f32 to vector<12x17xf32>
      %274 = vector.extract_strided_slice %64 {offsets = [0, 17], sizes = [12, 239], strides = [1, 1]} : vector<12x256xf32> to vector<12x239xf32>
      %275 = tpu.concatenate %274, %273 in 1 : vector<12x239xf32>, vector<12x17xf32> -> vector<12x256xf32>
      %276 = vector.broadcast %24 : vector<1x256xf32> to vector<12x256xf32>
      %277 = arith.mulf %275, %276 : vector<12x256xf32>
      %c26 = arith.constant 26 : index
      %c0_167 = arith.constant 0 : index
      %c0_168 = arith.constant 0 : index
      %278 = vector.load %arg4[%c26, %c0_167, %c0_168] : memref<27x4x12xf32, #tpu.memory_space<vmem>>, vector<1x4x12xf32>
      %279 = vector.shape_cast %278 : vector<1x4x12xf32> to vector<4x12xf32>
      %cst_169 = arith.constant dense<0.000000e+00> : vector<4x256xf32>
      %280 = tpu.matmul %279, %277, %cst_169 {dimension_numbers = #tpu.dot_dimension_numbers<[1], [0], [0], [1], [0, 0, 1, 1], [], []>} : vector<4x12xf32>, vector<12x256xf32>, vector<4x256xf32> -> vector<4x256xf32>
      %281 = arith.addf %272, %280 : vector<4x256xf32>
      %282 = vector.broadcast %41 : f32 to vector<4x256xf32>
      %283 = arith.mulf %281, %282 : vector<4x256xf32>
      %284 = vector.broadcast %42 : f32 to vector<4x256xf32>
      %285 = arith.addf %283, %284 : vector<4x256xf32>
      %cst_170 = arith.constant 0.000000e+00 : f32
      %286 = vector.broadcast %cst_170 : f32 to vector<4x256xf32>
      %287 = arith.maximumf %285, %286 : vector<4x256xf32>
      %c1_i32_171 = arith.constant 1 : i32
      %288 = arith.addi %arg10, %c1_i32_171 : i32
      %289 = arith.index_cast %288 : i32 to index
      %c12_172 = arith.constant 12 : index
      %c0_173 = arith.constant 0 : index
      %290 = vector.load %arg9[%289, %c12_172, %c0_173] : memref<10x20x256xf32, #tpu.memory_space<vmem>>, vector<1x4x256xf32>
      %291 = vector.shape_cast %290 : vector<1x4x256xf32> to vector<4x256xf32>
      %292 = vector.shape_cast %287 : vector<4x256xf32> to vector<1x4x256xf32>
      tpu.vector_store %arg9[%289, %c12_172, %c0_173], %292 {strides = array<i32>} : memref<10x20x256xf32, #tpu.memory_space<vmem>>, vector<1x4x256xf32>,
    }
    %c8_i32_35 = arith.constant 8 : i32
    %c3 = arith.constant 3 : index
    %c0_36 = arith.constant 0 : index
    %44 = memref.load %arg7[%c3, %c0_36] : memref<5x2xf32, #tpu.memory_space<smem>>
    %c3_37 = arith.constant 3 : index
    %c1_38 = arith.constant 1 : index
    %45 = memref.load %arg7[%c3_37, %c1_38] : memref<5x2xf32, #tpu.memory_space<smem>>
    %c0_i32_39 = arith.constant 0 : i32
    %c8_i32_40 = arith.constant 8 : i32
    %46 = arith.addi %c0_i32_39, %c8_i32_40 : i32
    %c1_i32_41 = arith.constant 1 : i32
    scf.for %arg10 = %c0_i32_39 to %46 step %c1_i32_41  : i32 {
      %c0_i32_50 = arith.constant 0 : i32
      %50 = arith.addi %arg10, %c0_i32_50 : i32
      %51 = arith.index_cast %50 : i32 to index
      %c0_51 = arith.constant 0 : index
      %c0_52 = arith.constant 0 : index
      %52 = vector.load %arg9[%51, %c0_51, %c0_52] : memref<10x20x256xf32, #tpu.memory_space<vmem>>, vector<1x20x256xf32>
      %53 = vector.shape_cast %52 : vector<1x20x256xf32> to vector<20x256xf32>
      %54 = vector.extract_strided_slice %53 {offsets = [0, 0], sizes = [16, 256], strides = [1, 1]} : vector<20x256xf32> to vector<16x256xf32>
      %c1_i32_53 = arith.constant 1 : i32
      %55 = arith.addi %arg10, %c1_i32_53 : i32
      %56 = arith.index_cast %55 : i32 to index
      %c0_54 = arith.constant 0 : index
      %c0_55 = arith.constant 0 : index
      %57 = vector.load %arg9[%56, %c0_54, %c0_55] : memref<10x20x256xf32, #tpu.memory_space<vmem>>, vector<1x20x256xf32>
      %58 = vector.shape_cast %57 : vector<1x20x256xf32> to vector<20x256xf32>
      %59 = vector.extract_strided_slice %58 {offsets = [0, 0], sizes = [16, 256], strides = [1, 1]} : vector<20x256xf32> to vector<16x256xf32>
      %c2_i32 = arith.constant 2 : i32
      %60 = arith.addi %arg10, %c2_i32 : i32
      %61 = arith.index_cast %60 : i32 to index
      %c0_56 = arith.constant 0 : index
      %c0_57 = arith.constant 0 : index
      %62 = vector.load %arg9[%61, %c0_56, %c0_57] : memref<10x20x256xf32, #tpu.memory_space<vmem>>, vector<1x20x256xf32>
      %63 = vector.shape_cast %62 : vector<1x20x256xf32> to vector<20x256xf32>
      %64 = vector.extract_strided_slice %63 {offsets = [0, 0], sizes = [16, 256], strides = [1, 1]} : vector<20x256xf32> to vector<16x256xf32>
      %cst_58 = arith.constant 0.000000e+00 : f32
      %65 = vector.broadcast %cst_58 : f32 to vector<4x256xf32>
      %cst_59 = arith.constant 0.000000e+00 : f32
      %66 = vector.broadcast %cst_59 : f32 to vector<16x17xf32>
      %67 = vector.extract_strided_slice %54 {offsets = [0, 0], sizes = [16, 239], strides = [1, 1]} : vector<16x256xf32> to vector<16x239xf32>
      %68 = tpu.concatenate %66, %67 in 1 : vector<16x17xf32>, vector<16x239xf32> -> vector<16x256xf32>
      %69 = vector.broadcast %20 : vector<1x256xf32> to vector<16x256xf32>
      %70 = arith.mulf %68, %69 : vector<16x256xf32>
      %c0_60 = arith.constant 0 : index
      %c0_61 = arith.constant 0 : index
      %c0_62 = arith.constant 0 : index
      %71 = vector.load %arg5[%c0_60, %c0_61, %c0_62] : memref<27x4x16xf32, #tpu.memory_space<vmem>>, vector<1x4x16xf32>
      %72 = vector.shape_cast %71 : vector<1x4x16xf32> to vector<4x16xf32>
      %cst_63 = arith.constant dense<0.000000e+00> : vector<4x256xf32>
      %73 = tpu.matmul %72, %70, %cst_63 {dimension_numbers = #tpu.dot_dimension_numbers<[1], [0], [0], [1], [0, 0, 1, 1], [], []>} : vector<4x16xf32>, vector<16x256xf32>, vector<4x256xf32> -> vector<4x256xf32>
      %74 = arith.addf %65, %73 : vector<4x256xf32>
      %cst_64 = arith.constant 0.000000e+00 : f32
      %75 = vector.broadcast %cst_64 : f32 to vector<16x16xf32>
      %76 = vector.extract_strided_slice %54 {offsets = [0, 0], sizes = [16, 240], strides = [1, 1]} : vector<16x256xf32> to vector<16x240xf32>
      %77 = tpu.concatenate %75, %76 in 1 : vector<16x16xf32>, vector<16x240xf32> -> vector<16x256xf32>
      %c1_65 = arith.constant 1 : index
      %c0_66 = arith.constant 0 : index
      %c0_67 = arith.constant 0 : index
      %78 = vector.load %arg5[%c1_65, %c0_66, %c0_67] : memref<27x4x16xf32, #tpu.memory_space<vmem>>, vector<1x4x16xf32>
      %79 = vector.shape_cast %78 : vector<1x4x16xf32> to vector<4x16xf32>
      %cst_68 = arith.constant dense<0.000000e+00> : vector<4x256xf32>
      %80 = tpu.matmul %79, %77, %cst_68 {dimension_numbers = #tpu.dot_dimension_numbers<[1], [0], [0], [1], [0, 0, 1, 1], [], []>} : vector<4x16xf32>, vector<16x256xf32>, vector<4x256xf32> -> vector<4x256xf32>
      %81 = arith.addf %74, %80 : vector<4x256xf32>
      %cst_69 = arith.constant 0.000000e+00 : f32
      %82 = vector.broadcast %cst_69 : f32 to vector<16x15xf32>
      %83 = vector.extract_strided_slice %54 {offsets = [0, 0], sizes = [16, 241], strides = [1, 1]} : vector<16x256xf32> to vector<16x241xf32>
      %84 = tpu.concatenate %82, %83 in 1 : vector<16x15xf32>, vector<16x241xf32> -> vector<16x256xf32>
      %85 = vector.broadcast %24 : vector<1x256xf32> to vector<16x256xf32>
      %86 = arith.mulf %84, %85 : vector<16x256xf32>
      %c2_70 = arith.constant 2 : index
      %c0_71 = arith.constant 0 : index
      %c0_72 = arith.constant 0 : index
      %87 = vector.load %arg5[%c2_70, %c0_71, %c0_72] : memref<27x4x16xf32, #tpu.memory_space<vmem>>, vector<1x4x16xf32>
      %88 = vector.shape_cast %87 : vector<1x4x16xf32> to vector<4x16xf32>
      %cst_73 = arith.constant dense<0.000000e+00> : vector<4x256xf32>
      %89 = tpu.matmul %88, %86, %cst_73 {dimension_numbers = #tpu.dot_dimension_numbers<[1], [0], [0], [1], [0, 0, 1, 1], [], []>} : vector<4x16xf32>, vector<16x256xf32>, vector<4x256xf32> -> vector<4x256xf32>
      %90 = arith.addf %81, %89 : vector<4x256xf32>
      %cst_74 = arith.constant 0.000000e+00 : f32
      %91 = vector.broadcast %cst_74 : f32 to vector<16x1xf32>
      %92 = vector.extract_strided_slice %54 {offsets = [0, 0], sizes = [16, 255], strides = [1, 1]} : vector<16x256xf32> to vector<16x255xf32>
      %93 = tpu.concatenate %91, %92 in 1 : vector<16x1xf32>, vector<16x255xf32> -> vector<16x256xf32>
      %94 = vector.broadcast %20 : vector<1x256xf32> to vector<16x256xf32>
      %95 = arith.mulf %93, %94 : vector<16x256xf32>
      %c3_75 = arith.constant 3 : index
      %c0_76 = arith.constant 0 : index
      %c0_77 = arith.constant 0 : index
      %96 = vector.load %arg5[%c3_75, %c0_76, %c0_77] : memref<27x4x16xf32, #tpu.memory_space<vmem>>, vector<1x4x16xf32>
      %97 = vector.shape_cast %96 : vector<1x4x16xf32> to vector<4x16xf32>
      %cst_78 = arith.constant dense<0.000000e+00> : vector<4x256xf32>
      %98 = tpu.matmul %97, %95, %cst_78 {dimension_numbers = #tpu.dot_dimension_numbers<[1], [0], [0], [1], [0, 0, 1, 1], [], []>} : vector<4x16xf32>, vector<16x256xf32>, vector<4x256xf32> -> vector<4x256xf32>
      %99 = arith.addf %90, %98 : vector<4x256xf32>
      %c4_79 = arith.constant 4 : index
      %c0_80 = arith.constant 0 : index
      %c0_81 = arith.constant 0 : index
      %100 = vector.load %arg5[%c4_79, %c0_80, %c0_81] : memref<27x4x16xf32, #tpu.memory_space<vmem>>, vector<1x4x16xf32>
      %101 = vector.shape_cast %100 : vector<1x4x16xf32> to vector<4x16xf32>
      %cst_82 = arith.constant dense<0.000000e+00> : vector<4x256xf32>
      %102 = tpu.matmul %101, %54, %cst_82 {dimension_numbers = #tpu.dot_dimension_numbers<[1], [0], [0], [1], [0, 0, 1, 1], [], []>} : vector<4x16xf32>, vector<16x256xf32>, vector<4x256xf32> -> vector<4x256xf32>
      %103 = arith.addf %99, %102 : vector<4x256xf32>
      %cst_83 = arith.constant 0.000000e+00 : f32
      %104 = vector.broadcast %cst_83 : f32 to vector<16x1xf32>
      %105 = vector.extract_strided_slice %54 {offsets = [0, 1], sizes = [16, 255], strides = [1, 1]} : vector<16x256xf32> to vector<16x255xf32>
      %106 = tpu.concatenate %105, %104 in 1 : vector<16x255xf32>, vector<16x1xf32> -> vector<16x256xf32>
      %107 = vector.broadcast %24 : vector<1x256xf32> to vector<16x256xf32>
      %108 = arith.mulf %106, %107 : vector<16x256xf32>
      %c5 = arith.constant 5 : index
      %c0_84 = arith.constant 0 : index
      %c0_85 = arith.constant 0 : index
      %109 = vector.load %arg5[%c5, %c0_84, %c0_85] : memref<27x4x16xf32, #tpu.memory_space<vmem>>, vector<1x4x16xf32>
      %110 = vector.shape_cast %109 : vector<1x4x16xf32> to vector<4x16xf32>
      %cst_86 = arith.constant dense<0.000000e+00> : vector<4x256xf32>
      %111 = tpu.matmul %110, %108, %cst_86 {dimension_numbers = #tpu.dot_dimension_numbers<[1], [0], [0], [1], [0, 0, 1, 1], [], []>} : vector<4x16xf32>, vector<16x256xf32>, vector<4x256xf32> -> vector<4x256xf32>
      %112 = arith.addf %103, %111 : vector<4x256xf32>
      %cst_87 = arith.constant 0.000000e+00 : f32
      %113 = vector.broadcast %cst_87 : f32 to vector<16x15xf32>
      %114 = vector.extract_strided_slice %54 {offsets = [0, 15], sizes = [16, 241], strides = [1, 1]} : vector<16x256xf32> to vector<16x241xf32>
      %115 = tpu.concatenate %114, %113 in 1 : vector<16x241xf32>, vector<16x15xf32> -> vector<16x256xf32>
      %116 = vector.broadcast %20 : vector<1x256xf32> to vector<16x256xf32>
      %117 = arith.mulf %115, %116 : vector<16x256xf32>
      %c6 = arith.constant 6 : index
      %c0_88 = arith.constant 0 : index
      %c0_89 = arith.constant 0 : index
      %118 = vector.load %arg5[%c6, %c0_88, %c0_89] : memref<27x4x16xf32, #tpu.memory_space<vmem>>, vector<1x4x16xf32>
      %119 = vector.shape_cast %118 : vector<1x4x16xf32> to vector<4x16xf32>
      %cst_90 = arith.constant dense<0.000000e+00> : vector<4x256xf32>
      %120 = tpu.matmul %119, %117, %cst_90 {dimension_numbers = #tpu.dot_dimension_numbers<[1], [0], [0], [1], [0, 0, 1, 1], [], []>} : vector<4x16xf32>, vector<16x256xf32>, vector<4x256xf32> -> vector<4x256xf32>
      %121 = arith.addf %112, %120 : vector<4x256xf32>
      %cst_91 = arith.constant 0.000000e+00 : f32
      %122 = vector.broadcast %cst_91 : f32 to vector<16x16xf32>
      %123 = vector.extract_strided_slice %54 {offsets = [0, 16], sizes = [16, 240], strides = [1, 1]} : vector<16x256xf32> to vector<16x240xf32>
      %124 = tpu.concatenate %123, %122 in 1 : vector<16x240xf32>, vector<16x16xf32> -> vector<16x256xf32>
      %c7 = arith.constant 7 : index
      %c0_92 = arith.constant 0 : index
      %c0_93 = arith.constant 0 : index
      %125 = vector.load %arg5[%c7, %c0_92, %c0_93] : memref<27x4x16xf32, #tpu.memory_space<vmem>>, vector<1x4x16xf32>
      %126 = vector.shape_cast %125 : vector<1x4x16xf32> to vector<4x16xf32>
      %cst_94 = arith.constant dense<0.000000e+00> : vector<4x256xf32>
      %127 = tpu.matmul %126, %124, %cst_94 {dimension_numbers = #tpu.dot_dimension_numbers<[1], [0], [0], [1], [0, 0, 1, 1], [], []>} : vector<4x16xf32>, vector<16x256xf32>, vector<4x256xf32> -> vector<4x256xf32>
      %128 = arith.addf %121, %127 : vector<4x256xf32>
      %cst_95 = arith.constant 0.000000e+00 : f32
      %129 = vector.broadcast %cst_95 : f32 to vector<16x17xf32>
      %130 = vector.extract_strided_slice %54 {offsets = [0, 17], sizes = [16, 239], strides = [1, 1]} : vector<16x256xf32> to vector<16x239xf32>
      %131 = tpu.concatenate %130, %129 in 1 : vector<16x239xf32>, vector<16x17xf32> -> vector<16x256xf32>
      %132 = vector.broadcast %24 : vector<1x256xf32> to vector<16x256xf32>
      %133 = arith.mulf %131, %132 : vector<16x256xf32>
      %c8 = arith.constant 8 : index
      %c0_96 = arith.constant 0 : index
      %c0_97 = arith.constant 0 : index
      %134 = vector.load %arg5[%c8, %c0_96, %c0_97] : memref<27x4x16xf32, #tpu.memory_space<vmem>>, vector<1x4x16xf32>
      %135 = vector.shape_cast %134 : vector<1x4x16xf32> to vector<4x16xf32>
      %cst_98 = arith.constant dense<0.000000e+00> : vector<4x256xf32>
      %136 = tpu.matmul %135, %133, %cst_98 {dimension_numbers = #tpu.dot_dimension_numbers<[1], [0], [0], [1], [0, 0, 1, 1], [], []>} : vector<4x16xf32>, vector<16x256xf32>, vector<4x256xf32> -> vector<4x256xf32>
      %137 = arith.addf %128, %136 : vector<4x256xf32>
      %cst_99 = arith.constant 0.000000e+00 : f32
      %138 = vector.broadcast %cst_99 : f32 to vector<16x17xf32>
      %139 = vector.extract_strided_slice %59 {offsets = [0, 0], sizes = [16, 239], strides = [1, 1]} : vector<16x256xf32> to vector<16x239xf32>
      %140 = tpu.concatenate %138, %139 in 1 : vector<16x17xf32>, vector<16x239xf32> -> vector<16x256xf32>
      %141 = vector.broadcast %20 : vector<1x256xf32> to vector<16x256xf32>
      %142 = arith.mulf %140, %141 : vector<16x256xf32>
      %c9_100 = arith.constant 9 : index
      %c0_101 = arith.constant 0 : index
      %c0_102 = arith.constant 0 : index
      %143 = vector.load %arg5[%c9_100, %c0_101, %c0_102] : memref<27x4x16xf32, #tpu.memory_space<vmem>>, vector<1x4x16xf32>
      %144 = vector.shape_cast %143 : vector<1x4x16xf32> to vector<4x16xf32>
      %cst_103 = arith.constant dense<0.000000e+00> : vector<4x256xf32>
      %145 = tpu.matmul %144, %142, %cst_103 {dimension_numbers = #tpu.dot_dimension_numbers<[1], [0], [0], [1], [0, 0, 1, 1], [], []>} : vector<4x16xf32>, vector<16x256xf32>, vector<4x256xf32> -> vector<4x256xf32>
      %146 = arith.addf %137, %145 : vector<4x256xf32>
      %cst_104 = arith.constant 0.000000e+00 : f32
      %147 = vector.broadcast %cst_104 : f32 to vector<16x16xf32>
      %148 = vector.extract_strided_slice %59 {offsets = [0, 0], sizes = [16, 240], strides = [1, 1]} : vector<16x256xf32> to vector<16x240xf32>
      %149 = tpu.concatenate %147, %148 in 1 : vector<16x16xf32>, vector<16x240xf32> -> vector<16x256xf32>
      %c10 = arith.constant 10 : index
      %c0_105 = arith.constant 0 : index
      %c0_106 = arith.constant 0 : index
      %150 = vector.load %arg5[%c10, %c0_105, %c0_106] : memref<27x4x16xf32, #tpu.memory_space<vmem>>, vector<1x4x16xf32>
      %151 = vector.shape_cast %150 : vector<1x4x16xf32> to vector<4x16xf32>
      %cst_107 = arith.constant dense<0.000000e+00> : vector<4x256xf32>
      %152 = tpu.matmul %151, %149, %cst_107 {dimension_numbers = #tpu.dot_dimension_numbers<[1], [0], [0], [1], [0, 0, 1, 1], [], []>} : vector<4x16xf32>, vector<16x256xf32>, vector<4x256xf32> -> vector<4x256xf32>
      %153 = arith.addf %146, %152 : vector<4x256xf32>
      %cst_108 = arith.constant 0.000000e+00 : f32
      %154 = vector.broadcast %cst_108 : f32 to vector<16x15xf32>
      %155 = vector.extract_strided_slice %59 {offsets = [0, 0], sizes = [16, 241], strides = [1, 1]} : vector<16x256xf32> to vector<16x241xf32>
      %156 = tpu.concatenate %154, %155 in 1 : vector<16x15xf32>, vector<16x241xf32> -> vector<16x256xf32>
      %157 = vector.broadcast %24 : vector<1x256xf32> to vector<16x256xf32>
      %158 = arith.mulf %156, %157 : vector<16x256xf32>
      %c11 = arith.constant 11 : index
      %c0_109 = arith.constant 0 : index
      %c0_110 = arith.constant 0 : index
      %159 = vector.load %arg5[%c11, %c0_109, %c0_110] : memref<27x4x16xf32, #tpu.memory_space<vmem>>, vector<1x4x16xf32>
      %160 = vector.shape_cast %159 : vector<1x4x16xf32> to vector<4x16xf32>
      %cst_111 = arith.constant dense<0.000000e+00> : vector<4x256xf32>
      %161 = tpu.matmul %160, %158, %cst_111 {dimension_numbers = #tpu.dot_dimension_numbers<[1], [0], [0], [1], [0, 0, 1, 1], [], []>} : vector<4x16xf32>, vector<16x256xf32>, vector<4x256xf32> -> vector<4x256xf32>
      %162 = arith.addf %153, %161 : vector<4x256xf32>
      %cst_112 = arith.constant 0.000000e+00 : f32
      %163 = vector.broadcast %cst_112 : f32 to vector<16x1xf32>
      %164 = vector.extract_strided_slice %59 {offsets = [0, 0], sizes = [16, 255], strides = [1, 1]} : vector<16x256xf32> to vector<16x255xf32>
      %165 = tpu.concatenate %163, %164 in 1 : vector<16x1xf32>, vector<16x255xf32> -> vector<16x256xf32>
      %166 = vector.broadcast %20 : vector<1x256xf32> to vector<16x256xf32>
      %167 = arith.mulf %165, %166 : vector<16x256xf32>
      %c12 = arith.constant 12 : index
      %c0_113 = arith.constant 0 : index
      %c0_114 = arith.constant 0 : index
      %168 = vector.load %arg5[%c12, %c0_113, %c0_114] : memref<27x4x16xf32, #tpu.memory_space<vmem>>, vector<1x4x16xf32>
      %169 = vector.shape_cast %168 : vector<1x4x16xf32> to vector<4x16xf32>
      %cst_115 = arith.constant dense<0.000000e+00> : vector<4x256xf32>
      %170 = tpu.matmul %169, %167, %cst_115 {dimension_numbers = #tpu.dot_dimension_numbers<[1], [0], [0], [1], [0, 0, 1, 1], [], []>} : vector<4x16xf32>, vector<16x256xf32>, vector<4x256xf32> -> vector<4x256xf32>
      %171 = arith.addf %162, %170 : vector<4x256xf32>
      %c13 = arith.constant 13 : index
      %c0_116 = arith.constant 0 : index
      %c0_117 = arith.constant 0 : index
      %172 = vector.load %arg5[%c13, %c0_116, %c0_117] : memref<27x4x16xf32, #tpu.memory_space<vmem>>, vector<1x4x16xf32>
      %173 = vector.shape_cast %172 : vector<1x4x16xf32> to vector<4x16xf32>
      %cst_118 = arith.constant dense<0.000000e+00> : vector<4x256xf32>
      %174 = tpu.matmul %173, %59, %cst_118 {dimension_numbers = #tpu.dot_dimension_numbers<[1], [0], [0], [1], [0, 0, 1, 1], [], []>} : vector<4x16xf32>, vector<16x256xf32>, vector<4x256xf32> -> vector<4x256xf32>
      %175 = arith.addf %171, %174 : vector<4x256xf32>
      %cst_119 = arith.constant 0.000000e+00 : f32
      %176 = vector.broadcast %cst_119 : f32 to vector<16x1xf32>
      %177 = vector.extract_strided_slice %59 {offsets = [0, 1], sizes = [16, 255], strides = [1, 1]} : vector<16x256xf32> to vector<16x255xf32>
      %178 = tpu.concatenate %177, %176 in 1 : vector<16x255xf32>, vector<16x1xf32> -> vector<16x256xf32>
      %179 = vector.broadcast %24 : vector<1x256xf32> to vector<16x256xf32>
      %180 = arith.mulf %178, %179 : vector<16x256xf32>
      %c14 = arith.constant 14 : index
      %c0_120 = arith.constant 0 : index
      %c0_121 = arith.constant 0 : index
      %181 = vector.load %arg5[%c14, %c0_120, %c0_121] : memref<27x4x16xf32, #tpu.memory_space<vmem>>, vector<1x4x16xf32>
      %182 = vector.shape_cast %181 : vector<1x4x16xf32> to vector<4x16xf32>
      %cst_122 = arith.constant dense<0.000000e+00> : vector<4x256xf32>
      %183 = tpu.matmul %182, %180, %cst_122 {dimension_numbers = #tpu.dot_dimension_numbers<[1], [0], [0], [1], [0, 0, 1, 1], [], []>} : vector<4x16xf32>, vector<16x256xf32>, vector<4x256xf32> -> vector<4x256xf32>
      %184 = arith.addf %175, %183 : vector<4x256xf32>
      %cst_123 = arith.constant 0.000000e+00 : f32
      %185 = vector.broadcast %cst_123 : f32 to vector<16x15xf32>
      %186 = vector.extract_strided_slice %59 {offsets = [0, 15], sizes = [16, 241], strides = [1, 1]} : vector<16x256xf32> to vector<16x241xf32>
      %187 = tpu.concatenate %186, %185 in 1 : vector<16x241xf32>, vector<16x15xf32> -> vector<16x256xf32>
      %188 = vector.broadcast %20 : vector<1x256xf32> to vector<16x256xf32>
      %189 = arith.mulf %187, %188 : vector<16x256xf32>
      %c15 = arith.constant 15 : index
      %c0_124 = arith.constant 0 : index
      %c0_125 = arith.constant 0 : index
      %190 = vector.load %arg5[%c15, %c0_124, %c0_125] : memref<27x4x16xf32, #tpu.memory_space<vmem>>, vector<1x4x16xf32>
      %191 = vector.shape_cast %190 : vector<1x4x16xf32> to vector<4x16xf32>
      %cst_126 = arith.constant dense<0.000000e+00> : vector<4x256xf32>
      %192 = tpu.matmul %191, %189, %cst_126 {dimension_numbers = #tpu.dot_dimension_numbers<[1], [0], [0], [1], [0, 0, 1, 1], [], []>} : vector<4x16xf32>, vector<16x256xf32>, vector<4x256xf32> -> vector<4x256xf32>
      %193 = arith.addf %184, %192 : vector<4x256xf32>
      %cst_127 = arith.constant 0.000000e+00 : f32
      %194 = vector.broadcast %cst_127 : f32 to vector<16x16xf32>
      %195 = vector.extract_strided_slice %59 {offsets = [0, 16], sizes = [16, 240], strides = [1, 1]} : vector<16x256xf32> to vector<16x240xf32>
      %196 = tpu.concatenate %195, %194 in 1 : vector<16x240xf32>, vector<16x16xf32> -> vector<16x256xf32>
      %c16 = arith.constant 16 : index
      %c0_128 = arith.constant 0 : index
      %c0_129 = arith.constant 0 : index
      %197 = vector.load %arg5[%c16, %c0_128, %c0_129] : memref<27x4x16xf32, #tpu.memory_space<vmem>>, vector<1x4x16xf32>
      %198 = vector.shape_cast %197 : vector<1x4x16xf32> to vector<4x16xf32>
      %cst_130 = arith.constant dense<0.000000e+00> : vector<4x256xf32>
      %199 = tpu.matmul %198, %196, %cst_130 {dimension_numbers = #tpu.dot_dimension_numbers<[1], [0], [0], [1], [0, 0, 1, 1], [], []>} : vector<4x16xf32>, vector<16x256xf32>, vector<4x256xf32> -> vector<4x256xf32>
      %200 = arith.addf %193, %199 : vector<4x256xf32>
      %cst_131 = arith.constant 0.000000e+00 : f32
      %201 = vector.broadcast %cst_131 : f32 to vector<16x17xf32>
      %202 = vector.extract_strided_slice %59 {offsets = [0, 17], sizes = [16, 239], strides = [1, 1]} : vector<16x256xf32> to vector<16x239xf32>
      %203 = tpu.concatenate %202, %201 in 1 : vector<16x239xf32>, vector<16x17xf32> -> vector<16x256xf32>
      %204 = vector.broadcast %24 : vector<1x256xf32> to vector<16x256xf32>
      %205 = arith.mulf %203, %204 : vector<16x256xf32>
      %c17 = arith.constant 17 : index
      %c0_132 = arith.constant 0 : index
      %c0_133 = arith.constant 0 : index
      %206 = vector.load %arg5[%c17, %c0_132, %c0_133] : memref<27x4x16xf32, #tpu.memory_space<vmem>>, vector<1x4x16xf32>
      %207 = vector.shape_cast %206 : vector<1x4x16xf32> to vector<4x16xf32>
      %cst_134 = arith.constant dense<0.000000e+00> : vector<4x256xf32>
      %208 = tpu.matmul %207, %205, %cst_134 {dimension_numbers = #tpu.dot_dimension_numbers<[1], [0], [0], [1], [0, 0, 1, 1], [], []>} : vector<4x16xf32>, vector<16x256xf32>, vector<4x256xf32> -> vector<4x256xf32>
      %209 = arith.addf %200, %208 : vector<4x256xf32>
      %cst_135 = arith.constant 0.000000e+00 : f32
      %210 = vector.broadcast %cst_135 : f32 to vector<16x17xf32>
      %211 = vector.extract_strided_slice %64 {offsets = [0, 0], sizes = [16, 239], strides = [1, 1]} : vector<16x256xf32> to vector<16x239xf32>
      %212 = tpu.concatenate %210, %211 in 1 : vector<16x17xf32>, vector<16x239xf32> -> vector<16x256xf32>
      %213 = vector.broadcast %20 : vector<1x256xf32> to vector<16x256xf32>
      %214 = arith.mulf %212, %213 : vector<16x256xf32>
      %c18 = arith.constant 18 : index
      %c0_136 = arith.constant 0 : index
      %c0_137 = arith.constant 0 : index
      %215 = vector.load %arg5[%c18, %c0_136, %c0_137] : memref<27x4x16xf32, #tpu.memory_space<vmem>>, vector<1x4x16xf32>
      %216 = vector.shape_cast %215 : vector<1x4x16xf32> to vector<4x16xf32>
      %cst_138 = arith.constant dense<0.000000e+00> : vector<4x256xf32>
      %217 = tpu.matmul %216, %214, %cst_138 {dimension_numbers = #tpu.dot_dimension_numbers<[1], [0], [0], [1], [0, 0, 1, 1], [], []>} : vector<4x16xf32>, vector<16x256xf32>, vector<4x256xf32> -> vector<4x256xf32>
      %218 = arith.addf %209, %217 : vector<4x256xf32>
      %cst_139 = arith.constant 0.000000e+00 : f32
      %219 = vector.broadcast %cst_139 : f32 to vector<16x16xf32>
      %220 = vector.extract_strided_slice %64 {offsets = [0, 0], sizes = [16, 240], strides = [1, 1]} : vector<16x256xf32> to vector<16x240xf32>
      %221 = tpu.concatenate %219, %220 in 1 : vector<16x16xf32>, vector<16x240xf32> -> vector<16x256xf32>
      %c19 = arith.constant 19 : index
      %c0_140 = arith.constant 0 : index
      %c0_141 = arith.constant 0 : index
      %222 = vector.load %arg5[%c19, %c0_140, %c0_141] : memref<27x4x16xf32, #tpu.memory_space<vmem>>, vector<1x4x16xf32>
      %223 = vector.shape_cast %222 : vector<1x4x16xf32> to vector<4x16xf32>
      %cst_142 = arith.constant dense<0.000000e+00> : vector<4x256xf32>
      %224 = tpu.matmul %223, %221, %cst_142 {dimension_numbers = #tpu.dot_dimension_numbers<[1], [0], [0], [1], [0, 0, 1, 1], [], []>} : vector<4x16xf32>, vector<16x256xf32>, vector<4x256xf32> -> vector<4x256xf32>
      %225 = arith.addf %218, %224 : vector<4x256xf32>
      %cst_143 = arith.constant 0.000000e+00 : f32
      %226 = vector.broadcast %cst_143 : f32 to vector<16x15xf32>
      %227 = vector.extract_strided_slice %64 {offsets = [0, 0], sizes = [16, 241], strides = [1, 1]} : vector<16x256xf32> to vector<16x241xf32>
      %228 = tpu.concatenate %226, %227 in 1 : vector<16x15xf32>, vector<16x241xf32> -> vector<16x256xf32>
      %229 = vector.broadcast %24 : vector<1x256xf32> to vector<16x256xf32>
      %230 = arith.mulf %228, %229 : vector<16x256xf32>
      %c20 = arith.constant 20 : index
      %c0_144 = arith.constant 0 : index
      %c0_145 = arith.constant 0 : index
      %231 = vector.load %arg5[%c20, %c0_144, %c0_145] : memref<27x4x16xf32, #tpu.memory_space<vmem>>, vector<1x4x16xf32>
      %232 = vector.shape_cast %231 : vector<1x4x16xf32> to vector<4x16xf32>
      %cst_146 = arith.constant dense<0.000000e+00> : vector<4x256xf32>
      %233 = tpu.matmul %232, %230, %cst_146 {dimension_numbers = #tpu.dot_dimension_numbers<[1], [0], [0], [1], [0, 0, 1, 1], [], []>} : vector<4x16xf32>, vector<16x256xf32>, vector<4x256xf32> -> vector<4x256xf32>
      %234 = arith.addf %225, %233 : vector<4x256xf32>
      %cst_147 = arith.constant 0.000000e+00 : f32
      %235 = vector.broadcast %cst_147 : f32 to vector<16x1xf32>
      %236 = vector.extract_strided_slice %64 {offsets = [0, 0], sizes = [16, 255], strides = [1, 1]} : vector<16x256xf32> to vector<16x255xf32>
      %237 = tpu.concatenate %235, %236 in 1 : vector<16x1xf32>, vector<16x255xf32> -> vector<16x256xf32>
      %238 = vector.broadcast %20 : vector<1x256xf32> to vector<16x256xf32>
      %239 = arith.mulf %237, %238 : vector<16x256xf32>
      %c21 = arith.constant 21 : index
      %c0_148 = arith.constant 0 : index
      %c0_149 = arith.constant 0 : index
      %240 = vector.load %arg5[%c21, %c0_148, %c0_149] : memref<27x4x16xf32, #tpu.memory_space<vmem>>, vector<1x4x16xf32>
      %241 = vector.shape_cast %240 : vector<1x4x16xf32> to vector<4x16xf32>
      %cst_150 = arith.constant dense<0.000000e+00> : vector<4x256xf32>
      %242 = tpu.matmul %241, %239, %cst_150 {dimension_numbers = #tpu.dot_dimension_numbers<[1], [0], [0], [1], [0, 0, 1, 1], [], []>} : vector<4x16xf32>, vector<16x256xf32>, vector<4x256xf32> -> vector<4x256xf32>
      %243 = arith.addf %234, %242 : vector<4x256xf32>
      %c22 = arith.constant 22 : index
      %c0_151 = arith.constant 0 : index
      %c0_152 = arith.constant 0 : index
      %244 = vector.load %arg5[%c22, %c0_151, %c0_152] : memref<27x4x16xf32, #tpu.memory_space<vmem>>, vector<1x4x16xf32>
      %245 = vector.shape_cast %244 : vector<1x4x16xf32> to vector<4x16xf32>
      %cst_153 = arith.constant dense<0.000000e+00> : vector<4x256xf32>
      %246 = tpu.matmul %245, %64, %cst_153 {dimension_numbers = #tpu.dot_dimension_numbers<[1], [0], [0], [1], [0, 0, 1, 1], [], []>} : vector<4x16xf32>, vector<16x256xf32>, vector<4x256xf32> -> vector<4x256xf32>
      %247 = arith.addf %243, %246 : vector<4x256xf32>
      %cst_154 = arith.constant 0.000000e+00 : f32
      %248 = vector.broadcast %cst_154 : f32 to vector<16x1xf32>
      %249 = vector.extract_strided_slice %64 {offsets = [0, 1], sizes = [16, 255], strides = [1, 1]} : vector<16x256xf32> to vector<16x255xf32>
      %250 = tpu.concatenate %249, %248 in 1 : vector<16x255xf32>, vector<16x1xf32> -> vector<16x256xf32>
      %251 = vector.broadcast %24 : vector<1x256xf32> to vector<16x256xf32>
      %252 = arith.mulf %250, %251 : vector<16x256xf32>
      %c23 = arith.constant 23 : index
      %c0_155 = arith.constant 0 : index
      %c0_156 = arith.constant 0 : index
      %253 = vector.load %arg5[%c23, %c0_155, %c0_156] : memref<27x4x16xf32, #tpu.memory_space<vmem>>, vector<1x4x16xf32>
      %254 = vector.shape_cast %253 : vector<1x4x16xf32> to vector<4x16xf32>
      %cst_157 = arith.constant dense<0.000000e+00> : vector<4x256xf32>
      %255 = tpu.matmul %254, %252, %cst_157 {dimension_numbers = #tpu.dot_dimension_numbers<[1], [0], [0], [1], [0, 0, 1, 1], [], []>} : vector<4x16xf32>, vector<16x256xf32>, vector<4x256xf32> -> vector<4x256xf32>
      %256 = arith.addf %247, %255 : vector<4x256xf32>
      %cst_158 = arith.constant 0.000000e+00 : f32
      %257 = vector.broadcast %cst_158 : f32 to vector<16x15xf32>
      %258 = vector.extract_strided_slice %64 {offsets = [0, 15], sizes = [16, 241], strides = [1, 1]} : vector<16x256xf32> to vector<16x241xf32>
      %259 = tpu.concatenate %258, %257 in 1 : vector<16x241xf32>, vector<16x15xf32> -> vector<16x256xf32>
      %260 = vector.broadcast %20 : vector<1x256xf32> to vector<16x256xf32>
      %261 = arith.mulf %259, %260 : vector<16x256xf32>
      %c24 = arith.constant 24 : index
      %c0_159 = arith.constant 0 : index
      %c0_160 = arith.constant 0 : index
      %262 = vector.load %arg5[%c24, %c0_159, %c0_160] : memref<27x4x16xf32, #tpu.memory_space<vmem>>, vector<1x4x16xf32>
      %263 = vector.shape_cast %262 : vector<1x4x16xf32> to vector<4x16xf32>
      %cst_161 = arith.constant dense<0.000000e+00> : vector<4x256xf32>
      %264 = tpu.matmul %263, %261, %cst_161 {dimension_numbers = #tpu.dot_dimension_numbers<[1], [0], [0], [1], [0, 0, 1, 1], [], []>} : vector<4x16xf32>, vector<16x256xf32>, vector<4x256xf32> -> vector<4x256xf32>
      %265 = arith.addf %256, %264 : vector<4x256xf32>
      %cst_162 = arith.constant 0.000000e+00 : f32
      %266 = vector.broadcast %cst_162 : f32 to vector<16x16xf32>
      %267 = vector.extract_strided_slice %64 {offsets = [0, 16], sizes = [16, 240], strides = [1, 1]} : vector<16x256xf32> to vector<16x240xf32>
      %268 = tpu.concatenate %267, %266 in 1 : vector<16x240xf32>, vector<16x16xf32> -> vector<16x256xf32>
      %c25 = arith.constant 25 : index
      %c0_163 = arith.constant 0 : index
      %c0_164 = arith.constant 0 : index
      %269 = vector.load %arg5[%c25, %c0_163, %c0_164] : memref<27x4x16xf32, #tpu.memory_space<vmem>>, vector<1x4x16xf32>
      %270 = vector.shape_cast %269 : vector<1x4x16xf32> to vector<4x16xf32>
      %cst_165 = arith.constant dense<0.000000e+00> : vector<4x256xf32>
      %271 = tpu.matmul %270, %268, %cst_165 {dimension_numbers = #tpu.dot_dimension_numbers<[1], [0], [0], [1], [0, 0, 1, 1], [], []>} : vector<4x16xf32>, vector<16x256xf32>, vector<4x256xf32> -> vector<4x256xf32>
      %272 = arith.addf %265, %271 : vector<4x256xf32>
      %cst_166 = arith.constant 0.000000e+00 : f32
      %273 = vector.broadcast %cst_166 : f32 to vector<16x17xf32>
      %274 = vector.extract_strided_slice %64 {offsets = [0, 17], sizes = [16, 239], strides = [1, 1]} : vector<16x256xf32> to vector<16x239xf32>
      %275 = tpu.concatenate %274, %273 in 1 : vector<16x239xf32>, vector<16x17xf32> -> vector<16x256xf32>
      %276 = vector.broadcast %24 : vector<1x256xf32> to vector<16x256xf32>
      %277 = arith.mulf %275, %276 : vector<16x256xf32>
      %c26 = arith.constant 26 : index
      %c0_167 = arith.constant 0 : index
      %c0_168 = arith.constant 0 : index
      %278 = vector.load %arg5[%c26, %c0_167, %c0_168] : memref<27x4x16xf32, #tpu.memory_space<vmem>>, vector<1x4x16xf32>
      %279 = vector.shape_cast %278 : vector<1x4x16xf32> to vector<4x16xf32>
      %cst_169 = arith.constant dense<0.000000e+00> : vector<4x256xf32>
      %280 = tpu.matmul %279, %277, %cst_169 {dimension_numbers = #tpu.dot_dimension_numbers<[1], [0], [0], [1], [0, 0, 1, 1], [], []>} : vector<4x16xf32>, vector<16x256xf32>, vector<4x256xf32> -> vector<4x256xf32>
      %281 = arith.addf %272, %280 : vector<4x256xf32>
      %282 = vector.broadcast %44 : f32 to vector<4x256xf32>
      %283 = arith.mulf %281, %282 : vector<4x256xf32>
      %284 = vector.broadcast %45 : f32 to vector<4x256xf32>
      %285 = arith.addf %283, %284 : vector<4x256xf32>
      %cst_170 = arith.constant 0.000000e+00 : f32
      %286 = vector.broadcast %cst_170 : f32 to vector<4x256xf32>
      %287 = arith.maximumf %285, %286 : vector<4x256xf32>
      %c1_i32_171 = arith.constant 1 : i32
      %288 = arith.addi %arg10, %c1_i32_171 : i32
      %289 = arith.index_cast %288 : i32 to index
      %c16_172 = arith.constant 16 : index
      %c0_173 = arith.constant 0 : index
      %290 = vector.load %arg9[%289, %c16_172, %c0_173] : memref<10x20x256xf32, #tpu.memory_space<vmem>>, vector<1x4x256xf32>
      %291 = vector.shape_cast %290 : vector<1x4x256xf32> to vector<4x256xf32>
      %292 = vector.shape_cast %287 : vector<4x256xf32> to vector<1x4x256xf32>
      tpu.vector_store %arg9[%289, %c16_172, %c0_173], %292 {strides = array<i32>} : memref<10x20x256xf32, #tpu.memory_space<vmem>>, vector<1x4x256xf32>,
    }
    %c8_i32_42 = arith.constant 8 : i32
    %c4 = arith.constant 4 : index
    %c0_43 = arith.constant 0 : index
    %47 = memref.load %arg7[%c4, %c0_43] : memref<5x2xf32, #tpu.memory_space<smem>>
    %c4_44 = arith.constant 4 : index
    %c1_45 = arith.constant 1 : index
    %48 = memref.load %arg7[%c4_44, %c1_45] : memref<5x2xf32, #tpu.memory_space<smem>>
    %c0_i32_46 = arith.constant 0 : i32
    %c8_i32_47 = arith.constant 8 : i32
    %49 = arith.addi %c0_i32_46, %c8_i32_47 : i32
    %c1_i32_48 = arith.constant 1 : i32
    scf.for %arg10 = %c0_i32_46 to %49 step %c1_i32_48  : i32 {
      %c0_i32_50 = arith.constant 0 : i32
      %50 = arith.addi %arg10, %c0_i32_50 : i32
      %51 = arith.index_cast %50 : i32 to index
      %c0_51 = arith.constant 0 : index
      %c0_52 = arith.constant 0 : index
      %52 = vector.load %arg9[%51, %c0_51, %c0_52] : memref<10x20x256xf32, #tpu.memory_space<vmem>>, vector<1x20x256xf32>
      %53 = vector.shape_cast %52 : vector<1x20x256xf32> to vector<20x256xf32>
      %c1_i32_53 = arith.constant 1 : i32
      %54 = arith.addi %arg10, %c1_i32_53 : i32
      %55 = arith.index_cast %54 : i32 to index
      %c0_54 = arith.constant 0 : index
      %c0_55 = arith.constant 0 : index
      %56 = vector.load %arg9[%55, %c0_54, %c0_55] : memref<10x20x256xf32, #tpu.memory_space<vmem>>, vector<1x20x256xf32>
      %57 = vector.shape_cast %56 : vector<1x20x256xf32> to vector<20x256xf32>
      %c2_i32 = arith.constant 2 : i32
      %58 = arith.addi %arg10, %c2_i32 : i32
      %59 = arith.index_cast %58 : i32 to index
      %c0_56 = arith.constant 0 : index
      %c0_57 = arith.constant 0 : index
      %60 = vector.load %arg9[%59, %c0_56, %c0_57] : memref<10x20x256xf32, #tpu.memory_space<vmem>>, vector<1x20x256xf32>
      %61 = vector.shape_cast %60 : vector<1x20x256xf32> to vector<20x256xf32>
      %cst_58 = arith.constant 0.000000e+00 : f32
      %62 = vector.broadcast %cst_58 : f32 to vector<4x256xf32>
      %cst_59 = arith.constant 0.000000e+00 : f32
      %63 = vector.broadcast %cst_59 : f32 to vector<20x17xf32>
      %64 = vector.extract_strided_slice %53 {offsets = [0, 0], sizes = [20, 239], strides = [1, 1]} : vector<20x256xf32> to vector<20x239xf32>
      %65 = tpu.concatenate %63, %64 in 1 : vector<20x17xf32>, vector<20x239xf32> -> vector<20x256xf32>
      %66 = vector.broadcast %20 : vector<1x256xf32> to vector<20x256xf32>
      %67 = arith.mulf %65, %66 : vector<20x256xf32>
      %c0_60 = arith.constant 0 : index
      %c0_61 = arith.constant 0 : index
      %c0_62 = arith.constant 0 : index
      %68 = vector.load %arg6[%c0_60, %c0_61, %c0_62] : memref<27x4x20xf32, #tpu.memory_space<vmem>>, vector<1x4x20xf32>
      %69 = vector.shape_cast %68 : vector<1x4x20xf32> to vector<4x20xf32>
      %cst_63 = arith.constant dense<0.000000e+00> : vector<4x256xf32>
      %70 = tpu.matmul %69, %67, %cst_63 {dimension_numbers = #tpu.dot_dimension_numbers<[1], [0], [0], [1], [0, 0, 1, 1], [], []>} : vector<4x20xf32>, vector<20x256xf32>, vector<4x256xf32> -> vector<4x256xf32>
      %71 = arith.addf %62, %70 : vector<4x256xf32>
      %cst_64 = arith.constant 0.000000e+00 : f32
      %72 = vector.broadcast %cst_64 : f32 to vector<20x16xf32>
      %73 = vector.extract_strided_slice %53 {offsets = [0, 0], sizes = [20, 240], strides = [1, 1]} : vector<20x256xf32> to vector<20x240xf32>
      %74 = tpu.concatenate %72, %73 in 1 : vector<20x16xf32>, vector<20x240xf32> -> vector<20x256xf32>
      %c1_65 = arith.constant 1 : index
      %c0_66 = arith.constant 0 : index
      %c0_67 = arith.constant 0 : index
      %75 = vector.load %arg6[%c1_65, %c0_66, %c0_67] : memref<27x4x20xf32, #tpu.memory_space<vmem>>, vector<1x4x20xf32>
      %76 = vector.shape_cast %75 : vector<1x4x20xf32> to vector<4x20xf32>
      %cst_68 = arith.constant dense<0.000000e+00> : vector<4x256xf32>
      %77 = tpu.matmul %76, %74, %cst_68 {dimension_numbers = #tpu.dot_dimension_numbers<[1], [0], [0], [1], [0, 0, 1, 1], [], []>} : vector<4x20xf32>, vector<20x256xf32>, vector<4x256xf32> -> vector<4x256xf32>
      %78 = arith.addf %71, %77 : vector<4x256xf32>
      %cst_69 = arith.constant 0.000000e+00 : f32
      %79 = vector.broadcast %cst_69 : f32 to vector<20x15xf32>
      %80 = vector.extract_strided_slice %53 {offsets = [0, 0], sizes = [20, 241], strides = [1, 1]} : vector<20x256xf32> to vector<20x241xf32>
      %81 = tpu.concatenate %79, %80 in 1 : vector<20x15xf32>, vector<20x241xf32> -> vector<20x256xf32>
      %82 = vector.broadcast %24 : vector<1x256xf32> to vector<20x256xf32>
      %83 = arith.mulf %81, %82 : vector<20x256xf32>
      %c2_70 = arith.constant 2 : index
      %c0_71 = arith.constant 0 : index
      %c0_72 = arith.constant 0 : index
      %84 = vector.load %arg6[%c2_70, %c0_71, %c0_72] : memref<27x4x20xf32, #tpu.memory_space<vmem>>, vector<1x4x20xf32>
      %85 = vector.shape_cast %84 : vector<1x4x20xf32> to vector<4x20xf32>
      %cst_73 = arith.constant dense<0.000000e+00> : vector<4x256xf32>
      %86 = tpu.matmul %85, %83, %cst_73 {dimension_numbers = #tpu.dot_dimension_numbers<[1], [0], [0], [1], [0, 0, 1, 1], [], []>} : vector<4x20xf32>, vector<20x256xf32>, vector<4x256xf32> -> vector<4x256xf32>
      %87 = arith.addf %78, %86 : vector<4x256xf32>
      %cst_74 = arith.constant 0.000000e+00 : f32
      %88 = vector.broadcast %cst_74 : f32 to vector<20x1xf32>
      %89 = vector.extract_strided_slice %53 {offsets = [0, 0], sizes = [20, 255], strides = [1, 1]} : vector<20x256xf32> to vector<20x255xf32>
      %90 = tpu.concatenate %88, %89 in 1 : vector<20x1xf32>, vector<20x255xf32> -> vector<20x256xf32>
      %91 = vector.broadcast %20 : vector<1x256xf32> to vector<20x256xf32>
      %92 = arith.mulf %90, %91 : vector<20x256xf32>
      %c3_75 = arith.constant 3 : index
      %c0_76 = arith.constant 0 : index
      %c0_77 = arith.constant 0 : index
      %93 = vector.load %arg6[%c3_75, %c0_76, %c0_77] : memref<27x4x20xf32, #tpu.memory_space<vmem>>, vector<1x4x20xf32>
      %94 = vector.shape_cast %93 : vector<1x4x20xf32> to vector<4x20xf32>
      %cst_78 = arith.constant dense<0.000000e+00> : vector<4x256xf32>
      %95 = tpu.matmul %94, %92, %cst_78 {dimension_numbers = #tpu.dot_dimension_numbers<[1], [0], [0], [1], [0, 0, 1, 1], [], []>} : vector<4x20xf32>, vector<20x256xf32>, vector<4x256xf32> -> vector<4x256xf32>
      %96 = arith.addf %87, %95 : vector<4x256xf32>
      %c4_79 = arith.constant 4 : index
      %c0_80 = arith.constant 0 : index
      %c0_81 = arith.constant 0 : index
      %97 = vector.load %arg6[%c4_79, %c0_80, %c0_81] : memref<27x4x20xf32, #tpu.memory_space<vmem>>, vector<1x4x20xf32>
      %98 = vector.shape_cast %97 : vector<1x4x20xf32> to vector<4x20xf32>
      %cst_82 = arith.constant dense<0.000000e+00> : vector<4x256xf32>
      %99 = tpu.matmul %98, %53, %cst_82 {dimension_numbers = #tpu.dot_dimension_numbers<[1], [0], [0], [1], [0, 0, 1, 1], [], []>} : vector<4x20xf32>, vector<20x256xf32>, vector<4x256xf32> -> vector<4x256xf32>
      %100 = arith.addf %96, %99 : vector<4x256xf32>
      %cst_83 = arith.constant 0.000000e+00 : f32
      %101 = vector.broadcast %cst_83 : f32 to vector<20x1xf32>
      %102 = vector.extract_strided_slice %53 {offsets = [0, 1], sizes = [20, 255], strides = [1, 1]} : vector<20x256xf32> to vector<20x255xf32>
      %103 = tpu.concatenate %102, %101 in 1 : vector<20x255xf32>, vector<20x1xf32> -> vector<20x256xf32>
      %104 = vector.broadcast %24 : vector<1x256xf32> to vector<20x256xf32>
      %105 = arith.mulf %103, %104 : vector<20x256xf32>
      %c5 = arith.constant 5 : index
      %c0_84 = arith.constant 0 : index
      %c0_85 = arith.constant 0 : index
      %106 = vector.load %arg6[%c5, %c0_84, %c0_85] : memref<27x4x20xf32, #tpu.memory_space<vmem>>, vector<1x4x20xf32>
      %107 = vector.shape_cast %106 : vector<1x4x20xf32> to vector<4x20xf32>
      %cst_86 = arith.constant dense<0.000000e+00> : vector<4x256xf32>
      %108 = tpu.matmul %107, %105, %cst_86 {dimension_numbers = #tpu.dot_dimension_numbers<[1], [0], [0], [1], [0, 0, 1, 1], [], []>} : vector<4x20xf32>, vector<20x256xf32>, vector<4x256xf32> -> vector<4x256xf32>
      %109 = arith.addf %100, %108 : vector<4x256xf32>
      %cst_87 = arith.constant 0.000000e+00 : f32
      %110 = vector.broadcast %cst_87 : f32 to vector<20x15xf32>
      %111 = vector.extract_strided_slice %53 {offsets = [0, 15], sizes = [20, 241], strides = [1, 1]} : vector<20x256xf32> to vector<20x241xf32>
      %112 = tpu.concatenate %111, %110 in 1 : vector<20x241xf32>, vector<20x15xf32> -> vector<20x256xf32>
      %113 = vector.broadcast %20 : vector<1x256xf32> to vector<20x256xf32>
      %114 = arith.mulf %112, %113 : vector<20x256xf32>
      %c6 = arith.constant 6 : index
      %c0_88 = arith.constant 0 : index
      %c0_89 = arith.constant 0 : index
      %115 = vector.load %arg6[%c6, %c0_88, %c0_89] : memref<27x4x20xf32, #tpu.memory_space<vmem>>, vector<1x4x20xf32>
      %116 = vector.shape_cast %115 : vector<1x4x20xf32> to vector<4x20xf32>
      %cst_90 = arith.constant dense<0.000000e+00> : vector<4x256xf32>
      %117 = tpu.matmul %116, %114, %cst_90 {dimension_numbers = #tpu.dot_dimension_numbers<[1], [0], [0], [1], [0, 0, 1, 1], [], []>} : vector<4x20xf32>, vector<20x256xf32>, vector<4x256xf32> -> vector<4x256xf32>
      %118 = arith.addf %109, %117 : vector<4x256xf32>
      %cst_91 = arith.constant 0.000000e+00 : f32
      %119 = vector.broadcast %cst_91 : f32 to vector<20x16xf32>
      %120 = vector.extract_strided_slice %53 {offsets = [0, 16], sizes = [20, 240], strides = [1, 1]} : vector<20x256xf32> to vector<20x240xf32>
      %121 = tpu.concatenate %120, %119 in 1 : vector<20x240xf32>, vector<20x16xf32> -> vector<20x256xf32>
      %c7 = arith.constant 7 : index
      %c0_92 = arith.constant 0 : index
      %c0_93 = arith.constant 0 : index
      %122 = vector.load %arg6[%c7, %c0_92, %c0_93] : memref<27x4x20xf32, #tpu.memory_space<vmem>>, vector<1x4x20xf32>
      %123 = vector.shape_cast %122 : vector<1x4x20xf32> to vector<4x20xf32>
      %cst_94 = arith.constant dense<0.000000e+00> : vector<4x256xf32>
      %124 = tpu.matmul %123, %121, %cst_94 {dimension_numbers = #tpu.dot_dimension_numbers<[1], [0], [0], [1], [0, 0, 1, 1], [], []>} : vector<4x20xf32>, vector<20x256xf32>, vector<4x256xf32> -> vector<4x256xf32>
      %125 = arith.addf %118, %124 : vector<4x256xf32>
      %cst_95 = arith.constant 0.000000e+00 : f32
      %126 = vector.broadcast %cst_95 : f32 to vector<20x17xf32>
      %127 = vector.extract_strided_slice %53 {offsets = [0, 17], sizes = [20, 239], strides = [1, 1]} : vector<20x256xf32> to vector<20x239xf32>
      %128 = tpu.concatenate %127, %126 in 1 : vector<20x239xf32>, vector<20x17xf32> -> vector<20x256xf32>
      %129 = vector.broadcast %24 : vector<1x256xf32> to vector<20x256xf32>
      %130 = arith.mulf %128, %129 : vector<20x256xf32>
      %c8 = arith.constant 8 : index
      %c0_96 = arith.constant 0 : index
      %c0_97 = arith.constant 0 : index
      %131 = vector.load %arg6[%c8, %c0_96, %c0_97] : memref<27x4x20xf32, #tpu.memory_space<vmem>>, vector<1x4x20xf32>
      %132 = vector.shape_cast %131 : vector<1x4x20xf32> to vector<4x20xf32>
      %cst_98 = arith.constant dense<0.000000e+00> : vector<4x256xf32>
      %133 = tpu.matmul %132, %130, %cst_98 {dimension_numbers = #tpu.dot_dimension_numbers<[1], [0], [0], [1], [0, 0, 1, 1], [], []>} : vector<4x20xf32>, vector<20x256xf32>, vector<4x256xf32> -> vector<4x256xf32>
      %134 = arith.addf %125, %133 : vector<4x256xf32>
      %cst_99 = arith.constant 0.000000e+00 : f32
      %135 = vector.broadcast %cst_99 : f32 to vector<20x17xf32>
      %136 = vector.extract_strided_slice %57 {offsets = [0, 0], sizes = [20, 239], strides = [1, 1]} : vector<20x256xf32> to vector<20x239xf32>
      %137 = tpu.concatenate %135, %136 in 1 : vector<20x17xf32>, vector<20x239xf32> -> vector<20x256xf32>
      %138 = vector.broadcast %20 : vector<1x256xf32> to vector<20x256xf32>
      %139 = arith.mulf %137, %138 : vector<20x256xf32>
      %c9_100 = arith.constant 9 : index
      %c0_101 = arith.constant 0 : index
      %c0_102 = arith.constant 0 : index
      %140 = vector.load %arg6[%c9_100, %c0_101, %c0_102] : memref<27x4x20xf32, #tpu.memory_space<vmem>>, vector<1x4x20xf32>
      %141 = vector.shape_cast %140 : vector<1x4x20xf32> to vector<4x20xf32>
      %cst_103 = arith.constant dense<0.000000e+00> : vector<4x256xf32>
      %142 = tpu.matmul %141, %139, %cst_103 {dimension_numbers = #tpu.dot_dimension_numbers<[1], [0], [0], [1], [0, 0, 1, 1], [], []>} : vector<4x20xf32>, vector<20x256xf32>, vector<4x256xf32> -> vector<4x256xf32>
      %143 = arith.addf %134, %142 : vector<4x256xf32>
      %cst_104 = arith.constant 0.000000e+00 : f32
      %144 = vector.broadcast %cst_104 : f32 to vector<20x16xf32>
      %145 = vector.extract_strided_slice %57 {offsets = [0, 0], sizes = [20, 240], strides = [1, 1]} : vector<20x256xf32> to vector<20x240xf32>
      %146 = tpu.concatenate %144, %145 in 1 : vector<20x16xf32>, vector<20x240xf32> -> vector<20x256xf32>
      %c10 = arith.constant 10 : index
      %c0_105 = arith.constant 0 : index
      %c0_106 = arith.constant 0 : index
      %147 = vector.load %arg6[%c10, %c0_105, %c0_106] : memref<27x4x20xf32, #tpu.memory_space<vmem>>, vector<1x4x20xf32>
      %148 = vector.shape_cast %147 : vector<1x4x20xf32> to vector<4x20xf32>
      %cst_107 = arith.constant dense<0.000000e+00> : vector<4x256xf32>
      %149 = tpu.matmul %148, %146, %cst_107 {dimension_numbers = #tpu.dot_dimension_numbers<[1], [0], [0], [1], [0, 0, 1, 1], [], []>} : vector<4x20xf32>, vector<20x256xf32>, vector<4x256xf32> -> vector<4x256xf32>
      %150 = arith.addf %143, %149 : vector<4x256xf32>
      %cst_108 = arith.constant 0.000000e+00 : f32
      %151 = vector.broadcast %cst_108 : f32 to vector<20x15xf32>
      %152 = vector.extract_strided_slice %57 {offsets = [0, 0], sizes = [20, 241], strides = [1, 1]} : vector<20x256xf32> to vector<20x241xf32>
      %153 = tpu.concatenate %151, %152 in 1 : vector<20x15xf32>, vector<20x241xf32> -> vector<20x256xf32>
      %154 = vector.broadcast %24 : vector<1x256xf32> to vector<20x256xf32>
      %155 = arith.mulf %153, %154 : vector<20x256xf32>
      %c11 = arith.constant 11 : index
      %c0_109 = arith.constant 0 : index
      %c0_110 = arith.constant 0 : index
      %156 = vector.load %arg6[%c11, %c0_109, %c0_110] : memref<27x4x20xf32, #tpu.memory_space<vmem>>, vector<1x4x20xf32>
      %157 = vector.shape_cast %156 : vector<1x4x20xf32> to vector<4x20xf32>
      %cst_111 = arith.constant dense<0.000000e+00> : vector<4x256xf32>
      %158 = tpu.matmul %157, %155, %cst_111 {dimension_numbers = #tpu.dot_dimension_numbers<[1], [0], [0], [1], [0, 0, 1, 1], [], []>} : vector<4x20xf32>, vector<20x256xf32>, vector<4x256xf32> -> vector<4x256xf32>
      %159 = arith.addf %150, %158 : vector<4x256xf32>
      %cst_112 = arith.constant 0.000000e+00 : f32
      %160 = vector.broadcast %cst_112 : f32 to vector<20x1xf32>
      %161 = vector.extract_strided_slice %57 {offsets = [0, 0], sizes = [20, 255], strides = [1, 1]} : vector<20x256xf32> to vector<20x255xf32>
      %162 = tpu.concatenate %160, %161 in 1 : vector<20x1xf32>, vector<20x255xf32> -> vector<20x256xf32>
      %163 = vector.broadcast %20 : vector<1x256xf32> to vector<20x256xf32>
      %164 = arith.mulf %162, %163 : vector<20x256xf32>
      %c12 = arith.constant 12 : index
      %c0_113 = arith.constant 0 : index
      %c0_114 = arith.constant 0 : index
      %165 = vector.load %arg6[%c12, %c0_113, %c0_114] : memref<27x4x20xf32, #tpu.memory_space<vmem>>, vector<1x4x20xf32>
      %166 = vector.shape_cast %165 : vector<1x4x20xf32> to vector<4x20xf32>
      %cst_115 = arith.constant dense<0.000000e+00> : vector<4x256xf32>
      %167 = tpu.matmul %166, %164, %cst_115 {dimension_numbers = #tpu.dot_dimension_numbers<[1], [0], [0], [1], [0, 0, 1, 1], [], []>} : vector<4x20xf32>, vector<20x256xf32>, vector<4x256xf32> -> vector<4x256xf32>
      %168 = arith.addf %159, %167 : vector<4x256xf32>
      %c13 = arith.constant 13 : index
      %c0_116 = arith.constant 0 : index
      %c0_117 = arith.constant 0 : index
      %169 = vector.load %arg6[%c13, %c0_116, %c0_117] : memref<27x4x20xf32, #tpu.memory_space<vmem>>, vector<1x4x20xf32>
      %170 = vector.shape_cast %169 : vector<1x4x20xf32> to vector<4x20xf32>
      %cst_118 = arith.constant dense<0.000000e+00> : vector<4x256xf32>
      %171 = tpu.matmul %170, %57, %cst_118 {dimension_numbers = #tpu.dot_dimension_numbers<[1], [0], [0], [1], [0, 0, 1, 1], [], []>} : vector<4x20xf32>, vector<20x256xf32>, vector<4x256xf32> -> vector<4x256xf32>
      %172 = arith.addf %168, %171 : vector<4x256xf32>
      %cst_119 = arith.constant 0.000000e+00 : f32
      %173 = vector.broadcast %cst_119 : f32 to vector<20x1xf32>
      %174 = vector.extract_strided_slice %57 {offsets = [0, 1], sizes = [20, 255], strides = [1, 1]} : vector<20x256xf32> to vector<20x255xf32>
      %175 = tpu.concatenate %174, %173 in 1 : vector<20x255xf32>, vector<20x1xf32> -> vector<20x256xf32>
      %176 = vector.broadcast %24 : vector<1x256xf32> to vector<20x256xf32>
      %177 = arith.mulf %175, %176 : vector<20x256xf32>
      %c14 = arith.constant 14 : index
      %c0_120 = arith.constant 0 : index
      %c0_121 = arith.constant 0 : index
      %178 = vector.load %arg6[%c14, %c0_120, %c0_121] : memref<27x4x20xf32, #tpu.memory_space<vmem>>, vector<1x4x20xf32>
      %179 = vector.shape_cast %178 : vector<1x4x20xf32> to vector<4x20xf32>
      %cst_122 = arith.constant dense<0.000000e+00> : vector<4x256xf32>
      %180 = tpu.matmul %179, %177, %cst_122 {dimension_numbers = #tpu.dot_dimension_numbers<[1], [0], [0], [1], [0, 0, 1, 1], [], []>} : vector<4x20xf32>, vector<20x256xf32>, vector<4x256xf32> -> vector<4x256xf32>
      %181 = arith.addf %172, %180 : vector<4x256xf32>
      %cst_123 = arith.constant 0.000000e+00 : f32
      %182 = vector.broadcast %cst_123 : f32 to vector<20x15xf32>
      %183 = vector.extract_strided_slice %57 {offsets = [0, 15], sizes = [20, 241], strides = [1, 1]} : vector<20x256xf32> to vector<20x241xf32>
      %184 = tpu.concatenate %183, %182 in 1 : vector<20x241xf32>, vector<20x15xf32> -> vector<20x256xf32>
      %185 = vector.broadcast %20 : vector<1x256xf32> to vector<20x256xf32>
      %186 = arith.mulf %184, %185 : vector<20x256xf32>
      %c15 = arith.constant 15 : index
      %c0_124 = arith.constant 0 : index
      %c0_125 = arith.constant 0 : index
      %187 = vector.load %arg6[%c15, %c0_124, %c0_125] : memref<27x4x20xf32, #tpu.memory_space<vmem>>, vector<1x4x20xf32>
      %188 = vector.shape_cast %187 : vector<1x4x20xf32> to vector<4x20xf32>
      %cst_126 = arith.constant dense<0.000000e+00> : vector<4x256xf32>
      %189 = tpu.matmul %188, %186, %cst_126 {dimension_numbers = #tpu.dot_dimension_numbers<[1], [0], [0], [1], [0, 0, 1, 1], [], []>} : vector<4x20xf32>, vector<20x256xf32>, vector<4x256xf32> -> vector<4x256xf32>
      %190 = arith.addf %181, %189 : vector<4x256xf32>
      %cst_127 = arith.constant 0.000000e+00 : f32
      %191 = vector.broadcast %cst_127 : f32 to vector<20x16xf32>
      %192 = vector.extract_strided_slice %57 {offsets = [0, 16], sizes = [20, 240], strides = [1, 1]} : vector<20x256xf32> to vector<20x240xf32>
      %193 = tpu.concatenate %192, %191 in 1 : vector<20x240xf32>, vector<20x16xf32> -> vector<20x256xf32>
      %c16 = arith.constant 16 : index
      %c0_128 = arith.constant 0 : index
      %c0_129 = arith.constant 0 : index
      %194 = vector.load %arg6[%c16, %c0_128, %c0_129] : memref<27x4x20xf32, #tpu.memory_space<vmem>>, vector<1x4x20xf32>
      %195 = vector.shape_cast %194 : vector<1x4x20xf32> to vector<4x20xf32>
      %cst_130 = arith.constant dense<0.000000e+00> : vector<4x256xf32>
      %196 = tpu.matmul %195, %193, %cst_130 {dimension_numbers = #tpu.dot_dimension_numbers<[1], [0], [0], [1], [0, 0, 1, 1], [], []>} : vector<4x20xf32>, vector<20x256xf32>, vector<4x256xf32> -> vector<4x256xf32>
      %197 = arith.addf %190, %196 : vector<4x256xf32>
      %cst_131 = arith.constant 0.000000e+00 : f32
      %198 = vector.broadcast %cst_131 : f32 to vector<20x17xf32>
      %199 = vector.extract_strided_slice %57 {offsets = [0, 17], sizes = [20, 239], strides = [1, 1]} : vector<20x256xf32> to vector<20x239xf32>
      %200 = tpu.concatenate %199, %198 in 1 : vector<20x239xf32>, vector<20x17xf32> -> vector<20x256xf32>
      %201 = vector.broadcast %24 : vector<1x256xf32> to vector<20x256xf32>
      %202 = arith.mulf %200, %201 : vector<20x256xf32>
      %c17 = arith.constant 17 : index
      %c0_132 = arith.constant 0 : index
      %c0_133 = arith.constant 0 : index
      %203 = vector.load %arg6[%c17, %c0_132, %c0_133] : memref<27x4x20xf32, #tpu.memory_space<vmem>>, vector<1x4x20xf32>
      %204 = vector.shape_cast %203 : vector<1x4x20xf32> to vector<4x20xf32>
      %cst_134 = arith.constant dense<0.000000e+00> : vector<4x256xf32>
      %205 = tpu.matmul %204, %202, %cst_134 {dimension_numbers = #tpu.dot_dimension_numbers<[1], [0], [0], [1], [0, 0, 1, 1], [], []>} : vector<4x20xf32>, vector<20x256xf32>, vector<4x256xf32> -> vector<4x256xf32>
      %206 = arith.addf %197, %205 : vector<4x256xf32>
      %cst_135 = arith.constant 0.000000e+00 : f32
      %207 = vector.broadcast %cst_135 : f32 to vector<20x17xf32>
      %208 = vector.extract_strided_slice %61 {offsets = [0, 0], sizes = [20, 239], strides = [1, 1]} : vector<20x256xf32> to vector<20x239xf32>
      %209 = tpu.concatenate %207, %208 in 1 : vector<20x17xf32>, vector<20x239xf32> -> vector<20x256xf32>
      %210 = vector.broadcast %20 : vector<1x256xf32> to vector<20x256xf32>
      %211 = arith.mulf %209, %210 : vector<20x256xf32>
      %c18 = arith.constant 18 : index
      %c0_136 = arith.constant 0 : index
      %c0_137 = arith.constant 0 : index
      %212 = vector.load %arg6[%c18, %c0_136, %c0_137] : memref<27x4x20xf32, #tpu.memory_space<vmem>>, vector<1x4x20xf32>
      %213 = vector.shape_cast %212 : vector<1x4x20xf32> to vector<4x20xf32>
      %cst_138 = arith.constant dense<0.000000e+00> : vector<4x256xf32>
      %214 = tpu.matmul %213, %211, %cst_138 {dimension_numbers = #tpu.dot_dimension_numbers<[1], [0], [0], [1], [0, 0, 1, 1], [], []>} : vector<4x20xf32>, vector<20x256xf32>, vector<4x256xf32> -> vector<4x256xf32>
      %215 = arith.addf %206, %214 : vector<4x256xf32>
      %cst_139 = arith.constant 0.000000e+00 : f32
      %216 = vector.broadcast %cst_139 : f32 to vector<20x16xf32>
      %217 = vector.extract_strided_slice %61 {offsets = [0, 0], sizes = [20, 240], strides = [1, 1]} : vector<20x256xf32> to vector<20x240xf32>
      %218 = tpu.concatenate %216, %217 in 1 : vector<20x16xf32>, vector<20x240xf32> -> vector<20x256xf32>
      %c19 = arith.constant 19 : index
      %c0_140 = arith.constant 0 : index
      %c0_141 = arith.constant 0 : index
      %219 = vector.load %arg6[%c19, %c0_140, %c0_141] : memref<27x4x20xf32, #tpu.memory_space<vmem>>, vector<1x4x20xf32>
      %220 = vector.shape_cast %219 : vector<1x4x20xf32> to vector<4x20xf32>
      %cst_142 = arith.constant dense<0.000000e+00> : vector<4x256xf32>
      %221 = tpu.matmul %220, %218, %cst_142 {dimension_numbers = #tpu.dot_dimension_numbers<[1], [0], [0], [1], [0, 0, 1, 1], [], []>} : vector<4x20xf32>, vector<20x256xf32>, vector<4x256xf32> -> vector<4x256xf32>
      %222 = arith.addf %215, %221 : vector<4x256xf32>
      %cst_143 = arith.constant 0.000000e+00 : f32
      %223 = vector.broadcast %cst_143 : f32 to vector<20x15xf32>
      %224 = vector.extract_strided_slice %61 {offsets = [0, 0], sizes = [20, 241], strides = [1, 1]} : vector<20x256xf32> to vector<20x241xf32>
      %225 = tpu.concatenate %223, %224 in 1 : vector<20x15xf32>, vector<20x241xf32> -> vector<20x256xf32>
      %226 = vector.broadcast %24 : vector<1x256xf32> to vector<20x256xf32>
      %227 = arith.mulf %225, %226 : vector<20x256xf32>
      %c20 = arith.constant 20 : index
      %c0_144 = arith.constant 0 : index
      %c0_145 = arith.constant 0 : index
      %228 = vector.load %arg6[%c20, %c0_144, %c0_145] : memref<27x4x20xf32, #tpu.memory_space<vmem>>, vector<1x4x20xf32>
      %229 = vector.shape_cast %228 : vector<1x4x20xf32> to vector<4x20xf32>
      %cst_146 = arith.constant dense<0.000000e+00> : vector<4x256xf32>
      %230 = tpu.matmul %229, %227, %cst_146 {dimension_numbers = #tpu.dot_dimension_numbers<[1], [0], [0], [1], [0, 0, 1, 1], [], []>} : vector<4x20xf32>, vector<20x256xf32>, vector<4x256xf32> -> vector<4x256xf32>
      %231 = arith.addf %222, %230 : vector<4x256xf32>
      %cst_147 = arith.constant 0.000000e+00 : f32
      %232 = vector.broadcast %cst_147 : f32 to vector<20x1xf32>
      %233 = vector.extract_strided_slice %61 {offsets = [0, 0], sizes = [20, 255], strides = [1, 1]} : vector<20x256xf32> to vector<20x255xf32>
      %234 = tpu.concatenate %232, %233 in 1 : vector<20x1xf32>, vector<20x255xf32> -> vector<20x256xf32>
      %235 = vector.broadcast %20 : vector<1x256xf32> to vector<20x256xf32>
      %236 = arith.mulf %234, %235 : vector<20x256xf32>
      %c21 = arith.constant 21 : index
      %c0_148 = arith.constant 0 : index
      %c0_149 = arith.constant 0 : index
      %237 = vector.load %arg6[%c21, %c0_148, %c0_149] : memref<27x4x20xf32, #tpu.memory_space<vmem>>, vector<1x4x20xf32>
      %238 = vector.shape_cast %237 : vector<1x4x20xf32> to vector<4x20xf32>
      %cst_150 = arith.constant dense<0.000000e+00> : vector<4x256xf32>
      %239 = tpu.matmul %238, %236, %cst_150 {dimension_numbers = #tpu.dot_dimension_numbers<[1], [0], [0], [1], [0, 0, 1, 1], [], []>} : vector<4x20xf32>, vector<20x256xf32>, vector<4x256xf32> -> vector<4x256xf32>
      %240 = arith.addf %231, %239 : vector<4x256xf32>
      %c22 = arith.constant 22 : index
      %c0_151 = arith.constant 0 : index
      %c0_152 = arith.constant 0 : index
      %241 = vector.load %arg6[%c22, %c0_151, %c0_152] : memref<27x4x20xf32, #tpu.memory_space<vmem>>, vector<1x4x20xf32>
      %242 = vector.shape_cast %241 : vector<1x4x20xf32> to vector<4x20xf32>
      %cst_153 = arith.constant dense<0.000000e+00> : vector<4x256xf32>
      %243 = tpu.matmul %242, %61, %cst_153 {dimension_numbers = #tpu.dot_dimension_numbers<[1], [0], [0], [1], [0, 0, 1, 1], [], []>} : vector<4x20xf32>, vector<20x256xf32>, vector<4x256xf32> -> vector<4x256xf32>
      %244 = arith.addf %240, %243 : vector<4x256xf32>
      %cst_154 = arith.constant 0.000000e+00 : f32
      %245 = vector.broadcast %cst_154 : f32 to vector<20x1xf32>
      %246 = vector.extract_strided_slice %61 {offsets = [0, 1], sizes = [20, 255], strides = [1, 1]} : vector<20x256xf32> to vector<20x255xf32>
      %247 = tpu.concatenate %246, %245 in 1 : vector<20x255xf32>, vector<20x1xf32> -> vector<20x256xf32>
      %248 = vector.broadcast %24 : vector<1x256xf32> to vector<20x256xf32>
      %249 = arith.mulf %247, %248 : vector<20x256xf32>
      %c23 = arith.constant 23 : index
      %c0_155 = arith.constant 0 : index
      %c0_156 = arith.constant 0 : index
      %250 = vector.load %arg6[%c23, %c0_155, %c0_156] : memref<27x4x20xf32, #tpu.memory_space<vmem>>, vector<1x4x20xf32>
      %251 = vector.shape_cast %250 : vector<1x4x20xf32> to vector<4x20xf32>
      %cst_157 = arith.constant dense<0.000000e+00> : vector<4x256xf32>
      %252 = tpu.matmul %251, %249, %cst_157 {dimension_numbers = #tpu.dot_dimension_numbers<[1], [0], [0], [1], [0, 0, 1, 1], [], []>} : vector<4x20xf32>, vector<20x256xf32>, vector<4x256xf32> -> vector<4x256xf32>
      %253 = arith.addf %244, %252 : vector<4x256xf32>
      %cst_158 = arith.constant 0.000000e+00 : f32
      %254 = vector.broadcast %cst_158 : f32 to vector<20x15xf32>
      %255 = vector.extract_strided_slice %61 {offsets = [0, 15], sizes = [20, 241], strides = [1, 1]} : vector<20x256xf32> to vector<20x241xf32>
      %256 = tpu.concatenate %255, %254 in 1 : vector<20x241xf32>, vector<20x15xf32> -> vector<20x256xf32>
      %257 = vector.broadcast %20 : vector<1x256xf32> to vector<20x256xf32>
      %258 = arith.mulf %256, %257 : vector<20x256xf32>
      %c24 = arith.constant 24 : index
      %c0_159 = arith.constant 0 : index
      %c0_160 = arith.constant 0 : index
      %259 = vector.load %arg6[%c24, %c0_159, %c0_160] : memref<27x4x20xf32, #tpu.memory_space<vmem>>, vector<1x4x20xf32>
      %260 = vector.shape_cast %259 : vector<1x4x20xf32> to vector<4x20xf32>
      %cst_161 = arith.constant dense<0.000000e+00> : vector<4x256xf32>
      %261 = tpu.matmul %260, %258, %cst_161 {dimension_numbers = #tpu.dot_dimension_numbers<[1], [0], [0], [1], [0, 0, 1, 1], [], []>} : vector<4x20xf32>, vector<20x256xf32>, vector<4x256xf32> -> vector<4x256xf32>
      %262 = arith.addf %253, %261 : vector<4x256xf32>
      %cst_162 = arith.constant 0.000000e+00 : f32
      %263 = vector.broadcast %cst_162 : f32 to vector<20x16xf32>
      %264 = vector.extract_strided_slice %61 {offsets = [0, 16], sizes = [20, 240], strides = [1, 1]} : vector<20x256xf32> to vector<20x240xf32>
      %265 = tpu.concatenate %264, %263 in 1 : vector<20x240xf32>, vector<20x16xf32> -> vector<20x256xf32>
      %c25 = arith.constant 25 : index
      %c0_163 = arith.constant 0 : index
      %c0_164 = arith.constant 0 : index
      %266 = vector.load %arg6[%c25, %c0_163, %c0_164] : memref<27x4x20xf32, #tpu.memory_space<vmem>>, vector<1x4x20xf32>
      %267 = vector.shape_cast %266 : vector<1x4x20xf32> to vector<4x20xf32>
      %cst_165 = arith.constant dense<0.000000e+00> : vector<4x256xf32>
      %268 = tpu.matmul %267, %265, %cst_165 {dimension_numbers = #tpu.dot_dimension_numbers<[1], [0], [0], [1], [0, 0, 1, 1], [], []>} : vector<4x20xf32>, vector<20x256xf32>, vector<4x256xf32> -> vector<4x256xf32>
      %269 = arith.addf %262, %268 : vector<4x256xf32>
      %cst_166 = arith.constant 0.000000e+00 : f32
      %270 = vector.broadcast %cst_166 : f32 to vector<20x17xf32>
      %271 = vector.extract_strided_slice %61 {offsets = [0, 17], sizes = [20, 239], strides = [1, 1]} : vector<20x256xf32> to vector<20x239xf32>
      %272 = tpu.concatenate %271, %270 in 1 : vector<20x239xf32>, vector<20x17xf32> -> vector<20x256xf32>
      %273 = vector.broadcast %24 : vector<1x256xf32> to vector<20x256xf32>
      %274 = arith.mulf %272, %273 : vector<20x256xf32>
      %c26 = arith.constant 26 : index
      %c0_167 = arith.constant 0 : index
      %c0_168 = arith.constant 0 : index
      %275 = vector.load %arg6[%c26, %c0_167, %c0_168] : memref<27x4x20xf32, #tpu.memory_space<vmem>>, vector<1x4x20xf32>
      %276 = vector.shape_cast %275 : vector<1x4x20xf32> to vector<4x20xf32>
      %cst_169 = arith.constant dense<0.000000e+00> : vector<4x256xf32>
      %277 = tpu.matmul %276, %274, %cst_169 {dimension_numbers = #tpu.dot_dimension_numbers<[1], [0], [0], [1], [0, 0, 1, 1], [], []>} : vector<4x20xf32>, vector<20x256xf32>, vector<4x256xf32> -> vector<4x256xf32>
      %278 = arith.addf %269, %277 : vector<4x256xf32>
      %279 = vector.broadcast %47 : f32 to vector<4x256xf32>
      %280 = arith.mulf %278, %279 : vector<4x256xf32>
      %281 = vector.broadcast %48 : f32 to vector<4x256xf32>
      %282 = arith.addf %280, %281 : vector<4x256xf32>
      %c0_170 = arith.constant 0 : index
      %283 = arith.index_cast %arg10 : i32 to index
      %c0_171 = arith.constant 0 : index
      %c0_172 = arith.constant 0 : index
      %284 = vector.load %arg1[%c0_170, %283, %c0_171, %c0_172] : memref<1x8x4x256xf32, #tpu.memory_space<vmem>>, vector<1x1x4x256xf32>
      %285 = vector.shape_cast %284 : vector<1x1x4x256xf32> to vector<4x256xf32>
      %286 = arith.addf %282, %285 : vector<4x256xf32>
      %c0_173 = arith.constant 0 : index
      %287 = arith.index_cast %arg10 : i32 to index
      %c0_174 = arith.constant 0 : index
      %c0_175 = arith.constant 0 : index
      %288 = vector.load %arg8[%c0_173, %287, %c0_174, %c0_175] : memref<1x8x4x256xf32, #tpu.memory_space<vmem>>, vector<1x1x4x256xf32>
      %289 = vector.shape_cast %288 : vector<1x1x4x256xf32> to vector<4x256xf32>
      %290 = vector.shape_cast %286 : vector<4x256xf32> to vector<1x1x4x256xf32>
      tpu.vector_store %arg8[%c0_173, %287, %c0_174, %c0_175], %290 {strides = array<i32>} : memref<1x8x4x256xf32, #tpu.memory_space<vmem>>, vector<1x1x4x256xf32>,
    }
    %c8_i32_49 = arith.constant 8 : i32
    return
  }
  func.func @transform_0(%arg0: i32) -> (i32, i32, i32, i32) {
    %c0_i32 = arith.constant 0 : i32
    %c0_i32_0 = arith.constant 0 : i32
    %c0_i32_1 = arith.constant 0 : i32
    %c0_i32_2 = arith.constant 0 : i32
    return %arg0, %c0_i32, %c0_i32_0, %c0_i32_1 : i32, i32, i32, i32
  }
  func.func @transform_1(%arg0: i32) -> (i32, i32, i32) {
    %c0_i32 = arith.constant 0 : i32
    %c0_i32_0 = arith.constant 0 : i32
    %c0_i32_1 = arith.constant 0 : i32
    %c0_i32_2 = arith.constant 0 : i32
    return %c0_i32, %c0_i32_0, %c0_i32_1 : i32, i32, i32
  }
  func.func @transform_2(%arg0: i32) -> (i32, i32, i32) {
    %c0_i32 = arith.constant 0 : i32
    %c0_i32_0 = arith.constant 0 : i32
    %c0_i32_1 = arith.constant 0 : i32
    %c0_i32_2 = arith.constant 0 : i32
    return %c0_i32, %c0_i32_0, %c0_i32_1 : i32, i32, i32
  }
  func.func @transform_3(%arg0: i32) -> (i32, i32, i32) {
    %c0_i32 = arith.constant 0 : i32
    %c0_i32_0 = arith.constant 0 : i32
    %c0_i32_1 = arith.constant 0 : i32
    %c0_i32_2 = arith.constant 0 : i32
    return %c0_i32, %c0_i32_0, %c0_i32_1 : i32, i32, i32
  }
  func.func @transform_4(%arg0: i32) -> (i32, i32, i32) {
    %c0_i32 = arith.constant 0 : i32
    %c0_i32_0 = arith.constant 0 : i32
    %c0_i32_1 = arith.constant 0 : i32
    %c0_i32_2 = arith.constant 0 : i32
    return %c0_i32, %c0_i32_0, %c0_i32_1 : i32, i32, i32
  }
  func.func @transform_5(%arg0: i32) -> (i32, i32, i32) {
    %c0_i32 = arith.constant 0 : i32
    %c0_i32_0 = arith.constant 0 : i32
    %c0_i32_1 = arith.constant 0 : i32
    %c0_i32_2 = arith.constant 0 : i32
    return %c0_i32, %c0_i32_0, %c0_i32_1 : i32, i32, i32
  }
  func.func @transform_6(%arg0: i32) -> (i32, i32) {
    %c0_i32 = arith.constant 0 : i32
    %c0_i32_0 = arith.constant 0 : i32
    %c0_i32_1 = arith.constant 0 : i32
    return %c0_i32, %c0_i32_0 : i32, i32
  }
  func.func @transform_7(%arg0: i32) -> (i32, i32, i32, i32) {
    %c0_i32 = arith.constant 0 : i32
    %c0_i32_0 = arith.constant 0 : i32
    %c0_i32_1 = arith.constant 0 : i32
    %c0_i32_2 = arith.constant 0 : i32
    return %arg0, %c0_i32, %c0_i32_0, %c0_i32_1 : i32, i32, i32, i32
  }
}

</mosaic_0001>

<bundles_post_ra>
// kernel: tpu_custom_call.1
= control target key start
LH: loop header
LB: loop body
LE: loop exit
PB: predicated region body
PF: predicated region fallthrough
CT: control target
= control target key end

     0   :  { %12 = vsyncpa [#allocation5], 0  ;;  %s18594_s0 = inlined_call_operand.vmem [shape: f32[2,8,4,256], index: 0, kind: input, shape index: {}]   ;;  %s18595_s1 = inlined_call_operand.vmem [shape: f32[27,4,4], index: 1, kind: input, shape index: {}]   ;;  %s18596_s2 = inlined_call_operand.vmem [shape: f32[27,4,8], index: 2, kind: input, shape index: {}]   ;;  %s18597_s3 = inlined_call_operand.vmem [shape: f32[27,4,12], index: 3, kind: input, shape index: {}]   ;;  %s18598_s4 = inlined_call_operand.vmem [shape: f32[27,4,16], index: 4, kind: input, shape index: {}]   ;;  %s18599_s5 = inlined_call_operand.vmem [shape: f32[27,4,20], index: 5, kind: input, shape index: {}]   ;;  %s18600_s6 = inlined_call_operand.vmem [shape: f32[5,2], index: 6, kind: input, shape index: {}]   ;;  %s18601_s7 = inlined_call_operand.hbm [shape: f32[2,8,4,256], index: 7, kind: output, shape index: {}]  }
   0x1   :  { %13 = vsyncpa [#allocation4], 0 }
   0x2   :  { %15 = vsyncpa [#allocation4 + $0x1], 0  ;;  %s15623_s24 = smov 0   ;;  %s15625_s25 = smov 0  }
   0x3   :  { %s15627_s26 = smov 0   ;;  %s15629_s27 = smov 0  }
   0x4 LB: > { %s15644_s28 = sadd.s32 4294967295, %s15510_s27   ;;  %s13862_s29 = sadd.s32 4294967294, %s15510_s27   ;;  %s15510_s27 = sphi %s15629_s27, %s18639_s27   ;;  %s15506_s26 = sphi %s15627_s26, %s18638_s26   ;;  %s15502_s25 = sphi %s15625_s25, %s18637_s25   ;;  %s15498_s24 = sphi %s15623_s24, %s18636_s24  }
   0x5   : > { %s15648_s30 = sadd.s32 1, %s15510_s27   ;;  %s180_s8 = sadd.s32 1, %s15506_s26 }
   0x6   : > { %s177_s9 = ssub.s32 %s15510_s27, %s15648_s30  ;;  %p190_p0 = scmp.ne.s32.totalorder %s15506_s26, %s15502_s25 }
   0x7   : > { %p178_p1 = scmp.eq.s32.totalorder %s177_s9, 0  ;;  %p191_p2 = scmp.eq.s32.totalorder %s15644_s28, 1 }
   0x8   : > { %p196_p3 = scmp.ne.s32.totalorder %s15502_s25, %s15498_s24  ;;  %p197_p4 = scmp.eq.s32.totalorder %s13862_s29, 1 }
   0x9   : > { %s15659_s10 = scalar_select %p178_p1, %s15506_s26, %s180_s8  }
   0xa   : > { %p15661_p5 = por %p191_p2, %p190_p0  ;;  %p15665_p6 = por %p197_p4, %p196_p3 }
   0xb   : > { %p13863_p7 = scmp.ge.s32.totalorder %s15510_s27, 1  ;;  %p204_p8 = scmp.lt.s32.totalorder %s15510_s27, 3 }
   0xc   : > { %p15095_p9 = scmp.eq.s32.totalorder %s15644_s28, 0  ;;  %s232_s16 = sshll.u32 %s18600_s6, 4  ;;  %s233_s16 = int_to_ptr.vmem [resolvable:$true] %s232_s16 }
   0xd   : > { %p15672_p10 = pnand %p13863_p7, %p204_p8  ;;  %s15409_s17 = scalar_lea.vmem %s233_s16, 128 }
   0xe   : > { %p15410_p13 = scmp.ne.s32.totalorder %s233_s16, %s15409_s17  ;;  %p15417_p3 = scmp.lt.s32.totalorder %s233_s16, %s233_s16 }
   0xf   : > { %p15087_p11 = pneg %p15672_p10  ;;  %p15418_p4 = scmp.lt.s32.totalorder %s15409_s17, %s15409_s17 }
  0x11   : > { %p15088_p12 = pnand %p15095_p9, %p15087_p11  ;;  %p15419_p7 = por %p15418_p4, %p15417_p3 }
  0x13   : > { %p15411_p0 = pneg %p15088_p12 }
  0x15   : > { %p15412_p1 = pnand %p15411_p0, %p15410_p13 }
  0x17   : > { %p15413_p2 = pneg %p15412_p1 }
  0x19   : > { %p15420_p8 = pnand %p15419_p7, %p15413_p2 }
  0x1b   : > { %15423 = shalt.err (!%p15420_p8)
}
  0x1c   : > { %s15532_s18 = smov [#allocation3]   ;;  %253 = sbr.rel (%p15672_p10) target bundleno = 2618 (0xa3a), region = 48 }
  0x1d   : > { %15090 = dma.vmem_to_smem (!%p15088_p12), %s233_s16, 128, %s15532_s18, [#allocation5]  }
  0x23   : > { %15489 = dma.done.wait (%p15095_p9), [#allocation5], 128  }
  0x24   : > { %15491 = vsyncadd (%p15095_p9), [#allocation5], 4294967168 }
  0x25   : > { %259 = sfence }
  0x26   : > { %s18602_s19 = sand.u32 1, %s15502_s25   ;;  %v291_v0 = vlaneseq  ;;  %s15690_s20 = sld [smem:[#allocation3]]  ;;  %v15533_v1 = vmov 0.0  }
  0x27   : > { %s15694_s21 = sshll.u32 %s18602_s19, 6  ;;  %330 = vst [vmem:[#allocation2] sm:$0xff] %v15533_v1  ;;  %331 = vst [vmem:[#allocation2 + $0x8] sm:$0xff] %v15533_v1  ;;  %s15696_s22 = sld [smem:[#allocation3 + $0x1]] }
  0x28   : > { %332 = vst [vmem:[#allocation2 + $0x10] sm:$0xff] %v15533_v1  ;;  %333 = vst [vmem:[#allocation2 + $0x18] sm:$0xff] %v15533_v1  ;;  %v292_v2 = vand.u32 127, %v291_v0  ;;  %p286_p9 = scmp.lt.s32.totalorder %s15644_s28, 1  ;;  %s15722_s15 = smov 0  }
  0x29   : > { %334 = vst [vmem:[#allocation2 + $0x20] sm:$0xf] %v15533_v1  ;;  %335 = vst [vmem:[#allocation2 + $0x28] sm:$0xf] %v15533_v1 }
  0x2a   : > { %337 = vst [vmem:[#allocation2 + $0x1b0] sm:$0xff] %v15533_v1  ;;  %338 = vst [vmem:[#allocation2 + $0x1b8] sm:$0xff] %v15533_v1  ;;  %v293_v3 = vadd.s32 128, %v292_v2  ;;  %v298_v4 = vand.u32 15, %v292_v2  ;;  %s287_s23 = scalar_select %p286_p9, %s15644_s28, 1 }
  0x2b   : > { %339 = vst [vmem:[#allocation2 + $0x1c0] sm:$0xff] %v15533_v1  ;;  %340 = vst [vmem:[#allocation2 + $0x1c8] sm:$0xff] %v15533_v1 }
  0x2c   : > { %341 = vst [vmem:[#allocation2 + $0x1d0] sm:$0xf] %v15533_v1  ;;  %342 = vst [vmem:[#allocation2 + $0x1d8] sm:$0xf] %v15533_v1  ;;  %v305_v5 = vand.u32 15, %v293_v3  ;;  %vm318_vm0 = vcmp.ne.s32.totalorder %v298_v4, 0 }
  0x2d   : > { %vm324_vm1 = vcmp.ne.s32.totalorder %v298_v4, 15  ;;  %s14422_s29 = sshll.u32 %s287_s23, 6  ;;  %v15700_v6 = vsel %vm318_vm0, 1.0, %v15533_v1 }
  0x2e   : > { %v15702_v7 = vsel %vm324_vm1, 1.0, %v15533_v1  ;;  %s15707_s13 = scalar_lea.vmem %s18594_s0, %s14422_s29  ;;  %vm319_vm2 = vcmp.ne.s32.totalorder %v305_v5, 0  ;;  %vm325_vm3 = vcmp.ne.s32.totalorder %v305_v5, 15 }
  0x2f   : > { %v343_v8 = vld [vmem:[%s15707_s13] sm:$0xff]  ;;  %v344_v9 = vld [vmem:[%s15707_s13 + $0x8] sm:$0xff]  ;;  %v345_v10 = vld [vmem:[%s15707_s13 + $0x10] sm:$0xff]  ;;  %v15712_v11 = vsel %vm319_vm2, 1.0, %v15533_v1  ;;  %v15714_v12 = vsel %vm325_vm3, 1.0, %v15533_v1 }
  0x30   : > { %376 = vst [vmem:[#allocation2 + $0x30] sm:$0xf] %v343_v8  ;;  %v359_v13 = vcombine.high %v343_v8, %v343_v8  ;;  %378 = vst [vmem:[#allocation2 + $0x60] sm:$0xf] %v344_v9  ;;  %v360_v14 = vcombine.high %v344_v9, %v344_v9  ;;  %v346_v15 = vld [vmem:[%s15707_s13 + $0x18] sm:$0xff]  ;;  %v347_v16 = vld [vmem:[%s15707_s13 + $0x20] sm:$0xff]  ;;  %v361_v18 = vcombine.high %v345_v10, %v345_v10 }
  0x31   : > { %380 = vst [vmem:[#allocation2 + $0x90] sm:$0xf] %v345_v10  ;;  %v348_v17 = vld [vmem:[%s15707_s13 + $0x28] sm:$0xff]  ;;  %382 = vst [vmem:[#allocation2 + $0xc0] sm:$0xf] %v346_v15  ;;  %v362_v19 = vcombine.high %v346_v15, %v346_v15  ;;  %v363_v20 = vcombine.high %v347_v16, %v347_v16  ;;  %v349_v22 = vld [vmem:[%s15707_s13 + $0x30] sm:$0xff] }
  0x32   : > { %384 = vst [vmem:[#allocation2 + $0xf0] sm:$0xf] %v347_v16  ;;  %386 = vst [vmem:[#allocation2 + $0x120] sm:$0xf] %v348_v17  ;;  %v364_v21 = vcombine.high %v348_v17, %v348_v17  ;;  %v350_v23 = vld [vmem:[%s15707_s13 + $0x38] sm:$0xff]  ;;  %v365_v24 = vcombine.high %v349_v22, %v349_v22 }
  0x33   : > { %377 = vst [vmem:[#allocation2 + $0x38] sm:$0xf] %v359_v13  ;;  %379 = vst [vmem:[#allocation2 + $0x68] sm:$0xf] %v360_v14  ;;  %v366_v25 = vcombine.high %v350_v23, %v350_v23 }
  0x34   : > { %388 = vst [vmem:[#allocation2 + $0x150] sm:$0xf] %v349_v22  ;;  %390 = vst [vmem:[#allocation2 + $0x180] sm:$0xf] %v350_v23 }
  0x35   : > { %381 = vst [vmem:[#allocation2 + $0x98] sm:$0xf] %v361_v18  ;;  %383 = vst [vmem:[#allocation2 + $0xc8] sm:$0xf] %v362_v19 }
  0x36   : > { %385 = vst [vmem:[#allocation2 + $0xf8] sm:$0xf] %v363_v20  ;;  %387 = vst [vmem:[#allocation2 + $0x128] sm:$0xf] %v364_v21 }
  0x37   : > { %389 = vst [vmem:[#allocation2 + $0x158] sm:$0xf] %v365_v24  ;;  %391 = vst [vmem:[#allocation2 + $0x188] sm:$0xf] %v366_v25 }
  0x38 LB: >> { %v15534_v26 = vmov 0.0   ;;  %s14423_s16 = smul.u32 48, %s15514_s15  ;;  %vm445_vm4 = vcmask 1043456   ;;  %s15535_s18 = smov 127   ;;  %vm441_vm5 = vcmask 31744   ;;  %vm878_vm6 = vcmask 1039360   ;;  %s15514_s15 = sphi %s15722_s15, %s399_s15  }
  0x39   : >> { %1697 = vmatprep.mubr.f32.mxu0 %v15534_v26  ;;  %515 = vmatprep.mubr.f32.mxu1 %v15534_v26  ;;  %s15536_s23 = smov 16   ;;  %v13932_v29 = vld [vmem:[%s18595_s1 + $0x34] sm:$0xf]  ;;  %s15537_s9 = smov 17   ;;  %vm435_vm7 = vcmask 130048   ;;  %vm423_vm8 = vcmask 138240  }
  0x3a   : >> { %s15730_s17 = scalar_lea.vmem [#allocation2], %s14423_s16  ;;  %s15538_s16 = smov 113   ;;  %v13881_v42 = vld [vmem:[%s18595_s1 + $0x4] sm:$0xf]  ;;  %v13936_v45 = vld [vmem:[%s18595_s1 + $0x38] sm:$0xf] }
  0x3b   : >> { %s15539_s29 = smov 15   ;;  %s15540_s8 = smov 112   ;;  %vm973_vm9 = vcmask 924672   ;;  %v430_v56 = vld [vmem:[%s18595_s1] sm:$0xf]  ;;  %vm606_vm10 = vcmask 121856  }
  0x3c   : >> { %s15541_s19 = smov 1   ;;  %s15542_s14 = smov 111   ;;  %v13940_v59 = vld [vmem:[%s18595_s1 + $0x3c] sm:$0xf]  ;;  %vm1068_vm11 = vcmask 916480   ;;  %vm701_vm12 = vcmask 7168  }
  0x3d   : >> { %v13888_v8 = vld [vmem:[%s18595_s1 + $0x8] sm:$0xf]  ;;  %v13944_v9 = vld [vmem:[%s18595_s1 + $0x40] sm:$0xf]  ;;  %vm1159_vm13 = vcmask 908288   ;;  %s399_s15 = sadd.s32 1, %s15514_s15  }
  0x3e   : >> { %v15733_v27 = vld [vmem:[%s15730_s17 + $0x38] sm:$0xff]  ;;  %v15736_v28 = vld [vmem:[%s15730_s17] sm:$0xff]  ;;  %v13877_v30 = vld [vmem:[%s15730_s17 + $0x30] sm:$0xff]  ;;  %p396_p10 = scmp.ge.s32.totalorder %s399_s15, 8  }
  0x3f   : >> { %1708 = vrot.lane.b32.xlu0 %v15733_v27, %s15535_s18  ;;  %431 = vrot.lane.b32.xlu1 %v15736_v28, %s15536_s23  ;;  %v15747_v31 = vld [vmem:[%s15730_s17 + $0x8] sm:$0xff]  ;;  %v15779_v32 = vld [vmem:[%s15730_s17 + $0x60] sm:$0xff] }
  0x40   : >> { %13933 = vmatprep.subr.msk.mxu0 %vm445_vm4, %v15733_v27  ;;  %v15782_v33 = vld [vmem:[%s15730_s17 + $0x68] sm:$0xff]  ;;  %v13948_v25 = vld [vmem:[%s18595_s1 + $0x44] sm:$0xf] }
  0x41   : >> { %13934 = vmatpush1.msk.msra.mxu0 %vm445_vm4, %v13877_v30  ;;  %v13892_v22 = vld [vmem:[%s18595_s1 + $0xc] sm:$0xf] }
  0x42   : >> { %13935 = vmatmul.mubr.msk.f32.vlgmr.msra.gmra.mrb[0].mxu0 %vm441_vm5, %v13932_v29 }
  0x43   : >> { %1706 = vrot.lane.b32.xlu0 %v13877_v30, %s15535_s18  ;;  %433 = vrot.lane.b32.xlu1 %v15747_v31, %s15536_s23 }
  0x44   : >> { %1791 = vmatprep.mubr.f32.mxu0 %v15534_v26 }
  0x47   : >> { %419 = vrot.lane.b32.xlu0 %v15736_v28, %s15537_s9  ;;  %421 = vrot.lane.b32.xlu1 %v15747_v31, %s15537_s9 }
  0x4b   : >> { %1802 = vrot.lane.b32.xlu0 %v15733_v27, %s15538_s16  ;;  %1800 = vrot.lane.b32.xlu1 %v13877_v30, %s15538_s16 }
  0x4f   : >> { %602 = vrot.lane.b32.xlu0 %v15736_v28, %s15539_s29  ;;  %604 = vrot.lane.b32.xlu1 %v15747_v31, %s15539_s29 }
  0x53   : >> { %1896 = vrot.lane.b32.xlu0 %v15733_v27, %s15540_s8  ;;  %1894 = vrot.lane.b32.xlu1 %v13877_v30, %s15540_s8 }
  0x57   : >> { %697 = vrot.lane.b32.xlu0 %v15736_v28, %s15541_s19  ;;  %699 = vrot.lane.b32.xlu1 %v15747_v31, %s15541_s19 }
  0x5b   : >> { %1986 = vrot.lane.b32.xlu0 %v15733_v27, %s15542_s14  ;;  %1984 = vrot.lane.b32.xlu1 %v13877_v30, %s15542_s14 }
  0x5f   : >> { %2080 = vrot.lane.b32.xlu0 %v15779_v32, %s15537_s9  ;;  %2082 = vrot.lane.b32.xlu1 %v15782_v33, %s15537_s9 }
  0x63   : >> { %876 = vrot.lane.b32.xlu0 %v15747_v31, %s15535_s18  ;;  %874 = vrot.lane.b32.xlu1 %v15736_v28, %s15535_s18 }
  0x67   : >> { %2174 = vrot.lane.b32.xlu0 %v15779_v32, %s15536_s23  ;;  %2176 = vrot.lane.b32.xlu1 %v15782_v33, %s15536_s23 }
  0x6b   : >> { %971 = vrot.lane.b32.xlu0 %v15747_v31, %s15538_s16  ;;  %2264 = vrot.lane.b32.xlu1 %v15779_v32, %s15539_s29 }
  0x6f   : >> { %2266 = vrot.lane.b32.xlu0 %v15782_v33, %s15539_s29  ;;  %969 = vrot.lane.b32.xlu1 %v15736_v28, %s15538_s16 }
  0x73   : >> { %2358 = vrot.lane.b32.xlu0 %v15779_v32, %s15541_s19  ;;  %2360 = vrot.lane.b32.xlu1 %v15782_v33, %s15541_s19 }
  0x77   : >> { %1066 = vrot.lane.b32.xlu0 %v15747_v31, %s15540_s8  ;;  %1064 = vrot.lane.b32.xlu1 %v15736_v28, %s15540_s8 }
  0x7b   : >> { %1157 = vrot.lane.b32.xlu0 %v15747_v31, %s15542_s14  ;;  %1155 = vrot.lane.b32.xlu1 %v15736_v28, %s15542_s14 }
  0x7f   : >> { %1252 = vrot.lane.b32.xlu0 %v13877_v30, %s15537_s9  ;;  %1254 = vrot.lane.b32.xlu1 %v15733_v27, %s15537_s9  ;;  %s16119_s9 = sld [smem:[#allocation3 + $0x80]] (%p396_p10) }
  0x83   : >> { %2536 = vrot.lane.b32.xlu0 %v15782_v33, %s15535_s18  ;;  %2534 = vrot.lane.b32.xlu1 %v15779_v32, %s15535_s18 }
  0x87   : >> { %2630 = vrot.lane.b32.xlu0 %v15782_v33, %s15538_s16  ;;  %2628 = vrot.lane.b32.xlu1 %v15779_v32, %s15538_s16  ;;  %s16121_s16 = sld [smem:[#allocation3 + $0x81]] (%p396_p10) }
  0x8b   : >> { %1346 = vrot.lane.b32.xlu0 %v13877_v30, %s15536_s23  ;;  %1348 = vrot.lane.b32.xlu1 %v15733_v27, %s15536_s23 }
  0x8f   : >> { %1436 = vrot.lane.b32.xlu0 %v13877_v30, %s15539_s29  ;;  %1438 = vrot.lane.b32.xlu1 %v15733_v27, %s15539_s29  ;;  %s16123_s29 = smov (%p396_p10), 0  }
  0x93   : >> { %2724 = vrot.lane.b32.xlu0 %v15782_v33, %s15540_s8  ;;  %2722 = vrot.lane.b32.xlu1 %v15779_v32, %s15540_s8 }
  0x97   : >> { %1530 = vrot.lane.b32.xlu0 %v13877_v30, %s15541_s19  ;;  %1532 = vrot.lane.b32.xlu1 %v15733_v27, %s15541_s19 }
  0x9b   : >> { %2814 = vrot.lane.b32.xlu0 %v15782_v33, %s15542_s14  ;;  %2812 = vrot.lane.b32.xlu1 %v15779_v32, %s15542_s14 }
  0xb1   : >> { %v1709_v34 = vpop.permute.xlu0 %1708  ;;  %v432_v35 = vpop.permute.xlu1 %431 }
  0xb2   : >> { %v1713_v36 = vsel %vm878_vm6, %v1709_v34, 0.0  ;;  %v438_v44 = vsel %vm435_vm7, 0.0, %v432_v35 }
  0xb3   : >> { %v1715_v37 = vmul.f32 %v15714_v12, %v1713_v36 }
  0xb5   : >> { %v1707_v38 = vpop.permute.xlu0 %1706  ;;  %13937 = vmatprep.subr.msk.mxu0 %vm445_vm4, %v1715_v37  ;;  %v434_v39 = vpop.permute.xlu1 %433 }
  0xb6   : >> { %v1710_v40 = vsel %vm878_vm6, %v1707_v38, %v1709_v34  ;;  %v436_v41 = vsel %vm435_vm7, %v432_v35, %v434_v39 }
  0xb7   : >> { %v1714_v43 = vmul.f32 %v15702_v7, %v1710_v40  ;;  %13882 = vmatprep.subr.msk.mxu1 %vm445_vm4, %v436_v41 }
  0xb8   : >> { %13883 = vmatpush1.msk.msra.mxu1 %vm445_vm4, %v438_v44 }
  0xb9   : >> { %13938 = vmatpush1.msk.msra.mxu0 %vm445_vm4, %v1714_v43  ;;  %v420_v46 = vpop.permute.xlu0 %419  ;;  %13884 = vmatmul.mubr.msk.f32.vlgmr.msra.gmra.mrb[0].mxu1 %vm441_vm5, %v13881_v42  ;;  %v422_v47 = vpop.permute.xlu1 %421  ;;  %v13952_v42 = vld [vmem:[%s18595_s1 + $0x48] sm:$0xf] }
  0xba   : >> { %v427_v48 = vsel %vm423_vm8, 0.0, %v420_v46  ;;  %v424_v49 = vsel %vm423_vm8, %v420_v46, %v422_v47  ;;  %13939 = vmatmul.mubr.msk.f32.vlgmr.msra.gmra.mrb[0].mxu0 %vm441_vm5, %v13936_v45  ;;  %595 = vmatprep.mubr.f32.mxu1 %v15534_v26 }
  0xbb   : >> { %v428_v50 = vmul.f32 %v15700_v6, %v427_v48  ;;  %v429_v51 = vmul.f32 %v15712_v11, %v424_v49  ;;  %1885 = vmatprep.mubr.f32.mxu0 %v15534_v26 }
  0xbd   : >> { %v1803_v52 = vpop.permute.xlu0 %1802  ;;  %13885 = vmatprep.subr.msk.mxu1 %vm445_vm4, %v429_v51  ;;  %v1801_v53 = vpop.permute.xlu1 %1800 }
  0xbe   : >> { %v1807_v54 = vsel %vm973_vm9, %v1803_v52, 0.0  ;;  %v1804_v55 = vsel %vm973_vm9, %v1801_v53, %v1803_v52  ;;  %13886 = vmatpush1.msk.msra.mxu1 %vm445_vm4, %v428_v50  ;;  %v13900_v50 = vld [vmem:[%s18595_s1 + $0x14] sm:$0xf]  ;;  %v13956_v53 = vld [vmem:[%s18595_s1 + $0x4c] sm:$0xf] }
  0xbf   : >> { %v1809_v57 = vmul.f32 %v15712_v11, %v1807_v54  ;;  %v1808_v58 = vmul.f32 %v15700_v6, %v1804_v55 }
  0xc1   : >> { %13941 = vmatprep.subr.msk.mxu0 %vm445_vm4, %v1809_v57  ;;  %v603_v60 = vpop.permute.xlu0 %602  ;;  %13887 = vmatmul.mubr.msk.f32.vlgmr.msra.gmra.mrb[0].mxu1 %vm441_vm5, %v430_v56  ;;  %v605_v61 = vpop.permute.xlu1 %604 }
  0xc2   : >> { %v610_v62 = vsel %vm606_vm10, 0.0, %v603_v60  ;;  %v607_v63 = vsel %vm606_vm10, %v603_v60, %v605_v61  ;;  %13942 = vmatpush1.msk.msra.mxu0 %vm445_vm4, %v1808_v58  ;;  %688 = vmatprep.mubr.f32.mxu1 %v15534_v26 }
  0xc3   : >> { %v611_v0 = vmul.f32 %v15702_v7, %v610_v62  ;;  %v612_v1 = vmul.f32 %v15714_v12, %v607_v63  ;;  %13943 = vmatmul.mubr.msk.f32.vlgmr.msra.gmra.mrb[0].mxu0 %vm441_vm5, %v13940_v59 }
  0xc4   : >> { %1975 = vmatprep.mubr.f32.mxu0 %v15534_v26 }
  0xc5   : >> { %v1897_v2 = vpop.permute.xlu0 %1896  ;;  %13889 = vmatprep.subr.msk.mxu1 %vm445_vm4, %v612_v1  ;;  %v1895_v3 = vpop.permute.xlu1 %1894 }
  0xc6   : >> { %v1900_v4 = vsel %vm1068_vm11, %v1897_v2, 0.0  ;;  %v1898_v5 = vsel %vm1068_vm11, %v1895_v3, %v1897_v2  ;;  %13890 = vmatpush1.msk.msra.mxu1 %vm445_vm4, %v611_v0  ;;  %v13904_v0 = vld [vmem:[%s18595_s1 + $0x18] sm:$0xf] }
  0xc7   : >> { %13945 = vmatprep.subr.msk.mxu0 %vm445_vm4, %v1900_v4  ;;  %v13960_v4 = vld [vmem:[%s18595_s1 + $0x50] sm:$0xf] }
  0xc8   : >> { %13946 = vmatpush1.msk.msra.mxu0 %vm445_vm4, %v1898_v5 }
  0xc9   : >> { %v698_v10 = vpop.permute.xlu0 %697  ;;  %13891 = vmatmul.mubr.msk.f32.vlgmr.msra.gmra.mrb[0].mxu1 %vm441_vm5, %v13888_v8  ;;  %v700_v13 = vpop.permute.xlu1 %699 }
  0xca   : >> { %v705_v14 = vsel %vm701_vm12, 0.0, %v698_v10  ;;  %v702_v15 = vsel %vm701_vm12, %v698_v10, %v700_v13  ;;  %783 = vmatprep.mubr.f32.mxu1 %v15534_v26 }
  0xcb   : >> { %v706_v16 = vmul.f32 %v15700_v6, %v705_v14  ;;  %v707_v17 = vmul.f32 %v15712_v11, %v702_v15  ;;  %13947 = vmatmul.mubr.msk.f32.vlgmr.msra.gmra.mrb[0].mxu0 %vm441_vm5, %v13944_v9  ;;  %v13908_v15 = vld [vmem:[%s18595_s1 + $0x1c] sm:$0xf] }
  0xcc   : >> { %2069 = vmatprep.mubr.f32.mxu0 %v15534_v26 }
  0xcd   : >> { %v1987_v18 = vpop.permute.xlu0 %1986  ;;  %13893 = vmatprep.subr.msk.mxu1 %vm445_vm4, %v707_v17  ;;  %v1985_v19 = vpop.permute.xlu1 %1984 }
  0xce   : >> { %v1991_v20 = vsel %vm1159_vm13, %v1987_v18, 0.0  ;;  %v1988_v21 = vsel %vm1159_vm13, %v1985_v19, %v1987_v18  ;;  %13894 = vmatpush1.msk.msra.mxu1 %vm445_vm4, %v706_v16 }
  0xcf   : >> { %v1993_v23 = vmul.f32 %v15714_v12, %v1991_v20  ;;  %v1992_v24 = vmul.f32 %v15702_v7, %v1988_v21  ;;  %13897 = vmatprep.subr.msk.mxu1 %vm445_vm4, %v15747_v31  ;;  %v13964_v20 = vld [vmem:[%s18595_s1 + $0x54] sm:$0xf] }
  0xd1   : >> { %v2081_v27 = vpop.permute.xlu0 %2080  ;;  %13895 = vmatmul.mubr.msk.f32.vlgmr.msra.gmra.mrb[0].mxu1 %vm441_vm5, %v13892_v22  ;;  %13949 = vmatprep.subr.msk.mxu0 %vm445_vm4, %v1993_v23  ;;  %v2083_v29 = vpop.permute.xlu1 %2082 }
  0xd2   : >> { %v2087_v30 = vsel %vm423_vm8, 0.0, %v2081_v27  ;;  %v2084_v34 = vsel %vm423_vm8, %v2081_v27, %v2083_v29  ;;  %13950 = vmatpush1.msk.msra.mxu0 %vm445_vm4, %v1992_v24  ;;  %13898 = vmatpush1.msk.msra.mxu1 %vm445_vm4, %v15736_v28  ;;  %v13896_v28 = vld [vmem:[%s18595_s1 + $0x10] sm:$0xf] }
  0xd3   : >> { %v2088_v31 = vmul.f32 %v15700_v6, %v2087_v30  ;;  %v2089_v35 = vmul.f32 %v15712_v11, %v2084_v34  ;;  %13951 = vmatmul.mubr.msk.f32.vlgmr.msra.gmra.mrb[0].mxu0 %vm441_vm5, %v13948_v25  ;;  %865 = vmatprep.mubr.f32.mxu1 %v15534_v26  ;;  %v13912_v30 = vld [vmem:[%s18595_s1 + $0x20] sm:$0xf] }
  0xd4   : >> { %2165 = vmatprep.mubr.f32.mxu0 %v15534_v26 }
  0xd5   : >> { %v877_v36 = vpop.permute.xlu0 %876  ;;  %v875_v37 = vpop.permute.xlu1 %874  ;;  %13953 = vmatprep.subr.msk.mxu0 %vm445_vm4, %v2089_v35 }
  0xd6   : >> { %v882_v38 = vsel %vm878_vm6, %v877_v36, 0.0  ;;  %v879_v39 = vsel %vm878_vm6, %v875_v37, %v877_v36  ;;  %13954 = vmatpush1.msk.msra.mxu0 %vm445_vm4, %v2088_v31 }
  0xd7   : >> { %v884_v40 = vmul.f32 %v15714_v12, %v882_v38  ;;  %v883_v41 = vmul.f32 %v15702_v7, %v879_v39 }
  0xd9   : >> { %v2175_v43 = vpop.permute.xlu0 %2174  ;;  %13899 = vmatmul.mubr.msk.f32.vlgmr.msra.gmra.mrb[0].mxu1 %vm441_vm5, %v13896_v28  ;;  %v2177_v44 = vpop.permute.xlu1 %2176  ;;  %13901 = vmatprep.subr.msk.mxu1 %vm445_vm4, %v884_v40 }
  0xda   : >> { %v2180_v45 = vsel %vm435_vm7, 0.0, %v2175_v43  ;;  %v2178_v46 = vsel %vm435_vm7, %v2175_v43, %v2177_v44  ;;  %13902 = vmatpush1.msk.msra.mxu1 %vm445_vm4, %v883_v41  ;;  %960 = vmatprep.mubr.f32.mxu1 %v15534_v26  ;;  %v13916_v43 = vld [vmem:[%s18595_s1 + $0x24] sm:$0xf] }
  0xdb   : >> { %13955 = vmatmul.mubr.msk.f32.vlgmr.msra.gmra.mrb[0].mxu0 %vm441_vm5, %v13952_v42  ;;  %13957 = vmatprep.subr.msk.mxu0 %vm445_vm4, %v2178_v46 }
  0xdc   : >> { %13958 = vmatpush1.msk.msra.mxu0 %vm445_vm4, %v2180_v45  ;;  %2255 = vmatprep.mubr.f32.mxu0 %v15534_v26 }
  0xdd   : >> { %v972_v47 = vpop.permute.xlu0 %971  ;;  %v2265_v48 = vpop.permute.xlu1 %2264 }
  0xde   : >> { %v977_v49 = vsel %vm973_vm9, %v972_v47, 0.0  ;;  %v2271_v52 = vsel %vm606_vm10, 0.0, %v2265_v48 }
  0xdf   : >> { %v979_v51 = vmul.f32 %v15712_v11, %v977_v49  ;;  %v2272_v56 = vmul.f32 %v15702_v7, %v2271_v52 }
  0xe1   : >> { %v2267_v54 = vpop.permute.xlu0 %2266  ;;  %13903 = vmatmul.mubr.msk.f32.vlgmr.msra.gmra.mrb[0].mxu1 %vm441_vm5, %v13900_v50  ;;  %v970_v55 = vpop.permute.xlu1 %969  ;;  %13905 = vmatprep.subr.msk.mxu1 %vm445_vm4, %v979_v51 }
  0xe2   : >> { %v2268_v57 = vsel %vm606_vm10, %v2265_v48, %v2267_v54  ;;  %v974_v58 = vsel %vm973_vm9, %v970_v55, %v972_v47  ;;  %1055 = vmatprep.mubr.f32.mxu1 %v15534_v26  ;;  %v13972_v47 = vld [vmem:[%s18595_s1 + $0x5c] sm:$0xf] }
  0xe3   : >> { %v2273_v59 = vmul.f32 %v15714_v12, %v2268_v57  ;;  %v978_v60 = vmul.f32 %v15700_v6, %v974_v58  ;;  %13959 = vmatmul.mubr.msk.f32.vlgmr.msra.gmra.mrb[0].mxu0 %vm441_vm5, %v13956_v53  ;;  %v13976_v58 = vld [vmem:[%s18595_s1 + $0x60] sm:$0xf] }
  0xe4   : >> { %2349 = vmatprep.mubr.f32.mxu0 %v15534_v26 }
  0xe5   : >> { %13906 = vmatpush1.msk.msra.mxu1 %vm445_vm4, %v978_v60  ;;  %13961 = vmatprep.subr.msk.mxu0 %vm445_vm4, %v2273_v59  ;;  %v2359_v61 = vpop.permute.xlu0 %2358  ;;  %v2361_v62 = vpop.permute.xlu1 %2360 }
  0xe6   : >> { %13962 = vmatpush1.msk.msra.mxu0 %vm445_vm4, %v2272_v56  ;;  %v2365_v63 = vsel %vm701_vm12, 0.0, %v2359_v61  ;;  %v2362_v1 = vsel %vm701_vm12, %v2359_v61, %v2361_v62  ;;  %v13920_v56 = vld [vmem:[%s18595_s1 + $0x28] sm:$0xf] }
  0xe7   : >> { %v2367_v2 = vmul.f32 %v15712_v11, %v2362_v1  ;;  %v2366_v3 = vmul.f32 %v15700_v6, %v2365_v63 }
  0xe9   : >> { %13907 = vmatmul.mubr.msk.f32.vlgmr.msra.gmra.mrb[0].mxu1 %vm441_vm5, %v13904_v0  ;;  %v1067_v5 = vpop.permute.xlu0 %1066  ;;  %13965 = vmatprep.subr.msk.mxu0 %vm445_vm4, %v2367_v2  ;;  %v1065_v8 = vpop.permute.xlu1 %1064 }
  0xea   : >> { %v1071_v9 = vsel %vm1068_vm11, %v1067_v5, 0.0  ;;  %v1069_v10 = vsel %vm1068_vm11, %v1065_v8, %v1067_v5  ;;  %1146 = vmatprep.mubr.f32.mxu1 %v15534_v26 }
  0xeb   : >> { %13963 = vmatmul.mubr.msk.f32.vlgmr.msra.gmra.mrb[0].mxu0 %vm441_vm5, %v13960_v4  ;;  %13909 = vmatprep.subr.msk.mxu1 %vm445_vm4, %v1071_v9  ;;  %v13924_v4 = vld [vmem:[%s18595_s1 + $0x2c] sm:$0xf] }
  0xec   : >> { %13966 = vmatpush1.msk.msra.mxu0 %vm445_vm4, %v2366_v3  ;;  %13910 = vmatpush1.msk.msra.mxu1 %vm445_vm4, %v1069_v10  ;;  %v13980_v10 = vld [vmem:[%s18595_s1 + $0x64] sm:$0xf] }
  0xed   : >> { %2443 = vmatprep.mubr.f32.mxu0 %v15534_v26  ;;  %v1158_v13 = vpop.permute.xlu0 %1157  ;;  %v1156_v14 = vpop.permute.xlu1 %1155  ;;  %13969 = vmatprep.subr.msk.mxu0 %vm445_vm4, %v15782_v33 }
  0xee   : >> { %v1163_v16 = vsel %vm1159_vm13, %v1158_v13, 0.0  ;;  %v1160_v17 = vsel %vm1159_vm13, %v1156_v14, %v1158_v13  ;;  %v13928_v14 = vld [vmem:[%s18595_s1 + $0x30] sm:$0xf] }
  0xef   : >> { %v1165_v18 = vmul.f32 %v15714_v12, %v1163_v16  ;;  %v1164_v19 = vmul.f32 %v15702_v7, %v1160_v17 }
  0xf1   : >> { %13911 = vmatmul.mubr.msk.f32.vlgmr.msra.gmra.mrb[0].mxu1 %vm441_vm5, %v13908_v15  ;;  %13913 = vmatprep.subr.msk.mxu1 %vm445_vm4, %v1165_v18  ;;  %v1253_v33 = vpop.permute.xlu0 %1252  ;;  %v1255_v21 = vpop.permute.xlu1 %1254  ;;  %v13984_v15 = vld [vmem:[%s18595_s1 + $0x68] sm:$0xf] }
  0xf2   : >> { %13914 = vmatpush1.msk.msra.mxu1 %vm445_vm4, %v1164_v19  ;;  %1241 = vmatprep.mubr.f32.mxu1 %v15534_v26  ;;  %v1256_v22 = vsel %vm423_vm8, %v1253_v33, %v1255_v21  ;;  %v1259_v23 = vsel %vm423_vm8, 0.0, %v1253_v33  ;;  %v2906_v19 = vstv %s15690_s20  ;;  %v2909_v33 = vstv %s15696_s22 }
  0xf3   : >> { %13967 = vmatmul.mubr.msk.f32.vlgmr.msra.gmra.mrb[0].mxu0 %vm441_vm5, %v13964_v20  ;;  %v1261_v24 = vmul.f32 %v15712_v11, %v1256_v22  ;;  %v1260_v29 = vmul.f32 %v15700_v6, %v1259_v23 }
  0xf4   : >> { %13970 = vmatpush1.msk.msra.mxu0 %vm445_vm4, %v15779_v32  ;;  %2525 = vmatprep.mubr.f32.mxu0 %v15534_v26  ;;  %v13968_v32 = vld [vmem:[%s18595_s1 + $0x58] sm:$0xf] }
  0xf5   : >> { %v2537_v25 = vpop.permute.xlu0 %2536  ;;  %13917 = vmatprep.subr.msk.mxu1 %vm445_vm4, %v1261_v24  ;;  %v2535_v27 = vpop.permute.xlu1 %2534 }
  0xf6   : >> { %v2541_v34 = vsel %vm878_vm6, %v2537_v25, 0.0  ;;  %v2538_v31 = vsel %vm878_vm6, %v2535_v27, %v2537_v25 }
  0xf7   : >> { %v2543_v35 = vmul.f32 %v15714_v12, %v2541_v34  ;;  %v2542_v36 = vmul.f32 %v15702_v7, %v2538_v31 }
  0xf9   : >> { %13915 = vmatmul.mubr.msk.f32.vlgmr.msra.gmra.mrb[0].mxu1 %vm441_vm5, %v13912_v30  ;;  %v2631_v37 = vpop.permute.xlu0 %2630  ;;  %13973 = vmatprep.subr.msk.mxu0 %vm445_vm4, %v2543_v35  ;;  %v2629_v38 = vpop.permute.xlu1 %2628 }
  0xfa   : >> { %13918 = vmatpush1.msk.msra.mxu1 %vm445_vm4, %v1260_v29  ;;  %v2635_v39 = vsel %vm973_vm9, %v2631_v37, 0.0  ;;  %1337 = vmatprep.mubr.f32.mxu1 %v15534_v26  ;;  %v2632_v40 = vsel %vm973_vm9, %v2629_v38, %v2631_v37 }
  0xfb   : >> { %13971 = vmatmul.mubr.msk.f32.vlgmr.msra.gmra.mrb[0].mxu0 %vm441_vm5, %v13968_v32  ;;  %v2637_v28 = vmul.f32 %v15712_v11, %v2635_v39  ;;  %v2636_v46 = vmul.f32 %v15700_v6, %v2632_v40 }
  0xfc   : >> { %13974 = vmatpush1.msk.msra.mxu0 %vm445_vm4, %v2542_v36  ;;  %2619 = vmatprep.mubr.f32.mxu0 %v15534_v26 }
  0xfd   : >> { %v1347_v41 = vpop.permute.xlu0 %1346  ;;  %13977 = vmatprep.subr.msk.mxu0 %vm445_vm4, %v2637_v28  ;;  %v1349_v42 = vpop.permute.xlu1 %1348 }
  0xfe   : >> { %v1350_v44 = vsel %vm435_vm7, %v1347_v41, %v1349_v42  ;;  %v1352_v45 = vsel %vm435_vm7, 0.0, %v1347_v41 }
  0xff   : >> { %13921 = vmatprep.subr.msk.mxu1 %vm445_vm4, %v1350_v44 }
 0x101   : >> { %13919 = vmatmul.mubr.msk.f32.vlgmr.msra.gmra.mrb[0].mxu1 %vm441_vm5, %v13916_v43  ;;  %v1437_v48 = vpop.permute.xlu0 %1436  ;;  %v1439_v49 = vpop.permute.xlu1 %1438 }
 0x102   : >> { %13922 = vmatpush1.msk.msra.mxu1 %vm445_vm4, %v1352_v45  ;;  %1427 = vmatprep.mubr.f32.mxu1 %v15534_v26  ;;  %v1440_v50 = vsel %vm606_vm10, %v1437_v48, %v1439_v49  ;;  %v1443_v51 = vsel %vm606_vm10, 0.0, %v1437_v48 }
 0x103   : >> { %13975 = vmatmul.mubr.msk.f32.vlgmr.msra.gmra.mrb[0].mxu0 %vm441_vm5, %v13972_v47  ;;  %v1445_v52 = vmul.f32 %v15714_v12, %v1440_v50  ;;  %v1444_v55 = vmul.f32 %v15702_v7, %v1443_v51 }
 0x104   : >> { %13978 = vmatpush1.msk.msra.mxu0 %vm445_vm4, %v2636_v46  ;;  %2713 = vmatprep.mubr.f32.mxu0 %v15534_v26 }
 0x105   : >> { %v2725_v53 = vpop.permute.xlu0 %2724  ;;  %13925 = vmatprep.subr.msk.mxu1 %vm445_vm4, %v1445_v52  ;;  %v2723_v54 = vpop.permute.xlu1 %2722 }
 0x106   : >> { %v2728_v57 = vsel %vm1068_vm11, %v2725_v53, 0.0  ;;  %v2726_v59 = vsel %vm1068_vm11, %v2723_v54, %v2725_v53 }
 0x107   : >> { %13981 = vmatprep.subr.msk.mxu0 %vm445_vm4, %v2728_v57 }
 0x109   : >> { %13923 = vmatmul.mubr.msk.f32.vlgmr.msra.gmra.mrb[0].mxu1 %vm441_vm5, %v13920_v56  ;;  %v1531_v60 = vpop.permute.xlu0 %1530  ;;  %v1533_v61 = vpop.permute.xlu1 %1532 }
 0x10a   : >> { %13926 = vmatpush1.msk.msra.mxu1 %vm445_vm4, %v1444_v55  ;;  %1521 = vmatprep.mubr.f32.mxu1 %v15534_v26  ;;  %v1534_v62 = vsel %vm701_vm12, %v1531_v60, %v1533_v61  ;;  %v1537_v63 = vsel %vm701_vm12, 0.0, %v1531_v60 }
 0x10b   : >> { %13979 = vmatmul.mubr.msk.f32.vlgmr.msra.gmra.mrb[0].mxu0 %vm441_vm5, %v13976_v58  ;;  %v1539_v0 = vmul.f32 %v15712_v11, %v1534_v62  ;;  %v1538_v3 = vmul.f32 %v15700_v6, %v1537_v63 }
 0x10c   : >> { %13982 = vmatpush1.msk.msra.mxu0 %vm445_vm4, %v2726_v59  ;;  %2803 = vmatprep.mubr.f32.mxu0 %v15534_v26 }
 0x10d   : >> { %v2815_v1 = vpop.permute.xlu0 %2814  ;;  %13929 = vmatprep.subr.msk.mxu1 %vm445_vm4, %v1539_v0  ;;  %v2813_v2 = vpop.permute.xlu1 %2812 }
 0x10e   : >> { %v2819_v5 = vsel %vm1159_vm13, %v2815_v1, 0.0  ;;  %v2816_v8 = vsel %vm1159_vm13, %v2813_v2, %v2815_v1 }
 0x10f   : >> { %v2821_v9 = vmul.f32 %v15714_v12, %v2819_v5  ;;  %v2820_v13 = vmul.f32 %v15702_v7, %v2816_v8 }
 0x111   : >> { %13927 = vmatmul.mubr.msk.f32.vlgmr.msra.gmra.mrb[0].mxu1 %vm441_vm5, %v13924_v4  ;;  %13985 = vmatprep.subr.msk.mxu0 %vm445_vm4, %v2821_v9 }
 0x112   : >> { %13930 = vmatpush1.msk.msra.mxu1 %vm445_vm4, %v1538_v3  ;;  %1615 = vmatprep.mubr.f32.mxu1 %v15534_v26 }
 0x113   : >> { %13983 = vmatmul.mubr.msk.f32.vlgmr.msra.gmra.mrb[0].mxu0 %vm441_vm5, %v13980_v10 }
 0x114   : >> { %13986 = vmatpush1.msk.msra.mxu0 %vm445_vm4, %v2820_v13  ;;  %2897 = vmatprep.mubr.f32.mxu0 %v15534_v26 }
 0x119   : >> { %13931 = vmatmul.mubr.msk.f32.vlgmr.msra.gmra.mrb[0].mxu1 %vm441_vm5, %v13928_v14 }
 0x11b   : >> { %13987 = vmatmul.mubr.msk.f32.vlgmr.msra.gmra.mrb[0].mxu0 %vm441_vm5, %v13984_v15 }
 0x1ec   : >> { %v1617_v16 = vpop.f32.mrb[0].mxu1 }
 0x1ed   : >> { %v1619_v17 = vpop.f32.mrb[1].mxu1 }
 0x1ee   : >> { %v2899_v18 = vpop.f32.mrb[0].mxu0 }
 0x1ef   : >> { %v14821_v20 = vadd.f32 %v2899_v18, %v1617_v16  ;;  %v2901_v26 = vpop.f32.mrb[1].mxu0 }
 0x1f0   : >> { %v14822_v21 = vadd.f32 %v2901_v26, %v1619_v17 }
 0x1f1   : >> { %v2907_v22 = vmul.f32 %v14821_v20, %v2906_v19 }
 0x1f2   : >> { %v2908_v23 = vmul.f32 %v14822_v21, %v2906_v19 }
 0x1f3   : >> { %v2910_v24 = vadd.f32 %v2909_v33, %v2907_v22 }
 0x1f4   : >> { %v2911_v25 = vadd.f32 %v2909_v33, %v2908_v23  ;;  %398 = sbr.rel (!%p396_p10) target bundleno = 56 (0x38), region = 272 }
 0x1f5   : >> { %v2912_v27 = vmax.f32 %v2910_v24, 0.0 }
 0x1f6   : >> { %v2913_v29 = vmax.f32 %v2911_v25, 0.0 }
 0x1f7   : >> { %v2916_v30 = vrot.slane %v2912_v27, 4 }
 0x1f8   : >> { %v2917_v34 = vrot.slane %v2913_v29, 4 }
 0x1f9   : >> { %13988 = vst [vmem:[%s15730_s17 + $0x30] sm:$0xf0] %v2916_v30 }
 0x1fa   : >> { %13989 = vst [vmem:[%s15730_s17 + $0x38] sm:$0xf0] %v2917_v34 }
 0x1fb LB: >> { %v15543_v31 = vmov 0.0   ;;  %s14424_s17 = smul.u32 48, %s15518_s29  ;;  %s15544_s20 = smov 127   ;;  %vm2972_vm14 = vcmask 64512   ;;  %v14027_v36 = vld [vmem:[%s18596_s2 + $0x34] sm:$0xf]  ;;  %vm16246_vm15 = vmneg %vm435_vm7  ;;  %s15518_s29 = sphi %s16123_s29, %s2929_s29  }
 0x1fc   : >> { %4152 = vmatprep.mubr.f32.mxu0 %v15543_v31  ;;  %3040 = vmatprep.mubr.f32.mxu1 %v15543_v31  ;;  %s15545_s22 = smov 16   ;;  %s15546_s18 = smov 17   ;;  %v13997_v49 = vld [vmem:[%s18596_s2 + $0x4] sm:$0xf]  ;;  %v14029_v51 = vld [vmem:[%s18596_s2 + $0x38] sm:$0xf] }
 0x1fd   : >> { %s16131_s15 = scalar_lea.vmem [#allocation2], %s14424_s17  ;;  %s15547_s14 = smov 113   ;;  %v2960_v62 = vld [vmem:[%s18596_s2] sm:$0xf]  ;;  %v14031_v1 = vld [vmem:[%s18596_s2 + $0x3c] sm:$0xf] }
 0x1fe   : >> { %s15548_s23 = smov 15   ;;  %s15549_s17 = smov 112   ;;  %v14002_v15 = vld [vmem:[%s18596_s2 + $0x8] sm:$0xf]  ;;  %v14033_v16 = vld [vmem:[%s18596_s2 + $0x40] sm:$0xf] }
 0x1ff   : >> { %s15550_s8 = smov 1   ;;  %s15551_s19 = smov 111   ;;  %v14004_v25 = vld [vmem:[%s18596_s2 + $0xc] sm:$0xf]  ;;  %v14036_v30 = vld [vmem:[%s18596_s2 + $0x44] sm:$0xf] }
 0x200   : >> { %s2929_s29 = sadd.s32 1, %s15518_s29  }
 0x201   : >> { %v16134_v35 = vld [vmem:[%s16131_s15 + $0x38] sm:$0xff]  ;;  %v16137_v32 = vld [vmem:[%s16131_s15] sm:$0xff]  ;;  %v13993_v37 = vld [vmem:[%s16131_s15 + $0x30] sm:$0xff]  ;;  %p2926_p11 = scmp.ge.s32.totalorder %s2929_s29, 8  }
 0x202   : >> { %4163 = vrot.lane.b32.xlu0 %v16134_v35, %s15544_s20  ;;  %2961 = vrot.lane.b32.xlu1 %v16137_v32, %s15545_s22  ;;  %v16148_v38 = vld [vmem:[%s16131_s15 + $0x8] sm:$0xff]  ;;  %v16178_v39 = vld [vmem:[%s16131_s15 + $0x60] sm:$0xff] }
 0x203   : >> { %4088 = vmatprep.subr.mxu0 %v16134_v35  ;;  %v16181_v28 = vld [vmem:[%s16131_s15 + $0x68] sm:$0xff] }
 0x204   : >> { %4089 = vmatpush1.msra.mxu0 %v13993_v37 }
 0x205   : >> { %14028 = vmatmul.mubr.msk.f32.vlgmr.msra.gmra.mrb[0].mxu0 %vm2972_vm14, %v14027_v36 }
 0x206   : >> { %4161 = vrot.lane.b32.xlu0 %v13993_v37, %s15544_s20  ;;  %2963 = vrot.lane.b32.xlu1 %v16148_v38, %s15545_s22 }
 0x207   : >> { %4240 = vmatprep.mubr.f32.mxu0 %v15543_v31 }
 0x20a   : >> { %2949 = vrot.lane.b32.xlu0 %v16137_v32, %s15546_s18  ;;  %2951 = vrot.lane.b32.xlu1 %v16148_v38, %s15546_s18 }
 0x20e   : >> { %4251 = vrot.lane.b32.xlu0 %v16134_v35, %s15547_s14  ;;  %4249 = vrot.lane.b32.xlu1 %v13993_v37, %s15547_s14 }
 0x212   : >> { %3121 = vrot.lane.b32.xlu0 %v16137_v32, %s15548_s23  ;;  %3123 = vrot.lane.b32.xlu1 %v16148_v38, %s15548_s23 }
 0x216   : >> { %4337 = vrot.lane.b32.xlu0 %v13993_v37, %s15549_s17  ;;  %4339 = vrot.lane.b32.xlu1 %v16134_v35, %s15549_s17 }
 0x21a   : >> { %3210 = vrot.lane.b32.xlu0 %v16137_v32, %s15550_s8  ;;  %3212 = vrot.lane.b32.xlu1 %v16148_v38, %s15550_s8 }
 0x21e   : >> { %4425 = vrot.lane.b32.xlu0 %v16134_v35, %s15551_s19  ;;  %4423 = vrot.lane.b32.xlu1 %v13993_v37, %s15551_s19 }
 0x222   : >> { %4513 = vrot.lane.b32.xlu0 %v16178_v39, %s15546_s18  ;;  %4515 = vrot.lane.b32.xlu1 %v16181_v28, %s15546_s18 }
 0x226   : >> { %3379 = vrot.lane.b32.xlu0 %v16148_v38, %s15544_s20  ;;  %3377 = vrot.lane.b32.xlu1 %v16137_v32, %s15544_s20 }
 0x22a   : >> { %4601 = vrot.lane.b32.xlu0 %v16178_v39, %s15545_s22  ;;  %4603 = vrot.lane.b32.xlu1 %v16181_v28, %s15545_s22 }
 0x22e   : >> { %3468 = vrot.lane.b32.xlu0 %v16148_v38, %s15547_s14  ;;  %4687 = vrot.lane.b32.xlu1 %v16178_v39, %s15548_s23 }
 0x232   : >> { %4689 = vrot.lane.b32.xlu0 %v16181_v28, %s15548_s23  ;;  %3466 = vrot.lane.b32.xlu1 %v16137_v32, %s15547_s14 }
 0x236   : >> { %4775 = vrot.lane.b32.xlu0 %v16178_v39, %s15550_s8  ;;  %4777 = vrot.lane.b32.xlu1 %v16181_v28, %s15550_s8 }
 0x23a   : >> { %3555 = vrot.lane.b32.xlu0 %v16137_v32, %s15549_s17  ;;  %3557 = vrot.lane.b32.xlu1 %v16148_v38, %s15549_s17 }
 0x23e   : >> { %3644 = vrot.lane.b32.xlu0 %v16148_v38, %s15551_s19  ;;  %3642 = vrot.lane.b32.xlu1 %v16137_v32, %s15551_s19 }
 0x242   : >> { %3733 = vrot.lane.b32.xlu0 %v13993_v37, %s15546_s18  ;;  %3735 = vrot.lane.b32.xlu1 %v16134_v35, %s15546_s18 }
 0x246   : >> { %4943 = vrot.lane.b32.xlu0 %v16181_v28, %s15544_s20  ;;  %4941 = vrot.lane.b32.xlu1 %v16178_v39, %s15544_s20 }
 0x24a   : >> { %5031 = vrot.lane.b32.xlu0 %v16181_v28, %s15547_s14  ;;  %5029 = vrot.lane.b32.xlu1 %v16178_v39, %s15547_s14 }
 0x24e   : >> { %3821 = vrot.lane.b32.xlu0 %v13993_v37, %s15545_s22  ;;  %3823 = vrot.lane.b32.xlu1 %v16134_v35, %s15545_s22 }
 0x252   : >> { %3907 = vrot.lane.b32.xlu0 %v13993_v37, %s15548_s23  ;;  %3909 = vrot.lane.b32.xlu1 %v16134_v35, %s15548_s23  ;;  %s16474_s23 = sld [smem:[#allocation3 + $0x100]] (%p2926_p11) }
 0x256   : >> { %5117 = vrot.lane.b32.xlu0 %v16178_v39, %s15549_s17  ;;  %5119 = vrot.lane.b32.xlu1 %v16181_v28, %s15549_s17  ;;  %s16476_s17 = sld [smem:[#allocation3 + $0x101]] (%p2926_p11) }
 0x25a   : >> { %3995 = vrot.lane.b32.xlu0 %v13993_v37, %s15550_s8  ;;  %3997 = vrot.lane.b32.xlu1 %v16134_v35, %s15550_s8  ;;  %s16478_s8 = smov (%p2926_p11), 0  }
 0x25e   : >> { %5205 = vrot.lane.b32.xlu0 %v16181_v28, %s15551_s19  ;;  %5203 = vrot.lane.b32.xlu1 %v16178_v39, %s15551_s19 }
 0x274   : >> { %v4164_v40 = vpop.permute.xlu0 %4163  ;;  %v2962_v41 = vpop.permute.xlu1 %2961 }
 0x275   : >> { %v4168_v42 = vsel %vm878_vm6, %v4164_v40, 0.0 }
 0x276   : >> { %v4170_v43 = vmul.f32 %v15714_v12, %v4168_v42 }
 0x278   : >> { %v4162_v44 = vpop.permute.xlu0 %4161  ;;  %4176 = vmatprep.subr.mxu0 %v4170_v43  ;;  %v2964_v45 = vpop.permute.xlu1 %2963 }
 0x279   : >> { %v4165_v47 = vsel %vm878_vm6, %v4162_v44, %v4164_v40  ;;  %v2966_v48 = vsel %vm435_vm7, %v2962_v41, %v2964_v45 }
 0x27a   : >> { %v4169_v50 = vmul.f32 %v15702_v7, %v4165_v47  ;;  %2976 = vmatprep.subr.mxu1 %v2966_v48  ;;  %v14038_v48 = vld [vmem:[%s18596_s2 + $0x48] sm:$0xf] }
 0x27b   : >> { %13999 = vmatpush1.msk.msra.mxu1 %vm16246_vm15, %v2962_v41 }
 0x27c   : >> { %4177 = vmatpush1.msra.mxu0 %v4169_v50  ;;  %v2950_v52 = vpop.permute.xlu0 %2949  ;;  %14000 = vmatmul.mubr.msk.f32.vlgmr.msra.gmra.mrb[0].mxu1 %vm2972_vm14, %v13997_v49  ;;  %v2952_v53 = vpop.permute.xlu1 %2951 }
 0x27d   : >> { %v2957_v54 = vsel %vm423_vm8, 0.0, %v2950_v52  ;;  %v2954_v55 = vsel %vm423_vm8, %v2950_v52, %v2952_v53  ;;  %14030 = vmatmul.mubr.msk.f32.vlgmr.msra.gmra.mrb[0].mxu0 %vm2972_vm14, %v14029_v51  ;;  %3114 = vmatprep.mubr.f32.mxu1 %v15543_v31 }
 0x27e   : >> { %v2958_v56 = vmul.f32 %v15700_v6, %v2957_v54  ;;  %v2959_v57 = vmul.f32 %v15712_v11, %v2954_v55  ;;  %4328 = vmatprep.mubr.f32.mxu0 %v15543_v31  ;;  %v14008_v55 = vld [vmem:[%s18596_s2 + $0x14] sm:$0xf] }
 0x280   : >> { %v4252_v58 = vpop.permute.xlu0 %4251  ;;  %3050 = vmatprep.subr.mxu1 %v2959_v57  ;;  %v4250_v59 = vpop.permute.xlu1 %4249 }
 0x281   : >> { %v4256_v60 = vsel %vm973_vm9, %v4252_v58, 0.0  ;;  %v4253_v61 = vsel %vm973_vm9, %v4250_v59, %v4252_v58  ;;  %3051 = vmatpush1.msra.mxu1 %v2958_v56  ;;  %v14040_v58 = vld [vmem:[%s18596_s2 + $0x4c] sm:$0xf] }
 0x282   : >> { %v4258_v63 = vmul.f32 %v15712_v11, %v4256_v60  ;;  %v4257_v0 = vmul.f32 %v15700_v6, %v4253_v61 }
 0x284   : >> { %4264 = vmatprep.subr.mxu0 %v4258_v63  ;;  %v3122_v2 = vpop.permute.xlu0 %3121  ;;  %14001 = vmatmul.mubr.msk.f32.vlgmr.msra.gmra.mrb[0].mxu1 %vm2972_vm14, %v2960_v62  ;;  %v3124_v3 = vpop.permute.xlu1 %3123 }
 0x285   : >> { %v3129_v4 = vsel %vm606_vm10, 0.0, %v3122_v2  ;;  %v3126_v5 = vsel %vm606_vm10, %v3122_v2, %v3124_v3  ;;  %4265 = vmatpush1.msra.mxu0 %v4257_v0  ;;  %3201 = vmatprep.mubr.f32.mxu1 %v15543_v31 }
 0x286   : >> { %v3130_v8 = vmul.f32 %v15702_v7, %v3129_v4  ;;  %v3131_v9 = vmul.f32 %v15714_v12, %v3126_v5  ;;  %14032 = vmatmul.mubr.msk.f32.vlgmr.msra.gmra.mrb[0].mxu0 %vm2972_vm14, %v14031_v1  ;;  %v14010_v4 = vld [vmem:[%s18596_s2 + $0x18] sm:$0xf] }
 0x287   : >> { %4414 = vmatprep.mubr.f32.mxu0 %v15543_v31 }
 0x288   : >> { %v4338_v10 = vpop.permute.xlu0 %4337  ;;  %3137 = vmatprep.subr.mxu1 %v3131_v9  ;;  %v4340_v13 = vpop.permute.xlu1 %4339 }
 0x289   : >> { %v4341_v14 = vsel %vm1068_vm11, %v4338_v10, %v4340_v13  ;;  %3138 = vmatpush1.msra.mxu1 %v3130_v8  ;;  %14034 = vmatprep.subr.msk.mxu0 %vm1068_vm11, %v4340_v13  ;;  %v14044_v13 = vld [vmem:[%s18596_s2 + $0x50] sm:$0xf] }
 0x28a   : >> { %4351 = vmatpush1.msra.mxu0 %v4341_v14 }
 0x28c   : >> { %v3211_v17 = vpop.permute.xlu0 %3210  ;;  %14003 = vmatmul.mubr.msk.f32.vlgmr.msra.gmra.mrb[0].mxu1 %vm2972_vm14, %v14002_v15  ;;  %v3213_v18 = vpop.permute.xlu1 %3212 }
 0x28d   : >> { %v3218_v19 = vsel %vm701_vm12, 0.0, %v3211_v17  ;;  %v3215_v20 = vsel %vm701_vm12, %v3211_v17, %v3213_v18  ;;  %3290 = vmatprep.mubr.f32.mxu1 %v15543_v31 }
 0x28e   : >> { %v3219_v26 = vmul.f32 %v15700_v6, %v3218_v19  ;;  %v3220_v33 = vmul.f32 %v15712_v11, %v3215_v20  ;;  %14035 = vmatmul.mubr.msk.f32.vlgmr.msra.gmra.mrb[0].mxu0 %vm2972_vm14, %v14033_v16  ;;  %v14012_v19 = vld [vmem:[%s18596_s2 + $0x1c] sm:$0xf] }
 0x28f   : >> { %4502 = vmatprep.mubr.f32.mxu0 %v15543_v31 }
 0x290   : >> { %v4426_v21 = vpop.permute.xlu0 %4425  ;;  %3226 = vmatprep.subr.mxu1 %v3220_v33  ;;  %v4424_v22 = vpop.permute.xlu1 %4423 }
 0x291   : >> { %v4430_v23 = vsel %vm1159_vm13, %v4426_v21, 0.0  ;;  %v4427_v24 = vsel %vm1159_vm13, %v4424_v22, %v4426_v21  ;;  %3227 = vmatpush1.msra.mxu1 %v3219_v26  ;;  %v14046_v22 = vld [vmem:[%s18596_s2 + $0x54] sm:$0xf] }
 0x292   : >> { %v4432_v27 = vmul.f32 %v15714_v12, %v4430_v23  ;;  %v4431_v29 = vmul.f32 %v15702_v7, %v4427_v24  ;;  %3304 = vmatprep.subr.mxu1 %v16148_v38 }
 0x294   : >> { %v4514_v34 = vpop.permute.xlu0 %4513  ;;  %14005 = vmatmul.mubr.msk.f32.vlgmr.msra.gmra.mrb[0].mxu1 %vm2972_vm14, %v14004_v25  ;;  %4438 = vmatprep.subr.mxu0 %v4432_v27  ;;  %v4516_v35 = vpop.permute.xlu1 %4515 }
 0x295   : >> { %v4520_v36 = vsel %vm423_vm8, 0.0, %v4514_v34  ;;  %v4517_v37 = vsel %vm423_vm8, %v4514_v34, %v4516_v35  ;;  %4439 = vmatpush1.msra.mxu0 %v4431_v29  ;;  %3305 = vmatpush1.msra.mxu1 %v16137_v32  ;;  %v14006_v32 = vld [vmem:[%s18596_s2 + $0x10] sm:$0xf]  ;;  %v14015_v35 = vld [vmem:[%s18596_s2 + $0x20] sm:$0xf] }
 0x296   : >> { %v4521_v40 = vmul.f32 %v15700_v6, %v4520_v36  ;;  %v4522_v38 = vmul.f32 %v15712_v11, %v4517_v37  ;;  %14037 = vmatmul.mubr.msk.f32.vlgmr.msra.gmra.mrb[0].mxu0 %vm2972_vm14, %v14036_v30  ;;  %3368 = vmatprep.mubr.f32.mxu1 %v15543_v31 }
 0x297   : >> { %4592 = vmatprep.mubr.f32.mxu0 %v15543_v31 }
 0x298   : >> { %v3380_v41 = vpop.permute.xlu0 %3379  ;;  %v3378_v42 = vpop.permute.xlu1 %3377  ;;  %4528 = vmatprep.subr.mxu0 %v4522_v38 }
 0x299   : >> { %v3385_v43 = vsel %vm878_vm6, %v3380_v41, 0.0  ;;  %v3382_v44 = vsel %vm878_vm6, %v3378_v42, %v3380_v41  ;;  %4529 = vmatpush1.msra.mxu0 %v4521_v40 }
 0x29a   : >> { %v3387_v45 = vmul.f32 %v15714_v12, %v3385_v43  ;;  %v3386_v47 = vmul.f32 %v15702_v7, %v3382_v44 }
 0x29c   : >> { %v4602_v49 = vpop.permute.xlu0 %4601  ;;  %14007 = vmatmul.mubr.msk.f32.vlgmr.msra.gmra.mrb[0].mxu1 %vm2972_vm14, %v14006_v32  ;;  %v4604_v50 = vpop.permute.xlu1 %4603  ;;  %3393 = vmatprep.subr.mxu1 %v3387_v45 }
 0x29d   : >> { %v4605_v51 = vsel %vm435_vm7, %v4602_v49, %v4604_v50  ;;  %3394 = vmatpush1.msra.mxu1 %v3386_v47  ;;  %3457 = vmatprep.mubr.f32.mxu1 %v15543_v31 }
 0x29e   : >> { %14039 = vmatmul.mubr.msk.f32.vlgmr.msra.gmra.mrb[0].mxu0 %vm2972_vm14, %v14038_v48  ;;  %4614 = vmatprep.subr.mxu0 %v4605_v51  ;;  %v14017_v48 = vld [vmem:[%s18596_s2 + $0x24] sm:$0xf]  ;;  %v14050_v51 = vld [vmem:[%s18596_s2 + $0x5c] sm:$0xf] }
 0x29f   : >> { %14042 = vmatpush1.msk.msra.mxu0 %vm16246_vm15, %v4602_v49  ;;  %4678 = vmatprep.mubr.f32.mxu0 %v15543_v31 }
 0x2a0   : >> { %v3469_v52 = vpop.permute.xlu0 %3468  ;;  %v4688_v53 = vpop.permute.xlu1 %4687 }
 0x2a1   : >> { %v3474_v54 = vsel %vm973_vm9, %v3469_v52, 0.0  ;;  %v4694_v57 = vsel %vm606_vm10, 0.0, %v4688_v53 }
 0x2a2   : >> { %v3476_v56 = vmul.f32 %v15712_v11, %v3474_v54  ;;  %v4695_v61 = vmul.f32 %v15702_v7, %v4694_v57 }
 0x2a4   : >> { %v4690_v59 = vpop.permute.xlu0 %4689  ;;  %14009 = vmatmul.mubr.msk.f32.vlgmr.msra.gmra.mrb[0].mxu1 %vm2972_vm14, %v14008_v55  ;;  %v3467_v60 = vpop.permute.xlu1 %3466  ;;  %3482 = vmatprep.subr.mxu1 %v3476_v56 }
 0x2a5   : >> { %v4691_v62 = vsel %vm606_vm10, %v4688_v53, %v4690_v59  ;;  %v3471_v63 = vsel %vm973_vm9, %v3467_v60, %v3469_v52  ;;  %3546 = vmatprep.mubr.f32.mxu1 %v15543_v31  ;;  %v14019_v60 = vld [vmem:[%s18596_s2 + $0x28] sm:$0xf] }
 0x2a6   : >> { %v4696_v0 = vmul.f32 %v15714_v12, %v4691_v62  ;;  %v3475_v1 = vmul.f32 %v15700_v6, %v3471_v63  ;;  %14043 = vmatmul.mubr.msk.f32.vlgmr.msra.gmra.mrb[0].mxu0 %vm2972_vm14, %v14040_v58 }
 0x2a7   : >> { %4766 = vmatprep.mubr.f32.mxu0 %v15543_v31 }
 0x2a8   : >> { %3483 = vmatpush1.msra.mxu1 %v3475_v1  ;;  %4702 = vmatprep.subr.mxu0 %v4696_v0  ;;  %v4776_v2 = vpop.permute.xlu0 %4775  ;;  %v4778_v3 = vpop.permute.xlu1 %4777 }
 0x2a9   : >> { %4703 = vmatpush1.msra.mxu0 %v4695_v61  ;;  %v4782_v5 = vsel %vm701_vm12, 0.0, %v4776_v2  ;;  %v4779_v8 = vsel %vm701_vm12, %v4776_v2, %v4778_v3  ;;  %v14052_v61 = vld [vmem:[%s18596_s2 + $0x60] sm:$0xf] }
 0x2aa   : >> { %v4784_v9 = vmul.f32 %v15712_v11, %v4779_v8  ;;  %v4783_v10 = vmul.f32 %v15700_v6, %v4782_v5 }
 0x2ac   : >> { %14011 = vmatmul.mubr.msk.f32.vlgmr.msra.gmra.mrb[0].mxu1 %vm2972_vm14, %v14010_v4  ;;  %v3556_v14 = vpop.permute.xlu0 %3555  ;;  %v3558_v15 = vpop.permute.xlu1 %3557  ;;  %4790 = vmatprep.subr.mxu0 %v4784_v9  ;;  %v14023_v9 = vld [vmem:[%s18596_s2 + $0x2c] sm:$0xf] }
 0x2ad   : >> { %v3560_v16 = vsel %vm1068_vm11, %v3556_v14, %v3558_v15  ;;  %14013 = vmatprep.subr.msk.mxu1 %vm1068_vm11, %v3558_v15  ;;  %3633 = vmatprep.mubr.f32.mxu1 %v15543_v31  ;;  %v14054_v15 = vld [vmem:[%s18596_s2 + $0x64] sm:$0xf] }
 0x2ae   : >> { %14045 = vmatmul.mubr.msk.f32.vlgmr.msra.gmra.mrb[0].mxu0 %vm2972_vm14, %v14044_v13  ;;  %3570 = vmatpush1.msra.mxu1 %v3560_v16 }
 0x2af   : >> { %4791 = vmatpush1.msra.mxu0 %v4783_v10  ;;  %4854 = vmatprep.mubr.f32.mxu0 %v15543_v31 }
 0x2b0   : >> { %v3645_v17 = vpop.permute.xlu0 %3644  ;;  %v3643_v18 = vpop.permute.xlu1 %3642  ;;  %4868 = vmatprep.subr.mxu0 %v16181_v28 }
 0x2b1   : >> { %v3650_v20 = vsel %vm1159_vm13, %v3645_v17, 0.0  ;;  %v3647_v26 = vsel %vm1159_vm13, %v3643_v18, %v3645_v17  ;;  %v14025_v17 = vld [vmem:[%s18596_s2 + $0x30] sm:$0xf]  ;;  %v14057_v18 = vld [vmem:[%s18596_s2 + $0x68] sm:$0xf] }
 0x2b2   : >> { %v3652_v33 = vmul.f32 %v15714_v12, %v3650_v20  ;;  %v3651_v21 = vmul.f32 %v15702_v7, %v3647_v26 }
 0x2b4   : >> { %14014 = vmatmul.mubr.msk.f32.vlgmr.msra.gmra.mrb[0].mxu1 %vm2972_vm14, %v14012_v19  ;;  %v3734_v23 = vpop.permute.xlu0 %3733  ;;  %3658 = vmatprep.subr.mxu1 %v3652_v33  ;;  %v3736_v28 = vpop.permute.xlu1 %3735  ;;  %v5291_v33 = vstv %s16119_s9 }
 0x2b5   : >> { %v3737_v24 = vsel %vm423_vm8, %v3734_v23, %v3736_v28  ;;  %3659 = vmatpush1.msra.mxu1 %v3651_v21  ;;  %3722 = vmatprep.mubr.f32.mxu1 %v15543_v31  ;;  %v3740_v25 = vsel %vm423_vm8, 0.0, %v3734_v23 }
 0x2b6   : >> { %14047 = vmatmul.mubr.msk.f32.vlgmr.msra.gmra.mrb[0].mxu0 %vm2972_vm14, %v14046_v22  ;;  %v3742_v27 = vmul.f32 %v15712_v11, %v3737_v24  ;;  %v3741_v34 = vmul.f32 %v15700_v6, %v3740_v25  ;;  %v5294_v22 = vstv %s16121_s16 }
 0x2b7   : >> { %4869 = vmatpush1.msra.mxu0 %v16178_v39  ;;  %4932 = vmatprep.mubr.f32.mxu0 %v15543_v31  ;;  %v14048_v39 = vld [vmem:[%s18596_s2 + $0x58] sm:$0xf] }
 0x2b8   : >> { %v4944_v29 = vpop.permute.xlu0 %4943  ;;  %v4942_v30 = vpop.permute.xlu1 %4941  ;;  %3748 = vmatprep.subr.mxu1 %v3742_v27 }
 0x2b9   : >> { %v4948_v36 = vsel %vm878_vm6, %v4944_v29, 0.0  ;;  %v4945_v37 = vsel %vm878_vm6, %v4942_v30, %v4944_v29 }
 0x2ba   : >> { %v4950_v40 = vmul.f32 %v15714_v12, %v4948_v36  ;;  %v4949_v38 = vmul.f32 %v15702_v7, %v4945_v37 }
 0x2bc   : >> { %14016 = vmatmul.mubr.msk.f32.vlgmr.msra.gmra.mrb[0].mxu1 %vm2972_vm14, %v14015_v35  ;;  %v5032_v41 = vpop.permute.xlu0 %5031  ;;  %v5030_v42 = vpop.permute.xlu1 %5029  ;;  %4956 = vmatprep.subr.mxu0 %v4950_v40 }
 0x2bd   : >> { %3749 = vmatpush1.msra.mxu1 %v3741_v34  ;;  %v5036_v43 = vsel %vm973_vm9, %v5032_v41, 0.0  ;;  %3812 = vmatprep.mubr.f32.mxu1 %v15543_v31  ;;  %v5033_v32 = vsel %vm973_vm9, %v5030_v42, %v5032_v41 }
 0x2be   : >> { %14049 = vmatmul.mubr.msk.f32.vlgmr.msra.gmra.mrb[0].mxu0 %vm2972_vm14, %v14048_v39  ;;  %v5038_v44 = vmul.f32 %v15712_v11, %v5036_v43  ;;  %v5037_v50 = vmul.f32 %v15700_v6, %v5033_v32 }
 0x2bf   : >> { %4957 = vmatpush1.msra.mxu0 %v4949_v38  ;;  %5020 = vmatprep.mubr.f32.mxu0 %v15543_v31 }
 0x2c0   : >> { %v3822_v45 = vpop.permute.xlu0 %3821  ;;  %v3824_v47 = vpop.permute.xlu1 %3823  ;;  %5044 = vmatprep.subr.mxu0 %v5038_v44 }
 0x2c1   : >> { %v3825_v49 = vsel %vm435_vm7, %v3822_v45, %v3824_v47 }
 0x2c2   : >> { %3834 = vmatprep.subr.mxu1 %v3825_v49 }
 0x2c4   : >> { %14018 = vmatmul.mubr.msk.f32.vlgmr.msra.gmra.mrb[0].mxu1 %vm2972_vm14, %v14017_v48  ;;  %v3908_v52 = vpop.permute.xlu0 %3907  ;;  %v3910_v53 = vpop.permute.xlu1 %3909 }
 0x2c5   : >> { %14021 = vmatpush1.msk.msra.mxu1 %vm16246_vm15, %v3822_v45  ;;  %3898 = vmatprep.mubr.f32.mxu1 %v15543_v31  ;;  %v3911_v54 = vsel %vm606_vm10, %v3908_v52, %v3910_v53  ;;  %v3914_v55 = vsel %vm606_vm10, 0.0, %v3908_v52 }
 0x2c6   : >> { %14051 = vmatmul.mubr.msk.f32.vlgmr.msra.gmra.mrb[0].mxu0 %vm2972_vm14, %v14050_v51  ;;  %v3916_v56 = vmul.f32 %v15714_v12, %v3911_v54  ;;  %v3915_v59 = vmul.f32 %v15702_v7, %v3914_v55 }
 0x2c7   : >> { %5045 = vmatpush1.msra.mxu0 %v5037_v50  ;;  %5108 = vmatprep.mubr.f32.mxu0 %v15543_v31 }
 0x2c8   : >> { %v5118_v57 = vpop.permute.xlu0 %5117  ;;  %3922 = vmatprep.subr.mxu1 %v3916_v56  ;;  %v5120_v58 = vpop.permute.xlu1 %5119 }
 0x2c9   : >> { %14055 = vmatprep.subr.msk.mxu0 %vm1068_vm11, %v5120_v58  ;;  %v5121_v62 = vsel %vm1068_vm11, %v5118_v57, %v5120_v58 }
 0x2cc   : >> { %14022 = vmatmul.mubr.msk.f32.vlgmr.msra.gmra.mrb[0].mxu1 %vm2972_vm14, %v14019_v60  ;;  %v3996_v63 = vpop.permute.xlu0 %3995  ;;  %v3998_v0 = vpop.permute.xlu1 %3997 }
 0x2cd   : >> { %3923 = vmatpush1.msra.mxu1 %v3915_v59  ;;  %3986 = vmatprep.mubr.f32.mxu1 %v15543_v31  ;;  %v3999_v1 = vsel %vm701_vm12, %v3996_v63, %v3998_v0  ;;  %v4002_v2 = vsel %vm701_vm12, 0.0, %v3996_v63 }
 0x2ce   : >> { %14053 = vmatmul.mubr.msk.f32.vlgmr.msra.gmra.mrb[0].mxu0 %vm2972_vm14, %v14052_v61  ;;  %v4004_v3 = vmul.f32 %v15712_v11, %v3999_v1  ;;  %v4003_v8 = vmul.f32 %v15700_v6, %v4002_v2 }
 0x2cf   : >> { %5131 = vmatpush1.msra.mxu0 %v5121_v62  ;;  %5194 = vmatprep.mubr.f32.mxu0 %v15543_v31 }
 0x2d0   : >> { %v5206_v4 = vpop.permute.xlu0 %5205  ;;  %4010 = vmatprep.subr.mxu1 %v4004_v3  ;;  %v5204_v5 = vpop.permute.xlu1 %5203 }
 0x2d1   : >> { %v5210_v10 = vsel %vm1159_vm13, %v5206_v4, 0.0  ;;  %v5207_v13 = vsel %vm1159_vm13, %v5204_v5, %v5206_v4 }
 0x2d2   : >> { %v5212_v14 = vmul.f32 %v15714_v12, %v5210_v10  ;;  %v5211_v16 = vmul.f32 %v15702_v7, %v5207_v13 }
 0x2d4   : >> { %14024 = vmatmul.mubr.msk.f32.vlgmr.msra.gmra.mrb[0].mxu1 %vm2972_vm14, %v14023_v9  ;;  %5218 = vmatprep.subr.mxu0 %v5212_v14 }
 0x2d5   : >> { %4011 = vmatpush1.msra.mxu1 %v4003_v8  ;;  %4074 = vmatprep.mubr.f32.mxu1 %v15543_v31 }
 0x2d6   : >> { %14056 = vmatmul.mubr.msk.f32.vlgmr.msra.gmra.mrb[0].mxu0 %vm2972_vm14, %v14054_v15 }
 0x2d7   : >> { %5219 = vmatpush1.msra.mxu0 %v5211_v16  ;;  %5282 = vmatprep.mubr.f32.mxu0 %v15543_v31 }
 0x2dc   : >> { %14026 = vmatmul.mubr.msk.f32.vlgmr.msra.gmra.mrb[0].mxu1 %vm2972_vm14, %v14025_v17 }
 0x2de   : >> { %14058 = vmatmul.mubr.msk.f32.vlgmr.msra.gmra.mrb[0].mxu0 %vm2972_vm14, %v14057_v18 }
 0x3af   : >> { %v4076_v19 = vpop.f32.mrb[0].mxu1 }
 0x3b0   : >> { %v4078_v20 = vpop.f32.mrb[1].mxu1 }
 0x3b1   : >> { %v5284_v26 = vpop.f32.mrb[0].mxu0 }
 0x3b2   : >> { %v14873_v21 = vadd.f32 %v5284_v26, %v4076_v19  ;;  %v5286_v31 = vpop.f32.mrb[1].mxu0 }
 0x3b3   : >> { %v14874_v23 = vadd.f32 %v5286_v31, %v4078_v20 }
 0x3b4   : >> { %v5292_v28 = vmul.f32 %v14873_v21, %v5291_v33 }
 0x3b5   : >> { %v5293_v24 = vmul.f32 %v14874_v23, %v5291_v33  ;;  %2928 = sbr.rel (!%p2926_p11) target bundleno = 507 (0x1fb), region = 283 }
 0x3b6   : >> { %v5295_v25 = vadd.f32 %v5294_v22, %v5292_v28 }
 0x3b7   : >> { %v5296_v27 = vadd.f32 %v5294_v22, %v5293_v24 }
 0x3b8   : >> { %v5297_v29 = vmax.f32 %v5295_v25, 0.0 }
 0x3b9   : >> { %v5298_v30 = vmax.f32 %v5296_v27, 0.0 }
 0x3ba   : >> { %14059 = vst [vmem:[%s16131_s15 + $0x40] sm:$0xf] %v5297_v29 }
 0x3bb   : >> { %14060 = vst [vmem:[%s16131_s15 + $0x48] sm:$0xf] %v5298_v30 }
 0x3bc LB: >> { %s14425_s19 = smul.u32 48, %s15522_s8  ;;  %v15552_v34 = vmov 0.0   ;;  %vm15553_vm0 = vmmov 1   ;;  %s15554_s16 = smov 127   ;;  %vm5376_vm2 = vcmask 97280   ;;  %vm16696_vm3 = vmpackc.low %vm445_vm4, %vm16246_vm15  ;;  %s15522_s8 = sphi %s16478_s8, %s5308_s8  }
 0x3bd   : >> { %6730 = vmatprep.mubr.f32.mxu0 %v15552_v34  ;;  %5450 = vmatprep.mubr.f32.mxu1 %v15552_v34  ;;  %vm16487_vm1 = vmpackc.low %vm445_vm4, %vm15553_vm0  ;;  %v14128_v45 = vld [vmem:[%s18597_s3 + $0x34] sm:$0xf]  ;;  %s15555_s20 = smov 16   ;;  %s15556_s22 = smov 17   ;;  %v14132_v28 = vld [vmem:[%s18597_s3 + $0x38] sm:$0xf] }
 0x3be   : >> { %s16491_s9 = scalar_lea.vmem [#allocation2], %s14425_s19  ;;  %s15557_s18 = smov 113   ;;  %v14072_v27 = vld [vmem:[%s18597_s3 + $0x4] sm:$0xf]  ;;  %vm16797_vm5 = vmpackc.low %vm445_vm4, %vm1068_vm11 }
 0x3bf   : >> { %s15558_s14 = smov 15   ;;  %s15559_s19 = smov 112  }
 0x3c0   : >> { %s18605_s29 = smov 1   ;;  %s18603_s15 = smov 111  }
 0x3c1   : >> { %s5308_s8 = sadd.s32 1, %s15522_s8  }
 0x3c2   : >> { %v16494_v36 = vld [vmem:[%s16491_s9 + $0x38] sm:$0xff]  ;;  %v16497_v37 = vld [vmem:[%s16491_s9 + $0x30] sm:$0xff]  ;;  %v16500_v40 = vld [vmem:[%s16491_s9 + $0x48] sm:$0xff]  ;;  %p5305_p12 = scmp.ge.s32.totalorder %s5308_s8, 8  }
 0x3c3   : >> { %6741 = vrot.lane.b32.xlu0 %v16494_v36, %s15554_s16  ;;  %6739 = vrot.lane.b32.xlu1 %v16497_v37, %s15554_s16  ;;  %v16507_v39 = vld [vmem:[%s16491_s9 + $0x40] sm:$0xff]  ;;  %v16510_v38 = vld [vmem:[%s16491_s9 + $0x10] sm:$0xff]  ;;  %v14509_v41 = vpack.c.bf16 %v16500_v40, %v16494_v36  ;;  %v15238_v50 = vpack.i.bf16 %v16497_v37, %v16500_v40 }
 0x3c4   : >> { %v16515_v42 = vld [vmem:[%s16491_s9 + $0x18] sm:$0xff]  ;;  %v16518_v43 = vld [vmem:[%s16491_s9] sm:$0xff]  ;;  %v16521_v44 = vld [vmem:[%s16491_s9 + $0x8] sm:$0xff]  ;;  %v14512_v32 = vpack.c.bf16 %v16507_v39, %v16497_v37  ;;  %v15243_v49 = vpack.i.bf16 %v16507_v39, %v16494_v36 }
 0x3c5   : >> { %14511 = vmatprep.subr.msk.bf16.mxu0 %vm16487_vm1, %v14509_v41  ;;  %v15233_v47 = vpack.i.bf16 %v16515_v42, %v16510_v38  ;;  %v15228_v48 = vpack.i.bf16 %v16521_v44, %v16518_v43  ;;  %v16591_v51 = vld [vmem:[%s16491_s9 + $0x68] sm:$0xff]  ;;  %v16594_v52 = vld [vmem:[%s16491_s9 + $0x60] sm:$0xff]  ;;  %v16601_v53 = vld [vmem:[%s16491_s9 + $0x78] sm:$0xff]  ;;  %v15263_v57 = vpack.i.bf16 %v16510_v38, %v16521_v44  ;;  %v15258_v58 = vpack.i.bf16 %v16518_v43, %v16515_v42 }
 0x3c6   : >> { %14514 = vmatpush1.bf16.msk.msra.mxu0 %vm16487_vm1, %v14512_v32  ;;  %v16604_v54 = vld [vmem:[%s16491_s9 + $0x70] sm:$0xff]  ;;  %v15248_v56 = vpack.i.bf16 %v16591_v51, %v16594_v52 }
 0x3c7   : >> { %6745 = vrot.lane.b32.xlu0 %v16500_v40, %s15554_s16  ;;  %6743 = vrot.lane.b32.xlu1 %v16507_v39, %s15554_s16  ;;  %v15253_v55 = vpack.i.bf16 %v16601_v53, %v16604_v54 }
 0x3c9   : >> { %14131 = vmatmul.mubr.msk.f32.vlgmr.msra.gmra.mrb[0].mxu0 %vm5376_vm2, %v14128_v45 }
 0x3ca   : >> { %6834 = vmatprep.mubr.f32.mxu0 %v15552_v34 }
 0x3cb   : >> { %15234 = vrot.lane.b32.xlu1 %v15233_v47, %s15555_s20  ;;  %15229 = vrot.lane.b32.xlu0 %v15228_v48, %s15555_s20  ;;  %v15273_v47 = vpack.i.bf16 %v16500_v40, %v16507_v39 }
 0x3cf   : >> { %5338 = vrot.lane.b32.xlu1 %v16521_v44, %s15556_s22  ;;  %5336 = vrot.lane.b32.xlu0 %v16518_v43, %s15556_s22 }
 0x3d3   : >> { %5342 = vrot.lane.b32.xlu1 %v16515_v42, %s15556_s22  ;;  %5340 = vrot.lane.b32.xlu0 %v16510_v38, %s15556_s22 }
 0x3d7   : >> { %6849 = vrot.lane.b32.xlu1 %v16500_v40, %s15557_s18  ;;  %6845 = vrot.lane.b32.xlu0 %v16494_v36, %s15557_s18 }
 0x3db   : >> { %6847 = vrot.lane.b32.xlu1 %v16507_v39, %s15557_s18  ;;  %6843 = vrot.lane.b32.xlu0 %v16497_v37, %s15557_s18 }
 0x3df   : >> { %5539 = vrot.lane.b32.xlu1 %v16521_v44, %s15558_s14  ;;  %5537 = vrot.lane.b32.xlu0 %v16518_v43, %s15558_s14 }
 0x3e3   : >> { %5543 = vrot.lane.b32.xlu1 %v16515_v42, %s15558_s14  ;;  %5541 = vrot.lane.b32.xlu0 %v16510_v38, %s15558_s14 }
 0x3e7   : >> { %15244 = vrot.lane.b32.xlu1 %v15243_v49, %s15559_s19  ;;  %15239 = vrot.lane.b32.xlu0 %v15238_v50, %s15559_s19 }
 0x3eb   : >> { %5644 = vrot.lane.b32.xlu1 %v16521_v44, %s18605_s29  ;;  %5642 = vrot.lane.b32.xlu0 %v16518_v43, %s18605_s29 }
 0x3ef   : >> { %5648 = vrot.lane.b32.xlu1 %v16515_v42, %s18605_s29  ;;  %5646 = vrot.lane.b32.xlu0 %v16510_v38, %s18605_s29 }
 0x3f3   : >> { %7051 = vrot.lane.b32.xlu1 %v16500_v40, %s18603_s15  ;;  %7047 = vrot.lane.b32.xlu0 %v16494_v36, %s18603_s15 }
 0x3f7   : >> { %7049 = vrot.lane.b32.xlu1 %v16507_v39, %s18603_s15  ;;  %7045 = vrot.lane.b32.xlu0 %v16497_v37, %s18603_s15 }
 0x3fb   : >> { %7155 = vrot.lane.b32.xlu1 %v16591_v51, %s15556_s22  ;;  %7153 = vrot.lane.b32.xlu0 %v16594_v52, %s15556_s22 }
 0x3ff   : >> { %7159 = vrot.lane.b32.xlu1 %v16601_v53, %s15556_s22  ;;  %7157 = vrot.lane.b32.xlu0 %v16604_v54, %s15556_s22 }
 0x403   : >> { %5835 = vrot.lane.b32.xlu1 %v16515_v42, %s15554_s16  ;;  %5831 = vrot.lane.b32.xlu0 %v16521_v44, %s15554_s16 }
 0x407   : >> { %5833 = vrot.lane.b32.xlu1 %v16510_v38, %s15554_s16  ;;  %5829 = vrot.lane.b32.xlu0 %v16518_v43, %s15554_s16 }
 0x40b   : >> { %15254 = vrot.lane.b32.xlu1 %v15253_v55, %s15555_s20  ;;  %15249 = vrot.lane.b32.xlu0 %v15248_v56, %s15555_s20  ;;  %v15268_v55 = vpack.i.bf16 %v16494_v36, %v16497_v37 }
 0x40f   : >> { %5940 = vrot.lane.b32.xlu1 %v16515_v42, %s15557_s18  ;;  %5936 = vrot.lane.b32.xlu0 %v16521_v44, %s15557_s18 }
 0x413   : >> { %7357 = vrot.lane.b32.xlu1 %v16591_v51, %s15558_s14  ;;  %7355 = vrot.lane.b32.xlu0 %v16594_v52, %s15558_s14 }
 0x417   : >> { %7361 = vrot.lane.b32.xlu1 %v16601_v53, %s15558_s14  ;;  %7359 = vrot.lane.b32.xlu0 %v16604_v54, %s15558_s14 }
 0x41b   : >> { %5938 = vrot.lane.b32.xlu1 %v16510_v38, %s15557_s18  ;;  %5934 = vrot.lane.b32.xlu0 %v16518_v43, %s15557_s18 }
 0x41f   : >> { %7461 = vrot.lane.b32.xlu1 %v16591_v51, %s18605_s29  ;;  %7459 = vrot.lane.b32.xlu0 %v16594_v52, %s18605_s29 }
 0x423   : >> { %7465 = vrot.lane.b32.xlu1 %v16601_v53, %s18605_s29  ;;  %7463 = vrot.lane.b32.xlu0 %v16604_v54, %s18605_s29  ;;  %s18625_s29 = smov 111  }
 0x427   : >> { %15264 = vrot.lane.b32.xlu1 %v15263_v57, %s15559_s19  ;;  %15259 = vrot.lane.b32.xlu0 %v15258_v58, %s15559_s19 }
 0x42b   : >> { %6144 = vrot.lane.b32.xlu1 %v16515_v42, %s18603_s15  ;;  %6140 = vrot.lane.b32.xlu0 %v16521_v44, %s18603_s15 }
 0x42f   : >> { %6142 = vrot.lane.b32.xlu1 %v16510_v38, %s18603_s15  ;;  %6138 = vrot.lane.b32.xlu0 %v16518_v43, %s18603_s15  ;;  %s17146_s15 = sld [smem:[#allocation3 + $0x181]] (%p5305_p12) }
 0x433   : >> { %6249 = vrot.lane.b32.xlu1 %v16494_v36, %s15556_s22  ;;  %6247 = vrot.lane.b32.xlu0 %v16497_v37, %s15556_s22 }
 0x435   : >> { %v6742_v59 = vpop.permute.xlu0 %6741  ;;  %v6740_v60 = vpop.permute.xlu1 %6739 }
 0x436   : >> { %v6753_v61 = vsel %vm878_vm6, %v6742_v59, 0.0  ;;  %v6747_v62 = vsel %vm878_vm6, %v6740_v60, %v6742_v59 }
 0x437   : >> { %6253 = vrot.lane.b32.xlu1 %v16500_v40, %s15556_s22  ;;  %6251 = vrot.lane.b32.xlu0 %v16507_v39, %s15556_s22  ;;  %v6756_v1 = vmul.f32 %v15714_v12, %v6753_v61  ;;  %v6755_v4 = vmul.f32 %v15702_v7, %v6747_v62 }
 0x439   : >> { %v6746_v63 = vpop.permute.xlu0 %6745  ;;  %v6744_v0 = vpop.permute.xlu1 %6743 }
 0x43a   : >> { %v6754_v2 = vsel %vm878_vm6, %v6746_v63, 0.0  ;;  %v6748_v3 = vsel %vm878_vm6, %v6744_v0, %v6746_v63 }
 0x43b   : >> { %v6758_v5 = vmul.f32 %v15714_v12, %v6754_v2  ;;  %v6757_v8 = vmul.f32 %v15702_v7, %v6748_v3  ;;  %7651 = vrot.lane.b32.xlu1 %v16601_v53, %s15554_s16  ;;  %7647 = vrot.lane.b32.xlu0 %v16591_v51, %s15554_s16  ;;  %v5357_v3 = vld [vmem:[%s18597_s3] sm:$0xf] }
 0x43d   : >> { %v14515_v9 = vpack.c.bf16 %v6758_v5, %v6756_v1  ;;  %v14518_v10 = vpack.c.bf16 %v6757_v8, %v6755_v4  ;;  %v15235_v13 = vpop.permute.xlu1 %15234  ;;  %v15230_v14 = vpop.permute.xlu0 %15229 }
 0x43e   : >> { %v15237_v15 = vunpack.i.h.bf16 %v15235_v13  ;;  %v15236_v16 = vunpack.i.l.bf16 %v15235_v13  ;;  %v15232_v17 = vunpack.i.h.bf16 %v15230_v14  ;;  %v15231_v18 = vunpack.i.l.bf16 %v15230_v14 }
 0x43f   : >> { %14517 = vmatprep.subr.msk.bf16.mxu0 %vm16487_vm1, %v14515_v9  ;;  %7649 = vrot.lane.b32.xlu1 %v16604_v54, %s15554_s16 }
 0x440   : >> { %v5373_v19 = vsel %vm435_vm7, 0.0, %v15236_v16  ;;  %7645 = vrot.lane.b32.xlu0 %v16594_v52, %s15554_s16  ;;  %14520 = vmatpush1.bf16.msk.msra.mxu0 %vm16487_vm1, %v14518_v10  ;;  %v5367_v20 = vsel %vm435_vm7, %v15231_v18, %v15232_v17  ;;  %v5368_v26 = vsel %vm435_vm7, %v15236_v16, %v15237_v15  ;;  %v15283_v16 = vpack.i.bf16 %v16604_v54, %v16591_v51  ;;  %v14136_v17 = vld [vmem:[%s18597_s3 + $0x3c] sm:$0xf] }
 0x441   : >> { %v14434_v33 = vpack.c.bf16 %v5373_v19, %v15231_v18  ;;  %v5339_v21 = vpop.permute.xlu1 %5338  ;;  %v5337_v31 = vpop.permute.xlu0 %5336  ;;  %v14431_v22 = vpack.c.bf16 %v5368_v26, %v5367_v20  ;;  %v15278_v19 = vpack.i.bf16 %v16594_v52, %v16601_v53 }
 0x442   : >> { %v5351_v24 = vsel %vm423_vm8, 0.0, %v5337_v31  ;;  %v5345_v25 = vsel %vm423_vm8, %v5337_v31, %v5339_v21 }
 0x443   : >> { %7755 = vrot.lane.b32.xlu1 %v16601_v53, %s15557_s18  ;;  %14433 = vmatprep.subr.msk.bf16.mxu1 %vm16487_vm1, %v14431_v22  ;;  %v5353_v41 = vmul.f32 %v15700_v6, %v5351_v24  ;;  %v5354_v48 = vmul.f32 %v15712_v11, %v5345_v25 }
 0x444   : >> { %7751 = vrot.lane.b32.xlu0 %v16591_v51, %s15557_s18  ;;  %14436 = vmatpush1.bf16.msk.msra.mxu1 %vm16696_vm3, %v14434_v33 }
 0x445   : >> { %v5343_v29 = vpop.permute.xlu1 %5342  ;;  %v5341_v30 = vpop.permute.xlu0 %5340  ;;  %14135 = vmatmul.mubr.msk.f32.vlgmr.msra.gmra.mrb[0].mxu0 %vm5376_vm2, %v14132_v28 }
 0x446   : >> { %v5346_v32 = vsel %vm423_vm8, %v5341_v30, %v5343_v29  ;;  %v5352_v45 = vsel %vm423_vm8, 0.0, %v5341_v30  ;;  %6938 = vmatprep.mubr.f32.mxu0 %v15552_v34 }
 0x447   : >> { %v5355_v49 = vmul.f32 %v15700_v6, %v5352_v45  ;;  %v5356_v50 = vmul.f32 %v15712_v11, %v5346_v32  ;;  %7753 = vrot.lane.b32.xlu1 %v16604_v54, %s15557_s18  ;;  %14077 = vmatmul.mubr.msk.f32.vlgmr.msra.gmra.mrb[0].mxu1 %vm5376_vm2, %v14072_v27 }
 0x448   : >> { %7749 = vrot.lane.b32.xlu0 %v16594_v52, %s15557_s18  ;;  %5530 = vmatprep.mubr.f32.mxu1 %v15552_v34 }
 0x449   : >> { %v14437_v56 = vpack.c.bf16 %v5356_v50, %v5354_v48  ;;  %v14440_v57 = vpack.c.bf16 %v5355_v49, %v5353_v41  ;;  %v6850_v58 = vpop.permute.xlu1 %6849  ;;  %v6846_v59 = vpop.permute.xlu0 %6845 }
 0x44a   : >> { %v6858_v60 = vsel %vm973_vm9, %v6850_v58, 0.0  ;;  %v6857_v61 = vsel %vm973_vm9, %v6846_v59, 0.0 }
 0x44b   : >> { %v6862_v62 = vmul.f32 %v15712_v11, %v6858_v60  ;;  %v6860_v63 = vmul.f32 %v15712_v11, %v6857_v61  ;;  %15274 = vrot.lane.b32.xlu1 %v15273_v47, %s15555_s20  ;;  %14439 = vmatprep.subr.msk.bf16.mxu1 %vm16487_vm1, %v14437_v56  ;;  %v14140_v61 = vld [vmem:[%s18597_s3 + $0x40] sm:$0xf] }
 0x44c   : >> { %15269 = vrot.lane.b32.xlu0 %v15268_v55, %s15555_s20  ;;  %14442 = vmatpush1.bf16.msk.msra.mxu1 %vm16487_vm1, %v14440_v57  ;;  %s17144_s20 = sld [smem:[#allocation3 + $0x180]] (%p5305_p12) }
 0x44d   : >> { %v14521_v0 = vpack.c.bf16 %v6862_v62, %v6860_v63  ;;  %v6848_v1 = vpop.permute.xlu1 %6847  ;;  %v6844_v2 = vpop.permute.xlu0 %6843 }
 0x44e   : >> { %v6852_v4 = vsel %vm973_vm9, %v6848_v1, %v6850_v58  ;;  %v6851_v5 = vsel %vm973_vm9, %v6844_v2, %v6846_v59  ;;  %v14081_v59 = vld [vmem:[%s18597_s3 + $0x8] sm:$0xf] }
 0x44f   : >> { %v6861_v8 = vmul.f32 %v15700_v6, %v6852_v4  ;;  %v6859_v9 = vmul.f32 %v15700_v6, %v6851_v5  ;;  %6451 = vrot.lane.b32.xlu1 %v16494_v36, %s15558_s14  ;;  %14523 = vmatprep.subr.msk.bf16.mxu0 %vm16487_vm1, %v14521_v0 }
 0x450   : >> { %6449 = vrot.lane.b32.xlu0 %v16497_v37, %s15558_s14  ;;  %14080 = vmatmul.mubr.msk.f32.vlgmr.msra.gmra.mrb[0].mxu1 %vm5376_vm2, %v5357_v3 }
 0x451   : >> { %v14524_v10 = vpack.c.bf16 %v6861_v8, %v6859_v9  ;;  %v5540_v13 = vpop.permute.xlu1 %5539  ;;  %v5538_v14 = vpop.permute.xlu0 %5537  ;;  %5633 = vmatprep.mubr.f32.mxu1 %v15552_v34 }
 0x452   : >> { %v5552_v15 = vsel %vm606_vm10, 0.0, %v5538_v14  ;;  %v5546_v18 = vsel %vm606_vm10, %v5538_v14, %v5540_v13 }
 0x453   : >> { %6455 = vrot.lane.b32.xlu1 %v16500_v40, %s15558_s14  ;;  %14526 = vmatpush1.bf16.msk.msra.mxu0 %vm16487_vm1, %v14524_v10  ;;  %v5554_v33 = vmul.f32 %v15702_v7, %v5552_v15  ;;  %v5555_v22 = vmul.f32 %v15714_v12, %v5546_v18  ;;  %v14455_v10 = vpack.c.bf16 %v16515_v42, %v16521_v44  ;;  %v14085_v42 = vld [vmem:[%s18597_s3 + $0xc] sm:$0xf] }
 0x454   : >> { %6453 = vrot.lane.b32.xlu0 %v16507_v39, %s15558_s14  ;;  %s18622_s14 = smov 1   ;;  %v14458_v44 = vpack.c.bf16 %v16510_v38, %v16518_v43 }
 0x455   : >> { %v5544_v20 = vpop.permute.xlu1 %5543  ;;  %v5542_v26 = vpop.permute.xlu0 %5541 }
 0x456   : >> { %v5547_v21 = vsel %vm606_vm10, %v5542_v26, %v5544_v20  ;;  %v5553_v31 = vsel %vm606_vm10, 0.0, %v5542_v26  ;;  %14139 = vmatmul.mubr.msk.f32.vlgmr.msra.gmra.mrb[0].mxu0 %vm5376_vm2, %v14136_v17 }
 0x457   : >> { %v5556_v28 = vmul.f32 %v15702_v7, %v5553_v31  ;;  %v5557_v24 = vmul.f32 %v15714_v12, %v5547_v21  ;;  %15284 = vrot.lane.b32.xlu1 %v15283_v16, %s15559_s19  ;;  %7036 = vmatprep.mubr.f32.mxu0 %v15552_v34 }
 0x458   : >> { %15279 = vrot.lane.b32.xlu0 %v15278_v19, %s15559_s19 }
 0x459   : >> { %v14443_v25 = vpack.c.bf16 %v5557_v24, %v5555_v22  ;;  %v14446_v27 = vpack.c.bf16 %v5556_v28, %v5554_v33  ;;  %v15245_v29 = vpop.permute.xlu1 %15244  ;;  %v15240_v30 = vpop.permute.xlu0 %15239  ;;  %v14145_v28 = vld [vmem:[%s18597_s3 + $0x44] sm:$0xf] }
 0x45a   : >> { %v15247_v41 = vunpack.i.h.bf16 %v15245_v29  ;;  %v15246_v32 = vunpack.i.l.bf16 %v15245_v29  ;;  %v15242_v45 = vunpack.i.h.bf16 %v15240_v30  ;;  %v15241_v47 = vunpack.i.l.bf16 %v15240_v30 }
 0x45b   : >> { %6555 = vrot.lane.b32.xlu1 %v16494_v36, %s18622_s14  ;;  %14445 = vmatprep.subr.msk.bf16.mxu1 %vm16487_vm1, %v14443_v25  ;;  %v14089_v25 = vld [vmem:[%s18597_s3 + $0x10] sm:$0xf] }
 0x45c   : >> { %v6955_v48 = vsel %vm1068_vm11, %v15242_v45, %v15246_v32  ;;  %v6956_v49 = vsel %vm1068_vm11, %v15247_v41, %v15241_v47  ;;  %v6961_v50 = vsel %vm1068_vm11, %v15241_v47, 0.0  ;;  %6553 = vrot.lane.b32.xlu0 %v16497_v37, %s18622_s14  ;;  %14448 = vmatpush1.bf16.msk.msra.mxu1 %vm16487_vm1, %v14446_v27 }
 0x45d   : >> { %v14527_v36 = vpack.c.bf16 %v6961_v50, %v15246_v32  ;;  %v14530_v56 = vpack.c.bf16 %v6956_v49, %v6955_v48  ;;  %v5645_v57 = vpop.permute.xlu1 %5644  ;;  %v5643_v58 = vpop.permute.xlu0 %5642 }
 0x45e   : >> { %v5657_v60 = vsel %vm701_vm12, 0.0, %v5643_v58  ;;  %v5651_v37 = vsel %vm701_vm12, %v5643_v58, %v5645_v57 }
 0x45f   : >> { %6559 = vrot.lane.b32.xlu1 %v16500_v40, %s18622_s14  ;;  %14529 = vmatprep.subr.msk.bf16.mxu0 %vm16797_vm5, %v14527_v36  ;;  %v5659_v40 = vmul.f32 %v15700_v6, %v5657_v60 }
 0x460   : >> { %6557 = vrot.lane.b32.xlu0 %v16507_v39, %s18622_s14  ;;  %14532 = vmatpush1.bf16.msk.msra.mxu0 %vm16487_vm1, %v14530_v56  ;;  %v5660_v39 = vmul.f32 %v15712_v11, %v5651_v37  ;;  %v14149_v37 = vld [vmem:[%s18597_s3 + $0x48] sm:$0xf]  ;;  %s17148_s14 = smov (%p5305_p12), 0  }
 0x461   : >> { %v5649_v62 = vpop.permute.xlu1 %5648  ;;  %v5647_v63 = vpop.permute.xlu0 %5646  ;;  %14084 = vmatmul.mubr.msk.f32.vlgmr.msra.gmra.mrb[0].mxu1 %vm5376_vm2, %v14081_v59 }
 0x462   : >> { %v5652_v0 = vsel %vm701_vm12, %v5647_v63, %v5649_v62  ;;  %v5658_v1 = vsel %vm701_vm12, 0.0, %v5647_v63  ;;  %5738 = vmatprep.mubr.f32.mxu1 %v15552_v34 }
 0x463   : >> { %v5661_v2 = vmul.f32 %v15700_v6, %v5658_v1  ;;  %v5662_v3 = vmul.f32 %v15712_v11, %v5652_v0  ;;  %7957 = vrot.lane.b32.xlu1 %v16601_v53, %s18625_s29  ;;  %14144 = vmatmul.mubr.msk.f32.vlgmr.msra.gmra.mrb[0].mxu0 %vm5376_vm2, %v14140_v61 }
 0x464   : >> { %7953 = vrot.lane.b32.xlu0 %v16591_v51, %s18625_s29  ;;  %7140 = vmatprep.mubr.f32.mxu0 %v15552_v34 }
 0x465   : >> { %v14449_v4 = vpack.c.bf16 %v5662_v3, %v5660_v39  ;;  %v14452_v5 = vpack.c.bf16 %v5661_v2, %v5659_v40  ;;  %v7052_v8 = vpop.permute.xlu1 %7051  ;;  %v7048_v9 = vpop.permute.xlu0 %7047 }
 0x466   : >> { %v7060_v13 = vsel %vm1159_vm13, %v7052_v8, 0.0  ;;  %v7059_v14 = vsel %vm1159_vm13, %v7048_v9, 0.0 }
 0x467   : >> { %v7064_v15 = vmul.f32 %v15714_v12, %v7060_v13  ;;  %v7062_v16 = vmul.f32 %v15714_v12, %v7059_v14  ;;  %7955 = vrot.lane.b32.xlu1 %v16604_v54, %s18625_s29  ;;  %14451 = vmatprep.subr.msk.bf16.mxu1 %vm16487_vm1, %v14449_v4  ;;  %v14093_v13 = vld [vmem:[%s18597_s3 + $0x14] sm:$0xf] }
 0x468   : >> { %7951 = vrot.lane.b32.xlu0 %v16594_v52, %s18625_s29  ;;  %14454 = vmatpush1.bf16.msk.msra.mxu1 %vm16487_vm1, %v14452_v5 }
 0x469   : >> { %v14533_v17 = vpack.c.bf16 %v7064_v15, %v7062_v16  ;;  %v7050_v18 = vpop.permute.xlu1 %7049  ;;  %v7046_v19 = vpop.permute.xlu0 %7045  ;;  %14457 = vmatprep.subr.msk.bf16.mxu1 %vm16487_vm1, %v14455_v10 }
 0x46a   : >> { %v7054_v20 = vsel %vm1159_vm13, %v7050_v18, %v7052_v8  ;;  %v7053_v26 = vsel %vm1159_vm13, %v7046_v19, %v7048_v9 }
 0x46b   : >> { %v7063_v33 = vmul.f32 %v15702_v7, %v7054_v20  ;;  %v7061_v21 = vmul.f32 %v15702_v7, %v7053_v26  ;;  %14535 = vmatprep.subr.msk.bf16.mxu0 %vm16487_vm1, %v14533_v17  ;;  %14088 = vmatmul.mubr.msk.f32.vlgmr.msra.gmra.mrb[0].mxu1 %vm5376_vm2, %v14085_v42 }
 0x46c   : >> { %14460 = vmatpush1.bf16.msk.msra.mxu1 %vm16487_vm1, %v14458_v44  ;;  %5820 = vmatprep.mubr.f32.mxu1 %v15552_v34 }
 0x46d   : >> { %v14536_v38 = vpack.c.bf16 %v7063_v33, %v7061_v21  ;;  %v7156_v43 = vpop.permute.xlu1 %7155  ;;  %v7154_v31 = vpop.permute.xlu0 %7153  ;;  %v14153_v21 = vld [vmem:[%s18597_s3 + $0x4c] sm:$0xf] }
 0x46e   : >> { %v7167_v22 = vsel %vm423_vm8, 0.0, %v7154_v31  ;;  %v7161_v24 = vsel %vm423_vm8, %v7154_v31, %v7156_v43 }
 0x46f   : >> { %14538 = vmatpush1.bf16.msk.msra.mxu0 %vm16487_vm1, %v14536_v38  ;;  %v7169_v30 = vmul.f32 %v15700_v6, %v7167_v22  ;;  %v7170_v45 = vmul.f32 %v15712_v11, %v7161_v24 }
 0x471   : >> { %v7160_v27 = vpop.permute.xlu1 %7159  ;;  %v7158_v29 = vpop.permute.xlu0 %7157 }
 0x472   : >> { %v7162_v41 = vsel %vm423_vm8, %v7158_v29, %v7160_v27  ;;  %v7168_v32 = vsel %vm423_vm8, 0.0, %v7158_v29  ;;  %14148 = vmatmul.mubr.msk.f32.vlgmr.msra.gmra.mrb[0].mxu0 %vm5376_vm2, %v14145_v28 }
 0x473   : >> { %v7171_v47 = vmul.f32 %v15700_v6, %v7168_v32  ;;  %v7172_v48 = vmul.f32 %v15712_v11, %v7162_v41  ;;  %14092 = vmatmul.mubr.msk.f32.vlgmr.msra.gmra.mrb[0].mxu1 %vm5376_vm2, %v14089_v25  ;;  %7248 = vmatprep.mubr.f32.mxu0 %v15552_v34 }
 0x474   : >> { %5925 = vmatprep.mubr.f32.mxu1 %v15552_v34 }
 0x475   : >> { %v14539_v49 = vpack.c.bf16 %v7172_v48, %v7170_v45  ;;  %v14542_v50 = vpack.c.bf16 %v7171_v47, %v7169_v30  ;;  %v5836_v36 = vpop.permute.xlu1 %5835  ;;  %v5832_v56 = vpop.permute.xlu0 %5831 }
 0x476   : >> { %v5845_v57 = vsel %vm878_vm6, %v5836_v36, 0.0  ;;  %v5844_v58 = vsel %vm878_vm6, %v5832_v56, 0.0 }
 0x477   : >> { %v5849_v59 = vmul.f32 %v15714_v12, %v5845_v57  ;;  %v5847_v60 = vmul.f32 %v15714_v12, %v5844_v58  ;;  %14541 = vmatprep.subr.msk.bf16.mxu0 %vm16487_vm1, %v14539_v49 }
 0x478   : >> { %14544 = vmatpush1.bf16.msk.msra.mxu0 %vm16487_vm1, %v14542_v50 }
 0x479   : >> { %v14461_v61 = vpack.c.bf16 %v5849_v59, %v5847_v60  ;;  %v5834_v62 = vpop.permute.xlu1 %5833  ;;  %v5830_v63 = vpop.permute.xlu0 %5829  ;;  %v14159_v59 = vld [vmem:[%s18597_s3 + $0x50] sm:$0xf] }
 0x47a   : >> { %v5839_v40 = vsel %vm878_vm6, %v5834_v62, %v5836_v36  ;;  %v5838_v0 = vsel %vm878_vm6, %v5830_v63, %v5832_v56  ;;  %v14097_v62 = vld [vmem:[%s18597_s3 + $0x18] sm:$0xf] }
 0x47b   : >> { %v5848_v1 = vmul.f32 %v15702_v7, %v5839_v40  ;;  %v5846_v39 = vmul.f32 %v15702_v7, %v5838_v0  ;;  %14463 = vmatprep.subr.msk.bf16.mxu1 %vm16487_vm1, %v14461_v61  ;;  %14152 = vmatmul.mubr.msk.f32.vlgmr.msra.gmra.mrb[0].mxu0 %vm5376_vm2, %v14149_v37 }
 0x47c   : >> { %7346 = vmatprep.mubr.f32.mxu0 %v15552_v34 }
 0x47d   : >> { %v14464_v2 = vpack.c.bf16 %v5848_v1, %v5846_v39  ;;  %v15255_v3 = vpop.permute.xlu1 %15254  ;;  %v15250_v4 = vpop.permute.xlu0 %15249 }
 0x47e   : >> { %v15257_v5 = vunpack.i.h.bf16 %v15255_v3  ;;  %v15256_v8 = vunpack.i.l.bf16 %v15255_v3  ;;  %v15252_v9 = vunpack.i.h.bf16 %v15250_v4  ;;  %v15251_v10 = vunpack.i.l.bf16 %v15250_v4 }
 0x47f   : >> { %14466 = vmatpush1.bf16.msk.msra.mxu1 %vm16487_vm1, %v14464_v2 }
 0x480   : >> { %v7266_v14 = vsel %vm435_vm7, %v15256_v8, %v15257_v5  ;;  %v7271_v15 = vsel %vm435_vm7, 0.0, %v15256_v8  ;;  %v7265_v16 = vsel %vm435_vm7, %v15251_v10, %v15252_v9 }
 0x481   : >> { %v14545_v42 = vpack.c.bf16 %v7266_v14, %v7265_v16  ;;  %v14548_v44 = vpack.c.bf16 %v7271_v15, %v15251_v10  ;;  %v5941_v17 = vpop.permute.xlu1 %5940  ;;  %v5937_v18 = vpop.permute.xlu0 %5936  ;;  %v14563_v15 = vpack.c.bf16 %v16601_v53, %v16591_v51  ;;  %v14163_v51 = vld [vmem:[%s18597_s3 + $0x54] sm:$0xf]  ;;  %v14566_v53 = vpack.c.bf16 %v16604_v54, %v16594_v52  ;;  %v14101_v52 = vld [vmem:[%s18597_s3 + $0x1c] sm:$0xf] }
 0x482   : >> { %v5950_v19 = vsel %vm973_vm9, %v5941_v17, 0.0  ;;  %v5949_v20 = vsel %vm973_vm9, %v5937_v18, 0.0  ;;  %14096 = vmatmul.mubr.msk.f32.vlgmr.msra.gmra.mrb[0].mxu1 %vm5376_vm2, %v14093_v13 }
 0x483   : >> { %v5954_v26 = vmul.f32 %v15712_v11, %v5950_v19  ;;  %v5952_v33 = vmul.f32 %v15712_v11, %v5949_v20  ;;  %14547 = vmatprep.subr.msk.bf16.mxu0 %vm16487_vm1, %v14545_v42  ;;  %6030 = vmatprep.mubr.f32.mxu1 %v15552_v34 }
 0x484   : >> { %14550 = vmatpush1.bf16.msk.msra.mxu0 %vm16696_vm3, %v14548_v44 }
 0x485   : >> { %v14467_v38 = vpack.c.bf16 %v5954_v26, %v5952_v33  ;;  %v7358_v43 = vpop.permute.xlu1 %7357  ;;  %v7356_v31 = vpop.permute.xlu0 %7355 }
 0x486   : >> { %v7363_v22 = vsel %vm606_vm10, %v7356_v31, %v7358_v43  ;;  %v7369_v28 = vsel %vm606_vm10, 0.0, %v7356_v31 }
 0x487   : >> { %14469 = vmatprep.subr.msk.bf16.mxu1 %vm16487_vm1, %v14467_v38  ;;  %14158 = vmatmul.mubr.msk.f32.vlgmr.msra.gmra.mrb[0].mxu0 %vm5376_vm2, %v14153_v21  ;;  %v7371_v30 = vmul.f32 %v15702_v7, %v7369_v28  ;;  %v7372_v41 = vmul.f32 %v15714_v12, %v7363_v22 }
 0x488   : >> { %7450 = vmatprep.mubr.f32.mxu0 %v15552_v34 }
 0x489   : >> { %v7362_v24 = vpop.permute.xlu1 %7361  ;;  %v7360_v25 = vpop.permute.xlu0 %7359 }
 0x48a   : >> { %v7364_v27 = vsel %vm606_vm10, %v7360_v25, %v7362_v24  ;;  %v7370_v29 = vsel %vm606_vm10, 0.0, %v7360_v25 }
 0x48b   : >> { %v7373_v32 = vmul.f32 %v15702_v7, %v7370_v29  ;;  %v7374_v45 = vmul.f32 %v15714_v12, %v7364_v27 }
 0x48d   : >> { %v14551_v47 = vpack.c.bf16 %v7374_v45, %v7372_v41  ;;  %v14554_v48 = vpack.c.bf16 %v7373_v32, %v7371_v30  ;;  %v5939_v49 = vpop.permute.xlu1 %5938  ;;  %v5935_v50 = vpop.permute.xlu0 %5934  ;;  %v14167_v32 = vld [vmem:[%s18597_s3 + $0x58] sm:$0xf] }
 0x48e   : >> { %v5944_v36 = vsel %vm973_vm9, %v5939_v49, %v5941_v17  ;;  %v5943_v56 = vsel %vm973_vm9, %v5935_v50, %v5937_v18 }
 0x48f   : >> { %v5953_v57 = vmul.f32 %v15700_v6, %v5944_v36  ;;  %v5951_v58 = vmul.f32 %v15700_v6, %v5943_v56  ;;  %14553 = vmatprep.subr.msk.bf16.mxu0 %vm16487_vm1, %v14551_v47  ;;  %v14106_v36 = vld [vmem:[%s18597_s3 + $0x20] sm:$0xf] }
 0x490   : >> { %14556 = vmatpush1.bf16.msk.msra.mxu0 %vm16487_vm1, %v14554_v48 }
 0x491   : >> { %v14470_v60 = vpack.c.bf16 %v5953_v57, %v5951_v58  ;;  %v7462_v37 = vpop.permute.xlu1 %7461  ;;  %v7460_v61 = vpop.permute.xlu0 %7459 }
 0x492   : >> { %v7467_v63 = vsel %vm701_vm12, %v7460_v61, %v7462_v37  ;;  %v7473_v40 = vsel %vm701_vm12, 0.0, %v7460_v61 }
 0x493   : >> { %14472 = vmatpush1.bf16.msk.msra.mxu1 %vm16487_vm1, %v14470_v60  ;;  %14162 = vmatmul.mubr.msk.f32.vlgmr.msra.gmra.mrb[0].mxu0 %vm5376_vm2, %v14159_v59  ;;  %v7475_v3 = vmul.f32 %v15700_v6, %v7473_v40  ;;  %v7476_v4 = vmul.f32 %v15712_v11, %v7467_v63 }
 0x494   : >> { %7554 = vmatprep.mubr.f32.mxu0 %v15552_v34 }
 0x495   : >> { %v7466_v0 = vpop.permute.xlu1 %7465  ;;  %v7464_v1 = vpop.permute.xlu0 %7463 }
 0x496   : >> { %v7468_v39 = vsel %vm701_vm12, %v7464_v1, %v7466_v0  ;;  %v7474_v2 = vsel %vm701_vm12, 0.0, %v7464_v1  ;;  %14100 = vmatmul.mubr.msk.f32.vlgmr.msra.gmra.mrb[0].mxu1 %vm5376_vm2, %v14097_v62 }
 0x497   : >> { %v7477_v5 = vmul.f32 %v15700_v6, %v7474_v2  ;;  %v7478_v8 = vmul.f32 %v15712_v11, %v7468_v39  ;;  %6129 = vmatprep.mubr.f32.mxu1 %v15552_v34 }
 0x499   : >> { %v14557_v9 = vpack.c.bf16 %v7478_v8, %v7476_v4  ;;  %v14560_v10 = vpack.c.bf16 %v7477_v5, %v7475_v3  ;;  %v15265_v13 = vpop.permute.xlu1 %15264  ;;  %v15260_v14 = vpop.permute.xlu0 %15259  ;;  %v14110_v5 = vld [vmem:[%s18597_s3 + $0x24] sm:$0xf] }
 0x49a   : >> { %v15267_v16 = vunpack.i.h.bf16 %v15265_v13  ;;  %v15266_v42 = vunpack.i.l.bf16 %v15265_v13  ;;  %v15262_v44 = vunpack.i.h.bf16 %v15260_v14  ;;  %v15261_v17 = vunpack.i.l.bf16 %v15260_v14 }
 0x49b   : >> { %14559 = vmatprep.subr.msk.bf16.mxu0 %vm16487_vm1, %v14557_v9 }
 0x49c   : >> { %v6048_v18 = vsel %vm1068_vm11, %v15262_v44, %v15266_v42  ;;  %v6049_v19 = vsel %vm1068_vm11, %v15267_v16, %v15261_v17  ;;  %v6054_v20 = vsel %vm1068_vm11, %v15261_v17, 0.0  ;;  %14562 = vmatpush1.bf16.msk.msra.mxu0 %vm16487_vm1, %v14560_v10 }
 0x49d   : >> { %v14473_v26 = vpack.c.bf16 %v6054_v20, %v15266_v42  ;;  %v14476_v33 = vpack.c.bf16 %v6049_v19, %v6048_v18  ;;  %v6145_v21 = vpop.permute.xlu1 %6144  ;;  %v6141_v38 = vpop.permute.xlu0 %6140  ;;  %14565 = vmatprep.subr.msk.bf16.mxu0 %vm16487_vm1, %v14563_v15 }
 0x49e   : >> { %v6154_v43 = vsel %vm1159_vm13, %v6145_v21, 0.0  ;;  %v6153_v31 = vsel %vm1159_vm13, %v6141_v38, 0.0 }
 0x49f   : >> { %v6158_v22 = vmul.f32 %v15714_v12, %v6154_v43  ;;  %v6156_v28 = vmul.f32 %v15714_v12, %v6153_v31  ;;  %14475 = vmatprep.subr.msk.bf16.mxu1 %vm16797_vm5, %v14473_v26  ;;  %14166 = vmatmul.mubr.msk.f32.vlgmr.msra.gmra.mrb[0].mxu0 %vm5376_vm2, %v14163_v51 }
 0x4a0   : >> { %14478 = vmatpush1.bf16.msk.msra.mxu1 %vm16487_vm1, %v14476_v33  ;;  %14568 = vmatpush1.bf16.msk.msra.mxu0 %vm16487_vm1, %v14566_v53  ;;  %v14171_v53 = vld [vmem:[%s18597_s3 + $0x5c] sm:$0xf] }
 0x4a1   : >> { %v14479_v54 = vpack.c.bf16 %v6158_v22, %v6156_v28  ;;  %v6143_v24 = vpop.permute.xlu1 %6142  ;;  %v6139_v25 = vpop.permute.xlu0 %6138  ;;  %7636 = vmatprep.mubr.f32.mxu0 %v15552_v34 }
 0x4a2   : >> { %v6148_v27 = vsel %vm1159_vm13, %v6143_v24, %v6145_v21  ;;  %v6147_v29 = vsel %vm1159_vm13, %v6139_v25, %v6141_v38 }
 0x4a3   : >> { %v6157_v30 = vmul.f32 %v15702_v7, %v6148_v27  ;;  %v6155_v41 = vmul.f32 %v15702_v7, %v6147_v29  ;;  %14481 = vmatprep.subr.msk.bf16.mxu1 %vm16487_vm1, %v14479_v54  ;;  %14105 = vmatmul.mubr.msk.f32.vlgmr.msra.gmra.mrb[0].mxu1 %vm5376_vm2, %v14101_v52 }
 0x4a4   : >> { %6234 = vmatprep.mubr.f32.mxu1 %v15552_v34 }
 0x4a5   : >> { %v14482_v45 = vpack.c.bf16 %v6157_v30, %v6155_v41  ;;  %v6250_v47 = vpop.permute.xlu1 %6249  ;;  %v6248_v48 = vpop.permute.xlu0 %6247 }
 0x4a6   : >> { %v6255_v49 = vsel %vm423_vm8, %v6248_v48, %v6250_v47  ;;  %v6261_v50 = vsel %vm423_vm8, 0.0, %v6248_v48 }
 0x4a7   : >> { %14484 = vmatpush1.bf16.msk.msra.mxu1 %vm16487_vm1, %v14482_v45  ;;  %14170 = vmatmul.mubr.msk.f32.vlgmr.msra.gmra.mrb[0].mxu0 %vm5376_vm2, %v14167_v32  ;;  %v6263_v60 = vmul.f32 %v15700_v6, %v6261_v50  ;;  %v6264_v37 = vmul.f32 %v15712_v11, %v6255_v49  ;;  %v14175_v32 = vld [vmem:[%s18597_s3 + $0x60] sm:$0xf] }
 0x4a8   : >> { %7740 = vmatprep.mubr.f32.mxu0 %v15552_v34 }
 0x4a9   : >> { %v6254_v56 = vpop.permute.xlu1 %6253  ;;  %v6252_v57 = vpop.permute.xlu0 %6251 }
 0x4aa   : >> { %v6256_v58 = vsel %vm423_vm8, %v6252_v57, %v6254_v56  ;;  %v6262_v59 = vsel %vm423_vm8, 0.0, %v6252_v57 }
 0x4ab   : >> { %v6265_v61 = vmul.f32 %v15700_v6, %v6262_v59  ;;  %v6266_v62 = vmul.f32 %v15712_v11, %v6256_v58  ;;  %14109 = vmatmul.mubr.msk.f32.vlgmr.msra.gmra.mrb[0].mxu1 %vm5376_vm2, %v14106_v36  ;;  %v14114_v58 = vld [vmem:[%s18597_s3 + $0x28] sm:$0xf] }
 0x4ac   : >> { %6342 = vmatprep.mubr.f32.mxu1 %v15552_v34 }
 0x4ad   : >> { %v14485_v63 = vpack.c.bf16 %v6266_v62, %v6264_v37  ;;  %v14488_v40 = vpack.c.bf16 %v6265_v61, %v6263_v60  ;;  %v7652_v0 = vpop.permute.xlu1 %7651  ;;  %v7648_v1 = vpop.permute.xlu0 %7647 }
 0x4ae   : >> { %v7660_v39 = vsel %vm878_vm6, %v7652_v0, 0.0  ;;  %v7659_v2 = vsel %vm878_vm6, %v7648_v1, 0.0 }
 0x4af   : >> { %v7664_v3 = vmul.f32 %v15714_v12, %v7660_v39  ;;  %v7662_v4 = vmul.f32 %v15714_v12, %v7659_v2  ;;  %14487 = vmatprep.subr.msk.bf16.mxu1 %vm16487_vm1, %v14485_v63 }
 0x4b0   : >> { %14490 = vmatpush1.bf16.msk.msra.mxu1 %vm16487_vm1, %v14488_v40 }
 0x4b1   : >> { %v14569_v8 = vpack.c.bf16 %v7664_v3, %v7662_v4  ;;  %v7650_v9 = vpop.permute.xlu1 %7649 }
 0x4b2   : >> { %v7654_v10 = vsel %vm878_vm6, %v7650_v9, %v7652_v0  ;;  %v7646_v13 = vpop.permute.xlu0 %7645 }
 0x4b3   : >> { %v7663_v14 = vmul.f32 %v15702_v7, %v7654_v10  ;;  %v7653_v15 = vsel %vm878_vm6, %v7646_v13, %v7648_v1  ;;  %14571 = vmatprep.subr.msk.bf16.mxu0 %vm16487_vm1, %v14569_v8  ;;  %14113 = vmatmul.mubr.msk.f32.vlgmr.msra.gmra.mrb[0].mxu1 %vm5376_vm2, %v14110_v5 }
 0x4b4   : >> { %v7661_v16 = vmul.f32 %v15702_v7, %v7653_v15  ;;  %6440 = vmatprep.mubr.f32.mxu1 %v15552_v34 }
 0x4b5   : >> { %v7756_v42 = vpop.permute.xlu1 %7755 }
 0x4b6   : >> { %v14572_v44 = vpack.c.bf16 %v7663_v14, %v7661_v16  ;;  %v7764_v17 = vsel %vm973_vm9, %v7756_v42, 0.0  ;;  %v7752_v18 = vpop.permute.xlu0 %7751  ;;  %v14120_v14 = vld [vmem:[%s18597_s3 + $0x2c] sm:$0xf] }
 0x4b7   : >> { %v7768_v19 = vmul.f32 %v15712_v11, %v7764_v17  ;;  %v7763_v20 = vsel %vm973_vm9, %v7752_v18, 0.0 }
 0x4b8   : >> { %v7766_v51 = vmul.f32 %v15712_v11, %v7763_v20  ;;  %14574 = vmatpush1.bf16.msk.msra.mxu0 %vm16487_vm1, %v14572_v44 }
 0x4b9   : >> { %v7754_v26 = vpop.permute.xlu1 %7753 }
 0x4ba   : >> { %v14575_v33 = vpack.c.bf16 %v7768_v19, %v7766_v51  ;;  %v7758_v21 = vsel %vm973_vm9, %v7754_v26, %v7756_v42  ;;  %v7750_v38 = vpop.permute.xlu0 %7749  ;;  %v14179_v19 = vld [vmem:[%s18597_s3 + $0x64] sm:$0xf] }
 0x4bb   : >> { %v7767_v43 = vmul.f32 %v15700_v6, %v7758_v21  ;;  %v7757_v31 = vsel %vm973_vm9, %v7750_v38, %v7752_v18  ;;  %14174 = vmatmul.mubr.msk.f32.vlgmr.msra.gmra.mrb[0].mxu0 %vm5376_vm2, %v14171_v53 }
 0x4bc   : >> { %v7765_v22 = vmul.f32 %v15700_v6, %v7757_v31  ;;  %14577 = vmatprep.subr.msk.bf16.mxu0 %vm16487_vm1, %v14575_v33  ;;  %7844 = vmatprep.mubr.f32.mxu0 %v15552_v34 }
 0x4bd   : >> { %v15275_v28 = vpop.permute.xlu1 %15274 }
 0x4be   : >> { %v14578_v52 = vpack.c.bf16 %v7767_v43, %v7765_v22  ;;  %v15277_v54 = vunpack.i.h.bf16 %v15275_v28  ;;  %v15276_v24 = vunpack.i.l.bf16 %v15275_v28  ;;  %v15270_v25 = vpop.permute.xlu0 %15269 }
 0x4bf   : >> { %v15272_v27 = vunpack.i.h.bf16 %v15270_v25  ;;  %v15271_v29 = vunpack.i.l.bf16 %v15270_v25 }
 0x4c0   : >> { %v6360_v30 = vsel %vm435_vm7, %v15276_v24, %v15277_v54  ;;  %v6365_v41 = vsel %vm435_vm7, 0.0, %v15276_v24  ;;  %14580 = vmatpush1.bf16.msk.msra.mxu0 %vm16487_vm1, %v14578_v52 }
 0x4c1   : >> { %v6359_v45 = vsel %vm435_vm7, %v15271_v29, %v15272_v27  ;;  %v14494_v47 = vpack.c.bf16 %v6365_v41, %v15271_v29  ;;  %v6452_v48 = vpop.permute.xlu1 %6451 }
 0x4c2   : >> { %v14491_v49 = vpack.c.bf16 %v6360_v30, %v6359_v45  ;;  %v6450_v50 = vpop.permute.xlu0 %6449 }
 0x4c3   : >> { %14178 = vmatmul.mubr.msk.f32.vlgmr.msra.gmra.mrb[0].mxu0 %vm5376_vm2, %v14175_v32  ;;  %v6457_v36 = vsel %vm606_vm10, %v6450_v50, %v6452_v48  ;;  %v6463_v56 = vsel %vm606_vm10, 0.0, %v6450_v50  ;;  %v14184_v48 = vld [vmem:[%s18597_s3 + $0x68] sm:$0xf] }
 0x4c4   : >> { %14493 = vmatprep.subr.msk.bf16.mxu1 %vm16487_vm1, %v14491_v49  ;;  %7942 = vmatprep.mubr.f32.mxu0 %v15552_v34  ;;  %v6465_v61 = vmul.f32 %v15702_v7, %v6463_v56  ;;  %v6466_v62 = vmul.f32 %v15714_v12, %v6457_v36  ;;  %v8055_v56 = vstv %s16474_s23 }
 0x4c5   : >> { %14496 = vmatpush1.bf16.msk.msra.mxu1 %vm16696_vm3, %v14494_v47  ;;  %v6456_v57 = vpop.permute.xlu1 %6455 }
 0x4c6   : >> { %v6454_v59 = vpop.permute.xlu0 %6453 }
 0x4c7   : >> { %v6458_v60 = vsel %vm606_vm10, %v6454_v59, %v6456_v57  ;;  %v6464_v37 = vsel %vm606_vm10, 0.0, %v6454_v59  ;;  %v8058_v59 = vstv %s16476_s17 }
 0x4c8   : >> { %v6467_v63 = vmul.f32 %v15702_v7, %v6464_v37  ;;  %v6468_v40 = vmul.f32 %v15714_v12, %v6458_v60  ;;  %14119 = vmatmul.mubr.msk.f32.vlgmr.msra.gmra.mrb[0].mxu1 %vm5376_vm2, %v14114_v58 }
 0x4c9   : >> { %v15285_v23 = vpop.permute.xlu1 %15284  ;;  %6544 = vmatprep.mubr.f32.mxu1 %v15552_v34 }
 0x4ca   : >> { %v14497_v0 = vpack.c.bf16 %v6468_v40, %v6466_v62  ;;  %v14500_v1 = vpack.c.bf16 %v6467_v63, %v6465_v61  ;;  %v15287_v39 = vunpack.i.h.bf16 %v15285_v23  ;;  %v15286_v2 = vunpack.i.l.bf16 %v15285_v23  ;;  %v15280_v3 = vpop.permute.xlu0 %15279 }
 0x4cb   : >> { %v15282_v4 = vunpack.i.h.bf16 %v15280_v3  ;;  %v15281_v5 = vunpack.i.l.bf16 %v15280_v3 }
 0x4cc   : >> { %14499 = vmatprep.subr.msk.bf16.mxu1 %vm16487_vm1, %v14497_v0 }
 0x4cd   : >> { %v7861_v8 = vsel %vm1068_vm11, %v15282_v4, %v15286_v2  ;;  %v7862_v9 = vsel %vm1068_vm11, %v15287_v39, %v15281_v5  ;;  %v7867_v10 = vsel %vm1068_vm11, %v15281_v5, 0.0  ;;  %14502 = vmatpush1.bf16.msk.msra.mxu1 %vm16487_vm1, %v14500_v1  ;;  %v6556_v13 = vpop.permute.xlu1 %6555 }
 0x4ce   : >> { %v14581_v15 = vpack.c.bf16 %v7867_v10, %v15286_v2  ;;  %v14584_v16 = vpack.c.bf16 %v7862_v9, %v7861_v8  ;;  %v6554_v42 = vpop.permute.xlu0 %6553 }
 0x4cf   : >> { %v6561_v44 = vsel %vm701_vm12, %v6554_v42, %v6556_v13  ;;  %v6567_v17 = vsel %vm701_vm12, 0.0, %v6554_v42 }
 0x4d0   : >> { %14583 = vmatprep.subr.msk.bf16.mxu0 %vm16797_vm5, %v14581_v15  ;;  %14123 = vmatmul.mubr.msk.f32.vlgmr.msra.gmra.mrb[0].mxu1 %vm5376_vm2, %v14120_v14  ;;  %v6569_v53 = vmul.f32 %v15700_v6, %v6567_v17  ;;  %v6570_v26 = vmul.f32 %v15712_v11, %v6561_v44 }
 0x4d1   : >> { %14586 = vmatpush1.bf16.msk.msra.mxu0 %vm16487_vm1, %v14584_v16  ;;  %v6560_v18 = vpop.permute.xlu1 %6559  ;;  %6648 = vmatprep.mubr.f32.mxu1 %v15552_v34 }
 0x4d2   : >> { %v6558_v20 = vpop.permute.xlu0 %6557 }
 0x4d3   : >> { %v6562_v55 = vsel %vm701_vm12, %v6558_v20, %v6560_v18  ;;  %v6568_v51 = vsel %vm701_vm12, 0.0, %v6558_v20 }
 0x4d4   : >> { %v6571_v33 = vmul.f32 %v15700_v6, %v6568_v51  ;;  %v6572_v21 = vmul.f32 %v15712_v11, %v6562_v55  ;;  %14183 = vmatmul.mubr.msk.f32.vlgmr.msra.gmra.mrb[0].mxu0 %vm5376_vm2, %v14179_v19 }
 0x4d5   : >> { %v7958_v38 = vpop.permute.xlu1 %7957  ;;  %8046 = vmatprep.mubr.f32.mxu0 %v15552_v34  ;;  %v14124_v34 = vld [vmem:[%s18597_s3 + $0x30] sm:$0xf] }
 0x4d6   : >> { %v14503_v43 = vpack.c.bf16 %v6572_v21, %v6570_v26  ;;  %v14506_v31 = vpack.c.bf16 %v6571_v33, %v6569_v53  ;;  %v7966_v22 = vsel %vm1159_vm13, %v7958_v38, 0.0  ;;  %v7954_v28 = vpop.permute.xlu0 %7953 }
 0x4d7   : >> { %v7970_v52 = vmul.f32 %v15714_v12, %v7966_v22  ;;  %v7965_v54 = vsel %vm1159_vm13, %v7954_v28, 0.0 }
 0x4d8   : >> { %v7968_v24 = vmul.f32 %v15714_v12, %v7965_v54  ;;  %14505 = vmatprep.subr.msk.bf16.mxu1 %vm16487_vm1, %v14503_v43 }
 0x4d9   : >> { %14508 = vmatpush1.bf16.msk.msra.mxu1 %vm16487_vm1, %v14506_v31  ;;  %v7956_v25 = vpop.permute.xlu1 %7955 }
 0x4da   : >> { %v14587_v27 = vpack.c.bf16 %v7970_v52, %v7968_v24  ;;  %v7960_v29 = vsel %vm1159_vm13, %v7956_v25, %v7958_v38  ;;  %v7952_v30 = vpop.permute.xlu0 %7951 }
 0x4db   : >> { %v7969_v41 = vmul.f32 %v15702_v7, %v7960_v29  ;;  %v7959_v32 = vsel %vm1159_vm13, %v7952_v30, %v7954_v28 }
 0x4dc   : >> { %v7967_v45 = vmul.f32 %v15702_v7, %v7959_v32  ;;  %14127 = vmatmul.mubr.msk.f32.vlgmr.msra.gmra.mrb[0].mxu1 %vm5376_vm2, %v14124_v34  ;;  %14589 = vmatprep.subr.msk.bf16.mxu0 %vm16487_vm1, %v14587_v27 }
 0x4de   : >> { %v14590_v47 = vpack.c.bf16 %v7969_v41, %v7967_v45 }
 0x4e0   : >> { %14592 = vmatpush1.bf16.msk.msra.mxu0 %vm16487_vm1, %v14590_v47 }
 0x4e3   : >> { %14187 = vmatmul.mubr.msk.f32.vlgmr.msra.gmra.mrb[0].mxu0 %vm5376_vm2, %v14184_v48 }
 0x5af   : >> { %v6650_v49 = vpop.f32.mrb[0].mxu1 }
 0x5b0   : >> { %v6652_v50 = vpop.f32.mrb[1].mxu1 }
 0x5b6   : >> { %v8048_v36 = vpop.f32.mrb[0].mxu0 }
 0x5b7   : >> { %v14925_v57 = vadd.f32 %v8048_v36, %v6650_v49  ;;  %v8050_v58 = vpop.f32.mrb[1].mxu0 }
 0x5b8   : >> { %v14926_v60 = vadd.f32 %v8050_v58, %v6652_v50 }
 0x5b9   : >> { %v8056_v37 = vmul.f32 %v14925_v57, %v8055_v56 }
 0x5ba   : >> { %v8057_v61 = vmul.f32 %v14926_v60, %v8055_v56 }
 0x5bb   : >> { %v8059_v35 = vadd.f32 %v8058_v59, %v8056_v37 }
 0x5bc   : >> { %v8060_v62 = vadd.f32 %v8058_v59, %v8057_v61  ;;  %5307 = sbr.rel (!%p5305_p12) target bundleno = 956 (0x3bc), region = 294 }
 0x5bd   : >> { %v8061_v63 = vmax.f32 %v8059_v35, 0.0 }
 0x5be   : >> { %v8062_v40 = vmax.f32 %v8060_v62, 0.0 }
 0x5bf   : >> { %v8065_v23 = vrot.slane %v8061_v63, 4 }
 0x5c0   : >> { %v8066_v0 = vrot.slane %v8062_v40, 4 }
 0x5c1   : >> { %14188 = vst [vmem:[%s16491_s9 + $0x40] sm:$0xf0] %v8065_v23 }
 0x5c2   : >> { %14189 = vst [vmem:[%s16491_s9 + $0x48] sm:$0xf0] %v8066_v0 }
 0x5c3 LB: >> { %s14426_s19 = smul.u32 48, %s15526_s14  ;;  %v15562_v1 = vmov 0.0   ;;  %s15563_s23 = smov 127   ;;  %v14236_v15 = vld [vmem:[%s18598_s4 + $0x34] sm:$0xf]  ;;  %vm17368_vm14 = vmpackc.low %vm16246_vm15, %vm16246_vm15  ;;  %s15526_s14 = sphi %s17148_s14, %s8078_s14  }
 0x5c4   : >> { %9424 = vmatprep.mubr.f32.mxu0 %v15562_v1  ;;  %8214 = vmatprep.mubr.f32.mxu1 %v15562_v1  ;;  %s15564_s22 = smov 16   ;;  %s15565_s16 = smov 17   ;;  %v14238_v59 = vld [vmem:[%s18598_s4 + $0x38] sm:$0xf]  ;;  %v14201_v61 = vld [vmem:[%s18598_s4 + $0x4] sm:$0xf]  ;;  %vm17446_vm0 = vmpackc.low %vm1068_vm11, %vm1068_vm11 }
 0x5c5   : >> { %s17156_s8 = scalar_lea.vmem [#allocation2], %s14426_s19  ;;  %s15566_s18 = smov 113  }
 0x5c6   : >> { %s15567_s29 = smov 15   ;;  %s15568_s19 = smov 112  }
 0x5c7   : >> { %s18609_s17 = smov 1   ;;  %s18607_s9 = smov 111  }
 0x5c8   : >> { %s8078_s14 = sadd.s32 1, %s15526_s14  }
 0x5c9   : >> { %v17159_v39 = vld [vmem:[%s17156_s8 + $0x38] sm:$0xff]  ;;  %v17162_v2 = vld [vmem:[%s17156_s8 + $0x30] sm:$0xff]  ;;  %v17165_v3 = vld [vmem:[%s17156_s8 + $0x48] sm:$0xff]  ;;  %p8075_p13 = scmp.ge.s32.totalorder %s8078_s14, 8  }
 0x5ca   : >> { %9435 = vrot.lane.b32.xlu0 %v17159_v39, %s15563_s23  ;;  %9433 = vrot.lane.b32.xlu1 %v17162_v2, %s15563_s23  ;;  %v17172_v4 = vld [vmem:[%s17156_s8 + $0x40] sm:$0xff]  ;;  %v17175_v5 = vld [vmem:[%s17156_s8 + $0x10] sm:$0xff]  ;;  %v14648_v8 = vpack.c.bf16 %v17165_v3, %v17159_v39  ;;  %v17241_v17 = vpack.i.bf16 %v17159_v39, %v17162_v2 }
 0x5cb   : >> { %v17180_v9 = vld [vmem:[%s17156_s8 + $0x18] sm:$0xff]  ;;  %v17183_v10 = vld [vmem:[%s17156_s8] sm:$0xff]  ;;  %v17186_v13 = vld [vmem:[%s17156_s8 + $0x8] sm:$0xff]  ;;  %v14650_v14 = vpack.c.bf16 %v17172_v4, %v17162_v2  ;;  %v17237_v44 = vpack.i.bf16 %v17165_v3, %v17172_v4 }
 0x5cc   : >> { %14649 = vmatprep.subr.bf16.mxu0 %v14648_v8  ;;  %v17199_v16 = vpack.i.bf16 %v17180_v9, %v17175_v5  ;;  %v17203_v42 = vpack.i.bf16 %v17186_v13, %v17183_v10  ;;  %v17264_v18 = vld [vmem:[%s17156_s8 + $0x68] sm:$0xff]  ;;  %v17267_v19 = vld [vmem:[%s17156_s8 + $0x60] sm:$0xff]  ;;  %v17274_v20 = vld [vmem:[%s17156_s8 + $0x78] sm:$0xff] }
 0x5cd   : >> { %14651 = vmatpush1.bf16.msra.mxu0 %v14650_v14  ;;  %v17277_v55 = vld [vmem:[%s17156_s8 + $0x70] sm:$0xff]  ;;  %v17297_v53 = vpack.i.bf16 %v17264_v18, %v17267_v19 }
 0x5ce   : >> { %9439 = vrot.lane.b32.xlu0 %v17165_v3, %s15563_s23  ;;  %9437 = vrot.lane.b32.xlu1 %v17172_v4, %s15563_s23  ;;  %v17293_v51 = vpack.i.bf16 %v17274_v20, %v17277_v55 }
 0x5d0   : >> { %14237 = vmatmul.mubr.msk.f32.vlgmr.msra.gmra.mrb[0].mxu0 %vm435_vm7, %v14236_v15 }
 0x5d1   : >> { %9522 = vmatprep.mubr.f32.mxu0 %v15562_v1 }
 0x5d2   : >> { %15294 = vrot.lane.b32.xlu1 %v17199_v16, %s15564_s22  ;;  %15289 = vrot.lane.b32.xlu0 %v17203_v42, %s15564_s22 }
 0x5d6   : >> { %8108 = vrot.lane.b32.xlu1 %v17186_v13, %s15565_s16  ;;  %8106 = vrot.lane.b32.xlu0 %v17183_v10, %s15565_s16 }
 0x5da   : >> { %8112 = vrot.lane.b32.xlu1 %v17180_v9, %s15565_s16  ;;  %8110 = vrot.lane.b32.xlu0 %v17175_v5, %s15565_s16 }
 0x5de   : >> { %9537 = vrot.lane.b32.xlu1 %v17165_v3, %s15566_s18  ;;  %9533 = vrot.lane.b32.xlu0 %v17159_v39, %s15566_s18 }
 0x5e2   : >> { %9535 = vrot.lane.b32.xlu1 %v17172_v4, %s15566_s18  ;;  %9531 = vrot.lane.b32.xlu0 %v17162_v2, %s15566_s18 }
 0x5e6   : >> { %8297 = vrot.lane.b32.xlu1 %v17186_v13, %s15567_s29  ;;  %8295 = vrot.lane.b32.xlu0 %v17183_v10, %s15567_s29 }
 0x5ea   : >> { %8301 = vrot.lane.b32.xlu1 %v17180_v9, %s15567_s29  ;;  %8299 = vrot.lane.b32.xlu0 %v17175_v5, %s15567_s29 }
 0x5ee   : >> { %15304 = vrot.lane.b32.xlu1 %v17237_v44, %s15568_s19  ;;  %15299 = vrot.lane.b32.xlu0 %v17241_v17, %s15568_s19 }
 0x5f2   : >> { %8396 = vrot.lane.b32.xlu1 %v17186_v13, %s18609_s17  ;;  %8394 = vrot.lane.b32.xlu0 %v17183_v10, %s18609_s17 }
 0x5f6   : >> { %8400 = vrot.lane.b32.xlu1 %v17180_v9, %s18609_s17  ;;  %8398 = vrot.lane.b32.xlu0 %v17175_v5, %s18609_s17 }
 0x5fa   : >> { %9729 = vrot.lane.b32.xlu1 %v17165_v3, %s18607_s9  ;;  %9725 = vrot.lane.b32.xlu0 %v17159_v39, %s18607_s9 }
 0x5fe   : >> { %9727 = vrot.lane.b32.xlu1 %v17172_v4, %s18607_s9  ;;  %9723 = vrot.lane.b32.xlu0 %v17162_v2, %s18607_s9 }
 0x602   : >> { %9827 = vrot.lane.b32.xlu1 %v17264_v18, %s15565_s16  ;;  %9825 = vrot.lane.b32.xlu0 %v17267_v19, %s15565_s16 }
 0x606   : >> { %9831 = vrot.lane.b32.xlu1 %v17274_v20, %s15565_s16  ;;  %9829 = vrot.lane.b32.xlu0 %v17277_v55, %s15565_s16 }
 0x60a   : >> { %8577 = vrot.lane.b32.xlu1 %v17180_v9, %s15563_s23  ;;  %8573 = vrot.lane.b32.xlu0 %v17186_v13, %s15563_s23 }
 0x60e   : >> { %8575 = vrot.lane.b32.xlu1 %v17175_v5, %s15563_s23  ;;  %8571 = vrot.lane.b32.xlu0 %v17183_v10, %s15563_s23 }
 0x612   : >> { %15314 = vrot.lane.b32.xlu1 %v17293_v51, %s15564_s22  ;;  %15309 = vrot.lane.b32.xlu0 %v17297_v53, %s15564_s22 }
 0x616   : >> { %8676 = vrot.lane.b32.xlu1 %v17180_v9, %s15566_s18  ;;  %8672 = vrot.lane.b32.xlu0 %v17186_v13, %s15566_s18 }
 0x61a   : >> { %10019 = vrot.lane.b32.xlu1 %v17264_v18, %s15567_s29  ;;  %10017 = vrot.lane.b32.xlu0 %v17267_v19, %s15567_s29 }
 0x61e   : >> { %10023 = vrot.lane.b32.xlu1 %v17274_v20, %s15567_s29  ;;  %10021 = vrot.lane.b32.xlu0 %v17277_v55, %s15567_s29 }
 0x622   : >> { %8674 = vrot.lane.b32.xlu1 %v17175_v5, %s15566_s18  ;;  %8670 = vrot.lane.b32.xlu0 %v17183_v10, %s15566_s18 }
 0x626   : >> { %10117 = vrot.lane.b32.xlu1 %v17264_v18, %s18609_s17  ;;  %10115 = vrot.lane.b32.xlu0 %v17267_v19, %s18609_s17 }
 0x62a   : >> { %10121 = vrot.lane.b32.xlu1 %v17274_v20, %s18609_s17  ;;  %10119 = vrot.lane.b32.xlu0 %v17277_v55, %s18609_s17  ;;  %s18631_s17 = smov 111  }
 0x62e   : >> { %15324 = vrot.lane.b32.xlu1 %v17199_v16, %s15568_s19  ;;  %15319 = vrot.lane.b32.xlu0 %v17203_v42, %s15568_s19 }
 0x632   : >> { %8870 = vrot.lane.b32.xlu1 %v17180_v9, %s18607_s9  ;;  %8866 = vrot.lane.b32.xlu0 %v17186_v13, %s18607_s9 }
 0x636   : >> { %8868 = vrot.lane.b32.xlu1 %v17175_v5, %s18607_s9  ;;  %8864 = vrot.lane.b32.xlu0 %v17183_v10, %s18607_s9  ;;  %s17721_s9 = sld [smem:[#allocation3 + $0x201]] (%p8075_p13) }
 0x63a   : >> { %8969 = vrot.lane.b32.xlu1 %v17159_v39, %s15565_s16  ;;  %8967 = vrot.lane.b32.xlu0 %v17162_v2, %s15565_s16 }
 0x63c   : >> { %v9436_v26 = vpop.permute.xlu0 %9435  ;;  %v9434_v33 = vpop.permute.xlu1 %9433 }
 0x63d   : >> { %v9447_v21 = vsel %vm878_vm6, %v9436_v26, 0.0  ;;  %v9441_v38 = vsel %vm878_vm6, %v9434_v33, %v9436_v26 }
 0x63e   : >> { %8973 = vrot.lane.b32.xlu1 %v17165_v3, %s15565_s16  ;;  %8971 = vrot.lane.b32.xlu0 %v17172_v4, %s15565_s16  ;;  %v9450_v22 = vmul.f32 %v15714_v12, %v9447_v21  ;;  %v9449_v54 = vmul.f32 %v15702_v7, %v9441_v38 }
 0x640   : >> { %v9440_v43 = vpop.permute.xlu0 %9439  ;;  %v9438_v31 = vpop.permute.xlu1 %9437 }
 0x641   : >> { %v9448_v28 = vsel %vm878_vm6, %v9440_v43, 0.0  ;;  %v9442_v52 = vsel %vm878_vm6, %v9438_v31, %v9440_v43 }
 0x642   : >> { %v9452_v24 = vmul.f32 %v15714_v12, %v9448_v28  ;;  %v9451_v25 = vmul.f32 %v15702_v7, %v9442_v52  ;;  %10297 = vrot.lane.b32.xlu1 %v17274_v20, %s15563_s23  ;;  %10293 = vrot.lane.b32.xlu0 %v17264_v18, %s15563_s23  ;;  %v8127_v52 = vld [vmem:[%s18598_s4] sm:$0xf] }
 0x644   : >> { %v14654_v34 = vpack.c.bf16 %v9451_v25, %v9449_v54  ;;  %v15295_v27 = vpop.permute.xlu1 %15294  ;;  %v15290_v29 = vpop.permute.xlu0 %15289  ;;  %v14652_v30 = vpack.c.bf16 %v9452_v24, %v9450_v22 }
 0x645   : >> { %v15297_v41 = vunpack.i.h.bf16 %v15295_v27  ;;  %v15296_v32 = vunpack.i.l.bf16 %v15295_v27  ;;  %v15292_v45 = vunpack.i.h.bf16 %v15290_v29  ;;  %v15291_v47 = vunpack.i.l.bf16 %v15290_v29 }
 0x646   : >> { %14653 = vmatprep.subr.bf16.mxu0 %v14652_v30  ;;  %10295 = vrot.lane.b32.xlu1 %v17277_v55, %s15563_s23  ;;  %v14240_v30 = vld [vmem:[%s18598_s4 + $0x3c] sm:$0xf] }
 0x647   : >> { %10291 = vrot.lane.b32.xlu0 %v17267_v19, %s15563_s23  ;;  %14655 = vmatpush1.bf16.msra.mxu0 %v14654_v34  ;;  %v8137_v48 = vsel %vm435_vm7, %v15291_v47, %v15292_v45  ;;  %v8138_v49 = vsel %vm435_vm7, %v15296_v32, %v15297_v41  ;;  %v14595_v58 = vpack.c.bf16 %v15296_v32, %v15291_v47 }
 0x648   : >> { %v8109_v50 = vpop.permute.xlu1 %8108  ;;  %v8107_v36 = vpop.permute.xlu0 %8106  ;;  %v14593_v56 = vpack.c.bf16 %v8138_v49, %v8137_v48 }
 0x649   : >> { %v8121_v60 = vsel %vm423_vm8, 0.0, %v8107_v36  ;;  %v8115_v37 = vsel %vm423_vm8, %v8107_v36, %v8109_v50 }
 0x64a   : >> { %10395 = vrot.lane.b32.xlu1 %v17274_v20, %s15566_s18  ;;  %14594 = vmatprep.subr.bf16.mxu1 %v14593_v56  ;;  %v8123_v63 = vmul.f32 %v15700_v6, %v8121_v60  ;;  %v8124_v0 = vmul.f32 %v15712_v11, %v8115_v37 }
 0x64b   : >> { %10391 = vrot.lane.b32.xlu0 %v17264_v18, %s15566_s18  ;;  %14597 = vmatpush1.bf16.msk.msra.mxu1 %vm17368_vm14, %v14595_v58 }
 0x64c   : >> { %v8113_v35 = vpop.permute.xlu1 %8112  ;;  %v8111_v62 = vpop.permute.xlu0 %8110  ;;  %14239 = vmatmul.mubr.msk.f32.vlgmr.msra.gmra.mrb[0].mxu0 %vm435_vm7, %v14238_v59 }
 0x64d   : >> { %v8116_v40 = vsel %vm423_vm8, %v8111_v62, %v8113_v35  ;;  %v8122_v23 = vsel %vm423_vm8, 0.0, %v8111_v62  ;;  %9620 = vmatprep.mubr.f32.mxu0 %v15562_v1 }
 0x64e   : >> { %v8125_v8 = vmul.f32 %v15700_v6, %v8122_v23  ;;  %v8126_v14 = vmul.f32 %v15712_v11, %v8116_v40  ;;  %10393 = vrot.lane.b32.xlu1 %v17277_v55, %s15566_s18  ;;  %14206 = vmatmul.mubr.msk.f32.vlgmr.msra.gmra.mrb[0].mxu1 %vm435_vm7, %v14201_v61 }
 0x64f   : >> { %10389 = vrot.lane.b32.xlu0 %v17267_v19, %s15566_s18  ;;  %8288 = vmatprep.mubr.f32.mxu1 %v15562_v1 }
 0x650   : >> { %v14600_v15 = vpack.c.bf16 %v8125_v8, %v8123_v63  ;;  %v9538_v16 = vpop.permute.xlu1 %9537  ;;  %v9534_v42 = vpop.permute.xlu0 %9533  ;;  %v14598_v26 = vpack.c.bf16 %v8126_v14, %v8124_v0 }
 0x651   : >> { %v9546_v33 = vsel %vm973_vm9, %v9538_v16, 0.0  ;;  %v9545_v21 = vsel %vm973_vm9, %v9534_v42, 0.0 }
 0x652   : >> { %v9550_v38 = vmul.f32 %v15712_v11, %v9546_v33  ;;  %v9548_v43 = vmul.f32 %v15712_v11, %v9545_v21  ;;  %15334 = vrot.lane.b32.xlu1 %v17237_v44, %s15564_s22  ;;  %14599 = vmatprep.subr.bf16.mxu1 %v14598_v26 }
 0x653   : >> { %15329 = vrot.lane.b32.xlu0 %v17241_v17, %s15564_s22  ;;  %14601 = vmatpush1.bf16.msra.mxu1 %v14600_v15  ;;  %s17719_s22 = sld [smem:[#allocation3 + $0x200]] (%p8075_p13) }
 0x654   : >> { %v9536_v31 = vpop.permute.xlu1 %9535  ;;  %v9532_v22 = vpop.permute.xlu0 %9531  ;;  %v14656_v28 = vpack.c.bf16 %v9550_v38, %v9548_v43 }
 0x655   : >> { %v9540_v54 = vsel %vm973_vm9, %v9536_v31, %v9538_v16  ;;  %v9539_v24 = vsel %vm973_vm9, %v9532_v22, %v9534_v42 }
 0x656   : >> { %v9549_v25 = vmul.f32 %v15700_v6, %v9540_v54  ;;  %v9547_v44 = vmul.f32 %v15700_v6, %v9539_v24  ;;  %9161 = vrot.lane.b32.xlu1 %v17159_v39, %s15567_s29  ;;  %14657 = vmatprep.subr.bf16.mxu0 %v14656_v28  ;;  %v14610_v54 = vpack.c.bf16 %v17180_v9, %v17186_v13  ;;  %v14210_v9 = vld [vmem:[%s18598_s4 + $0xc] sm:$0xf] }
 0x657   : >> { %9159 = vrot.lane.b32.xlu0 %v17162_v2, %s15567_s29  ;;  %14207 = vmatmul.mubr.msk.f32.vlgmr.msra.gmra.mrb[0].mxu1 %vm435_vm7, %v8127_v52  ;;  %v14612_v13 = vpack.c.bf16 %v17175_v5, %v17183_v10 }
 0x658   : >> { %v14658_v17 = vpack.c.bf16 %v9549_v25, %v9547_v44  ;;  %v8298_v34 = vpop.permute.xlu1 %8297  ;;  %v8296_v27 = vpop.permute.xlu0 %8295  ;;  %8385 = vmatprep.mubr.f32.mxu1 %v15562_v1 }
 0x659   : >> { %v8310_v29 = vsel %vm606_vm10, 0.0, %v8296_v27  ;;  %v8304_v41 = vsel %vm606_vm10, %v8296_v27, %v8298_v34 }
 0x65a   : >> { %9165 = vrot.lane.b32.xlu1 %v17165_v3, %s15567_s29  ;;  %14659 = vmatpush1.bf16.msra.mxu0 %v14658_v17  ;;  %v8312_v47 = vmul.f32 %v15702_v7, %v8310_v29  ;;  %v8313_v50 = vmul.f32 %v15714_v12, %v8304_v41 }
 0x65b   : >> { %9163 = vrot.lane.b32.xlu0 %v17172_v4, %s15567_s29  ;;  %s18628_s29 = smov 1  }
 0x65c   : >> { %v8302_v32 = vpop.permute.xlu1 %8301  ;;  %v8300_v45 = vpop.permute.xlu0 %8299 }
 0x65d   : >> { %v8305_v48 = vsel %vm606_vm10, %v8300_v45, %v8302_v32  ;;  %v8311_v49 = vsel %vm606_vm10, 0.0, %v8300_v45  ;;  %14241 = vmatmul.mubr.msk.f32.vlgmr.msra.gmra.mrb[0].mxu0 %vm435_vm7, %v14240_v30 }
 0x65e   : >> { %v8314_v36 = vmul.f32 %v15702_v7, %v8311_v49  ;;  %v8315_v56 = vmul.f32 %v15714_v12, %v8305_v48  ;;  %15344 = vrot.lane.b32.xlu1 %v17293_v51, %s15568_s19  ;;  %9714 = vmatprep.mubr.f32.mxu0 %v15562_v1  ;;  %v14246_v49 = vld [vmem:[%s18598_s4 + $0x44] sm:$0xf] }
 0x65f   : >> { %15339 = vrot.lane.b32.xlu0 %v17297_v53, %s15568_s19 }
 0x660   : >> { %v14604_v58 = vpack.c.bf16 %v8314_v36, %v8312_v47  ;;  %v15305_v59 = vpop.permute.xlu1 %15304  ;;  %v15300_v60 = vpop.permute.xlu0 %15299  ;;  %v14602_v37 = vpack.c.bf16 %v8315_v56, %v8313_v50  ;;  %v14212_v36 = vld [vmem:[%s18598_s4 + $0x10] sm:$0xf] }
 0x661   : >> { %v15307_v61 = vunpack.i.h.bf16 %v15305_v59  ;;  %v15306_v35 = vunpack.i.l.bf16 %v15305_v59  ;;  %v15302_v62 = vunpack.i.h.bf16 %v15300_v60  ;;  %v15301_v63 = vunpack.i.l.bf16 %v15300_v60 }
 0x662   : >> { %9259 = vrot.lane.b32.xlu1 %v17159_v39, %s18628_s29  ;;  %14603 = vmatprep.subr.bf16.mxu1 %v14602_v37  ;;  %v14208_v39 = vld [vmem:[%s18598_s4 + $0x8] sm:$0xf] }
 0x663   : >> { %v9638_v53 = vsel %vm1068_vm11, %v15306_v35, %v15307_v61  ;;  %v14660_v40 = vpack.c.bf16 %v15307_v61, %v15302_v62  ;;  %v9637_v23 = vsel %vm1068_vm11, %v15301_v63, %v15302_v62  ;;  %9257 = vrot.lane.b32.xlu0 %v17162_v2, %s18628_s29  ;;  %14605 = vmatpush1.bf16.msra.mxu1 %v14604_v58  ;;  %v14242_v2 = vld [vmem:[%s18598_s4 + $0x40] sm:$0xf] }
 0x664   : >> { %v14663_v0 = vpack.c.bf16 %v9638_v53, %v9637_v23  ;;  %v8397_v8 = vpop.permute.xlu1 %8396  ;;  %v8395_v14 = vpop.permute.xlu0 %8394 }
 0x665   : >> { %14662 = vmatprep.subr.msk.bf16.mxu0 %vm17446_vm0, %v14660_v40  ;;  %v8409_v15 = vsel %vm701_vm12, 0.0, %v8395_v14  ;;  %v8403_v16 = vsel %vm701_vm12, %v8395_v14, %v8397_v8 }
 0x666   : >> { %9263 = vrot.lane.b32.xlu1 %v17165_v3, %s18628_s29  ;;  %14664 = vmatpush1.bf16.msra.mxu0 %v14663_v0  ;;  %v8411_v33 = vmul.f32 %v15700_v6, %v8409_v15  ;;  %v8412_v38 = vmul.f32 %v15712_v11, %v8403_v16  ;;  %v14248_v15 = vld [vmem:[%s18598_s4 + $0x48] sm:$0xf] }
 0x667   : >> { %9261 = vrot.lane.b32.xlu0 %v17172_v4, %s18628_s29  ;;  %14209 = vmatmul.mubr.msk.f32.vlgmr.msra.gmra.mrb[0].mxu1 %vm435_vm7, %v14208_v39  ;;  %s17723_s29 = smov (%p8075_p13), 0  }
 0x668   : >> { %v8401_v42 = vpop.permute.xlu1 %8400  ;;  %v8399_v26 = vpop.permute.xlu0 %8398  ;;  %8484 = vmatprep.mubr.f32.mxu1 %v15562_v1 }
 0x669   : >> { %v8404_v3 = vsel %vm701_vm12, %v8399_v26, %v8401_v42  ;;  %v8410_v21 = vsel %vm701_vm12, 0.0, %v8399_v26  ;;  %14245 = vmatmul.mubr.msk.f32.vlgmr.msra.gmra.mrb[0].mxu0 %vm435_vm7, %v14242_v2 }
 0x66a   : >> { %v8413_v43 = vmul.f32 %v15700_v6, %v8410_v21  ;;  %v8414_v4 = vmul.f32 %v15712_v11, %v8404_v3  ;;  %10587 = vrot.lane.b32.xlu1 %v17274_v20, %s18631_s17  ;;  %9812 = vmatprep.mubr.f32.mxu0 %v15562_v1 }
 0x66b   : >> { %10583 = vrot.lane.b32.xlu0 %v17264_v18, %s18631_s17 }
 0x66c   : >> { %v14608_v31 = vpack.c.bf16 %v8413_v43, %v8411_v33  ;;  %v9730_v22 = vpop.permute.xlu1 %9729  ;;  %v9726_v28 = vpop.permute.xlu0 %9725  ;;  %v14606_v52 = vpack.c.bf16 %v8414_v4, %v8412_v38 }
 0x66d   : >> { %v9738_v24 = vsel %vm1159_vm13, %v9730_v22, 0.0  ;;  %v9737_v25 = vsel %vm1159_vm13, %v9726_v28, 0.0 }
 0x66e   : >> { %v9742_v44 = vmul.f32 %v15714_v12, %v9738_v24  ;;  %v9740_v17 = vmul.f32 %v15714_v12, %v9737_v25  ;;  %10585 = vrot.lane.b32.xlu1 %v17277_v55, %s18631_s17  ;;  %14607 = vmatprep.subr.bf16.mxu1 %v14606_v52 }
 0x66f   : >> { %10581 = vrot.lane.b32.xlu0 %v17267_v19, %s18631_s17  ;;  %14609 = vmatpush1.bf16.msra.mxu1 %v14608_v31 }
 0x670   : >> { %v9728_v34 = vpop.permute.xlu1 %9727  ;;  %v9724_v27 = vpop.permute.xlu0 %9723  ;;  %v14665_v29 = vpack.c.bf16 %v9742_v44, %v9740_v17  ;;  %14611 = vmatprep.subr.bf16.mxu1 %v14610_v54  ;;  %v14214_v54 = vld [vmem:[%s18598_s4 + $0x14] sm:$0xf] }
 0x671   : >> { %v9732_v30 = vsel %vm1159_vm13, %v9728_v34, %v9730_v22  ;;  %v9731_v41 = vsel %vm1159_vm13, %v9724_v27, %v9726_v28 }
 0x672   : >> { %v9741_v32 = vmul.f32 %v15702_v7, %v9732_v30  ;;  %v9739_v45 = vmul.f32 %v15702_v7, %v9731_v41  ;;  %14666 = vmatprep.subr.bf16.mxu0 %v14665_v29  ;;  %14211 = vmatmul.mubr.msk.f32.vlgmr.msra.gmra.mrb[0].mxu1 %vm435_vm7, %v14210_v9  ;;  %v14250_v41 = vld [vmem:[%s18598_s4 + $0x4c] sm:$0xf] }
 0x673   : >> { %14613 = vmatpush1.bf16.msra.mxu1 %v14612_v13  ;;  %8562 = vmatprep.mubr.f32.mxu1 %v15562_v1 }
 0x674   : >> { %v14667_v47 = vpack.c.bf16 %v9741_v32, %v9739_v45  ;;  %v9828_v5 = vpop.permute.xlu1 %9827  ;;  %v9826_v10 = vpop.permute.xlu0 %9825 }
 0x675   : >> { %v9839_v48 = vsel %vm423_vm8, 0.0, %v9826_v10  ;;  %v9833_v50 = vsel %vm423_vm8, %v9826_v10, %v9828_v5 }
 0x676   : >> { %14668 = vmatpush1.bf16.msra.mxu0 %v14667_v47  ;;  %v9841_v59 = vmul.f32 %v15700_v6, %v9839_v48  ;;  %v9842_v61 = vmul.f32 %v15712_v11, %v9833_v50 }
 0x678   : >> { %v9832_v56 = vpop.permute.xlu1 %9831  ;;  %v9830_v58 = vpop.permute.xlu0 %9829 }
 0x679   : >> { %v9834_v60 = vsel %vm423_vm8, %v9830_v58, %v9832_v56  ;;  %v9840_v37 = vsel %vm423_vm8, 0.0, %v9830_v58  ;;  %14247 = vmatmul.mubr.msk.f32.vlgmr.msra.gmra.mrb[0].mxu0 %vm435_vm7, %v14246_v49 }
 0x67a   : >> { %v9843_v35 = vmul.f32 %v15700_v6, %v9840_v37  ;;  %v9844_v62 = vmul.f32 %v15712_v11, %v9834_v60  ;;  %14213 = vmatmul.mubr.msk.f32.vlgmr.msra.gmra.mrb[0].mxu1 %vm435_vm7, %v14212_v36  ;;  %9914 = vmatprep.mubr.f32.mxu0 %v15562_v1 }
 0x67b   : >> { %8661 = vmatprep.mubr.f32.mxu1 %v15562_v1 }
 0x67c   : >> { %v14671_v63 = vpack.c.bf16 %v9843_v35, %v9841_v59  ;;  %v8578_v53 = vpop.permute.xlu1 %8577  ;;  %v8574_v40 = vpop.permute.xlu0 %8573  ;;  %v14669_v23 = vpack.c.bf16 %v9844_v62, %v9842_v61 }
 0x67d   : >> { %v8587_v0 = vsel %vm878_vm6, %v8578_v53, 0.0  ;;  %v8586_v8 = vsel %vm878_vm6, %v8574_v40, 0.0 }
 0x67e   : >> { %v8591_v14 = vmul.f32 %v15714_v12, %v8587_v0  ;;  %v8589_v39 = vmul.f32 %v15714_v12, %v8586_v8  ;;  %14670 = vmatprep.subr.bf16.mxu0 %v14669_v23  ;;  %v14256_v0 = vld [vmem:[%s18598_s4 + $0x50] sm:$0xf] }
 0x67f   : >> { %14672 = vmatpush1.bf16.msra.mxu0 %v14671_v63 }
 0x680   : >> { %v8576_v2 = vpop.permute.xlu1 %8575  ;;  %v8572_v16 = vpop.permute.xlu0 %8571  ;;  %v14614_v42 = vpack.c.bf16 %v8591_v14, %v8589_v39 }
 0x681   : >> { %v8581_v26 = vsel %vm878_vm6, %v8576_v2, %v8578_v53  ;;  %v8580_v33 = vsel %vm878_vm6, %v8572_v16, %v8574_v40 }
 0x682   : >> { %v8590_v3 = vmul.f32 %v15702_v7, %v8581_v26  ;;  %v8588_v21 = vmul.f32 %v15702_v7, %v8580_v33  ;;  %14615 = vmatprep.subr.bf16.mxu1 %v14614_v42  ;;  %14249 = vmatmul.mubr.msk.f32.vlgmr.msra.gmra.mrb[0].mxu0 %vm435_vm7, %v14248_v15  ;;  %v14216_v15 = vld [vmem:[%s18598_s4 + $0x18] sm:$0xf] }
 0x683   : >> { %10008 = vmatprep.mubr.f32.mxu0 %v15562_v1 }
 0x684   : >> { %v14616_v38 = vpack.c.bf16 %v8590_v3, %v8588_v21  ;;  %v15315_v43 = vpop.permute.xlu1 %15314  ;;  %v15310_v4 = vpop.permute.xlu0 %15309 }
 0x685   : >> { %v15317_v31 = vunpack.i.h.bf16 %v15315_v43  ;;  %v15316_v22 = vunpack.i.l.bf16 %v15315_v43  ;;  %v15312_v28 = vunpack.i.h.bf16 %v15310_v4  ;;  %v15311_v52 = vunpack.i.l.bf16 %v15310_v4 }
 0x686   : >> { %14617 = vmatpush1.bf16.msra.mxu1 %v14616_v38 }
 0x687   : >> { %v9932_v24 = vsel %vm435_vm7, %v15316_v22, %v15317_v31  ;;  %v9931_v25 = vsel %vm435_vm7, %v15311_v52, %v15312_v28  ;;  %v14675_v13 = vpack.c.bf16 %v15316_v22, %v15311_v52 }
 0x688   : >> { %v8677_v44 = vpop.permute.xlu1 %8676  ;;  %v8673_v17 = vpop.permute.xlu0 %8672  ;;  %v14673_v9 = vpack.c.bf16 %v9932_v24, %v9931_v25 }
 0x689   : >> { %v8686_v34 = vsel %vm973_vm9, %v8677_v44, 0.0  ;;  %v8685_v27 = vsel %vm973_vm9, %v8673_v17, 0.0  ;;  %14215 = vmatmul.mubr.msk.f32.vlgmr.msra.gmra.mrb[0].mxu1 %vm435_vm7, %v14214_v54  ;;  %v14686_v54 = vpack.c.bf16 %v17274_v20, %v17264_v18 }
 0x68a   : >> { %v8690_v29 = vmul.f32 %v15712_v11, %v8686_v34  ;;  %v8688_v30 = vmul.f32 %v15712_v11, %v8685_v27  ;;  %14674 = vmatprep.subr.bf16.mxu0 %v14673_v9  ;;  %8760 = vmatprep.mubr.f32.mxu1 %v15562_v1  ;;  %v14258_v27 = vld [vmem:[%s18598_s4 + $0x54] sm:$0xf] }
 0x68b   : >> { %14677 = vmatpush1.bf16.msk.msra.mxu0 %vm17368_vm14, %v14675_v13 }
 0x68c   : >> { %v10020_v32 = vpop.permute.xlu1 %10019  ;;  %v10018_v45 = vpop.permute.xlu0 %10017  ;;  %v14618_v47 = vpack.c.bf16 %v8690_v29, %v8688_v30  ;;  %v14688_v29 = vpack.c.bf16 %v17277_v55, %v17267_v19  ;;  %v14218_v19 = vld [vmem:[%s18598_s4 + $0x1c] sm:$0xf] }
 0x68d   : >> { %v10025_v5 = vsel %vm606_vm10, %v10018_v45, %v10020_v32  ;;  %v10031_v10 = vsel %vm606_vm10, 0.0, %v10018_v45 }
 0x68e   : >> { %14619 = vmatprep.subr.bf16.mxu1 %v14618_v47  ;;  %14255 = vmatmul.mubr.msk.f32.vlgmr.msra.gmra.mrb[0].mxu0 %vm435_vm7, %v14250_v41  ;;  %v10033_v56 = vmul.f32 %v15702_v7, %v10031_v10  ;;  %v10034_v58 = vmul.f32 %v15714_v12, %v10025_v5 }
 0x68f   : >> { %10106 = vmatprep.mubr.f32.mxu0 %v15562_v1 }
 0x690   : >> { %v10024_v48 = vpop.permute.xlu1 %10023  ;;  %v10022_v49 = vpop.permute.xlu0 %10021 }
 0x691   : >> { %v10026_v50 = vsel %vm606_vm10, %v10022_v49, %v10024_v48  ;;  %v10032_v36 = vsel %vm606_vm10, 0.0, %v10022_v49 }
 0x692   : >> { %v10035_v59 = vmul.f32 %v15702_v7, %v10032_v36  ;;  %v10036_v60 = vmul.f32 %v15714_v12, %v10026_v50 }
 0x694   : >> { %v14680_v37 = vpack.c.bf16 %v10035_v59, %v10033_v56  ;;  %v8675_v61 = vpop.permute.xlu1 %8674  ;;  %v8671_v35 = vpop.permute.xlu0 %8670  ;;  %v14678_v62 = vpack.c.bf16 %v10036_v60, %v10034_v58  ;;  %v14260_v56 = vld [vmem:[%s18598_s4 + $0x58] sm:$0xf] }
 0x695   : >> { %v8680_v63 = vsel %vm973_vm9, %v8675_v61, %v8677_v44  ;;  %v8679_v53 = vsel %vm973_vm9, %v8671_v35, %v8673_v17 }
 0x696   : >> { %v8689_v40 = vmul.f32 %v15700_v6, %v8680_v63  ;;  %v8687_v23 = vmul.f32 %v15700_v6, %v8679_v53  ;;  %14679 = vmatprep.subr.bf16.mxu0 %v14678_v62 }
 0x697   : >> { %14681 = vmatpush1.bf16.msra.mxu0 %v14680_v37  ;;  %v14222_v37 = vld [vmem:[%s18598_s4 + $0x20] sm:$0xf] }
 0x698   : >> { %v14620_v8 = vpack.c.bf16 %v8689_v40, %v8687_v23  ;;  %v10118_v14 = vpop.permute.xlu1 %10117  ;;  %v10116_v39 = vpop.permute.xlu0 %10115 }
 0x699   : >> { %v10123_v2 = vsel %vm701_vm12, %v10116_v39, %v10118_v14  ;;  %v10129_v16 = vsel %vm701_vm12, 0.0, %v10116_v39 }
 0x69a   : >> { %14621 = vmatpush1.bf16.msra.mxu1 %v14620_v8  ;;  %14257 = vmatmul.mubr.msk.f32.vlgmr.msra.gmra.mrb[0].mxu0 %vm435_vm7, %v14256_v0  ;;  %v10131_v21 = vmul.f32 %v15700_v6, %v10129_v16  ;;  %v10132_v38 = vmul.f32 %v15712_v11, %v10123_v2 }
 0x69b   : >> { %10204 = vmatprep.mubr.f32.mxu0 %v15562_v1 }
 0x69c   : >> { %v10122_v42 = vpop.permute.xlu1 %10121  ;;  %v10120_v26 = vpop.permute.xlu0 %10119 }
 0x69d   : >> { %v10124_v33 = vsel %vm701_vm12, %v10120_v26, %v10122_v42  ;;  %v10130_v3 = vsel %vm701_vm12, 0.0, %v10120_v26  ;;  %14217 = vmatmul.mubr.msk.f32.vlgmr.msra.gmra.mrb[0].mxu1 %vm435_vm7, %v14216_v15 }
 0x69e   : >> { %v10133_v43 = vmul.f32 %v15700_v6, %v10130_v3  ;;  %v10134_v4 = vmul.f32 %v15712_v11, %v10124_v33  ;;  %8855 = vmatprep.mubr.f32.mxu1 %v15562_v1 }
 0x6a0   : >> { %v14684_v31 = vpack.c.bf16 %v10133_v43, %v10131_v21  ;;  %v15325_v22 = vpop.permute.xlu1 %15324  ;;  %v15320_v28 = vpop.permute.xlu0 %15319  ;;  %v14682_v52 = vpack.c.bf16 %v10134_v4, %v10132_v38  ;;  %v14224_v21 = vld [vmem:[%s18598_s4 + $0x24] sm:$0xf] }
 0x6a1   : >> { %v15327_v24 = vunpack.i.h.bf16 %v15325_v22  ;;  %v15326_v25 = vunpack.i.l.bf16 %v15325_v22  ;;  %v15322_v44 = vunpack.i.h.bf16 %v15320_v28  ;;  %v15321_v17 = vunpack.i.l.bf16 %v15320_v28 }
 0x6a2   : >> { %14683 = vmatprep.subr.bf16.mxu0 %v14682_v52 }
 0x6a3   : >> { %v8779_v9 = vsel %vm1068_vm11, %v15326_v25, %v15327_v24  ;;  %v14622_v13 = vpack.c.bf16 %v15327_v24, %v15322_v44  ;;  %v8778_v34 = vsel %vm1068_vm11, %v15321_v17, %v15322_v44  ;;  %14685 = vmatpush1.bf16.msra.mxu0 %v14684_v31 }
 0x6a4   : >> { %v14625_v30 = vpack.c.bf16 %v8779_v9, %v8778_v34  ;;  %v8871_v18 = vpop.permute.xlu1 %8870  ;;  %v8867_v20 = vpop.permute.xlu0 %8866  ;;  %14687 = vmatprep.subr.bf16.mxu0 %v14686_v54  ;;  %v14262_v34 = vld [vmem:[%s18598_s4 + $0x5c] sm:$0xf] }
 0x6a5   : >> { %v8880_v41 = vsel %vm1159_vm13, %v8871_v18, 0.0  ;;  %v8879_v32 = vsel %vm1159_vm13, %v8867_v20, 0.0  ;;  %14624 = vmatprep.subr.msk.bf16.mxu1 %vm17446_vm0, %v14622_v13 }
 0x6a6   : >> { %v8884_v45 = vmul.f32 %v15714_v12, %v8880_v41  ;;  %v8882_v47 = vmul.f32 %v15714_v12, %v8879_v32  ;;  %14626 = vmatpush1.bf16.msra.mxu1 %v14625_v30  ;;  %14259 = vmatmul.mubr.msk.f32.vlgmr.msra.gmra.mrb[0].mxu0 %vm435_vm7, %v14258_v27 }
 0x6a7   : >> { %14689 = vmatpush1.bf16.msra.mxu0 %v14688_v29  ;;  %10282 = vmatprep.mubr.f32.mxu0 %v15562_v1 }
 0x6a8   : >> { %v8869_v55 = vpop.permute.xlu1 %8868  ;;  %v8865_v5 = vpop.permute.xlu0 %8864  ;;  %v14627_v10 = vpack.c.bf16 %v8884_v45, %v8882_v47 }
 0x6a9   : >> { %v8874_v48 = vsel %vm1159_vm13, %v8869_v55, %v8871_v18  ;;  %v8873_v49 = vsel %vm1159_vm13, %v8865_v5, %v8867_v20  ;;  %14221 = vmatmul.mubr.msk.f32.vlgmr.msra.gmra.mrb[0].mxu1 %vm435_vm7, %v14218_v19 }
 0x6aa   : >> { %v8883_v50 = vmul.f32 %v15702_v7, %v8874_v48  ;;  %v8881_v36 = vmul.f32 %v15702_v7, %v8873_v49  ;;  %14628 = vmatprep.subr.bf16.mxu1 %v14627_v10  ;;  %8954 = vmatprep.mubr.f32.mxu1 %v15562_v1 }
 0x6ac   : >> { %v14629_v58 = vpack.c.bf16 %v8883_v50, %v8881_v36  ;;  %v8970_v59 = vpop.permute.xlu1 %8969  ;;  %v8968_v60 = vpop.permute.xlu0 %8967  ;;  %v14264_v50 = vld [vmem:[%s18598_s4 + $0x60] sm:$0xf] }
 0x6ad   : >> { %v8975_v61 = vsel %vm423_vm8, %v8968_v60, %v8970_v59  ;;  %v8981_v35 = vsel %vm423_vm8, 0.0, %v8968_v60 }
 0x6ae   : >> { %14630 = vmatpush1.bf16.msra.mxu1 %v14629_v58  ;;  %14261 = vmatmul.mubr.msk.f32.vlgmr.msra.gmra.mrb[0].mxu0 %vm435_vm7, %v14260_v56  ;;  %v8983_v23 = vmul.f32 %v15700_v6, %v8981_v35  ;;  %v8984_v0 = vmul.f32 %v15712_v11, %v8975_v61 }
 0x6af   : >> { %10380 = vmatprep.mubr.f32.mxu0 %v15562_v1 }
 0x6b0   : >> { %v8974_v62 = vpop.permute.xlu1 %8973  ;;  %v8972_v63 = vpop.permute.xlu0 %8971 }
 0x6b1   : >> { %v8976_v53 = vsel %vm423_vm8, %v8972_v63, %v8974_v62  ;;  %v8982_v40 = vsel %vm423_vm8, 0.0, %v8972_v63  ;;  %14223 = vmatmul.mubr.msk.f32.vlgmr.msra.gmra.mrb[0].mxu1 %vm435_vm7, %v14222_v37  ;;  %v14226_v62 = vld [vmem:[%s18598_s4 + $0x28] sm:$0xf] }
 0x6b2   : >> { %v8985_v8 = vmul.f32 %v15700_v6, %v8982_v40  ;;  %v8986_v14 = vmul.f32 %v15712_v11, %v8976_v53  ;;  %9056 = vmatprep.mubr.f32.mxu1 %v15562_v1 }
 0x6b4   : >> { %v14633_v39 = vpack.c.bf16 %v8985_v8, %v8983_v23  ;;  %v10298_v15 = vpop.permute.xlu1 %10297  ;;  %v10294_v2 = vpop.permute.xlu0 %10293  ;;  %v14631_v16 = vpack.c.bf16 %v8986_v14, %v8984_v0 }
 0x6b5   : >> { %v10306_v42 = vsel %vm878_vm6, %v10298_v15, 0.0  ;;  %v10305_v26 = vsel %vm878_vm6, %v10294_v2, 0.0 }
 0x6b6   : >> { %v10310_v33 = vmul.f32 %v15714_v12, %v10306_v42  ;;  %v10308_v3 = vmul.f32 %v15714_v12, %v10305_v26  ;;  %14632 = vmatprep.subr.bf16.mxu1 %v14631_v16 }
 0x6b7   : >> { %14634 = vmatpush1.bf16.msra.mxu1 %v14633_v39 }
 0x6b8   : >> { %v10296_v38 = vpop.permute.xlu1 %10295  ;;  %v14690_v43 = vpack.c.bf16 %v10310_v33, %v10308_v3 }
 0x6b9   : >> { %v10300_v4 = vsel %vm878_vm6, %v10296_v38, %v10298_v15  ;;  %v10292_v31 = vpop.permute.xlu0 %10291 }
 0x6ba   : >> { %v10309_v22 = vmul.f32 %v15702_v7, %v10300_v4  ;;  %v10299_v28 = vsel %vm878_vm6, %v10292_v31, %v10294_v2  ;;  %14691 = vmatprep.subr.bf16.mxu0 %v14690_v43  ;;  %14225 = vmatmul.mubr.msk.f32.vlgmr.msra.gmra.mrb[0].mxu1 %vm435_vm7, %v14224_v21  ;;  %v14232_v31 = vld [vmem:[%s18598_s4 + $0x2c] sm:$0xf] }
 0x6bb   : >> { %v10307_v52 = vmul.f32 %v15702_v7, %v10299_v28  ;;  %9150 = vmatprep.mubr.f32.mxu1 %v15562_v1 }
 0x6bc   : >> { %v10396_v54 = vpop.permute.xlu1 %10395 }
 0x6bd   : >> { %v14692_v24 = vpack.c.bf16 %v10309_v22, %v10307_v52  ;;  %v10404_v25 = vsel %vm973_vm9, %v10396_v54, 0.0  ;;  %v10392_v44 = vpop.permute.xlu0 %10391  ;;  %v14266_v52 = vld [vmem:[%s18598_s4 + $0x64] sm:$0xf] }
 0x6be   : >> { %v10408_v17 = vmul.f32 %v15712_v11, %v10404_v25  ;;  %v10403_v9 = vsel %vm973_vm9, %v10392_v44, 0.0 }
 0x6bf   : >> { %v10406_v13 = vmul.f32 %v15712_v11, %v10403_v9  ;;  %14693 = vmatpush1.bf16.msra.mxu0 %v14692_v24 }
 0x6c0   : >> { %v10394_v27 = vpop.permute.xlu1 %10393 }
 0x6c1   : >> { %v10398_v29 = vsel %vm973_vm9, %v10394_v27, %v10396_v54  ;;  %v10390_v30 = vpop.permute.xlu0 %10389  ;;  %v14694_v18 = vpack.c.bf16 %v10408_v17, %v10406_v13 }
 0x6c2   : >> { %v10407_v20 = vmul.f32 %v15700_v6, %v10398_v29  ;;  %v10397_v41 = vsel %vm973_vm9, %v10390_v30, %v10392_v44  ;;  %14263 = vmatmul.mubr.msk.f32.vlgmr.msra.gmra.mrb[0].mxu0 %vm435_vm7, %v14262_v34 }
 0x6c3   : >> { %v10405_v32 = vmul.f32 %v15700_v6, %v10397_v41  ;;  %14695 = vmatprep.subr.bf16.mxu0 %v14694_v18  ;;  %10478 = vmatprep.mubr.f32.mxu0 %v15562_v1 }
 0x6c4   : >> { %v15335_v45 = vpop.permute.xlu1 %15334 }
 0x6c5   : >> { %v14696_v47 = vpack.c.bf16 %v10407_v20, %v10405_v32  ;;  %v15337_v19 = vunpack.i.h.bf16 %v15335_v45  ;;  %v15336_v55 = vunpack.i.l.bf16 %v15335_v45  ;;  %v15330_v5 = vpop.permute.xlu0 %15329 }
 0x6c6   : >> { %v15332_v10 = vunpack.i.h.bf16 %v15330_v5  ;;  %v15331_v48 = vunpack.i.l.bf16 %v15330_v5  ;;  %v14234_v5 = vld [vmem:[%s18598_s4 + $0x30] sm:$0xf] }
 0x6c7   : >> { %v9074_v49 = vsel %vm435_vm7, %v15336_v55, %v15337_v19  ;;  %14697 = vmatpush1.bf16.msra.mxu0 %v14696_v47 }
 0x6c8   : >> { %v9073_v36 = vsel %vm435_vm7, %v15331_v48, %v15332_v10  ;;  %v9162_v56 = vpop.permute.xlu1 %9161  ;;  %v14637_v60 = vpack.c.bf16 %v15336_v55, %v15331_v48 }
 0x6c9   : >> { %v9160_v58 = vpop.permute.xlu0 %9159  ;;  %v14635_v59 = vpack.c.bf16 %v9074_v49, %v9073_v36 }
 0x6ca   : >> { %14265 = vmatmul.mubr.msk.f32.vlgmr.msra.gmra.mrb[0].mxu0 %vm435_vm7, %v14264_v50  ;;  %v9167_v37 = vsel %vm606_vm10, %v9160_v58, %v9162_v56  ;;  %v9173_v61 = vsel %vm606_vm10, 0.0, %v9160_v58  ;;  %v14270_v58 = vld [vmem:[%s18598_s4 + $0x68] sm:$0xf] }
 0x6cb   : >> { %14636 = vmatprep.subr.bf16.mxu1 %v14635_v59  ;;  %10572 = vmatprep.mubr.f32.mxu0 %v15562_v1  ;;  %v9175_v23 = vmul.f32 %v15702_v7, %v9173_v61  ;;  %v9176_v0 = vmul.f32 %v15714_v12, %v9167_v37  ;;  %v10679_v61 = vstv %s17144_s20 }
 0x6cc   : >> { %14639 = vmatpush1.bf16.msk.msra.mxu1 %vm17368_vm14, %v14637_v60  ;;  %v9166_v35 = vpop.permute.xlu1 %9165 }
 0x6cd   : >> { %v9164_v63 = vpop.permute.xlu0 %9163 }
 0x6ce   : >> { %v9168_v53 = vsel %vm606_vm10, %v9164_v63, %v9166_v35  ;;  %v9174_v40 = vsel %vm606_vm10, 0.0, %v9164_v63  ;;  %v10682_v63 = vstv %s17146_s15 }
 0x6cf   : >> { %v9177_v8 = vmul.f32 %v15702_v7, %v9174_v40  ;;  %v9178_v14 = vmul.f32 %v15714_v12, %v9168_v53  ;;  %14231 = vmatmul.mubr.msk.f32.vlgmr.msra.gmra.mrb[0].mxu1 %vm435_vm7, %v14226_v62 }
 0x6d0   : >> { %v15345_v39 = vpop.permute.xlu1 %15344  ;;  %9248 = vmatprep.mubr.f32.mxu1 %v15562_v1 }
 0x6d1   : >> { %v14642_v15 = vpack.c.bf16 %v9177_v8, %v9175_v23  ;;  %v15347_v2 = vunpack.i.h.bf16 %v15345_v39  ;;  %v15346_v16 = vunpack.i.l.bf16 %v15345_v39  ;;  %v15340_v42 = vpop.permute.xlu0 %15339  ;;  %v14640_v26 = vpack.c.bf16 %v9178_v14, %v9176_v0 }
 0x6d2   : >> { %v15342_v33 = vunpack.i.h.bf16 %v15340_v42  ;;  %v15341_v3 = vunpack.i.l.bf16 %v15340_v42 }
 0x6d3   : >> { %v10496_v21 = vsel %vm1068_vm11, %v15346_v16, %v15347_v2  ;;  %14641 = vmatprep.subr.bf16.mxu1 %v14640_v26 }
 0x6d4   : >> { %v14698_v38 = vpack.c.bf16 %v15347_v2, %v15342_v33  ;;  %v10495_v43 = vsel %vm1068_vm11, %v15341_v3, %v15342_v33  ;;  %14643 = vmatpush1.bf16.msra.mxu1 %v14642_v15  ;;  %v9260_v4 = vpop.permute.xlu1 %9259 }
 0x6d5   : >> { %v14701_v22 = vpack.c.bf16 %v10496_v21, %v10495_v43  ;;  %v9258_v28 = vpop.permute.xlu0 %9257 }
 0x6d6   : >> { %14700 = vmatprep.subr.msk.bf16.mxu0 %vm17446_vm0, %v14698_v38  ;;  %v9265_v54 = vsel %vm701_vm12, %v9258_v28, %v9260_v4  ;;  %v9271_v24 = vsel %vm701_vm12, 0.0, %v9258_v28 }
 0x6d7   : >> { %14702 = vmatpush1.bf16.msra.mxu0 %v14701_v22  ;;  %14233 = vmatmul.mubr.msk.f32.vlgmr.msra.gmra.mrb[0].mxu1 %vm435_vm7, %v14232_v31  ;;  %v9273_v13 = vmul.f32 %v15700_v6, %v9271_v24  ;;  %v9274_v34 = vmul.f32 %v15712_v11, %v9265_v54 }
 0x6d8   : >> { %v9264_v25 = vpop.permute.xlu1 %9263  ;;  %9346 = vmatprep.mubr.f32.mxu1 %v15562_v1 }
 0x6d9   : >> { %v9262_v44 = vpop.permute.xlu0 %9261 }
 0x6da   : >> { %v9266_v17 = vsel %vm701_vm12, %v9262_v44, %v9264_v25  ;;  %v9272_v9 = vsel %vm701_vm12, 0.0, %v9262_v44  ;;  %14269 = vmatmul.mubr.msk.f32.vlgmr.msra.gmra.mrb[0].mxu0 %vm435_vm7, %v14266_v52 }
 0x6db   : >> { %v9275_v27 = vmul.f32 %v15700_v6, %v9272_v9  ;;  %v9276_v29 = vmul.f32 %v15712_v11, %v9266_v17  ;;  %10670 = vmatprep.mubr.f32.mxu0 %v15562_v1 }
 0x6dc   : >> { %v10588_v30 = vpop.permute.xlu1 %10587 }
 0x6dd   : >> { %v14646_v18 = vpack.c.bf16 %v9275_v27, %v9273_v13  ;;  %v10596_v20 = vsel %vm1159_vm13, %v10588_v30, 0.0  ;;  %v10584_v41 = vpop.permute.xlu0 %10583  ;;  %v14644_v32 = vpack.c.bf16 %v9276_v29, %v9274_v34 }
 0x6de   : >> { %v10600_v45 = vmul.f32 %v15714_v12, %v10596_v20  ;;  %v10595_v47 = vsel %vm1159_vm13, %v10584_v41, 0.0 }
 0x6df   : >> { %v10598_v19 = vmul.f32 %v15714_v12, %v10595_v47  ;;  %14645 = vmatprep.subr.bf16.mxu1 %v14644_v32 }
 0x6e0   : >> { %14647 = vmatpush1.bf16.msra.mxu1 %v14646_v18  ;;  %v10586_v55 = vpop.permute.xlu1 %10585 }
 0x6e1   : >> { %v10590_v1 = vsel %vm1159_vm13, %v10586_v55, %v10588_v30  ;;  %v10582_v10 = vpop.permute.xlu0 %10581  ;;  %v14703_v48 = vpack.c.bf16 %v10600_v45, %v10598_v19 }
 0x6e2   : >> { %v10599_v49 = vmul.f32 %v15702_v7, %v10590_v1  ;;  %v10589_v50 = vsel %vm1159_vm13, %v10582_v10, %v10584_v41 }
 0x6e3   : >> { %v10597_v36 = vmul.f32 %v15702_v7, %v10589_v50  ;;  %14235 = vmatmul.mubr.msk.f32.vlgmr.msra.gmra.mrb[0].mxu1 %vm435_vm7, %v14234_v5  ;;  %14704 = vmatprep.subr.bf16.mxu0 %v14703_v48 }
 0x6e5   : >> { %v14705_v56 = vpack.c.bf16 %v10599_v49, %v10597_v36 }
 0x6e7   : >> { %14706 = vmatpush1.bf16.msra.mxu0 %v14705_v56 }
 0x6ea   : >> { %14271 = vmatmul.mubr.msk.f32.vlgmr.msra.gmra.mrb[0].mxu0 %vm435_vm7, %v14270_v58 }
 0x7b6   : >> { %v9348_v59 = vpop.f32.mrb[0].mxu1 }
 0x7b7   : >> { %v9350_v60 = vpop.f32.mrb[1].mxu1 }
 0x7bd   : >> { %v10672_v37 = vpop.f32.mrb[0].mxu0 }
 0x7be   : >> { %v14977_v35 = vadd.f32 %v10672_v37, %v9348_v59  ;;  %v10674_v62 = vpop.f32.mrb[1].mxu0 }
 0x7bf   : >> { %v14978_v53 = vadd.f32 %v10674_v62, %v9350_v60 }
 0x7c0   : >> { %v10680_v40 = vmul.f32 %v14977_v35, %v10679_v61 }
 0x7c1   : >> { %v10681_v23 = vmul.f32 %v14978_v53, %v10679_v61  ;;  %8077 = sbr.rel (!%p8075_p13) target bundleno = 1475 (0x5c3), region = 305 }
 0x7c2   : >> { %v10683_v0 = vadd.f32 %v10682_v63, %v10680_v40 }
 0x7c3   : >> { %v10684_v8 = vadd.f32 %v10682_v63, %v10681_v23 }
 0x7c4   : >> { %v10685_v14 = vmax.f32 %v10683_v0, 0.0 }
 0x7c5   : >> { %v10686_v39 = vmax.f32 %v10684_v8, 0.0 }
 0x7c6   : >> { %14272 = vst [vmem:[%s17156_s8 + $0x50] sm:$0xf] %v10685_v14 }
 0x7c7   : >> { %14273 = vst [vmem:[%s17156_s8 + $0x58] sm:$0xf] %v10686_v39 }
 0x7c8 LB: >> { %v15571_v15 = vmov 0.0   ;;  %s14427_s8 = smul.u32 48, %s15530_s29  ;;  %s15572_s20 = smov 127   ;;  %vm10790_vm15 = vcmask 162816   ;;  %v14350_v52 = vld [vmem:[%s18599_s5 + $0x34] sm:$0xf]  ;;  %s15530_s29 = sphi %s17723_s29, %s10696_s29  }
 0x7c9   : >> { %12242 = vmatprep.mubr.f32.mxu0 %v15571_v15  ;;  %10864 = vmatprep.mubr.f32.mxu1 %v15571_v15  ;;  %s18611_s16 = smov 16   ;;  %s15574_s23 = smov 17  }
 0x7ca   : >> { %s17731_s14 = scalar_lea.vmem [#allocation2], %s14427_s8  ;;  %s15575_s18 = smov 113  }
 0x7cb   : >> { %s15576_s17 = smov 15   ;;  %s15577_s8 = smov 112  }
 0x7cc   : >> { %s15578_s15 = smov 1   ;;  %s15579_s19 = smov 111  }
 0x7ce   : >> { %v17734_v46 = vld [vmem:[%s17731_s14 + $0x38] sm:$0xff]  ;;  %v17737_v2 = vld [vmem:[%s17731_s14 + $0x30] sm:$0xff]  ;;  %v17740_v16 = vld [vmem:[%s17731_s14 + $0x48] sm:$0xff] }
 0x7cf   : >> { %12253 = vrot.lane.b32.xlu0 %v17734_v46, %s15572_s20  ;;  %12251 = vrot.lane.b32.xlu1 %v17737_v2, %s15572_s20  ;;  %v17747_v42 = vld [vmem:[%s17731_s14 + $0x40] sm:$0xff]  ;;  %v17750_v26 = vld [vmem:[%s17731_s14 + $0x10] sm:$0xff]  ;;  %v14762_v33 = vpack.c.bf16 %v17740_v16, %v17734_v46  ;;  %v17848_v44 = vpack.i.bf16 %v17734_v46, %v17737_v2 }
 0x7d0   : >> { %v17755_v3 = vld [vmem:[%s17731_s14 + $0x18] sm:$0xff]  ;;  %v17758_v21 = vld [vmem:[%s17731_s14] sm:$0xff]  ;;  %v17761_v38 = vld [vmem:[%s17731_s14 + $0x8] sm:$0xff]  ;;  %v14764_v43 = vpack.c.bf16 %v17747_v42, %v17737_v2  ;;  %v17844_v25 = vpack.i.bf16 %v17740_v16, %v17747_v42 }
 0x7d1   : >> { %14763 = vmatprep.subr.bf16.mxu0 %v14762_v33  ;;  %v17771_v4 = vpack.i.bf16 %v17755_v3, %v17750_v26  ;;  %v17775_v31 = vpack.i.bf16 %v17761_v38, %v17758_v21  ;;  %v17778_v22 = vld [vmem:[%s17731_s14 + $0x58] sm:$0xf]  ;;  %v17783_v28 = vld [vmem:[%s17731_s14 + $0x50] sm:$0xf]  ;;  %v17809_v54 = vld [vmem:[%s17731_s14 + $0x28] sm:$0xf] }
 0x7d2   : >> { %14765 = vmatpush1.bf16.msra.mxu0 %v14764_v43  ;;  %v17812_v24 = vld [vmem:[%s17731_s14 + $0x20] sm:$0xf]  ;;  %v17887_v17 = vld [vmem:[%s17731_s14 + $0x68] sm:$0xff]  ;;  %v17897_v13 = vld [vmem:[%s17731_s14 + $0x78] sm:$0xff] }
 0x7d3   : >> { %12257 = vrot.lane.b32.xlu0 %v17740_v16, %s15572_s20  ;;  %12255 = vrot.lane.b32.xlu1 %v17747_v42, %s15572_s20  ;;  %v17890_v9 = vld [vmem:[%s17731_s14 + $0x60] sm:$0xff]  ;;  %v17900_v34 = vld [vmem:[%s17731_s14 + $0x70] sm:$0xff] }
 0x7d4   : >> { %14351 = vmatprep.subr.msk.mxu0 %vm445_vm4, %v17778_v22  ;;  %v17907_v27 = vld [vmem:[%s17731_s14 + $0x88] sm:$0xf]  ;;  %v17910_v29 = vld [vmem:[%s17731_s14 + $0x80] sm:$0xf]  ;;  %v17926_v30 = vpack.i.bf16 %v17897_v13, %v17900_v34  ;;  %v17930_v18 = vpack.i.bf16 %v17887_v17, %v17890_v9  ;;  %v14354_v33 = vld [vmem:[%s18599_s5 + $0x38] sm:$0xf] }
 0x7d6   : >> { %14352 = vmatpush1.msk.msra.mxu0 %vm445_vm4, %v17783_v28 }
 0x7d7   : >> { %15354 = vrot.lane.b32.xlu1 %v17771_v4, %s18611_s16  ;;  %15349 = vrot.lane.b32.xlu0 %v17775_v31, %s18611_s16 }
 0x7d8   : >> { %14353 = vmatmul.mubr.msk.f32.vlgmr.msra.gmra.mrb[0].mxu0 %vm10790_vm15, %v14350_v52 }
 0x7d9   : >> { %12356 = vmatprep.mubr.f32.mxu0 %v15571_v15 }
 0x7db   : >> { %12259 = vrot.lane.b32.xlu1 %v17783_v28, %s15572_s20  ;;  %12261 = vrot.lane.b32.xlu0 %v17778_v22, %s15572_s20 }
 0x7df   : >> { %10734 = vrot.lane.b32.xlu1 %v17761_v38, %s15574_s23  ;;  %10732 = vrot.lane.b32.xlu0 %v17758_v21, %s15574_s23 }
 0x7e3   : >> { %10738 = vrot.lane.b32.xlu1 %v17755_v3, %s15574_s23  ;;  %10736 = vrot.lane.b32.xlu0 %v17750_v26, %s15574_s23 }
 0x7e7   : >> { %10774 = vrot.lane.b32.xlu1 %v17809_v54, %s18611_s16  ;;  %10772 = vrot.lane.b32.xlu0 %v17812_v24, %s18611_s16 }
 0x7eb   : >> { %12371 = vrot.lane.b32.xlu1 %v17740_v16, %s15575_s18  ;;  %12367 = vrot.lane.b32.xlu0 %v17734_v46, %s15575_s18 }
 0x7ef   : >> { %12369 = vrot.lane.b32.xlu1 %v17747_v42, %s15575_s18  ;;  %12365 = vrot.lane.b32.xlu0 %v17737_v2, %s15575_s18 }
 0x7f3   : >> { %10742 = vrot.lane.b32.xlu1 %v17809_v54, %s15574_s23  ;;  %10740 = vrot.lane.b32.xlu0 %v17812_v24, %s15574_s23 }
 0x7f7   : >> { %12373 = vrot.lane.b32.xlu1 %v17783_v28, %s15575_s18  ;;  %12375 = vrot.lane.b32.xlu0 %v17778_v22, %s15575_s18 }
 0x7fb   : >> { %10953 = vrot.lane.b32.xlu1 %v17761_v38, %s15576_s17  ;;  %10951 = vrot.lane.b32.xlu0 %v17758_v21, %s15576_s17 }
 0x7ff   : >> { %10957 = vrot.lane.b32.xlu1 %v17755_v3, %s15576_s17  ;;  %10955 = vrot.lane.b32.xlu0 %v17750_v26, %s15576_s17 }
 0x803   : >> { %15364 = vrot.lane.b32.xlu1 %v17844_v25, %s15577_s8  ;;  %15359 = vrot.lane.b32.xlu0 %v17848_v44, %s15577_s8 }
 0x807   : >> { %10961 = vrot.lane.b32.xlu1 %v17809_v54, %s15576_s17  ;;  %10959 = vrot.lane.b32.xlu0 %v17812_v24, %s15576_s17 }
 0x80b   : >> { %11068 = vrot.lane.b32.xlu1 %v17761_v38, %s15578_s15  ;;  %11066 = vrot.lane.b32.xlu0 %v17758_v21, %s15578_s15 }
 0x80f   : >> { %11072 = vrot.lane.b32.xlu1 %v17755_v3, %s15578_s15  ;;  %11070 = vrot.lane.b32.xlu0 %v17750_v26, %s15578_s15 }
 0x813   : >> { %12587 = vrot.lane.b32.xlu1 %v17734_v46, %s15579_s19  ;;  %12489 = vrot.lane.b32.xlu0 %v17778_v22, %s15577_s8 }
 0x817   : >> { %12487 = vrot.lane.b32.xlu1 %v17783_v28, %s15577_s8  ;;  %12591 = vrot.lane.b32.xlu0 %v17740_v16, %s15579_s19 }
 0x81b   : >> { %12589 = vrot.lane.b32.xlu1 %v17747_v42, %s15579_s19  ;;  %12585 = vrot.lane.b32.xlu0 %v17737_v2, %s15579_s19 }
 0x81f   : >> { %11076 = vrot.lane.b32.xlu1 %v17809_v54, %s15578_s15  ;;  %11074 = vrot.lane.b32.xlu0 %v17812_v24, %s15578_s15 }
 0x823   : >> { %12593 = vrot.lane.b32.xlu1 %v17783_v28, %s15579_s19  ;;  %12595 = vrot.lane.b32.xlu0 %v17778_v22, %s15579_s19 }
 0x827   : >> { %12707 = vrot.lane.b32.xlu1 %v17887_v17, %s15574_s23  ;;  %12705 = vrot.lane.b32.xlu0 %v17890_v9, %s15574_s23 }
 0x82b   : >> { %12711 = vrot.lane.b32.xlu1 %v17897_v13, %s15574_s23  ;;  %12709 = vrot.lane.b32.xlu0 %v17900_v34, %s15574_s23 }
 0x82f   : >> { %12715 = vrot.lane.b32.xlu1 %v17907_v27, %s15574_s23  ;;  %12713 = vrot.lane.b32.xlu0 %v17910_v29, %s15574_s23 }
 0x833   : >> { %11269 = vrot.lane.b32.xlu1 %v17755_v3, %s15572_s20  ;;  %11265 = vrot.lane.b32.xlu0 %v17761_v38, %s15572_s20 }
 0x837   : >> { %11267 = vrot.lane.b32.xlu1 %v17750_v26, %s15572_s20  ;;  %11263 = vrot.lane.b32.xlu0 %v17758_v21, %s15572_s20 }
 0x83b   : >> { %15374 = vrot.lane.b32.xlu1 %v17926_v30, %s18611_s16  ;;  %15369 = vrot.lane.b32.xlu0 %v17930_v18, %s18611_s16 }
 0x83f   : >> { %11271 = vrot.lane.b32.xlu1 %v17812_v24, %s15572_s20  ;;  %11273 = vrot.lane.b32.xlu0 %v17809_v54, %s15572_s20 }
 0x841   : >> { %v12254_v20 = vpop.permute.xlu0 %12253  ;;  %v12252_v41 = vpop.permute.xlu1 %12251 }
 0x842   : >> { %v12272_v32 = vsel %vm878_vm6, %v12254_v20, 0.0  ;;  %v12263_v45 = vsel %vm878_vm6, %v12252_v41, %v12254_v20 }
 0x843   : >> { %11384 = vrot.lane.b32.xlu1 %v17755_v3, %s15575_s18  ;;  %11380 = vrot.lane.b32.xlu0 %v17761_v38, %s15575_s18  ;;  %v12276_v55 = vmul.f32 %v15714_v12, %v12272_v32  ;;  %v12275_v10 = vmul.f32 %v15702_v7, %v12263_v45 }
 0x845   : >> { %v12258_v47 = vpop.permute.xlu0 %12257  ;;  %v12256_v19 = vpop.permute.xlu1 %12255 }
 0x846   : >> { %v12273_v5 = vsel %vm878_vm6, %v12258_v47, 0.0  ;;  %v12264_v1 = vsel %vm878_vm6, %v12256_v19, %v12258_v47 }
 0x847   : >> { %v12278_v48 = vmul.f32 %v15714_v12, %v12273_v5  ;;  %v12277_v49 = vmul.f32 %v15702_v7, %v12264_v1  ;;  %12829 = vrot.lane.b32.xlu1 %v17907_v27, %s18611_s16  ;;  %12827 = vrot.lane.b32.xlu0 %v17910_v29, %s18611_s16 }
 0x849   : >> { %v14768_v50 = vpack.c.bf16 %v12277_v49, %v12275_v10  ;;  %v15355_v36 = vpop.permute.xlu1 %15354  ;;  %v15350_v56 = vpop.permute.xlu0 %15349  ;;  %v14766_v58 = vpack.c.bf16 %v12278_v48, %v12276_v55 }
 0x84a   : >> { %v15357_v59 = vunpack.i.h.bf16 %v15355_v36  ;;  %v15356_v60 = vunpack.i.l.bf16 %v15355_v36  ;;  %v15352_v37 = vunpack.i.h.bf16 %v15350_v56  ;;  %v15351_v61 = vunpack.i.l.bf16 %v15350_v56  ;;  %v14289_v56 = vld [vmem:[%s18599_s5 + $0x4] sm:$0xf] }
 0x84b   : >> { %14767 = vmatprep.subr.bf16.mxu0 %v14766_v58  ;;  %12927 = vrot.lane.b32.xlu1 %v17887_v17, %s15576_s17 }
 0x84c   : >> { %12925 = vrot.lane.b32.xlu0 %v17890_v9, %s15576_s17  ;;  %14769 = vmatpush1.bf16.msra.mxu0 %v14768_v50  ;;  %v10778_v35 = vsel %vm435_vm7, %v15356_v60, %v15357_v59  ;;  %v10777_v62 = vsel %vm435_vm7, %v15351_v61, %v15352_v37  ;;  %v14709_v8 = vpack.c.bf16 %v15356_v60, %v15351_v61 }
 0x84d   : >> { %v12260_v63 = vpop.permute.xlu1 %12259  ;;  %v12262_v53 = vpop.permute.xlu0 %12261  ;;  %v14707_v40 = vpack.c.bf16 %v10778_v35, %v10777_v62 }
 0x84e   : >> { %v12265_v23 = vsel %vm878_vm6, %v12260_v63, %v12262_v53  ;;  %v12274_v0 = vsel %vm878_vm6, %v12262_v53, 0.0 }
 0x84f   : >> { %v12279_v14 = vmul.f32 %v15702_v7, %v12265_v23  ;;  %v12280_v39 = vmul.f32 %v15714_v12, %v12274_v0  ;;  %12931 = vrot.lane.b32.xlu1 %v17897_v13, %s15576_s17  ;;  %14708 = vmatprep.subr.bf16.mxu1 %v14707_v40 }
 0x850   : >> { %12929 = vrot.lane.b32.xlu0 %v17900_v34, %s15576_s17  ;;  %14711 = vmatpush1.bf16.msk.msra.mxu1 %vm17368_vm14, %v14709_v8 }
 0x851   : >> { %v10735_v43 = vpop.permute.xlu1 %10734  ;;  %14355 = vmatprep.subr.msk.mxu0 %vm445_vm4, %v12280_v39  ;;  %v10733_v52 = vpop.permute.xlu0 %10732 }
 0x852   : >> { %14356 = vmatpush1.msk.msra.mxu0 %vm445_vm4, %v12279_v14  ;;  %v10745_v32 = vsel %vm423_vm8, %v10733_v52, %v10735_v43  ;;  %v10754_v19 = vsel %vm423_vm8, 0.0, %v10733_v52 }
 0x853   : >> { %11382 = vrot.lane.b32.xlu1 %v17750_v26, %s15575_s18  ;;  %14357 = vmatmul.mubr.msk.f32.vlgmr.msra.gmra.mrb[0].mxu0 %vm10790_vm15, %v14354_v33  ;;  %v10758_v1 = vmul.f32 %v15712_v11, %v10745_v32  ;;  %v10757_v49 = vmul.f32 %v15700_v6, %v10754_v19 }
 0x854   : >> { %11378 = vrot.lane.b32.xlu0 %v17758_v21, %s15575_s18  ;;  %12470 = vmatprep.mubr.f32.mxu0 %v15571_v15 }
 0x855   : >> { %v10739_v20 = vpop.permute.xlu1 %10738  ;;  %v10737_v41 = vpop.permute.xlu0 %10736 }
 0x856   : >> { %v10746_v45 = vsel %vm423_vm8, %v10737_v41, %v10739_v20  ;;  %v10755_v47 = vsel %vm423_vm8, 0.0, %v10737_v41 }
 0x857   : >> { %v10760_v55 = vmul.f32 %v15712_v11, %v10746_v45  ;;  %12933 = vrot.lane.b32.xlu1 %v17910_v29, %s15576_s17  ;;  %v10759_v5 = vmul.f32 %v15700_v6, %v10755_v47  ;;  %v10763_v47 = vld [vmem:[%s18599_s5] sm:$0xf] }
 0x858   : >> { %11388 = vrot.lane.b32.xlu0 %v17809_v54, %s15575_s18 }
 0x859   : >> { %v10775_v10 = vpop.permute.xlu1 %10774  ;;  %v10773_v48 = vpop.permute.xlu0 %10772  ;;  %v14712_v58 = vpack.c.bf16 %v10760_v55, %v10758_v1  ;;  %v14714_v59 = vpack.c.bf16 %v10759_v5, %v10757_v49 }
 0x85a   : >> { %v10779_v50 = vsel %vm435_vm7, %v10773_v48, %v10775_v10  ;;  %v10787_v36 = vsel %vm435_vm7, 0.0, %v10773_v48 }
 0x85b   : >> { %11386 = vrot.lane.b32.xlu1 %v17812_v24, %s15575_s18  ;;  %14294 = vmatprep.subr.msk.mxu1 %vm445_vm4, %v10779_v50 }
 0x85c   : >> { %12935 = vrot.lane.b32.xlu0 %v17907_v27, %s15576_s17  ;;  %14295 = vmatpush1.msk.msra.mxu1 %vm445_vm4, %v10787_v36 }
 0x85d   : >> { %v12372_v60 = vpop.permute.xlu1 %12371  ;;  %v12368_v37 = vpop.permute.xlu0 %12367  ;;  %14713 = vmatprep.subr.bf16.mxu1 %v14712_v58  ;;  %14296 = vmatmul.mubr.msk.f32.vlgmr.msra.gmra.mrb[0].mxu1 %vm10790_vm15, %v14289_v56 }
 0x85e   : >> { %v12387_v61 = vsel %vm973_vm9, %v12372_v60, 0.0  ;;  %v12386_v35 = vsel %vm973_vm9, %v12368_v37, 0.0  ;;  %14715 = vmatpush1.bf16.msra.mxu1 %v14714_v59  ;;  %10944 = vmatprep.mubr.f32.mxu1 %v15571_v15 }
 0x85f   : >> { %v12392_v62 = vmul.f32 %v15712_v11, %v12387_v61  ;;  %v12390_v63 = vmul.f32 %v15712_v11, %v12386_v35  ;;  %13041 = vrot.lane.b32.xlu1 %v17887_v17, %s15578_s15 }
 0x860   : >> { %13039 = vrot.lane.b32.xlu0 %v17890_v9, %s15578_s15 }
 0x861   : >> { %v12370_v53 = vpop.permute.xlu1 %12369  ;;  %v12366_v40 = vpop.permute.xlu0 %12365  ;;  %v14770_v23 = vpack.c.bf16 %v12392_v62, %v12390_v63 }
 0x862   : >> { %v12378_v0 = vsel %vm973_vm9, %v12370_v53, %v12372_v60  ;;  %v12377_v8 = vsel %vm973_vm9, %v12366_v40, %v12368_v37 }
 0x863   : >> { %v12391_v14 = vmul.f32 %v15700_v6, %v12378_v0  ;;  %v12389_v39 = vmul.f32 %v15700_v6, %v12377_v8  ;;  %13045 = vrot.lane.b32.xlu1 %v17897_v13, %s15578_s15  ;;  %14771 = vmatprep.subr.bf16.mxu0 %v14770_v23 }
 0x864   : >> { %13043 = vrot.lane.b32.xlu0 %v17900_v34, %s15578_s15 }
 0x865   : >> { %v14772_v33 = vpack.c.bf16 %v12391_v14, %v12389_v39  ;;  %v10743_v43 = vpop.permute.xlu1 %10742  ;;  %v10741_v52 = vpop.permute.xlu0 %10740 }
 0x866   : >> { %v10747_v20 = vsel %vm423_vm8, %v10741_v52, %v10743_v43  ;;  %v10756_v41 = vsel %vm423_vm8, 0.0, %v10741_v52 }
 0x867   : >> { %v10761_v32 = vmul.f32 %v15700_v6, %v10756_v41  ;;  %v10762_v45 = vmul.f32 %v15712_v11, %v10747_v20  ;;  %15384 = vrot.lane.b32.xlu1 %v17771_v4, %s15577_s8  ;;  %14773 = vmatpush1.bf16.msra.mxu0 %v14772_v33 }
 0x868   : >> { %15379 = vrot.lane.b32.xlu0 %v17775_v31, %s15577_s8  ;;  %v14358_v31 = vld [vmem:[%s18599_s5 + $0x3c] sm:$0xf] }
 0x869   : >> { %v12374_v19 = vpop.permute.xlu1 %12373  ;;  %v12376_v55 = vpop.permute.xlu0 %12375  ;;  %14297 = vmatprep.subr.msk.mxu1 %vm445_vm4, %v10762_v45 }
 0x86a   : >> { %v12379_v5 = vsel %vm973_vm9, %v12374_v19, %v12376_v55  ;;  %v12388_v1 = vsel %vm973_vm9, %v12376_v55, 0.0  ;;  %14298 = vmatpush1.msk.msra.mxu1 %vm445_vm4, %v10761_v32 }
 0x86b   : >> { %v12393_v4 = vmul.f32 %v15700_v6, %v12379_v5  ;;  %v12394_v10 = vmul.f32 %v15712_v11, %v12388_v1  ;;  %13049 = vrot.lane.b32.xlu1 %v17907_v27, %s15578_s15  ;;  %14299 = vmatmul.mubr.msk.f32.vlgmr.msra.gmra.mrb[0].mxu1 %vm10790_vm15, %v10763_v47  ;;  %v14300_v5 = vld [vmem:[%s18599_s5 + $0x8] sm:$0xf] }
 0x86c   : >> { %13047 = vrot.lane.b32.xlu0 %v17910_v29, %s15578_s15  ;;  %11057 = vmatprep.mubr.f32.mxu1 %v15571_v15 }
 0x86d   : >> { %v10954_v48 = vpop.permute.xlu1 %10953  ;;  %14359 = vmatprep.subr.msk.mxu0 %vm445_vm4, %v12394_v10  ;;  %v10952_v49 = vpop.permute.xlu0 %10951 }
 0x86e   : >> { %14360 = vmatpush1.msk.msra.mxu0 %vm445_vm4, %v12393_v4  ;;  %v10964_v50 = vsel %vm606_vm10, %v10952_v49, %v10954_v48  ;;  %v10973_v36 = vsel %vm606_vm10, 0.0, %v10952_v49 }
 0x86f   : >> { %11602 = vrot.lane.b32.xlu1 %v17761_v38, %s15579_s19  ;;  %14361 = vmatmul.mubr.msk.f32.vlgmr.msra.gmra.mrb[0].mxu0 %vm10790_vm15, %v14358_v31  ;;  %v10976_v37 = vmul.f32 %v15702_v7, %v10973_v36  ;;  %v10977_v61 = vmul.f32 %v15714_v12, %v10964_v50 }
 0x870   : >> { %11503 = vrot.lane.b32.xlu0 %v17809_v54, %s15577_s8  ;;  %12576 = vmatprep.mubr.f32.mxu0 %v15571_v15 }
 0x871   : >> { %v10958_v56 = vpop.permute.xlu1 %10957  ;;  %v10956_v58 = vpop.permute.xlu0 %10955 }
 0x872   : >> { %v10965_v59 = vsel %vm606_vm10, %v10956_v58, %v10958_v56  ;;  %v10974_v60 = vsel %vm606_vm10, 0.0, %v10956_v58 }
 0x873   : >> { %v10978_v35 = vmul.f32 %v15702_v7, %v10974_v60  ;;  %v10979_v62 = vmul.f32 %v15714_v12, %v10965_v59  ;;  %11501 = vrot.lane.b32.xlu1 %v17812_v24, %s15577_s8 }
 0x874   : >> { %11606 = vrot.lane.b32.xlu0 %v17755_v3, %s15579_s19 }
 0x875   : >> { %v14718_v63 = vpack.c.bf16 %v10978_v35, %v10976_v37  ;;  %v15365_v53 = vpop.permute.xlu1 %15364  ;;  %v15360_v40 = vpop.permute.xlu0 %15359  ;;  %v14716_v23 = vpack.c.bf16 %v10979_v62, %v10977_v61 }
 0x876   : >> { %v15367_v0 = vunpack.i.h.bf16 %v15365_v53  ;;  %v15366_v8 = vunpack.i.l.bf16 %v15365_v53  ;;  %v15362_v14 = vunpack.i.h.bf16 %v15360_v40  ;;  %v15361_v39 = vunpack.i.l.bf16 %v15360_v40 }
 0x877   : >> { %11604 = vrot.lane.b32.xlu1 %v17750_v26, %s15579_s19  ;;  %14717 = vmatprep.subr.bf16.mxu1 %v14716_v23 }
 0x878   : >> { %v12492_v33 = vsel %vm1068_vm11, %v15366_v8, %v15367_v0  ;;  %v12491_v43 = vsel %vm1068_vm11, %v15361_v39, %v15362_v14  ;;  %11600 = vrot.lane.b32.xlu0 %v17758_v21, %s15579_s19  ;;  %14719 = vmatpush1.bf16.msra.mxu1 %v14718_v63  ;;  %v14774_v52 = vpack.c.bf16 %v15367_v0, %v15362_v14  ;;  %v14362_v0 = vld [vmem:[%s18599_s5 + $0x40] sm:$0xf] }
 0x879   : >> { %v14777_v20 = vpack.c.bf16 %v12492_v33, %v12491_v43  ;;  %v10962_v41 = vpop.permute.xlu1 %10961  ;;  %v10960_v32 = vpop.permute.xlu0 %10959 }
 0x87a   : >> { %v10966_v45 = vsel %vm606_vm10, %v10960_v32, %v10962_v41  ;;  %v10975_v47 = vsel %vm606_vm10, 0.0, %v10960_v32  ;;  %14776 = vmatprep.subr.msk.bf16.mxu0 %vm17446_vm0, %v14774_v52 }
 0x87b   : >> { %v10980_v19 = vmul.f32 %v15702_v7, %v10975_v47  ;;  %v10981_v55 = vmul.f32 %v15714_v12, %v10966_v45  ;;  %11608 = vrot.lane.b32.xlu1 %v17812_v24, %s15579_s19  ;;  %14778 = vmatpush1.bf16.msra.mxu0 %v14777_v20 }
 0x87c   : >> { %11610 = vrot.lane.b32.xlu0 %v17809_v54, %s15579_s19 }
 0x87d   : >> { %v11069_v1 = vpop.permute.xlu1 %11068  ;;  %v11067_v4 = vpop.permute.xlu0 %11066  ;;  %14301 = vmatprep.subr.msk.mxu1 %vm445_vm4, %v10981_v55 }
 0x87e   : >> { %14302 = vmatpush1.msk.msra.mxu1 %vm445_vm4, %v10980_v19  ;;  %v11079_v10 = vsel %vm701_vm12, %v11067_v4, %v11069_v1  ;;  %v11088_v31 = vsel %vm701_vm12, 0.0, %v11067_v4 }
 0x87f   : >> { %11723 = vrot.lane.b32.xlu1 %v17734_v46, %s15574_s23  ;;  %14303 = vmatmul.mubr.msk.f32.vlgmr.msra.gmra.mrb[0].mxu1 %vm10790_vm15, %v14300_v5  ;;  %v11091_v56 = vmul.f32 %v15700_v6, %v11088_v31  ;;  %v11092_v58 = vmul.f32 %v15712_v11, %v11079_v10 }
 0x880   : >> { %11721 = vrot.lane.b32.xlu0 %v17737_v2, %s15574_s23  ;;  %11172 = vmatprep.mubr.f32.mxu1 %v15571_v15 }
 0x881   : >> { %v11073_v48 = vpop.permute.xlu1 %11072  ;;  %v11071_v49 = vpop.permute.xlu0 %11070 }
 0x882   : >> { %v11080_v50 = vsel %vm701_vm12, %v11071_v49, %v11073_v48  ;;  %v11089_v36 = vsel %vm701_vm12, 0.0, %v11071_v49  ;;  %v14724_v48 = vpack.c.bf16 %v17755_v3, %v17761_v38 }
 0x883   : >> { %v11093_v59 = vmul.f32 %v15700_v6, %v11089_v36  ;;  %v11094_v60 = vmul.f32 %v15712_v11, %v11080_v50  ;;  %11727 = vrot.lane.b32.xlu1 %v17740_v16, %s15574_s23  ;;  %v14304_v36 = vld [vmem:[%s18599_s5 + $0xc] sm:$0xf] }
 0x884   : >> { %11725 = vrot.lane.b32.xlu0 %v17747_v42, %s15574_s23 }
 0x885   : >> { %v14722_v37 = vpack.c.bf16 %v11093_v59, %v11091_v56  ;;  %v12588_v61 = vpop.permute.xlu1 %12587  ;;  %v12490_v35 = vpop.permute.xlu0 %12489  ;;  %v14720_v62 = vpack.c.bf16 %v11094_v60, %v11092_v58  ;;  %v14726_v56 = vpack.c.bf16 %v17750_v26, %v17758_v21  ;;  %v14368_v26 = vld [vmem:[%s18599_s5 + $0x44] sm:$0xf] }
 0x886   : >> { %v12501_v63 = vsel %vm1068_vm11, %v12490_v35, 0.0  ;;  %v12606_v53 = vsel %vm1159_vm13, %v12588_v61, 0.0 }
 0x887   : >> { %13241 = vrot.lane.b32.xlu1 %v17897_v13, %s15572_s20  ;;  %14721 = vmatprep.subr.bf16.mxu1 %v14720_v62  ;;  %v12610_v39 = vmul.f32 %v15714_v12, %v12606_v53 }
 0x888   : >> { %13237 = vrot.lane.b32.xlu0 %v17887_v17, %s15572_s20  ;;  %14365 = vmatprep.subr.msk.mxu0 %vm445_vm4, %v12501_v63 }
 0x889   : >> { %14723 = vmatpush1.bf16.msra.mxu1 %v14722_v37  ;;  %v12488_v40 = vpop.permute.xlu1 %12487  ;;  %v12592_v23 = vpop.permute.xlu0 %12591 }
 0x88a   : >> { %v12493_v8 = vsel %vm1068_vm11, %v12488_v40, %v12490_v35  ;;  %v12607_v14 = vsel %vm1159_vm13, %v12592_v23, 0.0 }
 0x88b   : >> { %v12612_v33 = vmul.f32 %v15714_v12, %v12607_v14  ;;  %13239 = vrot.lane.b32.xlu1 %v17900_v34, %s15572_s20  ;;  %14366 = vmatpush1.msk.msra.mxu0 %vm445_vm4, %v12493_v8 }
 0x88c   : >> { %13235 = vrot.lane.b32.xlu0 %v17890_v9, %s15572_s20  ;;  %14367 = vmatmul.mubr.msk.f32.vlgmr.msra.gmra.mrb[0].mxu0 %vm10790_vm15, %v14362_v0 }
 0x88d   : >> { %v12590_v43 = vpop.permute.xlu1 %12589  ;;  %v12586_v52 = vpop.permute.xlu0 %12585  ;;  %v14779_v20 = vpack.c.bf16 %v12612_v33, %v12610_v39  ;;  %12690 = vmatprep.mubr.f32.mxu0 %v15571_v15 }
 0x88e   : >> { %v12598_v41 = vsel %vm1159_vm13, %v12590_v43, %v12592_v23  ;;  %v12597_v32 = vsel %vm1159_vm13, %v12586_v52, %v12588_v61 }
 0x88f   : >> { %v12611_v45 = vmul.f32 %v15702_v7, %v12598_v41  ;;  %v12609_v47 = vmul.f32 %v15702_v7, %v12597_v32  ;;  %11731 = vrot.lane.b32.xlu1 %v17778_v22, %s15574_s23  ;;  %14780 = vmatprep.subr.bf16.mxu0 %v14779_v20 }
 0x890   : >> { %11729 = vrot.lane.b32.xlu0 %v17783_v28, %s15574_s23 }
 0x891   : >> { %v14781_v19 = vpack.c.bf16 %v12611_v45, %v12609_v47  ;;  %v11077_v55 = vpop.permute.xlu1 %11076  ;;  %v11075_v5 = vpop.permute.xlu0 %11074  ;;  %v14372_v47 = vld [vmem:[%s18599_s5 + $0x48] sm:$0xf] }
 0x892   : >> { %v11081_v1 = vsel %vm701_vm12, %v11075_v5, %v11077_v55  ;;  %v11090_v4 = vsel %vm701_vm12, 0.0, %v11075_v5 }
 0x893   : >> { %v11095_v10 = vmul.f32 %v15700_v6, %v11090_v4  ;;  %v11096_v31 = vmul.f32 %v15712_v11, %v11081_v1  ;;  %13243 = vrot.lane.b32.xlu1 %v17910_v29, %s15572_s20  ;;  %14782 = vmatpush1.bf16.msra.mxu0 %v14781_v19 }
 0x894   : >> { %13245 = vrot.lane.b32.xlu0 %v17907_v27, %s15572_s20  ;;  %s18632_s20 = smov 16  }
 0x895   : >> { %v12594_v49 = vpop.permute.xlu1 %12593  ;;  %v12596_v50 = vpop.permute.xlu0 %12595  ;;  %14305 = vmatprep.subr.msk.mxu1 %vm445_vm4, %v11096_v31 }
 0x896   : >> { %v12599_v58 = vsel %vm1159_vm13, %v12594_v49, %v12596_v50  ;;  %v12608_v59 = vsel %vm1159_vm13, %v12596_v50, 0.0  ;;  %14306 = vmatpush1.msk.msra.mxu1 %vm445_vm4, %v11095_v10 }
 0x897   : >> { %v12613_v3 = vmul.f32 %v15702_v7, %v12599_v58  ;;  %v12614_v38 = vmul.f32 %v15714_v12, %v12608_v59  ;;  %13355 = vrot.lane.b32.xlu1 %v17897_v13, %s15575_s18  ;;  %14725 = vmatprep.subr.bf16.mxu1 %v14724_v48 }
 0x898   : >> { %13351 = vrot.lane.b32.xlu0 %v17887_v17, %s15575_s18  ;;  %14307 = vmatmul.mubr.msk.f32.vlgmr.msra.gmra.mrb[0].mxu1 %vm10790_vm15, %v14304_v36 }
 0x899   : >> { %v12708_v21 = vpop.permute.xlu1 %12707  ;;  %v12706_v60 = vpop.permute.xlu0 %12705  ;;  %14369 = vmatprep.subr.msk.mxu0 %vm445_vm4, %v12614_v38  ;;  %14727 = vmatpush1.bf16.msra.mxu1 %v14726_v56 }
 0x89a   : >> { %14370 = vmatpush1.msk.msra.mxu0 %vm445_vm4, %v12613_v3  ;;  %14309 = vmatprep.subr.msk.mxu1 %vm445_vm4, %v17809_v54  ;;  %v12717_v37 = vsel %vm423_vm8, %v12706_v60, %v12708_v21  ;;  %v12726_v61 = vsel %vm423_vm8, 0.0, %v12706_v60  ;;  %v14308_v54 = vld [vmem:[%s18599_s5 + $0x10] sm:$0xf] }
 0x89b   : >> { %13353 = vrot.lane.b32.xlu1 %v17900_v34, %s15575_s18  ;;  %14371 = vmatmul.mubr.msk.f32.vlgmr.msra.gmra.mrb[0].mxu0 %vm10790_vm15, %v14368_v26  ;;  %v12729_v40 = vmul.f32 %v15700_v6, %v12726_v61  ;;  %v12730_v23 = vmul.f32 %v15712_v11, %v12717_v37 }
 0x89c   : >> { %13349 = vrot.lane.b32.xlu0 %v17890_v9, %s15575_s18  ;;  %11254 = vmatprep.mubr.f32.mxu1 %v15571_v15 }
 0x89d   : >> { %v12712_v35 = vpop.permute.xlu1 %12711  ;;  %v12710_v62 = vpop.permute.xlu0 %12709  ;;  %14310 = vmatpush1.msk.msra.mxu1 %vm445_vm4, %v17812_v24  ;;  %12810 = vmatprep.mubr.f32.mxu0 %v15571_v15 }
 0x89e   : >> { %v12718_v63 = vsel %vm423_vm8, %v12710_v62, %v12712_v35  ;;  %v12727_v53 = vsel %vm423_vm8, 0.0, %v12710_v62 }
 0x89f   : >> { %v12731_v0 = vmul.f32 %v15700_v6, %v12727_v53  ;;  %v12732_v8 = vmul.f32 %v15712_v11, %v12718_v63  ;;  %15394 = vrot.lane.b32.xlu1 %v17844_v25, %s18632_s20 }
 0x8a0   : >> { %15389 = vrot.lane.b32.xlu0 %v17848_v44, %s18632_s20  ;;  %14311 = vmatmul.mubr.msk.f32.vlgmr.msra.gmra.mrb[0].mxu1 %vm10790_vm15, %v14308_v54 }
 0x8a1   : >> { %v14785_v24 = vpack.c.bf16 %v12731_v0, %v12729_v40  ;;  %v12716_v14 = vpop.permute.xlu1 %12715  ;;  %v12714_v39 = vpop.permute.xlu0 %12713  ;;  %v14783_v33 = vpack.c.bf16 %v12732_v8, %v12730_v23  ;;  %11369 = vmatprep.mubr.f32.mxu1 %v15571_v15  ;;  %v14312_v40 = vld [vmem:[%s18599_s5 + $0x14] sm:$0xf] }
 0x8a2   : >> { %v12719_v43 = vsel %vm423_vm8, %v12714_v39, %v12716_v14  ;;  %v12728_v52 = vsel %vm423_vm8, 0.0, %v12714_v39 }
 0x8a3   : >> { %v12734_v20 = vmul.f32 %v15712_v11, %v12719_v43  ;;  %13357 = vrot.lane.b32.xlu1 %v17910_v29, %s15575_s18  ;;  %14784 = vmatprep.subr.bf16.mxu0 %v14783_v33  ;;  %v12733_v41 = vmul.f32 %v15700_v6, %v12728_v52 }
 0x8a4   : >> { %13359 = vrot.lane.b32.xlu0 %v17907_v27, %s15575_s18  ;;  %14786 = vmatpush1.bf16.msra.mxu0 %v14785_v24  ;;  %s18633_s18 = scalar_lea.vmem [#allocation6], %s15694_s21 }
 0x8a5   : >> { %v11270_v25 = vpop.permute.xlu1 %11269  ;;  %v11266_v44 = vpop.permute.xlu0 %11265  ;;  %14373 = vmatprep.subr.msk.mxu0 %vm445_vm4, %v12734_v20  ;;  %v14376_v20 = vld [vmem:[%s18599_s5 + $0x4c] sm:$0xf] }
 0x8a6   : >> { %v11286_v32 = vsel %vm878_vm6, %v11270_v25, 0.0  ;;  %v11285_v45 = vsel %vm878_vm6, %v11266_v44, 0.0 }
 0x8a7   : >> { %v11291_v19 = vmul.f32 %v15714_v12, %v11286_v32  ;;  %v11289_v55 = vmul.f32 %v15714_v12, %v11285_v45  ;;  %11845 = vrot.lane.b32.xlu1 %v17778_v22, %s18632_s20 }
 0x8a8   : >> { %11843 = vrot.lane.b32.xlu0 %v17783_v28, %s18632_s20  ;;  %14374 = vmatpush1.msk.msra.mxu0 %vm445_vm4, %v12733_v41 }
 0x8a9   : >> { %v11268_v5 = vpop.permute.xlu1 %11267  ;;  %v11264_v1 = vpop.permute.xlu0 %11263  ;;  %v14728_v4 = vpack.c.bf16 %v11291_v19, %v11289_v55  ;;  %14375 = vmatmul.mubr.msk.f32.vlgmr.msra.gmra.mrb[0].mxu0 %vm10790_vm15, %v14372_v47 }
 0x8aa   : >> { %v11277_v10 = vsel %vm878_vm6, %v11268_v5, %v11270_v25  ;;  %v11276_v31 = vsel %vm878_vm6, %v11264_v1, %v11266_v44  ;;  %12916 = vmatprep.mubr.f32.mxu0 %v15571_v15 }
 0x8ab   : >> { %v11290_v48 = vmul.f32 %v15702_v7, %v11277_v10  ;;  %v11288_v49 = vmul.f32 %v15702_v7, %v11276_v31  ;;  %11943 = vrot.lane.b32.xlu1 %v17734_v46, %s15576_s17  ;;  %14729 = vmatprep.subr.bf16.mxu1 %v14728_v4 }
 0x8ac   : >> { %11941 = vrot.lane.b32.xlu0 %v17737_v2, %s15576_s17 }
 0x8ad   : >> { %v14730_v50 = vpack.c.bf16 %v11290_v48, %v11288_v49  ;;  %v15375_v36 = vpop.permute.xlu1 %15374  ;;  %v15370_v56 = vpop.permute.xlu0 %15369 }
 0x8ae   : >> { %v15377_v58 = vunpack.i.h.bf16 %v15375_v36  ;;  %v15376_v59 = vunpack.i.l.bf16 %v15375_v36  ;;  %v15372_v3 = vunpack.i.h.bf16 %v15370_v56  ;;  %v15371_v38 = vunpack.i.l.bf16 %v15370_v56 }
 0x8af   : >> { %11947 = vrot.lane.b32.xlu1 %v17740_v16, %s15576_s17  ;;  %14731 = vmatpush1.bf16.msra.mxu1 %v14730_v50 }
 0x8b0   : >> { %v12832_v26 = vsel %vm435_vm7, %v15376_v59, %v15377_v58  ;;  %v12831_v21 = vsel %vm435_vm7, %v15371_v38, %v15372_v3  ;;  %11945 = vrot.lane.b32.xlu0 %v17747_v42, %s15576_s17  ;;  %v14789_v35 = vpack.c.bf16 %v15376_v59, %v15371_v38 }
 0x8b1   : >> { %v11272_v60 = vpop.permute.xlu1 %11271  ;;  %v11274_v37 = vpop.permute.xlu0 %11273  ;;  %v14787_v61 = vpack.c.bf16 %v12832_v26, %v12831_v21 }
 0x8b2   : >> { %v11278_v62 = vsel %vm878_vm6, %v11272_v60, %v11274_v37  ;;  %v11287_v54 = vsel %vm878_vm6, %v11274_v37, 0.0 }
 0x8b3   : >> { %v11292_v63 = vmul.f32 %v15702_v7, %v11278_v62  ;;  %v11293_v53 = vmul.f32 %v15714_v12, %v11287_v54  ;;  %15404 = vrot.lane.b32.xlu1 %v17926_v30, %s15577_s8  ;;  %14788 = vmatprep.subr.bf16.mxu0 %v14787_v61 }
 0x8b4   : >> { %15399 = vrot.lane.b32.xlu0 %v17930_v18, %s15577_s8  ;;  %14791 = vmatpush1.bf16.msk.msra.mxu0 %vm17368_vm14, %v14789_v35  ;;  %v14316_v35 = vld [vmem:[%s18599_s5 + $0x18] sm:$0xf] }
 0x8b5   : >> { %v11385_v23 = vpop.permute.xlu1 %11384  ;;  %v11381_v0 = vpop.permute.xlu0 %11380  ;;  %14313 = vmatprep.subr.msk.mxu1 %vm445_vm4, %v11293_v53  ;;  %v14384_v53 = vld [vmem:[%s18599_s5 + $0x50] sm:$0xf] }
 0x8b6   : >> { %v11401_v8 = vsel %vm973_vm9, %v11385_v23, 0.0  ;;  %v11400_v24 = vsel %vm973_vm9, %v11381_v0, 0.0  ;;  %14314 = vmatpush1.msk.msra.mxu1 %vm445_vm4, %v11292_v63 }
 0x8b7   : >> { %v11406_v30 = vmul.f32 %v15712_v11, %v11401_v8  ;;  %v11404_v18 = vmul.f32 %v15712_v11, %v11400_v24  ;;  %11951 = vrot.lane.b32.xlu1 %v17778_v22, %s15576_s17  ;;  %14315 = vmatmul.mubr.msk.f32.vlgmr.msra.gmra.mrb[0].mxu1 %vm10790_vm15, %v14312_v40 }
 0x8b8   : >> { %11949 = vrot.lane.b32.xlu0 %v17783_v28, %s15576_s17  ;;  %11484 = vmatprep.mubr.f32.mxu1 %v15571_v15 }
 0x8b9   : >> { %v12830_v14 = vpop.permute.xlu1 %12829  ;;  %v12828_v39 = vpop.permute.xlu0 %12827  ;;  %v14732_v33 = vpack.c.bf16 %v11406_v30, %v11404_v18 }
 0x8ba   : >> { %v12841_v43 = vsel %vm435_vm7, 0.0, %v12828_v39  ;;  %v12833_v52 = vsel %vm435_vm7, %v12828_v39, %v12830_v14 }
 0x8bb   : >> { %12057 = vrot.lane.b32.xlu1 %v17734_v46, %s15578_s15  ;;  %14733 = vmatprep.subr.bf16.mxu1 %v14732_v33 }
 0x8bc   : >> { %12055 = vrot.lane.b32.xlu0 %v17737_v2, %s15578_s15  ;;  %14381 = vmatprep.subr.msk.mxu0 %vm445_vm4, %v12833_v52 }
 0x8bd   : >> { %14382 = vmatpush1.msk.msra.mxu0 %vm445_vm4, %v12841_v43  ;;  %v12928_v25 = vpop.permute.xlu1 %12927 }
 0x8be   : >> { %v12926_v44 = vpop.permute.xlu0 %12925  ;;  %14383 = vmatmul.mubr.msk.f32.vlgmr.msra.gmra.mrb[0].mxu0 %vm10790_vm15, %v14376_v20 }
 0x8bf   : >> { %12061 = vrot.lane.b32.xlu1 %v17740_v16, %s15578_s15  ;;  %13030 = vmatprep.mubr.f32.mxu0 %v15571_v15  ;;  %v12937_v46 = vsel %vm606_vm10, %v12926_v44, %v12928_v25  ;;  %v12946_v2 = vsel %vm606_vm10, 0.0, %v12926_v44 }
 0x8c0   : >> { %12059 = vrot.lane.b32.xlu0 %v17747_v42, %s15578_s15  ;;  %v12949_v16 = vmul.f32 %v15702_v7, %v12946_v2  ;;  %v12950_v19 = vmul.f32 %v15714_v12, %v12937_v46 }
 0x8c1   : >> { %v12932_v41 = vpop.permute.xlu1 %12931 }
 0x8c2   : >> { %v12930_v32 = vpop.permute.xlu0 %12929 }
 0x8c3   : >> { %v12938_v45 = vsel %vm606_vm10, %v12930_v32, %v12932_v41  ;;  %v12947_v47 = vsel %vm606_vm10, 0.0, %v12930_v32  ;;  %13571 = vrot.lane.b32.xlu1 %v17887_v17, %s15579_s19 }
 0x8c4   : >> { %v12951_v55 = vmul.f32 %v15702_v7, %v12947_v47  ;;  %v12952_v42 = vmul.f32 %v15714_v12, %v12938_v45  ;;  %13473 = vrot.lane.b32.xlu0 %v17907_v27, %s15577_s8 }
 0x8c5   : >> { %v11383_v5 = vpop.permute.xlu1 %11382 }
 0x8c6   : >> { %v14794_v1 = vpack.c.bf16 %v12951_v55, %v12949_v16  ;;  %v11392_v4 = vsel %vm973_vm9, %v11383_v5, %v11385_v23  ;;  %v11379_v10 = vpop.permute.xlu0 %11378  ;;  %v14792_v31 = vpack.c.bf16 %v12952_v42, %v12950_v19 }
 0x8c7   : >> { %v11405_v48 = vmul.f32 %v15700_v6, %v11392_v4  ;;  %v11391_v49 = vsel %vm973_vm9, %v11379_v10, %v11381_v0  ;;  %13471 = vrot.lane.b32.xlu1 %v17910_v29, %s15577_s8  ;;  %v14800_v4 = vpack.c.bf16 %v17897_v13, %v17887_v17  ;;  %s14428_s8 = sshll.u32 %s15530_s29, 3  ;;  %s10696_s29 = sadd.s32 1, %s15530_s29  }
 0x8c8   : >> { %v11403_v50 = vmul.f32 %v15700_v6, %v11391_v49  ;;  %13575 = vrot.lane.b32.xlu0 %v17897_v13, %s15579_s19  ;;  %14793 = vmatprep.subr.bf16.mxu0 %v14792_v31  ;;  %v14802_v49 = vpack.c.bf16 %v17900_v34, %v17890_v9  ;;  %s13691_s23 = scalar_lea.vmem %s15707_s13, %s14428_s8  ;;  %p10693_p0 = scmp.ge.s32.totalorder %s10696_s29, 8  }
 0x8c9   : >> { %14795 = vmatpush1.bf16.msra.mxu0 %v14794_v1  ;;  %v12934_v36 = vpop.permute.xlu1 %12933  ;;  %s18634_s17 = scalar_lea.vmem (%p10693_p0), [#allocation6], %s15694_s21 }
 0x8ca   : >> { %v14734_v56 = vpack.c.bf16 %v11405_v48, %v11403_v50  ;;  %v11389_v58 = vpop.permute.xlu0 %11388  ;;  %v12948_v26 = vsel %vm606_vm10, 0.0, %v12934_v36  ;;  %v14388_v48 = vld [vmem:[%s18599_s5 + $0x54] sm:$0xf] }
 0x8cb   : >> { %v11402_v59 = vsel %vm973_vm9, %v11389_v58, 0.0  ;;  %13573 = vrot.lane.b32.xlu1 %v17900_v34, %s15579_s19  ;;  %v12953_v54 = vmul.f32 %v15702_v7, %v12948_v26 }
 0x8cc   : >> { %v11408_v3 = vmul.f32 %v15712_v11, %v11402_v59  ;;  %13569 = vrot.lane.b32.xlu0 %v17890_v9, %s15579_s19  ;;  %14735 = vmatpush1.bf16.msra.mxu1 %v14734_v56 }
 0x8cd   : >> { %v11387_v38 = vpop.permute.xlu1 %11386 }
 0x8ce   : >> { %v11393_v21 = vsel %vm973_vm9, %v11387_v38, %v11389_v58  ;;  %v12936_v60 = vpop.permute.xlu0 %12935  ;;  %14317 = vmatprep.subr.msk.mxu1 %vm445_vm4, %v11408_v3 }
 0x8cf   : >> { %v11407_v37 = vmul.f32 %v15700_v6, %v11393_v21  ;;  %v12939_v61 = vsel %vm606_vm10, %v12934_v36, %v12936_v60  ;;  %12065 = vrot.lane.b32.xlu1 %v17778_v22, %s15578_s15  ;;  %v14320_v36 = vld [vmem:[%s18599_s5 + $0x1c] sm:$0xf] }
 0x8d0   : >> { %v12954_v62 = vmul.f32 %v15714_v12, %v12939_v61  ;;  %12063 = vrot.lane.b32.xlu0 %v17783_v28, %s15578_s15  ;;  %s13703_s15 = scalar_lea.vmem %s18633_s18, %s14428_s8 [#allocation6]  ;;  %s13719_s8 = sshll.u32 (%p10693_p0), %s18634_s17, 4  ;;  %s18549_s8 = int_to_ptr.vmem [resolvable:$true] %s13719_s8 }
 0x8d1   : >> { %v13042_v63 = vpop.permute.xlu1 %13041  ;;  %14318 = vmatpush1.msk.msra.mxu1 %vm445_vm4, %v11407_v37  ;;  %s15424_s13 = scalar_lea.vmem (%p10693_p0), %s18549_s8, 1024 }
 0x8d2   : >> { %v13040_v40 = vpop.permute.xlu0 %13039  ;;  %14385 = vmatprep.subr.msk.mxu0 %vm445_vm4, %v12954_v62  ;;  %14319 = vmatmul.mubr.msk.f32.vlgmr.msra.gmra.mrb[0].mxu1 %vm10790_vm15, %v14316_v35  ;;  %p15425_p1 = scmp.ne.s32.totalorder (%p10693_p0), %s18549_s8, %s15424_s13 }
 0x8d3   : >> { %14386 = vmatpush1.msk.msra.mxu0 %vm445_vm4, %v12953_v54  ;;  %13577 = vrot.lane.b32.xlu1 %v17910_v29, %s15579_s19  ;;  %v13051_v22 = vsel %vm701_vm12, %v13040_v40, %v13042_v63  ;;  %v13060_v28 = vsel %vm701_vm12, 0.0, %v13040_v40 }
 0x8d4   : >> { %13579 = vrot.lane.b32.xlu0 %v17907_v27, %s15579_s19  ;;  %14387 = vmatmul.mubr.msk.f32.vlgmr.msra.gmra.mrb[0].mxu0 %vm10790_vm15, %v14384_v53  ;;  %v13063_v30 = vmul.f32 %v15700_v6, %v13060_v28  ;;  %v13064_v18 = vmul.f32 %v15712_v11, %v13051_v22  ;;  %s14430_s19 = sshll.u32 (%p10693_p0), %s15644_s28, 10  ;;  %p15426_p2 = pnand (%p10693_p0), %p15425_p1, %p15661_p5 }
 0x8d5   : >> { %v13046_v23 = vpop.permute.xlu1 %13045  ;;  %11591 = vmatprep.mubr.f32.mxu1 %v15571_v15  ;;  %13144 = vmatprep.mubr.f32.mxu0 %v15571_v15  ;;  %s18545_s14 = scalar_lea.hbm (%p10693_p0), %s18601_s7, %s14430_s19  ;;  %s15580_s28 = smov (%p10693_p0), [#allocation6]  }
 0x8d6   : >> { %v13044_v0 = vpop.permute.xlu0 %13043  ;;  %p15427_p3 = pneg (%p10693_p0), %p15426_p2 }
 0x8d7   : >> { %v13052_v8 = vsel %vm701_vm12, %v13044_v0, %v13046_v23  ;;  %v13061_v24 = vsel %vm701_vm12, 0.0, %v13044_v0  ;;  %v14326_v23 = vld [vmem:[%s18599_s5 + $0x20] sm:$0xf] }
 0x8d8   : >> { %v13065_v14 = vmul.f32 %v15700_v6, %v13061_v24  ;;  %v13066_v39 = vmul.f32 %v15712_v11, %v13052_v8 }
 0x8d9   : >> { %v15385_v33 = vpop.permute.xlu1 %15384 }
 0x8da   : >> { %v14798_v43 = vpack.c.bf16 %v13065_v14, %v13063_v30  ;;  %v15387_v52 = vunpack.i.h.bf16 %v15385_v33  ;;  %v15386_v20 = vunpack.i.l.bf16 %v15385_v33  ;;  %v15380_v25 = vpop.permute.xlu0 %15379  ;;  %v14796_v44 = vpack.c.bf16 %v13066_v39, %v13064_v18 }
 0x8db   : >> { %v15382_v46 = vunpack.i.h.bf16 %v15380_v25  ;;  %v15381_v2 = vunpack.i.l.bf16 %v15380_v25 }
 0x8dc   : >> { %v11507_v41 = vsel %vm1068_vm11, %v15386_v20, %v15387_v52  ;;  %14797 = vmatprep.subr.bf16.mxu0 %v14796_v44 }
 0x8dd   : >> { %v14736_v32 = vpack.c.bf16 %v15387_v52, %v15382_v46  ;;  %v11506_v45 = vsel %vm1068_vm11, %v15381_v2, %v15382_v46  ;;  %14799 = vmatpush1.bf16.msra.mxu0 %v14798_v43  ;;  %v13050_v47 = vpop.permute.xlu1 %13049 }
 0x8de   : >> { %v14739_v16 = vpack.c.bf16 %v11507_v41, %v11506_v45  ;;  %v13048_v19 = vpop.permute.xlu0 %13047 }
 0x8df   : >> { %v13053_v55 = vsel %vm701_vm12, %v13048_v19, %v13050_v47  ;;  %v13062_v42 = vsel %vm701_vm12, 0.0, %v13048_v19  ;;  %14738 = vmatprep.subr.msk.bf16.mxu1 %vm17446_vm0, %v14736_v32 }
 0x8e0   : >> { %v13067_v5 = vmul.f32 %v15700_v6, %v13062_v42  ;;  %v13068_v1 = vmul.f32 %v15712_v11, %v13053_v55  ;;  %14740 = vmatpush1.bf16.msra.mxu1 %v14739_v16 }
 0x8e1   : >> { %v11603_v10 = vpop.permute.xlu1 %11602 }
 0x8e2   : >> { %v11504_v31 = vpop.permute.xlu0 %11503  ;;  %14389 = vmatprep.subr.msk.mxu0 %vm445_vm4, %v13068_v1  ;;  %v11622_v17 = vsel %vm1159_vm13, %v11603_v10, 0.0 }
 0x8e3   : >> { %14390 = vmatpush1.msk.msra.mxu0 %vm445_vm4, %v13067_v5  ;;  %v11516_v50 = vsel %vm1068_vm11, %v11504_v31, 0.0  ;;  %v11626_v34 = vmul.f32 %v15714_v12, %v11622_v17 }
 0x8e4   : >> { %14323 = vmatprep.subr.msk.mxu1 %vm445_vm4, %v11516_v50  ;;  %14801 = vmatprep.subr.bf16.mxu0 %v14800_v4 }
 0x8e5   : >> { %v11502_v13 = vpop.permute.xlu1 %11501  ;;  %14391 = vmatmul.mubr.msk.f32.vlgmr.msra.gmra.mrb[0].mxu0 %vm10790_vm15, %v14388_v48 }
 0x8e6   : >> { %v11508_v56 = vsel %vm1068_vm11, %v11502_v13, %v11504_v31  ;;  %v11607_v58 = vpop.permute.xlu0 %11606  ;;  %14803 = vmatpush1.bf16.msra.mxu0 %v14802_v49  ;;  %13226 = vmatprep.mubr.f32.mxu0 %v15571_v15 }
 0x8e7   : >> { %v11623_v9 = vsel %vm1159_vm13, %v11607_v58, 0.0  ;;  %14324 = vmatpush1.msk.msra.mxu1 %vm445_vm4, %v11508_v56  ;;  %14393 = vmatprep.subr.msk.mxu0 %vm445_vm4, %v17907_v27  ;;  %v14392_v27 = vld [vmem:[%s18599_s5 + $0x58] sm:$0xf] }
 0x8e8   : >> { %v11628_v59 = vmul.f32 %v15714_v12, %v11623_v9  ;;  %14325 = vmatmul.mubr.msk.f32.vlgmr.msra.gmra.mrb[0].mxu1 %vm10790_vm15, %v14320_v36  ;;  %v14330_v36 = vld [vmem:[%s18599_s5 + $0x24] sm:$0xf] }
 0x8e9   : >> { %v11605_v3 = vpop.permute.xlu1 %11604  ;;  %11706 = vmatprep.mubr.f32.mxu1 %v15571_v15 }
 0x8ea   : >> { %v11614_v38 = vsel %vm1159_vm13, %v11605_v3, %v11607_v58  ;;  %v11601_v26 = vpop.permute.xlu0 %11600  ;;  %v14741_v21 = vpack.c.bf16 %v11628_v59, %v11626_v34  ;;  %14394 = vmatpush1.msk.msra.mxu0 %vm445_vm4, %v17910_v29 }
 0x8eb   : >> { %v11627_v60 = vmul.f32 %v15702_v7, %v11614_v38  ;;  %v11613_v37 = vsel %vm1159_vm13, %v11601_v26, %v11603_v10  ;;  %v14396_v38 = vld [vmem:[%s18599_s5 + $0x5c] sm:$0xf] }
 0x8ec   : >> { %v11625_v61 = vmul.f32 %v15702_v7, %v11613_v37  ;;  %14742 = vmatprep.subr.bf16.mxu1 %v14741_v21 }
 0x8ed   : >> { %v11609_v35 = vpop.permute.xlu1 %11608  ;;  %14395 = vmatmul.mubr.msk.f32.vlgmr.msra.gmra.mrb[0].mxu0 %vm10790_vm15, %v14392_v27 }
 0x8ee   : >> { %v14743_v62 = vpack.c.bf16 %v11627_v60, %v11625_v61  ;;  %v11611_v54 = vpop.permute.xlu0 %11610  ;;  %13340 = vmatprep.mubr.f32.mxu0 %v15571_v15 }
 0x8ef   : >> { %v11615_v29 = vsel %vm1159_vm13, %v11609_v35, %v11611_v54  ;;  %v11624_v63 = vsel %vm1159_vm13, %v11611_v54, 0.0 }
 0x8f0   : >> { %v11630_v53 = vmul.f32 %v15714_v12, %v11624_v63  ;;  %14744 = vmatpush1.bf16.msra.mxu1 %v14743_v62  ;;  %v11629_v22 = vmul.f32 %v15702_v7, %v11615_v29 }
 0x8f1   : >> { %v11724_v40 = vpop.permute.xlu1 %11723 }
 0x8f2   : >> { %v11722_v28 = vpop.permute.xlu0 %11721  ;;  %14327 = vmatprep.subr.msk.mxu1 %vm445_vm4, %v11630_v53 }
 0x8f3   : >> { %v11733_v0 = vsel %vm423_vm8, %v11722_v28, %v11724_v40  ;;  %v11742_v8 = vsel %vm423_vm8, 0.0, %v11722_v28 }
 0x8f4   : >> { %14328 = vmatpush1.msk.msra.mxu1 %vm445_vm4, %v11629_v22  ;;  %v11745_v39 = vmul.f32 %v15700_v6, %v11742_v8  ;;  %v11746_v33 = vmul.f32 %v15712_v11, %v11733_v0 }
 0x8f5   : >> { %v11728_v24 = vpop.permute.xlu1 %11727  ;;  %14329 = vmatmul.mubr.msk.f32.vlgmr.msra.gmra.mrb[0].mxu1 %vm10790_vm15, %v14326_v23 }
 0x8f6   : >> { %v11726_v30 = vpop.permute.xlu0 %11725  ;;  %11826 = vmatprep.mubr.f32.mxu1 %v15571_v15 }
 0x8f7   : >> { %v11734_v18 = vsel %vm423_vm8, %v11726_v30, %v11728_v24  ;;  %v11743_v14 = vsel %vm423_vm8, 0.0, %v11726_v30 }
 0x8f8   : >> { %v11747_v43 = vmul.f32 %v15700_v6, %v11743_v14  ;;  %v11748_v52 = vmul.f32 %v15712_v11, %v11734_v18 }
 0x8f9   : >> { %v13242_v20 = vpop.permute.xlu1 %13241 }
 0x8fa   : >> { %v14747_v25 = vpack.c.bf16 %v11747_v43, %v11745_v39  ;;  %v13257_v44 = vsel %vm878_vm6, %v13242_v20, 0.0  ;;  %v13238_v46 = vpop.permute.xlu0 %13237  ;;  %v14745_v2 = vpack.c.bf16 %v11748_v52, %v11746_v33 }
 0x8fb   : >> { %v13262_v41 = vmul.f32 %v15714_v12, %v13257_v44  ;;  %v13256_v32 = vsel %vm878_vm6, %v13238_v46, 0.0 }
 0x8fc   : >> { %v13260_v45 = vmul.f32 %v15714_v12, %v13256_v32  ;;  %14746 = vmatprep.subr.bf16.mxu1 %v14745_v2  ;;  %v14400_v2 = vld [vmem:[%s18599_s5 + $0x60] sm:$0xf] }
 0x8fd   : >> { %14748 = vmatpush1.bf16.msra.mxu1 %v14747_v25  ;;  %v13240_v47 = vpop.permute.xlu1 %13239 }
 0x8fe   : >> { %v13248_v16 = vsel %vm878_vm6, %v13240_v47, %v13242_v20  ;;  %v13236_v19 = vpop.permute.xlu0 %13235  ;;  %v14804_v55 = vpack.c.bf16 %v13262_v41, %v13260_v45  ;;  %v14334_v47 = vld [vmem:[%s18599_s5 + $0x28] sm:$0xf] }
 0x8ff   : >> { %v13261_v42 = vmul.f32 %v15702_v7, %v13248_v16  ;;  %v13247_v5 = vsel %vm878_vm6, %v13236_v19, %v13238_v46 }
 0x900   : >> { %v13259_v1 = vmul.f32 %v15702_v7, %v13247_v5  ;;  %14805 = vmatprep.subr.bf16.mxu0 %v14804_v55 }
 0x901   : >> { %v11732_v4 = vpop.permute.xlu1 %11731 }
 0x902   : >> { %v14806_v10 = vpack.c.bf16 %v13261_v42, %v13259_v1  ;;  %v11730_v31 = vpop.permute.xlu0 %11729 }
 0x903   : >> { %v11735_v48 = vsel %vm423_vm8, %v11730_v31, %v11732_v4  ;;  %v11744_v49 = vsel %vm423_vm8, 0.0, %v11730_v31 }
 0x904   : >> { %v11749_v50 = vmul.f32 %v15700_v6, %v11744_v49  ;;  %v11750_v17 = vmul.f32 %v15712_v11, %v11735_v48  ;;  %14807 = vmatpush1.bf16.msra.mxu0 %v14806_v10 }
 0x905   : >> { %v13244_v13 = vpop.permute.xlu1 %13243 }
 0x906   : >> { %v13246_v56 = vpop.permute.xlu0 %13245  ;;  %14331 = vmatprep.subr.msk.mxu1 %vm445_vm4, %v11750_v17 }
 0x907   : >> { %v13249_v58 = vsel %vm878_vm6, %v13244_v13, %v13246_v56  ;;  %v13258_v9 = vsel %vm878_vm6, %v13246_v56, 0.0  ;;  %14332 = vmatpush1.msk.msra.mxu1 %vm445_vm4, %v11749_v50 }
 0x908   : >> { %v13263_v34 = vmul.f32 %v15702_v7, %v13249_v58  ;;  %v13264_v59 = vmul.f32 %v15714_v12, %v13258_v9  ;;  %14333 = vmatmul.mubr.msk.f32.vlgmr.msra.gmra.mrb[0].mxu1 %vm10790_vm15, %v14330_v36 }
 0x909   : >> { %v13356_v3 = vpop.permute.xlu1 %13355  ;;  %11932 = vmatprep.mubr.f32.mxu1 %v15571_v15 }
 0x90a   : >> { %v13371_v26 = vsel %vm973_vm9, %v13356_v3, 0.0  ;;  %v13352_v21 = vpop.permute.xlu0 %13351  ;;  %14397 = vmatprep.subr.msk.mxu0 %vm445_vm4, %v13264_v59 }
 0x90b   : >> { %v13376_v27 = vmul.f32 %v15712_v11, %v13371_v26  ;;  %v13370_v60 = vsel %vm973_vm9, %v13352_v21, 0.0  ;;  %14398 = vmatpush1.msk.msra.mxu0 %vm445_vm4, %v13263_v34 }
 0x90c   : >> { %v13374_v37 = vmul.f32 %v15712_v11, %v13370_v60  ;;  %14399 = vmatmul.mubr.msk.f32.vlgmr.msra.gmra.mrb[0].mxu0 %vm10790_vm15, %v14396_v38 }
 0x90d   : >> { %v13354_v61 = vpop.permute.xlu1 %13353  ;;  %13454 = vmatprep.mubr.f32.mxu0 %v15571_v15 }
 0x90e   : >> { %v13362_v35 = vsel %vm973_vm9, %v13354_v61, %v13356_v3  ;;  %v13350_v62 = vpop.permute.xlu0 %13349  ;;  %v14808_v54 = vpack.c.bf16 %v13376_v27, %v13374_v37 }
 0x90f   : >> { %v13375_v29 = vmul.f32 %v15700_v6, %v13362_v35  ;;  %v13361_v63 = vsel %vm973_vm9, %v13350_v62, %v13352_v21 }
 0x910   : >> { %v13373_v53 = vmul.f32 %v15700_v6, %v13361_v63  ;;  %14809 = vmatprep.subr.bf16.mxu0 %v14808_v54 }
 0x911   : >> { %v15395_v40 = vpop.permute.xlu1 %15394 }
 0x912   : >> { %v14810_v22 = vpack.c.bf16 %v13375_v29, %v13373_v53  ;;  %v15397_v28 = vunpack.i.h.bf16 %v15395_v40  ;;  %v15396_v23 = vunpack.i.l.bf16 %v15395_v40  ;;  %v15390_v0 = vpop.permute.xlu0 %15389  ;;  %v14342_v29 = vld [vmem:[%s18599_s5 + $0x2c] sm:$0xf] }
 0x913   : >> { %v15392_v8 = vunpack.i.h.bf16 %v15390_v0  ;;  %v15391_v24 = vunpack.i.l.bf16 %v15390_v0 }
 0x914   : >> { %v11848_v30 = vsel %vm435_vm7, %v15396_v23, %v15397_v28  ;;  %14811 = vmatpush1.bf16.msra.mxu0 %v14810_v22 }
 0x915   : >> { %v11847_v18 = vsel %vm435_vm7, %v15391_v24, %v15392_v8  ;;  %v13358_v14 = vpop.permute.xlu1 %13357  ;;  %v14751_v43 = vpack.c.bf16 %v15396_v23, %v15391_v24 }
 0x916   : >> { %v13360_v39 = vpop.permute.xlu0 %13359  ;;  %v14749_v33 = vpack.c.bf16 %v11848_v30, %v11847_v18 }
 0x917   : >> { %v13363_v52 = vsel %vm973_vm9, %v13358_v14, %v13360_v39  ;;  %v13372_v20 = vsel %vm973_vm9, %v13360_v39, 0.0 }
 0x918   : >> { %v13377_v25 = vmul.f32 %v15700_v6, %v13363_v52  ;;  %v13378_v44 = vmul.f32 %v15712_v11, %v13372_v20  ;;  %14750 = vmatprep.subr.bf16.mxu1 %v14749_v33 }
 0x919   : >> { %14753 = vmatpush1.bf16.msk.msra.mxu1 %vm17368_vm14, %v14751_v43  ;;  %v11846_v46 = vpop.permute.xlu1 %11845 }
 0x91a   : >> { %v11844_v41 = vpop.permute.xlu0 %11843  ;;  %14401 = vmatprep.subr.msk.mxu0 %vm445_vm4, %v13378_v44  ;;  %v14404_v44 = vld [vmem:[%s18599_s5 + $0x64] sm:$0xf] }
 0x91b   : >> { %v11857_v32 = vsel %vm435_vm7, 0.0, %v11844_v41  ;;  %14402 = vmatpush1.msk.msra.mxu0 %vm445_vm4, %v13377_v25  ;;  %v11849_v45 = vsel %vm435_vm7, %v11844_v41, %v11846_v46 }
 0x91c   : >> { %14339 = vmatprep.subr.msk.mxu1 %vm445_vm4, %v11849_v45  ;;  %14403 = vmatmul.mubr.msk.f32.vlgmr.msra.gmra.mrb[0].mxu0 %vm10790_vm15, %v14400_v2 }
 0x91d   : >> { %14340 = vmatpush1.msk.msra.mxu1 %vm445_vm4, %v11857_v32  ;;  %v11944_v16 = vpop.permute.xlu1 %11943  ;;  %13560 = vmatprep.mubr.f32.mxu0 %v15571_v15 }
 0x91e   : >> { %v11942_v19 = vpop.permute.xlu0 %11941  ;;  %14341 = vmatmul.mubr.msk.f32.vlgmr.msra.gmra.mrb[0].mxu1 %vm10790_vm15, %v14334_v47 }
 0x91f   : >> { %12046 = vmatprep.mubr.f32.mxu1 %v15571_v15  ;;  %v11953_v55 = vsel %vm606_vm10, %v11942_v19, %v11944_v16  ;;  %v11962_v42 = vsel %vm606_vm10, 0.0, %v11942_v19 }
 0x920   : >> { %v11965_v31 = vmul.f32 %v15702_v7, %v11962_v42  ;;  %v11966_v48 = vmul.f32 %v15714_v12, %v11953_v55 }
 0x921   : >> { %v11948_v5 = vpop.permute.xlu1 %11947 }
 0x922   : >> { %v11946_v1 = vpop.permute.xlu0 %11945 }
 0x923   : >> { %v11954_v4 = vsel %vm606_vm10, %v11946_v1, %v11948_v5  ;;  %v11963_v10 = vsel %vm606_vm10, 0.0, %v11946_v1 }
 0x924   : >> { %v11967_v49 = vmul.f32 %v15702_v7, %v11963_v10  ;;  %v11968_v50 = vmul.f32 %v15714_v12, %v11954_v4 }
 0x925   : >> { %v15405_v17 = vpop.permute.xlu1 %15404 }
 0x926   : >> { %v14756_v13 = vpack.c.bf16 %v11967_v49, %v11965_v31  ;;  %v15407_v36 = vunpack.i.h.bf16 %v15405_v17  ;;  %v15406_v56 = vunpack.i.l.bf16 %v15405_v17  ;;  %v15400_v58 = vpop.permute.xlu0 %15399  ;;  %v14754_v9 = vpack.c.bf16 %v11968_v50, %v11966_v48 }
 0x927   : >> { %v15402_v34 = vunpack.i.h.bf16 %v15400_v58  ;;  %v15401_v59 = vunpack.i.l.bf16 %v15400_v58 }
 0x928   : >> { %v13476_v3 = vsel %vm1068_vm11, %v15406_v56, %v15407_v36  ;;  %14755 = vmatprep.subr.bf16.mxu1 %v14754_v9 }
 0x929   : >> { %v14812_v38 = vpack.c.bf16 %v15407_v36, %v15402_v34  ;;  %v13475_v26 = vsel %vm1068_vm11, %v15401_v59, %v15402_v34  ;;  %14757 = vmatpush1.bf16.msra.mxu1 %v14756_v13  ;;  %v11952_v21 = vpop.permute.xlu1 %11951  ;;  %v14346_v13 = vld [vmem:[%s18599_s5 + $0x30] sm:$0xf]  ;;  %v14410_v59 = vld [vmem:[%s18599_s5 + $0x68] sm:$0xf] }
 0x92a   : >> { %v14815_v27 = vpack.c.bf16 %v13476_v3, %v13475_v26  ;;  %v11950_v60 = vpop.permute.xlu0 %11949 }
 0x92b   : >> { %v11955_v37 = vsel %vm606_vm10, %v11950_v60, %v11952_v21  ;;  %v11964_v61 = vsel %vm606_vm10, 0.0, %v11950_v60  ;;  %14814 = vmatprep.subr.msk.bf16.mxu0 %vm17446_vm0, %v14812_v38  ;;  %v13683_v21 = vstv %s17719_s22  ;;  %v13692_v60 = vld [vmem:[%s13691_s23] sm:$0xff]  ;;  %s18635_s23 = sand.u32 (%p10693_p0), 1, %s15502_s25   ;;  %s15428_s22 = sshll.u32 (%p10693_p0), %s15580_s28, 4  ;;  %s15429_s22 = int_to_ptr.vmem [resolvable:$false] %s15428_s22 }
 0x92c   : >> { %v11969_v35 = vmul.f32 %v15702_v7, %v11964_v61  ;;  %v11970_v62 = vmul.f32 %v15714_v12, %v11955_v37  ;;  %14816 = vmatpush1.bf16.msra.mxu0 %v14815_v27  ;;  %v13686_v61 = vstv %s17721_s9  ;;  %s18553_s29 = scalar_lea.sflag (%p10693_p0), [#allocation4], %s18635_s23  ;;  %s15430_s9 = scalar_lea.vmem (%p10693_p0), %s15429_s22, 2048 }
 0x92d   : >> { %v12058_v54 = vpop.permute.xlu1 %12057  ;;  %p15431_p4 = scmp.lt.s32.totalorder (%p10693_p0), %s18549_s8, %s15429_s22  ;;  %p15432_p7 = scmp.lt.s32.totalorder (%p10693_p0), %s15430_s9, %s15424_s13 }
 0x92e   : >> { %v12056_v63 = vpop.permute.xlu0 %12055  ;;  %14343 = vmatprep.subr.msk.mxu1 %vm445_vm4, %v11970_v62 }
 0x92f   : >> { %14344 = vmatpush1.msk.msra.mxu1 %vm445_vm4, %v11969_v35  ;;  %v12067_v53 = vsel %vm701_vm12, %v12056_v63, %v12058_v54  ;;  %v12076_v40 = vsel %vm701_vm12, 0.0, %v12056_v63  ;;  %p15433_p8 = por (%p10693_p0), %p15432_p7, %p15431_p4 }
 0x930   : >> { %14345 = vmatmul.mubr.msk.f32.vlgmr.msra.gmra.mrb[0].mxu1 %vm10790_vm15, %v14342_v29  ;;  %v12079_v8 = vmul.f32 %v15700_v6, %v12076_v40  ;;  %v12080_v24 = vmul.f32 %v15712_v11, %v12067_v53  ;;  %v13694_v29 = vcombine.high %v13692_v60, %v13692_v60 }
 0x931   : >> { %v12062_v22 = vpop.permute.xlu1 %12061  ;;  %12160 = vmatprep.mubr.f32.mxu1 %v15571_v15  ;;  %p15434_p9 = pnand (%p10693_p0), %p15433_p8, %p15427_p3 }
 0x932   : >> { %v12060_v28 = vpop.permute.xlu0 %12059 }
 0x933   : >> { %v12068_v23 = vsel %vm701_vm12, %v12060_v28, %v12062_v22  ;;  %v12077_v0 = vsel %vm701_vm12, 0.0, %v12060_v28 }
 0x934   : >> { %v12081_v30 = vmul.f32 %v15700_v6, %v12077_v0  ;;  %v12082_v18 = vmul.f32 %v15712_v11, %v12068_v23 }
 0x935   : >> { %v13572_v14 = vpop.permute.xlu1 %13571 }
 0x936   : >> { %v14760_v39 = vpack.c.bf16 %v12081_v30, %v12079_v8  ;;  %v13474_v33 = vpop.permute.xlu0 %13473  ;;  %v14758_v43 = vpack.c.bf16 %v12082_v18, %v12080_v24  ;;  %v13590_v20 = vsel %vm1159_vm13, %v13572_v14, 0.0 }
 0x937   : >> { %v13485_v52 = vsel %vm1068_vm11, %v13474_v33, 0.0  ;;  %v13594_v32 = vmul.f32 %v15714_v12, %v13590_v20 }
 0x938   : >> { %14759 = vmatprep.subr.bf16.mxu1 %v14758_v43  ;;  %14407 = vmatprep.subr.msk.mxu0 %vm445_vm4, %v13485_v52 }
 0x939   : >> { %14761 = vmatpush1.bf16.msra.mxu1 %v14760_v39  ;;  %v13472_v25 = vpop.permute.xlu1 %13471 }
 0x93a   : >> { %v13477_v46 = vsel %vm1068_vm11, %v13472_v25, %v13474_v33  ;;  %v13576_v2 = vpop.permute.xlu0 %13575 }
 0x93b   : >> { %v13591_v41 = vsel %vm1159_vm13, %v13576_v2, 0.0  ;;  %14408 = vmatpush1.msk.msra.mxu0 %vm445_vm4, %v13477_v46 }
 0x93c   : >> { %v13596_v45 = vmul.f32 %v15714_v12, %v13591_v41  ;;  %14409 = vmatmul.mubr.msk.f32.vlgmr.msra.gmra.mrb[0].mxu0 %vm10790_vm15, %v14404_v44 }
 0x93d   : >> { %v13574_v47 = vpop.permute.xlu1 %13573  ;;  %13674 = vmatprep.mubr.f32.mxu0 %v15571_v15 }
 0x93e   : >> { %v13582_v16 = vsel %vm1159_vm13, %v13574_v47, %v13576_v2  ;;  %v13570_v19 = vpop.permute.xlu0 %13569  ;;  %v14817_v55 = vpack.c.bf16 %v13596_v45, %v13594_v32 }
 0x93f   : >> { %v13595_v42 = vmul.f32 %v15702_v7, %v13582_v16  ;;  %v13581_v5 = vsel %vm1159_vm13, %v13570_v19, %v13572_v14 }
 0x940   : >> { %v13593_v1 = vmul.f32 %v15702_v7, %v13581_v5  ;;  %14818 = vmatprep.subr.bf16.mxu0 %v14817_v55 }
 0x941   : >> { %v12066_v4 = vpop.permute.xlu1 %12065 }
 0x942   : >> { %v14819_v10 = vpack.c.bf16 %v13595_v42, %v13593_v1  ;;  %v12064_v31 = vpop.permute.xlu0 %12063 }
 0x943   : >> { %v12069_v48 = vsel %vm701_vm12, %v12064_v31, %v12066_v4  ;;  %v12078_v49 = vsel %vm701_vm12, 0.0, %v12064_v31 }
 0x944   : >> { %v12083_v15 = vmul.f32 %v15700_v6, %v12078_v49  ;;  %v12084_v50 = vmul.f32 %v15712_v11, %v12069_v48  ;;  %14820 = vmatpush1.bf16.msra.mxu0 %v14819_v10 }
 0x945   : >> { %v13578_v17 = vpop.permute.xlu1 %13577 }
 0x946   : >> { %v13580_v36 = vpop.permute.xlu0 %13579  ;;  %14347 = vmatprep.subr.msk.mxu1 %vm445_vm4, %v12084_v50 }
 0x947   : >> { %v13583_v56 = vsel %vm1159_vm13, %v13578_v17, %v13580_v36  ;;  %v13592_v58 = vsel %vm1159_vm13, %v13580_v36, 0.0  ;;  %14348 = vmatpush1.msk.msra.mxu1 %vm445_vm4, %v12083_v15 }
 0x948   : >> { %v13597_v9 = vmul.f32 %v15702_v7, %v13583_v56  ;;  %v13598_v34 = vmul.f32 %v15714_v12, %v13592_v58  ;;  %14349 = vmatmul.mubr.msk.f32.vlgmr.msra.gmra.mrb[0].mxu1 %vm10790_vm15, %v14346_v13 }
 0x94a   : >> { %14411 = vmatprep.subr.msk.mxu0 %vm445_vm4, %v13598_v34 }
 0x94b   : >> { %14412 = vmatpush1.msk.msra.mxu0 %vm445_vm4, %v13597_v9 }
 0x94c   : >> { %14413 = vmatmul.mubr.msk.f32.vlgmr.msra.gmra.mrb[0].mxu0 %vm10790_vm15, %v14410_v59 }
 0xa1b   : >> { %v12162_v3 = vpop.f32.mrb[0].mxu1 }
 0xa1c   : >> { %v12164_v38 = vpop.f32.mrb[1].mxu1 }
 0xa1f   : >> { %v13676_v26 = vpop.f32.mrb[0].mxu0 }
 0xa20   : >> { %v15029_v27 = vadd.f32 %v13676_v26, %v12162_v3  ;;  %v13678_v37 = vpop.f32.mrb[1].mxu0 }
 0xa21   : >> { %v15030_v35 = vadd.f32 %v13678_v37, %v12164_v38 }
 0xa22   : >> { %v13684_v62 = vmul.f32 %v15029_v27, %v13683_v21 }
 0xa23   : >> { %v13685_v54 = vmul.f32 %v15030_v35, %v13683_v21 }
 0xa24   : >> { %v13687_v63 = vadd.f32 %v13686_v61, %v13684_v62 }
 0xa25   : >> { %v13688_v53 = vadd.f32 %v13686_v61, %v13685_v54  ;;  %10695 = sbr.rel (!%p10693_p0) target bundleno = 1992 (0x7c8), region = 316 }
 0xa26   : >> { %v13696_v40 = vadd.f32 %v13692_v60, %v13687_v63 }
 0xa27   : >> { %v13697_v22 = vadd.f32 %v13694_v29, %v13688_v53 }
 0xa29   : >> { %v13700_v28 = vcombine.low %v13696_v40, %v13697_v22 }
 0xa2b   : >> { %13704 = vst [vmem:[%s13703_s15] sm:$0xff] %v13700_v28 }
 0xa2c   : > { %15437 = shalt.err (!%p15434_p9)
}
 0xa2d   : > { %s15438_s21 = scalar_lea.hbm %s18545_s14, 1024  ;;  %s15442_s19 = scalar_lea.hbm %s18601_s7, 2048 }
 0xa2e   : > { %p15439_p10 = scmp.ne.s32.totalorder %s18545_s14, %s15438_s21  ;;  %p15443_p13 = scmp.lt.u32.totalorder %s18545_s14, %s18601_s7 }
 0xa2f   : > { %p15444_p0 = scmp.lt.u32.totalorder %s15442_s19, %s15438_s21  ;;  %p15446_p2 = scmp.lt.u32.totalorder %s15438_s21, %s18545_s14 }
 0xa30   : > { %p15440_p11 = pnand %p15439_p10, %p15661_p5 }
 0xa31   : > { %p15445_p1 = por %p15444_p0, %p15443_p13 }
 0xa32   : > { %p15441_p12 = pneg %p15440_p11 }
 0xa33   : > { %p15447_p3 = por %p15446_p2, %p15445_p1 }
 0xa35   : > { %p15448_p4 = pnand %p15447_p3, %p15441_p12 }
 0xa37   : > { %15451 = shalt.err (!%p15448_p4)
}
 0xa38   : > { %s15581_s17 = smov 128   ;;  %s15582_s23 = smov 8  }
 0xa39   : > { %15085 = dma.vmem_to_hbm [thread:$0]  (%p15661_p5), %s18549_s8, 1024, %s18545_s14, %s18553_s29, %s15581_s17, %s15581_s17, %s15582_s23  }
 0xa3a PF: > { %p15097_p7 = scmp.ge.s32.totalorder %s15510_s27, 2  ;;  %s13734_s13 = sand.u32 1, %s15498_s24  }
 0xa3b   : > { %s13735_s28 = scalar_lea.sflag [#allocation4], %s13734_s13 }
 0xa3c   : > { %p15092_p8 = pnand %p15097_p7, %p15665_p6 }
 0xa3e   : > { %15493 = dma.done.wait (!%p15092_p8), %s13735_s28, 1024  }
 0xa3f   : > { %15495 = vsyncadd (!%p15092_p8), %s13735_s28, 4294966272  ;;  %p18_p9 = scmp.ge.s32.totalorder %s15648_s30, 4   ;;  %s18636_s24 = smov %s15502_s25 }
 0xa40   : > { %s18637_s25 = smov %s15506_s26  ;;  %s18638_s26 = smov %s15659_s10 }
 0xa41   : > { %s18639_s27 = smov %s15648_s30  ;;  %20 = sbr.rel (!%p18_p9) target bundleno = 4 (0x4), region = 327 }
 0xa48   :  { %13740 = vsyncpa [#allocation4], 1 }
 0xa49   :  { %13742 = vsyncpa [#allocation4 + $0x1], 1 }
 0xa4a   :  { %13743 = vsyncpa [#allocation5], 1 }
 0xa4b   :  { %13745 = vsyncpa [#allocation5 + $0x1], 1 }

</bundles_post_ra>
